<compile_context>
chip_gen: v5e
topology: v5e:2x2
jax: 0.10.0
libtpu: 0.0.40
codegen_flags: <defaults>
</compile_context>

<pallas_src>
import math
import jax
import jax.numpy as jnp
from jax.experimental import pallas as pl
from jax.experimental.pallas import tpu as pltpu

LN_EPS = 1e-5
INV_SQRT2 = 1.0 / math.sqrt(2.0)


def _round_up(a, m):
    return (a + m - 1) // m * m


def _make_ffn_kernel(mxu_dtype):
    def kernel(x_ref, g_ref, beta_ref, w1_ref, b1_ref, w2_ref, b2_ref, o_ref,
               xn_ref, acc_ref):
        h_idx = pl.program_id(1)

        # --- Per row-tile prologue: LayerNorm (f32) + accumulator init ------
        @pl.when(h_idx == 0)
        def _():
            x = x_ref[...].astype(jnp.float32)                 # (TILE_R, dim)
            mean = jnp.mean(x, axis=-1, keepdims=True)
            xc = x - mean
            var = jnp.mean(xc * xc, axis=-1, keepdims=True)    # biased, torch-style
            xn = xc * jax.lax.rsqrt(var + LN_EPS)
            xn = xn * g_ref[...].astype(jnp.float32) + beta_ref[...].astype(jnp.float32)
            xn_ref[...] = xn.astype(xn_ref.dtype)              # cached for all h tiles
            acc_ref[...] = jnp.zeros_like(acc_ref)

        # --- Linear(dim -> tile_h) + exact (erf) GELU, f32 elementwise ------
        h = jnp.dot(xn_ref[...], w1_ref[...], preferred_element_type=jnp.float32)
        h = h + b1_ref[...].astype(jnp.float32)
        h = 0.5 * h * (1.0 + jax.lax.erf(h * INV_SQRT2))       # torch nn.GELU() (erf)

        # --- Dropout(p=0.0) is identity ---
        # TODO(synk): dropout with p>0 would need pltpu.prng_* masking; p=0 here.

        # --- Accumulate Linear(tile_h -> dim) over hidden tiles (f32 acc) ---
        acc_ref[...] += jnp.dot(h.astype(mxu_dtype), w2_ref[...],
                                preferred_element_type=jnp.float32)

        # --- Epilogue: add output bias, write lane-dense output block -------
        @pl.when(h_idx == pl.num_programs(1) - 1)
        def _():
            o_ref[...] = (acc_ref[...] + b2_ref[...].astype(jnp.float32)).astype(o_ref.dtype)

    return kernel


def feedforward_pallas(x, gamma, beta, w1, b1, w2, b2, *,
                       tile_rows=256, tile_h=512, mxu_dtype=jnp.float32):
    """x: (B, S, dim).  Weights follow y = x @ W + b convention
    (W1: (dim, hidden), W2: (hidden, dim)).  `mxu_dtype` controls the matmul
    operand dtype (f32 for exactness, bf16 for MXU throughput)."""
    B, S, dim = x.shape
    hidden = w1.shape[1]
    N = B * S

    # Row tiling: multiple of 8 sublanes, padded grid (no divisibility assert).
    tile_rows = max(8, min(int(tile_rows), _round_up(N, 8)))
    tile_rows = _round_up(tile_rows, 8)
    N_pad = _round_up(N, tile_rows)

    # Hidden tiling: multiple of 128 lanes; pad hidden with zero columns/rows
    # (zero-padded hidden units contribute exactly zero to the output).
    tile_h = min(int(tile_h), _round_up(hidden, 128))
    tile_h = _round_up(max(tile_h, 128), 128)
    H_pad = _round_up(hidden, tile_h)

    x2d = x.reshape(N, dim)
    if N_pad != N:
        x2d = jnp.pad(x2d, ((0, N_pad - N), (0, 0)))

    w1p, b1p, w2p = w1, b1, w2
    if H_pad != hidden:
        w1p = jnp.pad(w1p, ((0, 0), (0, H_pad - hidden)))
        b1p = jnp.pad(b1p, ((0, H_pad - hidden),))
        w2p = jnp.pad(w2p, ((0, H_pad - hidden), (0, 0)))
    w1p = w1p.astype(mxu_dtype)
    w2p = w2p.astype(mxu_dtype)

    gamma2 = gamma.reshape(1, dim).astype(jnp.float32)
    beta2 = beta.reshape(1, dim).astype(jnp.float32)
    b1_2 = b1p.reshape(1, H_pad).astype(jnp.float32)
    b2_2 = b2.reshape(1, dim).astype(jnp.float32)

    grid = (N_pad // tile_rows, H_pad // tile_h)

    # VMEM budget: actual tile footprint (double-buffered streams) + headroom.
    wb = jnp.dtype(mxu_dtype).itemsize
    xb = x2d.dtype.itemsize
    est = (
        2 * tile_rows * dim * xb            # x tile (double-buffered)
        + 2 * tile_rows * dim * xb          # out tile
        + 2 * dim * tile_h * wb             # W1 block
        + 2 * tile_h * dim * wb             # W2 block
        + tile_rows * dim * wb              # xn scratch
        + tile_rows * dim * 4               # f32 accumulator
        + 2 * tile_rows * tile_h * 4        # h intermediate headroom
        + 2 * (3 * dim + H_pad) * 4         # gamma/beta/b1/b2 blocks
    )
    try:
        phys = int(pltpu.get_tpu_info().vmem_capacity_bytes)
    except Exception:
        phys = 64 * 1024 * 1024             # conservative (v7x per-TC)
    vmem_limit = int(min(max(2 * est + (8 << 20), 32 << 20), int(0.75 * phys)))

    out2d = pl.pallas_call(
        _make_ffn_kernel(mxu_dtype),
        out_shape=jax.ShapeDtypeStruct((N_pad, dim), x.dtype),
        grid_spec=pltpu.PrefetchScalarGridSpec(
            num_scalar_prefetch=0,
            grid=grid,
            in_specs=[
                pl.BlockSpec((tile_rows, dim), lambda i, h: (i, 0)),   # x tile
                pl.BlockSpec((1, dim), lambda i, h: (0, 0)),           # LN gamma
                pl.BlockSpec((1, dim), lambda i, h: (0, 0)),           # LN beta
                pl.BlockSpec((dim, tile_h), lambda i, h: (0, h)),      # W1 block
                pl.BlockSpec((1, tile_h), lambda i, h: (0, h)),        # b1 block
                pl.BlockSpec((tile_h, dim), lambda i, h: (h, 0)),      # W2 block
                pl.BlockSpec((1, dim), lambda i, h: (0, 0)),           # b2
            ],
            out_specs=pl.BlockSpec((tile_rows, dim), lambda i, h: (i, 0)),
            scratch_shapes=[
                pltpu.VMEM((tile_rows, dim), mxu_dtype),   # cached LayerNorm output
                pltpu.VMEM((tile_rows, dim), jnp.float32), # output accumulator
            ],
        ),
        compiler_params=pltpu.CompilerParams(
            dimension_semantics=("parallel", "arbitrary"),
            vmem_limit_bytes=vmem_limit,
        ),
    )(x2d, gamma2, beta2, w1p, b1_2, w2p, b2_2)

    if N_pad != N:
        out2d = out2d[:N]
    return out2d.reshape(B, S, dim)


def feedforward_ref(x, gamma, beta, w1, b1, w2, b2):
    """Pure-JAX reference mirroring the PyTorch module."""
    mean = jnp.mean(x, axis=-1, keepdims=True)
    var = jnp.mean((x - mean) ** 2, axis=-1, keepdims=True)
    xn = (x - mean) / jnp.sqrt(var + LN_EPS) * gamma + beta
    h = xn @ w1 + b1
    h = 0.5 * h * (1.0 + jax.lax.erf(h * INV_SQRT2))
    return h @ w2 + b2


def _make_params(key, dim, hidden):
    k_w1, k_b1, k_w2, k_b2 = jax.random.split(key, 4)
    gamma = jnp.ones((dim,), jnp.float32)
    beta = jnp.zeros((dim,), jnp.float32)
    lim1 = 1.0 / math.sqrt(dim)
    lim2 = 1.0 / math.sqrt(hidden)
    w1 = jax.random.uniform(k_w1, (dim, hidden), jnp.float32, -lim1, lim1)
    b1 = jax.random.uniform(k_b1, (hidden,), jnp.float32, -lim1, lim1)
    w2 = jax.random.uniform(k_w2, (hidden, dim), jnp.float32, -lim2, lim2)
    b2 = jax.random.uniform(k_b2, (dim,), jnp.float32, -lim2, lim2)
    return gamma, beta, w1, b1, w2, b2


if __name__ == "__main__":
    key = jax.random.PRNGKey(0)
    k1, k2, k3 = jax.random.split(key, 3)

    # --- Test 1: main config (lane-dense dims, 2 row tiles), exact f32 path --
    B, S, dim, hidden = 2, 128, 256, 512
    x = jax.random.normal(k1, (B, S, dim), dtype=jnp.float32)
    params = _make_params(k2, dim, hidden)
    out = feedforward_pallas(x, *params, tile_rows=128, tile_h=512,
                             mxu_dtype=jnp.float32)
    out = jax.block_until_ready(out)
    ref = feedforward_ref(x, *params)
    assert out.shape == (B, S, dim)
    assert jnp.allclose(out, ref, atol=2e-3, rtol=2e-3), "f32 mismatch vs reference"

    # --- Test 2: ragged shapes exercising row/hidden padding + multi h-tiles -
    B2, S2, dim2, hidden2 = 3, 7, 192, 384
    x2 = jax.random.normal(k3, (B2, S2, dim2), dtype=jnp.float32)
    params2 = _make_params(k2, dim2, hidden2)
    out2 = feedforward_pallas(x2, *params2, tile_rows=16, tile_h=128,
                              mxu_dtype=jnp.float32)
    out2 = jax.block_until_ready(out2)
    ref2 = feedforward_ref(x2, *params2)
    assert out2.shape == (B2, S2, dim2)
    assert jnp.allclose(out2, ref2, atol=2e-3, rtol=2e-3), "padded-path mismatch"

    # --- Test 3: bf16 MXU operands (performance config), looser tolerance ----
    out_bf16 = feedforward_pallas(x, *params, tile_rows=128, tile_h=512,
                                  mxu_dtype=jnp.bfloat16)
    out_bf16 = jax.block_until_ready(out_bf16)
    assert jnp.allclose(out_bf16, ref, atol=5e-2, rtol=5e-2), "bf16 mismatch vs reference"

    print("KERNEL_OK")
</pallas_src>

<mosaic_0001>
module attributes {stable_mosaic.version = 11 : i64} {
  func.func @kernel(%arg0: i32, %arg1: i32, %arg2: memref<128x256xf32, #tpu.memory_space<vmem>>, %arg3: memref<1x256xf32, #tpu.memory_space<vmem>>, %arg4: memref<1x256xf32, #tpu.memory_space<vmem>>, %arg5: memref<256x512xf32, #tpu.memory_space<vmem>>, %arg6: memref<1x512xf32, #tpu.memory_space<vmem>>, %arg7: memref<512x256xf32, #tpu.memory_space<vmem>>, %arg8: memref<1x256xf32, #tpu.memory_space<vmem>>, %arg9: memref<128x256xf32, #tpu.memory_space<vmem>>, %arg10: memref<128x256xf32, #tpu.memory_space<vmem>>, %arg11: memref<128x256xf32, #tpu.memory_space<vmem>>) attributes {dimension_semantics = [#tpu.dimension_semantics<parallel>, #tpu.dimension_semantics<arbitrary>], iteration_bounds = array<i64: 2, 1>, scalar_prefetch = 0 : i64, scratch_operands = 2 : i64, tpu.core_type = #tpu.core_type<tc>, window_params = [{transform_indices = @transform_0, window_bounds = array<i64: 128, 256>}, {pipeline_mode = #tpu.pipeline_mode<synchronous>, transform_indices = @transform_1, window_bounds = array<i64: 1, 256>}, {pipeline_mode = #tpu.pipeline_mode<synchronous>, transform_indices = @transform_2, window_bounds = array<i64: 1, 256>}, {transform_indices = @transform_3, window_bounds = array<i64: 256, 512>}, {transform_indices = @transform_4, window_bounds = array<i64: 1, 512>}, {transform_indices = @transform_5, window_bounds = array<i64: 512, 256>}, {pipeline_mode = #tpu.pipeline_mode<synchronous>, transform_indices = @transform_6, window_bounds = array<i64: 1, 256>}, {transform_indices = @transform_7, window_bounds = array<i64: 128, 256>}]} {
    %c0_i32 = arith.constant 0 : i32
    %0 = arith.cmpi eq, %arg1, %c0_i32 : i32
    %1 = arith.extui %0 : i1 to i32
    %c0_i32_0 = arith.constant 0 : i32
    %2 = arith.cmpi ne, %1, %c0_i32_0 : i32
    scf.if %2 {
      %c0_18 = arith.constant 0 : index
      %c0_19 = arith.constant 0 : index
      %25 = vector.load %arg2[%c0_18, %c0_19] : memref<128x256xf32, #tpu.memory_space<vmem>>, vector<128x256xf32>
      %cst_20 = arith.constant dense<0.000000e+00> : vector<128xf32>
      %26 = vector.multi_reduction <add>, %25, %cst_20 [1] : vector<128x256xf32> to vector<128xf32>
      %27 = vector.shape_cast %26 : vector<128xf32> to vector<128x1xf32>
      %cst_21 = arith.constant 2.560000e+02 : f32
      %28 = vector.broadcast %cst_21 : f32 to vector<128x1xf32>
      %29 = arith.divf %27, %28 : vector<128x1xf32>
      %30 = vector.broadcast %29 : vector<128x1xf32> to vector<128x256xf32>
      %31 = arith.subf %25, %30 : vector<128x256xf32>
      %32 = arith.mulf %31, %31 : vector<128x256xf32>
      %cst_22 = arith.constant dense<0.000000e+00> : vector<128xf32>
      %33 = vector.multi_reduction <add>, %32, %cst_22 [1] : vector<128x256xf32> to vector<128xf32>
      %34 = vector.shape_cast %33 : vector<128xf32> to vector<128x1xf32>
      %cst_23 = arith.constant 2.560000e+02 : f32
      %35 = vector.broadcast %cst_23 : f32 to vector<128x1xf32>
      %36 = arith.divf %34, %35 : vector<128x1xf32>
      %cst_24 = arith.constant 9.99999974E-6 : f32
      %37 = vector.broadcast %cst_24 : f32 to vector<128x1xf32>
      %38 = arith.addf %36, %37 : vector<128x1xf32>
      %39 = math.rsqrt %38 : vector<128x1xf32>
      %40 = vector.broadcast %39 : vector<128x1xf32> to vector<128x256xf32>
      %41 = arith.mulf %31, %40 : vector<128x256xf32>
      %c0_25 = arith.constant 0 : index
      %c0_26 = arith.constant 0 : index
      %42 = vector.load %arg3[%c0_25, %c0_26] : memref<1x256xf32, #tpu.memory_space<vmem>>, vector<1x256xf32>
      %43 = vector.broadcast %42 : vector<1x256xf32> to vector<128x256xf32>
      %44 = arith.mulf %41, %43 : vector<128x256xf32>
      %c0_27 = arith.constant 0 : index
      %c0_28 = arith.constant 0 : index
      %45 = vector.load %arg4[%c0_27, %c0_28] : memref<1x256xf32, #tpu.memory_space<vmem>>, vector<1x256xf32>
      %46 = vector.broadcast %45 : vector<1x256xf32> to vector<128x256xf32>
      %47 = arith.addf %44, %46 : vector<128x256xf32>
      %c0_29 = arith.constant 0 : index
      %c0_30 = arith.constant 0 : index
      %48 = vector.load %arg10[%c0_29, %c0_30] : memref<128x256xf32, #tpu.memory_space<vmem>>, vector<128x256xf32>
      tpu.vector_store %arg10[%c0_29, %c0_30], %47 {strides = array<i32>} : memref<128x256xf32, #tpu.memory_space<vmem>>, vector<128x256xf32>,
      %cst_31 = arith.constant 0.000000e+00 : f32
      %49 = vector.broadcast %cst_31 : f32 to vector<128x256xf32>
      %c0_32 = arith.constant 0 : index
      %c0_33 = arith.constant 0 : index
      %50 = vector.load %arg11[%c0_32, %c0_33] : memref<128x256xf32, #tpu.memory_space<vmem>>, vector<128x256xf32>
      tpu.vector_store %arg11[%c0_32, %c0_33], %49 {strides = array<i32>} : memref<128x256xf32, #tpu.memory_space<vmem>>, vector<128x256xf32>,
    } else {
    }
    %c0 = arith.constant 0 : index
    %c0_1 = arith.constant 0 : index
    %3 = vector.load %arg10[%c0, %c0_1] : memref<128x256xf32, #tpu.memory_space<vmem>>, vector<128x256xf32>
    %c0_2 = arith.constant 0 : index
    %c0_3 = arith.constant 0 : index
    %4 = vector.load %arg5[%c0_2, %c0_3] : memref<256x512xf32, #tpu.memory_space<vmem>>, vector<256x512xf32>
    %cst = arith.constant dense<0.000000e+00> : vector<128x512xf32>
    %5 = tpu.matmul %3, %4, %cst {dimension_numbers = #tpu.dot_dimension_numbers<[1], [0], [0], [1], [0, 0, 1, 1], [], []>} : vector<128x256xf32>, vector<256x512xf32>, vector<128x512xf32> -> vector<128x512xf32>
    %c0_4 = arith.constant 0 : index
    %c0_5 = arith.constant 0 : index
    %6 = vector.load %arg6[%c0_4, %c0_5] : memref<1x512xf32, #tpu.memory_space<vmem>>, vector<1x512xf32>
    %7 = vector.broadcast %6 : vector<1x512xf32> to vector<128x512xf32>
    %8 = arith.addf %5, %7 : vector<128x512xf32>
    %cst_6 = arith.constant 5.000000e-01 : f32
    %9 = vector.broadcast %cst_6 : f32 to vector<128x512xf32>
    %10 = arith.mulf %9, %8 : vector<128x512xf32>
    %cst_7 = arith.constant 0.707106769 : f32
    %11 = vector.broadcast %cst_7 : f32 to vector<128x512xf32>
    %12 = arith.mulf %8, %11 : vector<128x512xf32>
    %13 = math.erf %12 : vector<128x512xf32>
    %cst_8 = arith.constant 1.000000e+00 : f32
    %14 = vector.broadcast %cst_8 : f32 to vector<128x512xf32>
    %15 = arith.addf %14, %13 : vector<128x512xf32>
    %16 = arith.mulf %10, %15 : vector<128x512xf32>
    %c0_9 = arith.constant 0 : index
    %c0_10 = arith.constant 0 : index
    %17 = vector.load %arg11[%c0_9, %c0_10] : memref<128x256xf32, #tpu.memory_space<vmem>>, vector<128x256xf32>
    %c0_11 = arith.constant 0 : index
    %c0_12 = arith.constant 0 : index
    %18 = vector.load %arg7[%c0_11, %c0_12] : memref<512x256xf32, #tpu.memory_space<vmem>>, vector<512x256xf32>
    %cst_13 = arith.constant dense<0.000000e+00> : vector<128x256xf32>
    %19 = tpu.matmul %16, %18, %cst_13 {dimension_numbers = #tpu.dot_dimension_numbers<[1], [0], [0], [1], [0, 0, 1, 1], [], []>} : vector<128x512xf32>, vector<512x256xf32>, vector<128x256xf32> -> vector<128x256xf32>
    %20 = arith.addf %17, %19 : vector<128x256xf32>
    %c0_14 = arith.constant 0 : index
    %c0_15 = arith.constant 0 : index
    %21 = vector.load %arg11[%c0_14, %c0_15] : memref<128x256xf32, #tpu.memory_space<vmem>>, vector<128x256xf32>
    tpu.vector_store %arg11[%c0_14, %c0_15], %20 {strides = array<i32>} : memref<128x256xf32, #tpu.memory_space<vmem>>, vector<128x256xf32>,
    %c0_i32_16 = arith.constant 0 : i32
    %22 = arith.cmpi eq, %arg1, %c0_i32_16 : i32
    %23 = arith.extui %22 : i1 to i32
    %c0_i32_17 = arith.constant 0 : i32
    %24 = arith.cmpi ne, %23, %c0_i32_17 : i32
    scf.if %24 {
      %c0_18 = arith.constant 0 : index
      %c0_19 = arith.constant 0 : index
      %25 = vector.load %arg11[%c0_18, %c0_19] : memref<128x256xf32, #tpu.memory_space<vmem>>, vector<128x256xf32>
      %c0_20 = arith.constant 0 : index
      %c0_21 = arith.constant 0 : index
      %26 = vector.load %arg8[%c0_20, %c0_21] : memref<1x256xf32, #tpu.memory_space<vmem>>, vector<1x256xf32>
      %27 = vector.broadcast %26 : vector<1x256xf32> to vector<128x256xf32>
      %28 = arith.addf %25, %27 : vector<128x256xf32>
      %c0_22 = arith.constant 0 : index
      %c0_23 = arith.constant 0 : index
      %29 = vector.load %arg9[%c0_22, %c0_23] : memref<128x256xf32, #tpu.memory_space<vmem>>, vector<128x256xf32>
      tpu.vector_store %arg9[%c0_22, %c0_23], %28 {strides = array<i32>} : memref<128x256xf32, #tpu.memory_space<vmem>>, vector<128x256xf32>,
    } else {
    }
    return
  }
  func.func @transform_0(%arg0: i32, %arg1: i32) -> (i32, i32) {
    %c0_i32 = arith.constant 0 : i32
    %c0_i32_0 = arith.constant 0 : i32
    return %arg0, %c0_i32 : i32, i32
  }
  func.func @transform_1(%arg0: i32, %arg1: i32) -> (i32, i32) {
    %c0_i32 = arith.constant 0 : i32
    %c0_i32_0 = arith.constant 0 : i32
    %c0_i32_1 = arith.constant 0 : i32
    return %c0_i32, %c0_i32_0 : i32, i32
  }
  func.func @transform_2(%arg0: i32, %arg1: i32) -> (i32, i32) {
    %c0_i32 = arith.constant 0 : i32
    %c0_i32_0 = arith.constant 0 : i32
    %c0_i32_1 = arith.constant 0 : i32
    return %c0_i32, %c0_i32_0 : i32, i32
  }
  func.func @transform_3(%arg0: i32, %arg1: i32) -> (i32, i32) {
    %c0_i32 = arith.constant 0 : i32
    %c0_i32_0 = arith.constant 0 : i32
    return %c0_i32, %arg1 : i32, i32
  }
  func.func @transform_4(%arg0: i32, %arg1: i32) -> (i32, i32) {
    %c0_i32 = arith.constant 0 : i32
    %c0_i32_0 = arith.constant 0 : i32
    return %c0_i32, %arg1 : i32, i32
  }
  func.func @transform_5(%arg0: i32, %arg1: i32) -> (i32, i32) {
    %c0_i32 = arith.constant 0 : i32
    %c0_i32_0 = arith.constant 0 : i32
    return %arg1, %c0_i32 : i32, i32
  }
  func.func @transform_6(%arg0: i32, %arg1: i32) -> (i32, i32) {
    %c0_i32 = arith.constant 0 : i32
    %c0_i32_0 = arith.constant 0 : i32
    %c0_i32_1 = arith.constant 0 : i32
    return %c0_i32, %c0_i32_0 : i32, i32
  }
  func.func @transform_7(%arg0: i32, %arg1: i32) -> (i32, i32) {
    %c0_i32 = arith.constant 0 : i32
    %c0_i32_0 = arith.constant 0 : i32
    return %arg0, %c0_i32 : i32, i32
  }
}

</mosaic_0001>

<bundles_post_ra>
// kernel: tpu_custom_call.1
= control target key start
LH: loop header
LB: loop body
LE: loop exit
PB: predicated region body
PF: predicated region fallthrough
CT: control target
= control target key end

     0   :  { %s10425_s0 = inlined_call_operand.hbm [shape: f32[256,256], index: 0, kind: input, shape index: {}]   ;;  %s10426_s1 = inlined_call_operand.hbm [shape: f32[1,256], index: 1, kind: input, shape index: {}]   ;;  %s10427_s2 = inlined_call_operand.hbm [shape: f32[1,256], index: 2, kind: input, shape index: {}]   ;;  %s10428_s3 = inlined_call_operand.hbm [shape: f32[256,512], index: 3, kind: input, shape index: {}]   ;;  %s10429_s4 = inlined_call_operand.hbm [shape: f32[1,512], index: 4, kind: input, shape index: {}]   ;;  %s10430_s5 = inlined_call_operand.hbm [shape: f32[512,256], index: 5, kind: input, shape index: {}]   ;;  %s10431_s6 = inlined_call_operand.vmem [shape: f32[1,256], index: 6, kind: input, shape index: {}]   ;;  %s10432_s7 = inlined_call_operand.hbm [shape: f32[256,256], index: 7, kind: output, shape index: {}]  }
   0x1   :  { %10584 = sst [smem:[#allocation85_spill]] %s10426_s1 }
   0x2   :  { %10585 = sst [smem:[#allocation86_spill]] %s10427_s2 }
   0x3   :  { %10586 = sst [smem:[#allocation87_spill]] %s10428_s3 }
   0x4   :  { %10587 = sst [smem:[#allocation88_spill]] %s10429_s4 }
   0x5   :  { %12 = vsyncpa [#allocation5], 0 }
   0x6   :  { %14 = vsyncpa [#allocation5 + $0x1], 0 }
   0x7   :  { %15 = vsyncpa [#allocation8], 0 }
   0x8   :  { %16 = vsyncpa [#allocation11], 0 }
   0x9   :  { %17 = vsyncpa [#allocation14], 0 }
   0xa   :  { %18 = vsyncpa [#allocation6], 0 }
   0xb   :  { %20 = vsyncpa [#allocation6 + $0x1], 0  ;;  %s6214_s24 = smov 0   ;;  %s6216_s25 = smov 0  }
   0xc   :  { %s6218_s26 = smov 0   ;;  %s6220_s27 = smov 0  }
   0xd   :  { %s6222_s28 = smov 0   ;;  %s6224_s29 = smov 0  }
   0xe LB: > { %s10433_s30 = sadd.s32 4294967295, %s6160_s29   ;;  %p5510_p0 = scmp.ge.s32.totalorder %s6160_s29, 1  ;;  %s6160_s29 = sphi %s6224_s29, %s26_s29   ;;  %s6156_s28 = sphi %s6222_s28, %s11022_s28   ;;  %s6152_s27 = sphi %s6220_s27, %s11021_s27   ;;  %s6148_s26 = sphi %s6218_s26, %s11020_s26   ;;  %s6144_s25 = sphi %s6216_s25, %s11019_s25   ;;  %s6140_s24 = sphi %s6214_s24, %s11018_s24  }
   0xf   : > { %p6248_p1 = scmp.eq.s32.totalorder %s10433_s30, 0  ;;  %p236_p2 = scmp.lt.s32.totalorder %s6160_s29, 3 }
  0x10   : > { %s10589_s1 = sld [smem:[#allocation85_spill]]  ;;  %p5516_p4 = scmp.ge.s32.totalorder %s6160_s29, 2 }
  0x11   : > { %p6256_p3 = pnand %p5510_p0, %p236_p2  ;;  %s6162_s13 = smov [#allocation7]  }
  0x12   : > { %s250_s14 = sshll.u32 %s6162_s13, 4  ;;  %s10591_s3 = sld [smem:[#allocation87_spill]]  ;;  %s251_s14 = int_to_ptr.vmem [resolvable:$true] %s250_s14 }
  0x13   : > { %p5627_p5 = pneg %p6256_p3  ;;  %s6163_s19 = smov [#allocation10]  }
  0x14   : > { %s276_s20 = sshll.u32 %s6163_s19, 4  ;;  %s6164_s21 = smov 512   ;;  %s277_s20 = int_to_ptr.vmem [resolvable:$true] %s276_s20 }
  0x15   : > { %p6268_p6 = pnand %p5627_p5, %p6248_p1  ;;  %s6165_s22 = smov 32  }
  0x16   : > { %s248_s11 = sshll.u32 %s10589_s1, 4  ;;  %s10593_s2 = sld [smem:[#allocation86_spill]]  ;;  %s249_s11 = int_to_ptr.hbm [resolvable:$true] %s248_s11 }
  0x17   : > { %5630 = dma.hbm_to_vmem [thread:$0]  (!%p6268_p6), %s249_s11, 32, %s251_s14, [#allocation8]  }
  0x18   : > { %s274_s17 = sshll.u32 %s10591_s3, 4  ;;  %s6166_s13 = smov [#allocation9]   ;;  %s275_s17 = int_to_ptr.hbm [resolvable:$true] %s274_s17 }
  0x19   : > { %5636 = dma.hbm_to_vmem [thread:$0]  (!%p6268_p6), %s275_s17, 16384, %s277_s20, [#allocation11], %s6164_s21, %s6164_s21, %s6165_s22  }
  0x1a   : > { %s262_s15 = sshll.u32 %s6166_s13, 4  ;;  %s10594_s4 = sld [smem:[#allocation88_spill]]  ;;  %s263_s15 = int_to_ptr.vmem [resolvable:$true] %s262_s15 }
  0x1b   : > { %s6167_s14 = smov [#allocation12]   ;;  %s306_s21 = sshll.u32 %s10430_s5, 4  ;;  %s307_s21 = int_to_ptr.hbm [resolvable:$true] %s306_s21 }
  0x1c   : > { %s260_s10 = sshll.u32 %s10593_s2, 4  ;;  %s293_s17 = sshll.u32 %s6167_s14, 4  ;;  %s261_s10 = int_to_ptr.hbm [resolvable:$true] %s260_s10  ;;  %s294_s17 = int_to_ptr.vmem [resolvable:$true] %s293_s17 }
  0x1d   : > { %5633 = dma.hbm_to_vmem [thread:$0]  (!%p6268_p6), %s261_s10, 32, %s263_s15, [#allocation8]  }
  0x1e   : > { %s6168_s30 = smov [#allocation13]   ;;  %s10434_s23 = smov 256  }
  0x1f   : > { %s308_s22 = sshll.u32 %s6168_s30, 4  ;;  %s10435_s9 = smov 16   ;;  %s309_s22 = int_to_ptr.vmem [resolvable:$true] %s308_s22 }
  0x20   : > { %s291_s11 = sshll.u32 %s10594_s4, 4  ;;  %s5509_s10 = sadd.s32 4294967294, %s6160_s29   ;;  %s292_s11 = int_to_ptr.hbm [resolvable:$true] %s291_s11 }
  0x21   : > { %5639 = dma.hbm_to_vmem [thread:$0]  (!%p6268_p6), %s292_s11, 64, %s294_s17, [#allocation11]  }
  0x22   : > { %5642 = dma.hbm_to_vmem [thread:$0]  (!%p6268_p6), %s307_s21, 16384, %s309_s22, [#allocation14], %s10434_s23, %s10434_s23, %s10435_s9  }
  0x23   : > { %s38_s13 = sadd.s32 1, %s6156_s28  ;;  %s45_s15 = sadd.s32 1, %s6148_s26 }
  0x24   : > { %p40_p7 = scmp.ge.s32.totalorder %s38_s13, 2  ;;  %p52_p8 = scmp.ne.s32.totalorder %s6148_s26, %s6144_s25 }
  0x25   : > { %p53_p9 = scmp.eq.s32.totalorder %s6160_s29, 0  ;;  %p58_p10 = scmp.ne.s32.totalorder %s6144_s25, %s6140_s24 }
  0x26   : > { %s11024_s13 = smov (%p40_p7, %s38_s13), 0  ;;  %s10597_s14 = sadd.s32 4294967295, %s6160_s29  }
  0x27   : > { %p6304_p11 = por %p53_p9, %p52_p8  ;;  %p6310_p12 = por %p6248_p1, %p58_p10 }
  0x28   : > { %s42_s11 = ssub.s32 %s6156_s28, %s11024_s13  ;;  %p223_p13 = scmp.eq.s32.totalorder %s10597_s14, 1 }
  0x29   : > { %p43_p0 = scmp.eq.s32.totalorder %s42_s11, 0  ;;  %p229_p2 = scmp.eq.s32.totalorder %s5509_s10, 1 }
  0x2a   : > { %p6318_p5 = por %p223_p13, %p52_p8  ;;  %p5656_p6 = scmp.lt.s32.totalorder %s6160_s29, 2 }
  0x2b   : > { %s6324_s19 = scalar_select %p43_p0, %s6148_s26, %s45_s15  }
  0x2c   : > { %p6326_p7 = por %p229_p2, %p58_p10  ;;  %s325_s21 = sand.u32 1, %s6148_s26  }
  0x2d   : > { %s5517_s30 = sshll.u32 %s325_s21, 8  ;;  %s5600_s22 = sshll.u32 %s6156_s28, 8 }
  0x2e   : > { %s335_s14 = scalar_lea.hbm %s10425_s0, %s5600_s22  ;;  %s329_s11 = scalar_lea.vmem [#allocation4], %s5517_s30 }
  0x2f   : > { %s338_s10 = sshll.u32 %s329_s11, 4  ;;  %s336_s1 = sshll.u32 %s335_s14, 4  ;;  %s339_s10 = int_to_ptr.vmem [resolvable:$true] %s338_s10  ;;  %s337_s1 = int_to_ptr.hbm [resolvable:$true] %s336_s1 }
  0x30   : > { %p5644_p8 = pnand %p5656_p6, %p6304_p11  ;;  %s326_s15 = scalar_lea.sflag [#allocation5], %s325_s21 }
  0x31   : > { %s10600_s2 = smov 16   ;;  %s10601_s3 = smov 256  }
  0x32   : > { %5646 = dma.hbm_to_vmem [thread:$0]  (!%p5644_p8), %s337_s1, 4096, %s339_s10, %s326_s15, %s10601_s3, %s10601_s3, %s10600_s2  }
  0x33   : > { %350 = sbr.rel (%p6256_p3) target bundleno = 1485 (0x5cd), region = 48 }
  0x38   : > { %s6343_s4 = sand.u32 1, %s6144_s25  }
  0x39   : > { %s5522_s23 = sshll.u32 %s6343_s4, 8  ;;  %s353_s9 = scalar_lea.sflag [#allocation5], %s6343_s4 }
  0x3a   : > { %s6349_s18 = scalar_lea.vmem [#allocation4], %s5522_s23 }
  0x3b   : > { %6119 = dma.done.wait (%p6310_p12), %s353_s9, 4096  }
  0x3c   : > { %6121 = vsyncadd (%p6310_p12), %s353_s9, 4294963200 }
  0x3d   : > { %6123 = dma.done.wait (%p6248_p1), [#allocation8], 64  }
  0x3e   : > { %6125 = vsyncadd (%p6248_p1), [#allocation8], 4294967232 }
  0x3f   : > { %6127 = dma.done.wait (%p6248_p1), [#allocation11], 16448  }
  0x40   : > { %6129 = vsyncadd (%p6248_p1), [#allocation11], 4294950848 }
  0x41   : > { %6131 = dma.done.wait (%p6248_p1), [#allocation14], 16384  }
  0x42   : > { %6133 = vsyncadd (%p6248_p1), [#allocation14], 4294950912  ;;  %v426_v0 = vld [vmem:[%s6349_s18 + $0x20] sm:$0xff]  ;;  %v427_v1 = vld [vmem:[%s6349_s18 + $0x28] sm:$0xff]  ;;  %v6171_v24 = vmov 256.0   ;;  %s10261_s3 = scalar_lea.vmem [#allocation15], %s5522_s23 }
  0x43   : > { %v422_v2 = vld [vmem:[%s6349_s18] sm:$0xff]  ;;  %v460_v3 = vadd.f32 %v427_v1, %v426_v0  ;;  %v423_v4 = vld [vmem:[%s6349_s18 + $0x8] sm:$0xff]  ;;  %v424_v9 = vld [vmem:[%s6349_s18 + $0x10] sm:$0xff]  ;;  %5723 = vrcp.f32 %v6171_v24  ;;  %s5602_s8 = sshll.u32 %s6152_s27, 8  ;;  %s5370_s30 = sshll.u32 %s10261_s3, 4  ;;  %s5371_s30 = int_to_ptr.vmem [resolvable:$true] %s5370_s30 }
  0x44   : > { %v6372_v5 = vld [vmem:[%s6349_s18 + $0x40] sm:$0xff]  ;;  %v6375_v6 = vld [vmem:[%s6349_s18 + $0x48] sm:$0xff]  ;;  %v454_v7 = vadd.f32 %v423_v4, %v422_v2  ;;  %v428_v10 = vld [vmem:[%s6349_s18 + $0x30] sm:$0xff]  ;;  %s5369_s21 = scalar_lea.hbm %s10432_s7, %s5602_s8  ;;  %s5357_s27 = scalar_lea.sflag [#allocation6], %s6343_s4 }
  0x45   : > { %v466_v8 = vadd.f32 %v6375_v6, %v6372_v5  ;;  %461 = vadd.xlane.f32.xlu1 %v460_v3  ;;  %v429_v11 = vld [vmem:[%s6349_s18 + $0x38] sm:$0xff]  ;;  %v432_v13 = vld [vmem:[%s6349_s18 + $0x50] sm:$0xff]  ;;  %v6386_v18 = vld [vmem:[%s6349_s18 + $0x60] sm:$0xff]  ;;  %s5372_s22 = sshll.u32 %s5369_s21, 4  ;;  %s6086_s23 = scalar_lea.hbm %s10432_s7, 512  ;;  %s5373_s22 = int_to_ptr.hbm [resolvable:$true] %s5372_s22 }
  0x46   : > { %455 = vadd.xlane.f32.xlu0 %v454_v7  ;;  %v425_v12 = vld [vmem:[%s6349_s18 + $0x18] sm:$0xff]  ;;  %v463_v15 = vadd.f32 %v429_v11, %v428_v10  ;;  %v6389_v19 = vld [vmem:[%s6349_s18 + $0x68] sm:$0xff]  ;;  %v6392_v20 = vld [vmem:[%s6349_s18 + $0x70] sm:$0xff]  ;;  %s6080_s14 = sshra.s32 %s5373_s22, 4  ;;  %s6081_s14 = int_to_ptr.hbm [resolvable:$true] %s6080_s14 }
  0x47   : > { %467 = vadd.xlane.f32.xlu2 %v466_v8  ;;  %v433_v14 = vld [vmem:[%s6349_s18 + $0x58] sm:$0xff]  ;;  %v457_v16 = vadd.f32 %v425_v12, %v424_v9  ;;  %v472_v22 = vadd.f32 %v6389_v19, %v6386_v18  ;;  %v6422_v49 = vld [vmem:[%s6349_s18 + $0xa0] sm:$0xff]  ;;  %v6428_v53 = vld [vmem:[%s6349_s18 + $0xa8] sm:$0xff]  ;;  %s6082_s11 = scalar_lea.hbm %s6081_s14, 256  ;;  %p6087_p10 = scmp.lt.s32.totalorder %s6081_s14, %s10432_s7 }
  0x48   : > { %v469_v17 = vadd.f32 %v433_v14, %v432_v13  ;;  %v6395_v21 = vld [vmem:[%s6349_s18 + $0x78] sm:$0xff]  ;;  %v6431_v54 = vld [vmem:[%s6349_s18 + $0x80] sm:$0xff]  ;;  %v6434_v55 = vld [vmem:[%s6349_s18 + $0x88] sm:$0xff]  ;;  %v484_v60 = vadd.f32 %v6428_v53, %v6422_v49  ;;  %p6083_p1 = scmp.ne.s32.totalorder %s6081_s14, %s6082_s11  ;;  %p6088_p11 = scmp.lt.s32.totalorder %s6086_s23, %s6082_s11 }
  0x49   : > { %v475_v23 = vadd.f32 %v6395_v21, %v6392_v20  ;;  %v5724_v25 = vpop.eup %5723  ;;  %v478_v61 = vadd.f32 %v6434_v55, %v6431_v54  ;;  %v6486_v24 = vld [vmem:[%s6349_s18 + $0xb0] sm:$0xff] }
  0x4a   : > { %v503_v26 = vmul.f32 256.0, %v5724_v25  ;;  %vm507_vm0 = vweird.f32 %v5724_v25  ;;  %p6084_p3 = pnand %p6083_p1, %p6318_p5  ;;  %p6089_p12 = por %p6088_p11, %p6087_p10 }
  0x4c   : > { %v504_v27 = vsub.f32 1.0, %v503_v26  ;;  %p6085_p9 = pneg %p6084_p3 }
  0x4d   : > { %464 = vadd.xlane.f32.xlu1 %v463_v15 }
  0x4e   : > { %458 = vadd.xlane.f32.xlu0 %v457_v16  ;;  %v505_v28 = vmul.f32 %v5724_v25, %v504_v27  ;;  %v1093_v27 = vld [vmem:[#allocation10 + $0x1e0] sm:$0xff]  ;;  %p6090_p13 = pnand %p6089_p12, %p6085_p9 }
  0x4f   : > { %470 = vadd.xlane.f32.xlu2 %v469_v17  ;;  %1171 = vmatpush.msra.mxu0 %v1093_v27  ;;  %v1141_v27 = vld [vmem:[#allocation10 + $0x360] sm:$0xff] }
  0x50   : > { %v506_v29 = vadd.f32 %v5724_v25, %v505_v28  ;;  %v1157_v28 = vld [vmem:[#allocation10 + $0x3e0] sm:$0xff] }
  0x51   : > { %1236 = vmatpush.msra.mxu1 %v1157_v28  ;;  %v1078_v28 = vld [vmem:[#allocation10 + $0x168] sm:$0xff] }
  0x52   : > { %v6401_v30 = vsel %vm507_vm0, %v5724_v25, %v506_v29  ;;  %v6489_v25 = vld [vmem:[%s6349_s18 + $0xb8] sm:$0xff]  ;;  %v1094_v29 = vld [vmem:[#allocation10 + $0x1e8] sm:$0xff] }
  0x53   : > { %1301 = vmatpush.msra.mxu2 %v1094_v29  ;;  %v1142_v29 = vld [vmem:[#allocation10 + $0x368] sm:$0xff] }
  0x56   : > { %473 = vadd.xlane.f32.xlu0 %v472_v22  ;;  %v6480_v22 = vld [vmem:[%s6349_s18 + $0xd0] sm:$0xff] }
  0x57   : > { %476 = vadd.xlane.f32.xlu2 %v475_v23  ;;  %v6483_v23 = vld [vmem:[%s6349_s18 + $0xd8] sm:$0xff] }
  0xb8   : > { %v462_v31 = vpop.xlane.xlu1 %461 }
  0xb9   : > { %v511_v32 = vmul.f32 %v6401_v30, %v462_v31  ;;  %v456_v33 = vpop.xlane.xlu0 %455  ;;  %v1158_v31 = vld [vmem:[#allocation10 + $0x3e8] sm:$0xff] }
  0xba   : > { %v468_v34 = vpop.xlane.xlu2 %467  ;;  %v509_v35 = vmul.f32 %v6401_v30, %v456_v33  ;;  %v1153_v33 = vld [vmem:[#allocation10 + $0x3c0] sm:$0xff]  ;;  %1366 = vmatpush.msra.mxu3 %v1158_v31 }
  0xbb   : > { %v6405_v36 = vsub.f32 %v426_v0, %v511_v32  ;;  %v6407_v37 = vsub.f32 %v427_v1, %v511_v32  ;;  %v513_v7 = vmul.f32 %v6401_v30, %v468_v34  ;;  %v1089_v32 = vld [vmem:[#allocation10 + $0x1c0] sm:$0xff]  ;;  %v1090_v34 = vld [vmem:[#allocation10 + $0x1c8] sm:$0xff]  ;;  %1237 = vmatpush.msra.mxu1 %v1153_v33 }
  0xbc   : > { %v6409_v38 = vsub.f32 %v422_v2, %v509_v35  ;;  %v6411_v39 = vsub.f32 %v423_v4, %v509_v35  ;;  %v1154_v35 = vld [vmem:[#allocation10 + $0x3c8] sm:$0xff]  ;;  %1172 = vmatpush.msra.mxu0 %v1089_v32  ;;  %1302 = vmatpush.msra.mxu2 %v1090_v34  ;;  %v1073_v31 = vld [vmem:[#allocation10 + $0x140] sm:$0xff] }
  0xbd   : > { %v561_v40 = vmul.f32 %v6405_v36, %v6405_v36  ;;  %v562_v41 = vmul.f32 %v6407_v37, %v6407_v37  ;;  %1367 = vmatpush.msra.mxu3 %v1154_v35  ;;  %v1137_v32 = vld [vmem:[#allocation10 + $0x340] sm:$0xff]  ;;  %v1074_v33 = vld [vmem:[#allocation10 + $0x148] sm:$0xff] }
  0xbe   : > { %v557_v42 = vmul.f32 %v6409_v38, %v6409_v38  ;;  %v558_v43 = vmul.f32 %v6411_v39, %v6411_v39  ;;  %v1138_v34 = vld [vmem:[#allocation10 + $0x348] sm:$0xff]  ;;  %v1069_v35 = vld [vmem:[#allocation10 + $0x120] sm:$0xff] }
  0xbf   : > { %v595_v44 = vadd.f32 %v562_v41, %v561_v40  ;;  %v493_v40 = vadd.f32 %v6483_v23, %v6480_v22  ;;  %v487_v41 = vadd.f32 %v6489_v25, %v6486_v24 }
  0xc0   : > { %v589_v45 = vadd.f32 %v558_v43, %v557_v42  ;;  %v465_v46 = vpop.xlane.xlu1 %464 }
  0xc1   : > { %v459_v47 = vpop.xlane.xlu0 %458  ;;  %596 = vadd.xlane.f32.xlu2 %v595_v44  ;;  %v512_v52 = vmul.f32 %v6401_v30, %v465_v46 }
  0xc2   : > { %v471_v48 = vpop.xlane.xlu2 %470  ;;  %v510_v50 = vmul.f32 %v6401_v30, %v459_v47  ;;  %590 = vadd.xlane.f32.xlu1 %v589_v45 }
  0xc3   : > { %v514_v51 = vmul.f32 %v6401_v30, %v471_v48  ;;  %v6448_v62 = vsub.f32 %v428_v10, %v512_v52  ;;  %v6450_v63 = vsub.f32 %v429_v11, %v512_v52  ;;  %v6466_v10 = vld [vmem:[%s6349_s18 + $0x90] sm:$0xff]  ;;  %v6469_v11 = vld [vmem:[%s6349_s18 + $0x98] sm:$0xff]  ;;  %v6512_v48 = vld [vmem:[%s6349_s18 + $0xc0] sm:$0xff] }
  0xc4   : > { %v6436_v56 = vsub.f32 %v424_v9, %v510_v50  ;;  %v6438_v57 = vsub.f32 %v425_v12, %v510_v50  ;;  %v481_v16 = vadd.f32 %v6469_v11, %v6466_v10 }
  0xc5   : > { %v6440_v58 = vsub.f32 %v432_v13, %v514_v51  ;;  %v6442_v59 = vsub.f32 %v433_v14, %v514_v51  ;;  %v563_v8 = vmul.f32 %v6448_v62, %v6448_v62  ;;  %v564_v9 = vmul.f32 %v6450_v63, %v6450_v63 }
  0xc6   : > { %v559_v0 = vmul.f32 %v6436_v56, %v6436_v56  ;;  %v560_v1 = vmul.f32 %v6438_v57, %v6438_v57  ;;  %v6472_v13 = vsub.f32 %v6372_v5, %v513_v7  ;;  %v6475_v14 = vsub.f32 %v6375_v6, %v513_v7 }
  0xc7   : > { %v567_v3 = vmul.f32 %v6440_v58, %v6440_v58  ;;  %v568_v4 = vmul.f32 %v6442_v59, %v6442_v59  ;;  %v598_v15 = vadd.f32 %v564_v9, %v563_v8  ;;  %v1085_v8 = vld [vmem:[#allocation10 + $0x1a0] sm:$0xff] }
  0xc8   : > { %v592_v2 = vadd.f32 %v560_v1, %v559_v0  ;;  %v565_v6 = vmul.f32 %v6472_v13, %v6472_v13  ;;  %v566_v26 = vmul.f32 %v6475_v14, %v6475_v14  ;;  %v6530_v1 = vld [vmem:[%s6349_s18 + $0xe0] sm:$0xff]  ;;  %1173 = vmatpush.msra.mxu0 %v1085_v8  ;;  %v1122_v8 = vld [vmem:[#allocation10 + $0x2c8] sm:$0xff] }
  0xc9   : > { %485 = vadd.xlane.f32.xlu2 %v484_v60  ;;  %v604_v12 = vadd.f32 %v568_v4, %v567_v3  ;;  %v474_v17 = vpop.xlane.xlu0 %473  ;;  %v6538_v3 = vld [vmem:[%s6349_s18 + $0xf0] sm:$0xff]  ;;  %v6541_v4 = vld [vmem:[%s6349_s18 + $0xf8] sm:$0xff]  ;;  %v1149_v9 = vld [vmem:[#allocation10 + $0x3a0] sm:$0xff] }
  0xca   : > { %479 = vadd.xlane.f32.xlu1 %v478_v61  ;;  %593 = vadd.xlane.f32.xlu0 %v592_v2  ;;  %v515_v5 = vmul.f32 %v6401_v30, %v474_v17  ;;  %v601_v44 = vadd.f32 %v566_v26, %v565_v6  ;;  %v477_v45 = vpop.xlane.xlu2 %476  ;;  %v6533_v2 = vld [vmem:[%s6349_s18 + $0xe8] sm:$0xff]  ;;  %v499_v7 = vadd.f32 %v6541_v4, %v6538_v3 }
  0xcb   : > { %v516_v46 = vmul.f32 %v6401_v30, %v477_v45  ;;  %1238 = vmatpush.msra.mxu1 %v1149_v9  ;;  %v1145_v17 = vld [vmem:[#allocation10 + $0x380] sm:$0xff]  ;;  %v1146_v6 = vld [vmem:[#allocation10 + $0x388] sm:$0xff] }
  0xcc   : > { %v6501_v42 = vsub.f32 %v6386_v18, %v515_v5  ;;  %v6504_v43 = vsub.f32 %v6389_v19, %v515_v5  ;;  %v6515_v19 = vld [vmem:[%s6349_s18 + $0xc8] sm:$0xff] }
  0xcd   : > { %v6518_v50 = vsub.f32 %v6392_v20, %v516_v46  ;;  %v6521_v51 = vsub.f32 %v6395_v21, %v516_v46  ;;  %v490_v52 = vadd.f32 %v6515_v19, %v6512_v48  ;;  %v496_v21 = vadd.f32 %v6533_v2, %v6530_v1  ;;  %v1082_v5 = vld [vmem:[#allocation10 + $0x188] sm:$0xff]  ;;  %1239 = vmatpush.msra.mxu1 %v1145_v17  ;;  %v1077_v26 = vld [vmem:[#allocation10 + $0x160] sm:$0xff] }
  0xce   : > { %v569_v47 = vmul.f32 %v6501_v42, %v6501_v42  ;;  %v570_v18 = vmul.f32 %v6504_v43, %v6504_v43  ;;  %v1065_v45 = vld [vmem:[#allocation10 + $0x100] sm:$0xff] }
  0xcf   : > { %v571_v61 = vmul.f32 %v6518_v50, %v6518_v50  ;;  %v572_v0 = vmul.f32 %v6521_v51, %v6521_v51  ;;  %1240 = vmatpush.msra.mxu1 %v1141_v27  ;;  %v1129_v46 = vld [vmem:[#allocation10 + $0x300] sm:$0xff] }
  0xd0   : > { %v607_v60 = vadd.f32 %v570_v18, %v569_v47  ;;  %v1066_v47 = vld [vmem:[#allocation10 + $0x108] sm:$0xff]  ;;  %v1053_v9 = vld [vmem:[#allocation10 + $0xa0] sm:$0xff] }
  0xd1   : > { %605 = vadd.xlane.f32.xlu2 %v604_v12  ;;  %v610_v20 = vadd.f32 %v572_v0, %v571_v61  ;;  %v1086_v12 = vld [vmem:[#allocation10 + $0x1a8] sm:$0xff]  ;;  %1241 = vmatpush.msra.mxu1 %v1137_v32  ;;  %v1049_v17 = vld [vmem:[#allocation10 + $0x80] sm:$0xff] }
  0xd2   : > { %599 = vadd.xlane.f32.xlu1 %v598_v15  ;;  %482 = vadd.xlane.f32.xlu0 %v481_v16  ;;  %v1150_v15 = vld [vmem:[#allocation10 + $0x3a8] sm:$0xff]  ;;  %v1081_v16 = vld [vmem:[#allocation10 + $0x180] sm:$0xff] }
  0xd3   : > { %1303 = vmatpush.msra.mxu2 %v1086_v12  ;;  %1368 = vmatpush.msra.mxu3 %v1150_v15  ;;  %v1130_v18 = vld [vmem:[#allocation10 + $0x308] sm:$0xff]  ;;  %v1117_v12 = vld [vmem:[#allocation10 + $0x2a0] sm:$0xff] }
  0xd4   : > { %1174 = vmatpush.msra.mxu0 %v1081_v16  ;;  %v1062_v61 = vld [vmem:[#allocation10 + $0xe8] sm:$0xff]  ;;  %v1045_v27 = vld [vmem:[#allocation10 + $0x60] sm:$0xff] }
  0xd5   : > { %1304 = vmatpush.msra.mxu2 %v1082_v5  ;;  %1369 = vmatpush.msra.mxu3 %v1146_v6  ;;  %v1126_v0 = vld [vmem:[#allocation10 + $0x2e8] sm:$0xff]  ;;  %v1113_v5 = vld [vmem:[#allocation10 + $0x280] sm:$0xff] }
  0xd6   : > { %1175 = vmatpush.msra.mxu0 %v1077_v26  ;;  %v1054_v15 = vld [vmem:[#allocation10 + $0xa8] sm:$0xff]  ;;  %v1041_v32 = vld [vmem:[#allocation10 + $0x40] sm:$0xff] }
  0xd7   : > { %1305 = vmatpush.msra.mxu2 %v1078_v28  ;;  %1370 = vmatpush.msra.mxu3 %v1142_v29  ;;  %v1118_v16 = vld [vmem:[#allocation10 + $0x2a8] sm:$0xff]  ;;  %v1109_v28 = vld [vmem:[#allocation10 + $0x260] sm:$0xff] }
  0xd8   : > { %1176 = vmatpush.msra.mxu0 %v1073_v31  ;;  %v1050_v6 = vld [vmem:[#allocation10 + $0x88] sm:$0xff] }
  0xd9   : > { %494 = vadd.xlane.f32.xlu2 %v493_v40  ;;  %1306 = vmatpush.msra.mxu2 %v1074_v33  ;;  %v1133_v40 = vld [vmem:[#allocation10 + $0x320] sm:$0xff]  ;;  %v1114_v26 = vld [vmem:[#allocation10 + $0x288] sm:$0xff] }
  0xda   : > { %488 = vadd.xlane.f32.xlu1 %v487_v41  ;;  %602 = vadd.xlane.f32.xlu0 %v601_v44  ;;  %v1070_v41 = vld [vmem:[#allocation10 + $0x128] sm:$0xff]  ;;  %v1105_v33 = vld [vmem:[#allocation10 + $0x240] sm:$0xff] }
  0xdb   : > { %1371 = vmatpush.msra.mxu3 %v1138_v34  ;;  %1177 = vmatpush.msra.mxu0 %v1069_v35  ;;  %v1134_v44 = vld [vmem:[#allocation10 + $0x328] sm:$0xff] }
  0xdc   : > { %1242 = vmatpush.msra.mxu1 %v1133_v40  ;;  %1307 = vmatpush.msra.mxu2 %v1070_v41  ;;  %v1046_v29 = vld [vmem:[#allocation10 + $0x68] sm:$0xff]  ;;  %v1037_v40 = vld [vmem:[#allocation10 + $0x20] sm:$0xff] }
  0xdd   : > { %1372 = vmatpush.msra.mxu3 %v1134_v44  ;;  %1178 = vmatpush.msra.mxu0 %v1065_v45  ;;  %v1110_v31 = vld [vmem:[#allocation10 + $0x268] sm:$0xff]  ;;  %v1101_v41 = vld [vmem:[#allocation10 + $0x220] sm:$0xff] }
  0xde   : > { %1243 = vmatpush.msra.mxu1 %v1129_v46  ;;  %1308 = vmatpush.msra.mxu2 %v1066_v47  ;;  %v1042_v34 = vld [vmem:[#allocation10 + $0x48] sm:$0xff]  ;;  %v1033_v46 = vld [vmem:[#allocation10] sm:$0xff] }
  0xdf   : > { %1373 = vmatpush.msra.mxu3 %v1130_v18  ;;  %v1106_v35 = vld [vmem:[#allocation10 + $0x248] sm:$0xff]  ;;  %v1097_v47 = vld [vmem:[#allocation10 + $0x200] sm:$0xff] }
  0xe0   : > { %1309 = vmatpush.msra.mxu2 %v1062_v61  ;;  %v1038_v44 = vld [vmem:[#allocation10 + $0x28] sm:$0xff] }
  0xe1   : > { %1374 = vmatpush.msra.mxu3 %v1126_v0  ;;  %v1102_v45 = vld [vmem:[#allocation10 + $0x228] sm:$0xff] }
  0xe2   : > { %491 = vadd.xlane.f32.xlu0 %v490_v52  ;;  %608 = vadd.xlane.f32.xlu1 %v607_v60  ;;  %v1061_v52 = vld [vmem:[#allocation10 + $0xe0] sm:$0xff]  ;;  %v1034_v18 = vld [vmem:[#allocation10 + $0x8] sm:$0xff] }
  0xe3   : > { %v1125_v60 = vld [vmem:[#allocation10 + $0x2e0] sm:$0xff]  ;;  %1179 = vmatpush.msra.mxu0 %v1061_v52  ;;  %1375 = vmatpush.msra.mxu3 %v1122_v8 }
  0xe4   : > { %1244 = vmatpush.msra.mxu1 %v1125_v60  ;;  %v1098_v60 = vld [vmem:[#allocation10 + $0x208] sm:$0xff] }
  0xe5   : > { %1376 = vmatpush.msra.mxu3 %v1118_v16 }
  0xe7   : > { %1377 = vmatpush.msra.mxu3 %v1114_v26 }
  0xe9   : > { %1378 = vmatpush.msra.mxu3 %v1110_v31 }
  0xea   : > { %611 = vadd.xlane.f32.xlu0 %v610_v20  ;;  %497 = vadd.xlane.f32.xlu1 %v496_v21  ;;  %v1057_v20 = vld [vmem:[#allocation10 + $0xc0] sm:$0xff] }
  0xeb   : > { %v1121_v21 = vld [vmem:[#allocation10 + $0x2c0] sm:$0xff]  ;;  %1180 = vmatpush.msra.mxu0 %v1057_v20  ;;  %1379 = vmatpush.msra.mxu3 %v1106_v35 }
  0xec   : > { %1245 = vmatpush.msra.mxu1 %v1121_v21 }
  0xed   : > { %1181 = vmatpush.msra.mxu0 %v1053_v9  ;;  %1380 = vmatpush.msra.mxu3 %v1102_v45 }
  0xee   : > { %1246 = vmatpush.msra.mxu1 %v1117_v12 }
  0xef   : > { %1182 = vmatpush.msra.mxu0 %v1049_v17  ;;  %1381 = vmatpush.msra.mxu3 %v1098_v60 }
  0xf0   : > { %1247 = vmatpush.msra.mxu1 %v1113_v5 }
  0xf1   : > { %1183 = vmatpush.msra.mxu0 %v1045_v27 }
  0xf2   : > { %500 = vadd.xlane.f32.xlu0 %v499_v7  ;;  %v1058_v7 = vld [vmem:[#allocation10 + $0xc8] sm:$0xff]  ;;  %1248 = vmatpush.msra.mxu1 %v1109_v28 }
  0xf3   : > { %1310 = vmatpush.msra.mxu2 %v1058_v7  ;;  %1184 = vmatpush.msra.mxu0 %v1041_v32 }
  0xf4   : > { %1249 = vmatpush.msra.mxu1 %v1105_v33 }
  0xf5   : > { %1311 = vmatpush.msra.mxu2 %v1054_v15  ;;  %1185 = vmatpush.msra.mxu0 %v1037_v40 }
  0xf6   : > { %1250 = vmatpush.msra.mxu1 %v1101_v41 }
  0xf7   : > { %1312 = vmatpush.msra.mxu2 %v1050_v6  ;;  %1186 = vmatpush.msra.mxu0 %v1033_v46 }
  0xf8   : > { %1251 = vmatpush.msra.mxu1 %v1097_v47  ;;  %v861_v47 = vld [vmem:[#allocation7] sm:$0x3] }
  0xf9   : > { %1313 = vmatpush.msra.mxu2 %v1046_v29 }
  0xfb   : > { %1314 = vmatpush.msra.mxu2 %v1042_v34 }
  0xfd   : > { %1315 = vmatpush.msra.mxu2 %v1038_v44 }
  0xff   : > { %1316 = vmatpush.msra.mxu2 %v1034_v18 }
 0x134   : > { %v597_v52 = vpop.xlane.xlu2 %596 }
 0x135   : > { %v639_v61 = vmul.f32 %v597_v52, %v6401_v30  ;;  %v591_v0 = vpop.xlane.xlu1 %590 }
 0x136   : > { %v637_v20 = vmul.f32 %v591_v0, %v6401_v30 }
 0x137   : > { %v6547_v21 = vadd.f32 1e-05, %v639_v61 }
 0x138   : > { %v653_v7 = vadd.f32 1e-05, %v637_v20  ;;  %v899_v20 = vld [vmem:[#allocation9] sm:$0x3] }
 0x139   : > { %5725 = vrsqrt.f32 %v6547_v21  ;;  %vm695_vm4 = vweird.f32 %v6547_v21 }
 0x13a   : > { %5727 = vrsqrt.f32 %v653_v7  ;;  %vm675_vm2 = vweird.f32 %v653_v7 }
 0x13c   : > { %v486_v8 = vpop.xlane.xlu2 %485 }
 0x13d   : > { %v519_v9 = vmul.f32 %v6401_v30, %v486_v8  ;;  %v480_v12 = vpop.xlane.xlu1 %479  ;;  %v594_v15 = vpop.xlane.xlu0 %593 }
 0x13e   : > { %v517_v16 = vmul.f32 %v6401_v30, %v480_v12  ;;  %v638_v17 = vmul.f32 %v594_v15, %v6401_v30  ;;  %v6589_v12 = vperm.slane %v861_v47, 0  ;;  %v6591_v15 = vperm.slane %v861_v47, 1 }
 0x13f   : > { %v6553_v5 = vpop.eup %5725  ;;  %v6564_v31 = vsub.f32 %v6422_v49, %v519_v9  ;;  %v6570_v34 = vsub.f32 %v6428_v53, %v519_v9 }
 0x140   : > { %v5728_v6 = vpop.eup %5727  ;;  %v690_v26 = vmul.f32 %v6553_v5, %v6547_v21  ;;  %v6558_v27 = vsub.f32 %v6431_v54, %v517_v16  ;;  %v6561_v28 = vsub.f32 %v6434_v55, %v517_v16  ;;  %v6566_v32 = vadd.f32 1e-05, %v638_v17 }
 0x141   : > { %v670_v29 = vmul.f32 %v5728_v6, %v653_v7  ;;  %v577_v52 = vmul.f32 %v6564_v31, %v6564_v31  ;;  %v578_v60 = vmul.f32 %v6570_v34, %v6570_v34  ;;  %vm676_vm1 = vweird.f32 %v5728_v6 }
 0x142   : > { %v691_v33 = vmul.f32 %v6553_v5, %v690_v26  ;;  %v573_v35 = vmul.f32 %v6558_v27, %v6558_v27  ;;  %v574_v54 = vmul.f32 %v6561_v28, %v6561_v28  ;;  %5729 = vrsqrt.f32 %v6566_v32  ;;  %vm677_vm3 = vmor %vm675_vm2, %vm676_vm1 }
 0x143   : > { %v671_v40 = vmul.f32 %v5728_v6, %v670_v29  ;;  %vm696_vm5 = vweird.f32 %v6553_v5  ;;  %vm685_vm8 = vweird.f32 %v6566_v32 }
 0x144   : > { %v606_v55 = vpop.xlane.xlu2 %605  ;;  %v613_v41 = vadd.f32 %v574_v54, %v573_v35  ;;  %v692_v49 = vmul.f32 0.5, %v691_v33  ;;  %v619_v35 = vadd.f32 %v578_v60, %v577_v52  ;;  %v6598_v54 = vperm.slane %v899_v20, 0  ;;  %vm697_vm6 = vmor %vm695_vm4, %vm696_vm5 }
 0x145   : > { %v672_v44 = vmul.f32 0.5, %v671_v40  ;;  %v600_v45 = vpop.xlane.xlu1 %599  ;;  %v483_v46 = vpop.xlane.xlu0 %482  ;;  %v642_v0 = vmul.f32 %v606_v55, %v6401_v30  ;;  %v6603_v55 = vperm.slane %v899_v20, 1 }
 0x146   : > { %v640_v18 = vmul.f32 %v600_v45, %v6401_v30  ;;  %v518_v53 = vmul.f32 %v6401_v30, %v483_v46  ;;  %614 = vadd.xlane.f32.xlu2 %v613_v41  ;;  %v693_v17 = vsub.f32 1.5, %v692_v49 }
 0x147   : > { %v673_v61 = vsub.f32 1.5, %v672_v44  ;;  %v6601_v40 = vadd.f32 1e-05, %v642_v0 }
 0x148   : > { %v6584_v8 = vadd.f32 1e-05, %v640_v18  ;;  %v6587_v9 = vsub.f32 %v6466_v10, %v518_v53  ;;  %v5730_v16 = vpop.eup %5729  ;;  %v6594_v29 = vsub.f32 %v6469_v11, %v518_v53  ;;  %v694_v45 = vmul.f32 %v6553_v5, %v693_v17 }
 0x149   : > { %v674_v26 = vmul.f32 %v5728_v6, %v673_v61  ;;  %v680_v33 = vmul.f32 %v5730_v16, %v6566_v32  ;;  %vm686_vm7 = vweird.f32 %v5730_v16  ;;  %vm725_vm0 = vweird.f32 %v6601_v40 }
 0x14a   : > { %5731 = vrsqrt.f32 %v6584_v8  ;;  %v575_v44 = vmul.f32 %v6587_v9, %v6587_v9  ;;  %v576_v18 = vmul.f32 %v6594_v29, %v6594_v29  ;;  %vm687_vm9 = vmor %vm685_vm8, %vm686_vm7  ;;  %vm705_vm10 = vweird.f32 %v6584_v8 }
 0x14b   : > { %v678_v10 = vsel %vm677_vm3, %v5728_v6, %v674_v26  ;;  %v681_v41 = vmul.f32 %v5730_v16, %v680_v33  ;;  %5733 = vrsqrt.f32 %v6601_v40 }
 0x14c   : > { %v829_v7 = vmul.f32 %v678_v10, %v6409_v38  ;;  %v830_v11 = vmul.f32 %v678_v10, %v6411_v39  ;;  %v495_v49 = vpop.xlane.xlu2 %494  ;;  %v616_v61 = vadd.f32 %v576_v18, %v575_v44 }
 0x14d   : > { %v522_v46 = vmul.f32 %v6401_v30, %v495_v49  ;;  %v489_v6 = vpop.xlane.xlu1 %488  ;;  %v603_v47 = vpop.xlane.xlu0 %602  ;;  %v682_v53 = vmul.f32 0.5, %v681_v41 }
 0x14e   : > { %v520_v38 = vmul.f32 %v6401_v30, %v489_v6  ;;  %v641_v39 = vmul.f32 %v603_v47, %v6401_v30  ;;  %620 = vadd.xlane.f32.xlu2 %v619_v35  ;;  %v867_v52 = vmul.f32 %v6589_v12, %v829_v7  ;;  %v868_v0 = vmul.f32 %v6591_v15, %v830_v11 }
 0x14f   : > { %v6619_v60 = vsub.f32 %v6480_v22, %v522_v46  ;;  %v683_v17 = vsub.f32 1.5, %v682_v53  ;;  %v6629_v26 = vsub.f32 %v6483_v23, %v522_v46  ;;  %617 = vadd.xlane.f32.xlu1 %v616_v61 }
 0x150   : > { %v6622_v20 = vpop.eup %5731  ;;  %v6632_v33 = vsub.f32 %v6486_v24, %v520_v38  ;;  %v6637_v35 = vsub.f32 %v6489_v25, %v520_v38  ;;  %v6639_v10 = vadd.f32 1e-05, %v641_v39  ;;  %v6643_v21 = vadd.f32 %v6598_v54, %v867_v52 }
 0x151   : > { %v700_v22 = vmul.f32 %v6622_v20, %v6584_v8  ;;  %v684_v7 = vmul.f32 %v5730_v16, %v683_v17  ;;  %v6646_v23 = vadd.f32 %v6603_v55, %v868_v0  ;;  %v698_v24 = vsel %vm697_vm6, %v6553_v5, %v694_v45  ;;  %v6659_v5 = vpop.eup %5733 }
 0x152   : > { %5735 = vrsqrt.f32 %v6639_v10  ;;  %v583_v25 = vmul.f32 %v6619_v60, %v6619_v60  ;;  %1187 = vmatmul.f32.vlgmr.msra.gmra.mxu0 %v6643_v21  ;;  %v584_v32 = vmul.f32 %v6629_v26, %v6629_v26  ;;  %v579_v49 = vmul.f32 %v6632_v33, %v6632_v33  ;;  %1317 = vmatmul.f32.vlgmr.msra.gmra.mxu2 %v6643_v21 }
 0x153   : > { %v701_v11 = vmul.f32 %v6622_v20, %v700_v22  ;;  %v688_v41 = vsel %vm687_vm9, %v5730_v16, %v684_v7  ;;  %1252 = vmatmul.f32.vlgmr.msra.gmra.mxu1 %v6646_v23  ;;  %1382 = vmatmul.f32.vlgmr.msra.gmra.mxu3 %v6646_v23  ;;  %v580_v47 = vmul.f32 %v6637_v35, %v6637_v35  ;;  %vm706_vm11 = vweird.f32 %v6622_v20 }
 0x154   : > { %v831_v44 = vmul.f32 %v688_v41, %v6436_v56  ;;  %v832_v45 = vmul.f32 %v688_v41, %v6438_v57  ;;  %v833_v18 = vmul.f32 %v698_v24, %v6405_v36  ;;  %v628_v39 = vadd.f32 %v584_v32, %v583_v25  ;;  %vm707_vm12 = vmor %vm705_vm10, %vm706_vm11 }
 0x155   : > { %v702_v46 = vmul.f32 0.5, %v701_v11  ;;  %v609_v16 = vpop.xlane.xlu1 %608  ;;  %v492_v6 = vpop.xlane.xlu0 %491  ;;  %v622_v52 = vadd.f32 %v580_v47, %v579_v49  ;;  %v834_v0 = vmul.f32 %v698_v24, %v6407_v37  ;;  %v720_v17 = vmul.f32 %v6659_v5, %v6601_v40 }
 0x156   : > { %v643_v53 = vmul.f32 %v609_v16, %v6401_v30  ;;  %v521_v38 = vmul.f32 %v6401_v30, %v492_v6  ;;  %v869_v57 = vmul.f32 %v6589_v12, %v831_v44  ;;  %v870_v61 = vmul.f32 %v6591_v15, %v832_v45  ;;  %629 = vadd.xlane.f32.xlu2 %v628_v39 }
 0x157   : > { %v703_v56 = vsub.f32 1.5, %v702_v46  ;;  %623 = vadd.xlane.f32.xlu0 %v622_v52  ;;  %v872_v32 = vmul.f32 %v6591_v15, %v834_v0  ;;  %v721_v49 = vmul.f32 %v6659_v5, %v720_v17  ;;  %vm715_vm13 = vweird.f32 %v6639_v10 }
 0x158   : > { %v6676_v22 = vadd.f32 1e-05, %v643_v53  ;;  %v5736_v36 = vpop.eup %5735  ;;  %v6679_v7 = vsub.f32 %v6512_v48, %v521_v38  ;;  %v6682_v11 = vsub.f32 %v6515_v19, %v521_v38  ;;  %v6685_v25 = vadd.f32 %v6598_v54, %v869_v57 }
 0x159   : > { %v6688_v37 = vadd.f32 %v6603_v55, %v870_v61  ;;  %v704_v24 = vmul.f32 %v6622_v20, %v703_v56  ;;  %v710_v41 = vmul.f32 %v5736_v36, %v6639_v10  ;;  %v871_v19 = vmul.f32 %v6589_v12, %v833_v18 }
 0x15a   : > { %5737 = vrsqrt.f32 %v6676_v22  ;;  %1190 = vmatmul.f32.gmra.mxu0 %v6685_v25  ;;  %1320 = vmatmul.f32.gmra.mxu2 %v6685_v25  ;;  %v581_v46 = vmul.f32 %v6679_v7, %v6679_v7  ;;  %v582_v16 = vmul.f32 %v6682_v11, %v6682_v11  ;;  %v722_v61 = vmul.f32 0.5, %v721_v49 }
 0x15b   : > { %v711_v48 = vmul.f32 %v5736_v36, %v710_v41  ;;  %1255 = vmatmul.f32.gmra.mxu1 %v6688_v37  ;;  %1385 = vmatmul.f32.gmra.mxu3 %v6688_v37  ;;  %v708_v6 = vsel %vm707_vm12, %v6622_v20, %v704_v24  ;;  %v6725_v17 = vadd.f32 %v6598_v54, %v871_v19  ;;  %vm716_vm14 = vweird.f32 %v5736_v36 }
 0x15c   : > { %v625_v53 = vadd.f32 %v582_v16, %v581_v46  ;;  %v835_v20 = vmul.f32 %v708_v6, %v6448_v62  ;;  %v836_v0 = vmul.f32 %v708_v6, %v6450_v63  ;;  %v723_v41 = vsub.f32 1.5, %v722_v61  ;;  %vm717_vm15 = vmor %vm715_vm13, %vm716_vm14 }
 0x15d   : > { %v498_v44 = vpop.xlane.xlu1 %497  ;;  %v612_v45 = vpop.xlane.xlu0 %611  ;;  %v712_v47 = vmul.f32 0.5, %v711_v48  ;;  %vm726_vm1 = vweird.f32 %v6659_v5  ;;  %vm735_vm3 = vweird.f32 %v6676_v22 }
 0x15e   : > { %v523_v18 = vmul.f32 %v6401_v30, %v498_v44  ;;  %v644_v8 = vmul.f32 %v612_v45, %v6401_v30  ;;  %626 = vadd.xlane.f32.xlu1 %v625_v53  ;;  %v874_v49 = vmul.f32 %v6591_v15, %v836_v0  ;;  %v724_v10 = vmul.f32 %v6659_v5, %v723_v41  ;;  %vm727_vm2 = vmor %vm725_vm0, %vm726_vm1  ;;  %v1156_v41 = vld [vmem:[#allocation10 + $0x3d8] sm:$0xff] }
 0x15f   : > { %v713_v39 = vsub.f32 1.5, %v712_v47 }
 0x160   : > { %v6710_v38 = vpop.eup %5737  ;;  %v6713_v56 = vsub.f32 %v6530_v1, %v523_v18  ;;  %v6716_v52 = vsub.f32 %v6533_v2, %v523_v18  ;;  %v6718_v57 = vadd.f32 1e-05, %v644_v8  ;;  %v6728_v1 = vadd.f32 %v6603_v55, %v872_v32 }
 0x161   : > { %v714_v24 = vmul.f32 %v5736_v36, %v713_v39  ;;  %v730_v62 = vmul.f32 %v6710_v38, %v6676_v22  ;;  %v873_v32 = vmul.f32 %v6589_v12, %v835_v20  ;;  %v1095_v20 = vld [vmem:[#allocation10 + $0x1f0] sm:$0xff]  ;;  %v728_v0 = vsel %vm727_vm2, %v6659_v5, %v724_v10  ;;  %v1152_v5 = vld [vmem:[#allocation10 + $0x3b8] sm:$0xff] }
 0x162   : > { %5739 = vrsqrt.f32 %v6718_v57  ;;  %v585_v2 = vmul.f32 %v6713_v56, %v6713_v56  ;;  %v586_v63 = vmul.f32 %v6716_v52, %v6716_v52  ;;  %1193 = vmatmul.f32.gmra.mxu0 %v6725_v17  ;;  %1323 = vmatmul.f32.gmra.mxu2 %v6725_v17  ;;  %vm736_vm4 = vweird.f32 %v6710_v38  ;;  %v1144_v22 = vld [vmem:[#allocation10 + $0x378] sm:$0xff] }
 0x163   : > { %1258 = vmatmul.f32.gmra.mxu1 %v6728_v1  ;;  %1388 = vmatmul.f32.gmra.mxu3 %v6728_v1  ;;  %v718_v45 = vsel %vm717_vm15, %v5736_v36, %v714_v24  ;;  %v731_v46 = vmul.f32 %v6710_v38, %v730_v62  ;;  %v6758_v18 = vadd.f32 %v6598_v54, %v873_v32  ;;  %v1159_v62 = vld [vmem:[#allocation10 + $0x3f0] sm:$0xff]  ;;  %vm737_vm5 = vmor %vm735_vm3, %vm736_vm4  ;;  %vm745_vm6 = vweird.f32 %v6718_v57 }
 0x164   : > { %v631_v19 = vadd.f32 %v586_v63, %v585_v2  ;;  %v6761_v36 = vadd.f32 %v6603_v55, %v874_v49  ;;  %v837_v8 = vmul.f32 %v718_v45, %v6472_v13  ;;  %v838_v40 = vmul.f32 %v718_v45, %v6475_v14  ;;  %v1096_v13 = vld [vmem:[#allocation10 + $0x1f8] sm:$0xff]  ;;  %1431 = vmatpush.msrb.mxu0 %v1095_v20  ;;  %v1091_v32 = vld [vmem:[#allocation10 + $0x1d0] sm:$0xff] }
 0x165   : > { %v501_v48 = vpop.xlane.xlu0 %500  ;;  %v1160_v14 = vld [vmem:[#allocation10 + $0x3f8] sm:$0xff]  ;;  %1561 = vmatpush.msrb.mxu2 %v1096_v13  ;;  %v1155_v49 = vld [vmem:[#allocation10 + $0x3d0] sm:$0xff]  ;;  %1496 = vmatpush.msrb.mxu1 %v1159_v62  ;;  %v840_v10 = vmul.f32 %v728_v0, %v6442_v59 }
 0x166   : > { %v524_v44 = vmul.f32 %v6401_v30, %v501_v48  ;;  %632 = vadd.xlane.f32.xlu0 %v631_v19  ;;  %10602 = vst [vmem:[#allocation21_spill] sm:$0xff] %v6761_v36  ;;  %v875_v2 = vmul.f32 %v6589_v12, %v837_v8  ;;  %v876_v24 = vmul.f32 %v6591_v15, %v838_v40  ;;  %v1092_v63 = vld [vmem:[#allocation10 + $0x1d8] sm:$0xff]  ;;  %v1087_v45 = vld [vmem:[#allocation10 + $0x1b0] sm:$0xff] }
 0x167   : > { %1626 = vmatpush.msrb.mxu3 %v1160_v14  ;;  %1562 = vmatpush.msrb.mxu2 %v1092_v63  ;;  %v1148_v59 = vld [vmem:[#allocation10 + $0x398] sm:$0xff]  ;;  %v878_v20 = vmul.f32 %v6591_v15, %v840_v10 }
 0x168   : > { %v6746_v16 = vpop.eup %5739  ;;  %v6751_v6 = vsub.f32 %v6538_v3, %v524_v44  ;;  %v6754_v47 = vsub.f32 %v6541_v4, %v524_v44  ;;  %v732_v4 = vmul.f32 0.5, %v731_v46  ;;  %v1088_v44 = vld [vmem:[#allocation10 + $0x1b8] sm:$0xff]  ;;  %v839_v46 = vmul.f32 %v728_v0, %v6440_v58  ;;  %1432 = vmatpush.msrb.mxu0 %v1091_v32  ;;  %1497 = vmatpush.msrb.mxu1 %v1155_v49  ;;  %v1151_v58 = vld [vmem:[#allocation10 + $0x3b0] sm:$0xff] }
 0x169   : > { %v740_v39 = vmul.f32 %v6746_v16, %v6718_v57  ;;  %1627 = vmatpush.msrb.mxu3 %v1156_v41  ;;  %v6784_v8 = vadd.f32 %v6598_v54, %v875_v2  ;;  %v6787_v40 = vadd.f32 %v6603_v55, %v876_v24  ;;  %1563 = vmatpush.msrb.mxu2 %v1088_v44  ;;  %v1080_v13 = vld [vmem:[#allocation10 + $0x178] sm:$0xff]  ;;  %vm746_vm7 = vweird.f32 %v6746_v16 }
 0x16a   : > { %v587_v53 = vmul.f32 %v6751_v6, %v6751_v6  ;;  %v588_v3 = vmul.f32 %v6754_v47, %v6754_v47  ;;  %1196 = vmatmul.f32.gmra.mxu0 %v6758_v18  ;;  %1326 = vmatmul.f32.gmra.mxu2 %v6758_v18  ;;  %v733_v48 = vsub.f32 1.5, %v732_v4  ;;  %v1084_v4 = vld [vmem:[#allocation10 + $0x198] sm:$0xff]  ;;  %v877_v14 = vmul.f32 %v6589_v12, %v839_v46  ;;  %vm747_vm8 = vmor %vm745_vm6, %vm746_vm7 }
 0x16b   : > { %1261 = vmatmul.f32.gmra.mxu1 %v6761_v36  ;;  %1391 = vmatmul.f32.gmra.mxu3 %v6761_v36  ;;  %v741_v19 = vmul.f32 %v6746_v16, %v740_v39  ;;  %10603 = vst [vmem:[#allocation22_spill] sm:$0xff] %v6784_v8  ;;  %v1083_v39 = vld [vmem:[#allocation10 + $0x190] sm:$0xff]  ;;  %v6807_v41 = vadd.f32 %v6603_v55, %v878_v20  ;;  %v1076_v46 = vld [vmem:[#allocation10 + $0x158] sm:$0xff] }
 0x16c   : > { %v634_v61 = vadd.f32 %v588_v3, %v587_v53  ;;  %10604 = vst [vmem:[#allocation23_spill] sm:$0xff] %v6787_v40  ;;  %v734_v53 = vmul.f32 %v6710_v38, %v733_v48  ;;  %1628 = vmatpush.msrb.mxu3 %v1152_v5  ;;  %1433 = vmatpush.msrb.mxu0 %v1087_v45  ;;  %v1079_v5 = vld [vmem:[#allocation10 + $0x170] sm:$0xff]  ;;  %v1140_v10 = vld [vmem:[#allocation10 + $0x358] sm:$0xff] }
 0x16d   : > { %v742_v3 = vmul.f32 0.5, %v741_v19  ;;  %1498 = vmatpush.msrb.mxu1 %v1151_v58  ;;  %1564 = vmatpush.msrb.mxu2 %v1084_v4  ;;  %v6804_v63 = vadd.f32 %v6598_v54, %v877_v14  ;;  %10606 = vst [vmem:[#allocation25_spill] sm:$0xff] %v6807_v41  ;;  %v1143_v45 = vld [vmem:[#allocation10 + $0x370] sm:$0xff] }
 0x16e   : > { %635 = vadd.xlane.f32.xlu1 %v634_v61  ;;  %v1147_v61 = vld [vmem:[#allocation10 + $0x390] sm:$0xff]  ;;  %v738_v0 = vsel %vm737_vm5, %v6710_v38, %v734_v53  ;;  %1629 = vmatpush.msrb.mxu3 %v1148_v59  ;;  %v1072_v59 = vld [vmem:[#allocation10 + $0x138] sm:$0xff] }
 0x16f   : > { %v743_v2 = vsub.f32 1.5, %v742_v3  ;;  %1434 = vmatpush.msrb.mxu0 %v1083_v39  ;;  %1499 = vmatpush.msrb.mxu1 %v1147_v61  ;;  %v841_v24 = vmul.f32 %v738_v0, %v6501_v42  ;;  %v842_v62 = vmul.f32 %v738_v0, %v6504_v43  ;;  %10605 = vst [vmem:[#allocation24_spill] sm:$0xff] %v6804_v63  ;;  %v1075_v58 = vld [vmem:[#allocation10 + $0x150] sm:$0xff]  ;;  %v1136_v61 = vld [vmem:[#allocation10 + $0x338] sm:$0xff] }
 0x170   : > { %1565 = vmatpush.msrb.mxu2 %v1080_v13  ;;  %1630 = vmatpush.msrb.mxu3 %v1144_v22  ;;  %v1139_v4 = vld [vmem:[#allocation10 + $0x350] sm:$0xff]  ;;  %v1068_v0 = vld [vmem:[#allocation10 + $0x118] sm:$0xff] }
 0x171   : > { %v744_v38 = vmul.f32 %v6746_v16, %v743_v2  ;;  %v879_v42 = vmul.f32 %v6589_v12, %v841_v24  ;;  %v880_v43 = vmul.f32 %v6591_v15, %v842_v62  ;;  %1435 = vmatpush.msrb.mxu0 %v1079_v5  ;;  %1500 = vmatpush.msrb.mxu1 %v1143_v45  ;;  %v1071_v20 = vld [vmem:[#allocation10 + $0x130] sm:$0xff] }
 0x172   : > { %1199 = vmatmul.f32.gmra.mxu0 %v6784_v8  ;;  %1329 = vmatmul.f32.gmra.mxu2 %v6784_v8  ;;  %v1135_v22 = vld [vmem:[#allocation10 + $0x330] sm:$0xff] }
 0x173   : > { %1264 = vmatmul.f32.gmra.mxu1 %v6787_v40  ;;  %1394 = vmatmul.f32.gmra.mxu3 %v6787_v40  ;;  %v748_v57 = vsel %vm747_vm8, %v6746_v16, %v744_v38  ;;  %v6820_v32 = vadd.f32 %v6598_v54, %v879_v42  ;;  %v6823_v49 = vadd.f32 %v6603_v55, %v880_v43 }
 0x174   : > { %v843_v48 = vmul.f32 %v748_v57, %v6518_v50  ;;  %v844_v19 = vmul.f32 %v748_v57, %v6521_v51  ;;  %1566 = vmatpush.msrb.mxu2 %v1076_v46  ;;  %1631 = vmatpush.msrb.mxu3 %v1140_v10 }
 0x175   : > { %10607 = vst [vmem:[#allocation26_spill] sm:$0xff] %v6820_v32  ;;  %1436 = vmatpush.msrb.mxu0 %v1075_v58  ;;  %1501 = vmatpush.msrb.mxu1 %v1139_v4 }
 0x176   : > { %10608 = vst [vmem:[#allocation27_spill] sm:$0xff] %v6823_v49  ;;  %v881_v16 = vmul.f32 %v6589_v12, %v843_v48  ;;  %v882_v50 = vmul.f32 %v6591_v15, %v844_v19  ;;  %1567 = vmatpush.msrb.mxu2 %v1072_v59  ;;  %1632 = vmatpush.msrb.mxu3 %v1136_v61 }
 0x177   : > { %1437 = vmatpush.msrb.mxu0 %v1071_v20  ;;  %1502 = vmatpush.msrb.mxu1 %v1135_v22  ;;  %v1161_v20 = vld [vmem:[#allocation12] sm:$0xf] }
 0x178   : > { %v6832_v51 = vadd.f32 %v6598_v54, %v881_v16  ;;  %v6835_v44 = vadd.f32 %v6603_v55, %v882_v50  ;;  %1568 = vmatpush.msrb.mxu2 %v1068_v0 }
 0x17a   : > { %1202 = vmatmul.f32.gmra.mxu0 %v6804_v63  ;;  %1332 = vmatmul.f32.gmra.mxu2 %v6804_v63  ;;  %10609 = vst [vmem:[#allocation28_spill] sm:$0xff] %v6832_v51  ;;  %v1036_v63 = vld [vmem:[#allocation10 + $0x18] sm:$0xff] }
 0x17b   : > { %1267 = vmatmul.f32.gmra.mxu1 %v6807_v41  ;;  %1397 = vmatmul.f32.gmra.mxu3 %v6807_v41  ;;  %10610 = vst [vmem:[#allocation29_spill] sm:$0xff] %v6835_v44 }
 0x182   : > { %1205 = vmatmul.f32.gmra.mxu0 %v6820_v32  ;;  %1335 = vmatmul.f32.gmra.mxu2 %v6820_v32 }
 0x183   : > { %1270 = vmatmul.f32.gmra.mxu1 %v6823_v49  ;;  %1400 = vmatmul.f32.gmra.mxu3 %v6823_v49 }
 0x18a   : > { %1208 = vmatmul.f32.gmra.mxu0 %v6832_v51  ;;  %1338 = vmatmul.f32.gmra.mxu2 %v6832_v51  ;;  %v1111_v51 = vld [vmem:[#allocation10 + $0x270] sm:$0xff] }
 0x18b   : > { %1273 = vmatmul.f32.gmra.mxu1 %v6835_v44  ;;  %1403 = vmatmul.f32.gmra.mxu3 %v6835_v44  ;;  %v1047_v44 = vld [vmem:[#allocation10 + $0x70] sm:$0xff] }
 0x1b9   : > { %v615_v53 = vpop.xlane.xlu2 %614 }
 0x1ba   : > { %v645_v3 = vmul.f32 %v615_v53, %v6401_v30 }
 0x1bc   : > { %v661_v39 = vadd.f32 1e-05, %v645_v3 }
 0x1be   : > { %5741 = vrsqrt.f32 %v661_v39  ;;  %vm755_vm10 = vweird.f32 %v661_v39 }
 0x1c1   : > { %v621_v45 = vpop.xlane.xlu2 %620 }
 0x1c2   : > { %v618_v14 = vpop.xlane.xlu1 %617  ;;  %v647_v4 = vmul.f32 %v621_v45, %v6401_v30  ;;  %v1132_v45 = vld [vmem:[#allocation10 + $0x318] sm:$0xff] }
 0x1c3   : > { %v646_v24 = vmul.f32 %v618_v14, %v6401_v30  ;;  %1633 = vmatpush.msrb.mxu3 %v1132_v45  ;;  %v1063_v45 = vld [vmem:[#allocation10 + $0xf0] sm:$0xff] }
 0x1c4   : > { %v5742_v13 = vpop.eup %5741 }
 0x1c5   : > { %v750_v2 = vmul.f32 %v5742_v13, %v661_v39  ;;  %v662_v38 = vadd.f32 1e-05, %v646_v24  ;;  %vm756_vm9 = vweird.f32 %v5742_v13 }
 0x1c6   : > { %vm757_vm11 = vmor %vm755_vm10, %vm756_vm9 }
 0x1c7   : > { %v751_v62 = vmul.f32 %v5742_v13, %v750_v2  ;;  %5743 = vrsqrt.f32 %v662_v38  ;;  %vm765_vm13 = vweird.f32 %v662_v38  ;;  %v6864_v2 = vperm.slane %v1161_v20, 0 }
 0x1c9   : > { %v752_v42 = vmul.f32 0.5, %v751_v62 }
 0x1ca   : > { %v624_v14 = vpop.xlane.xlu0 %623 }
 0x1cb   : > { %v753_v43 = vsub.f32 1.5, %v752_v42  ;;  %v648_v0 = vmul.f32 %v624_v14, %v6401_v30 }
 0x1cd   : > { %v754_v57 = vmul.f32 %v5742_v13, %v753_v43  ;;  %v5744_v48 = vpop.eup %5743 }
 0x1ce   : > { %v760_v5 = vmul.f32 %v5744_v48, %v662_v38  ;;  %vm766_vm12 = vweird.f32 %v5744_v48  ;;  %v6870_v38 = vadd.f32 1e-05, %v648_v0 }
 0x1cf   : > { %v758_v19 = vsel %vm757_vm11, %v5742_v13, %v754_v57  ;;  %vm767_vm14 = vmor %vm765_vm13, %vm766_vm12  ;;  %v1188_v24 = vpop.f32.mrf.mxu0 }
 0x1d0   : > { %v845_v16 = vmul.f32 %v758_v19, %v6558_v27  ;;  %v846_v50 = vmul.f32 %v758_v19, %v6561_v28  ;;  %v761_v46 = vmul.f32 %v5744_v48, %v760_v5  ;;  %v6858_v28 = vadd.f32 1e-05, %v647_v4 }
 0x1d1   : > { %v627_v57 = vpop.xlane.xlu1 %626  ;;  %vm785_vm2 = vweird.f32 %v6870_v38 }
 0x1d2   : > { %v883_v10 = vmul.f32 %v6589_v12, %v845_v16  ;;  %v884_v53 = vmul.f32 %v6591_v15, %v846_v50  ;;  %v762_v3 = vmul.f32 0.5, %v761_v46  ;;  %5745 = vrsqrt.f32 %v6858_v28  ;;  %v1067_v46 = vld [vmem:[#allocation10 + $0x110] sm:$0xff] }
 0x1d3   : > { %5747 = vrsqrt.f32 %v6870_v38  ;;  %v649_v50 = vmul.f32 %v627_v57, %v6401_v30  ;;  %1438 = vmatpush.msrb.mxu0 %v1067_v46  ;;  %vm775_vm15 = vweird.f32 %v6858_v28 }
 0x1d4   : > { %v6848_v58 = vadd.f32 %v6598_v54, %v883_v10  ;;  %v6852_v59 = vadd.f32 %v6603_v55, %v884_v53  ;;  %v763_v39 = vsub.f32 1.5, %v762_v3  ;;  %v1131_v10 = vld [vmem:[#allocation10 + $0x310] sm:$0xff] }
 0x1d5   : > { %v6891_v4 = vadd.f32 1e-05, %v649_v50  ;;  %1503 = vmatpush.msrb.mxu1 %v1131_v10  ;;  %v1064_v50 = vld [vmem:[#allocation10 + $0xf8] sm:$0xff]  ;;  %1439 = vmatpush.msrb.mxu0 %v1063_v45 }
 0x1d6   : > { %10611 = vst [vmem:[#allocation30_spill] sm:$0xff] %v6848_v58  ;;  %1211 = vmatmul.f32.gmra.mxu0 %v6848_v58  ;;  %1341 = vmatmul.f32.gmra.mxu2 %v6848_v58  ;;  %v764_v27 = vmul.f32 %v5744_v48, %v763_v39  ;;  %v6893_v39 = vperm.slane %v1161_v20, 1  ;;  %v1112_v58 = vld [vmem:[#allocation10 + $0x278] sm:$0xff] }
 0x1d7   : > { %10612 = vst [vmem:[#allocation31_spill] sm:$0xff] %v6852_v59  ;;  %1276 = vmatmul.f32.gmra.mxu1 %v6852_v59  ;;  %1406 = vmatmul.f32.gmra.mxu3 %v6852_v59  ;;  %5749 = vrsqrt.f32 %v6891_v4  ;;  %vm795_vm5 = vweird.f32 %v6891_v4 }
 0x1d8   : > { %v768_v61 = vsel %vm767_vm14, %v5744_v48, %v764_v27  ;;  %v6874_v42 = vpop.eup %5745  ;;  %v1253_v48 = vpop.f32.mrf.mxu1  ;;  %1569 = vmatpush.msrb.mxu2 %v1064_v50  ;;  %v1123_v50 = vld [vmem:[#allocation10 + $0x2d0] sm:$0xff] }
 0x1d9   : > { %v847_v13 = vmul.f32 %v768_v61, %v6587_v9  ;;  %v1189_v9 = vadd.f32 %v1188_v24, %v6864_v2  ;;  %v848_v43 = vmul.f32 %v768_v61, %v6594_v29  ;;  %v770_v19 = vmul.f32 %v6874_v42, %v6858_v28  ;;  %v1318_v27 = vpop.f32.mrf.mxu2  ;;  %v6896_v61 = vpop.eup %5747 }
 0x1da   : > { %v1319_v0 = vadd.f32 %v1318_v27, %v6893_v39  ;;  %v780_v20 = vmul.f32 %v6896_v61, %v6870_v38  ;;  %v1060_v27 = vld [vmem:[#allocation10 + $0xd8] sm:$0xff]  ;;  %vm776_vm0 = vweird.f32 %v6874_v42  ;;  %vm786_vm3 = vweird.f32 %v6896_v61 }
 0x1db   : > { %v885_v22 = vmul.f32 %v6589_v12, %v847_v13  ;;  %v6880_v16 = vadd.f32 %v1253_v48, %v1189_v9  ;;  %v886_v5 = vmul.f32 %v6591_v15, %v848_v43  ;;  %v771_v29 = vmul.f32 %v6874_v42, %v770_v19  ;;  %v630_v13 = vpop.xlane.xlu2 %629  ;;  %v1383_v9 = vpop.f32.mrf.mxu3  ;;  %1570 = vmatpush.msrb.mxu2 %v1060_v27  ;;  %vm777_vm1 = vmor %vm775_vm15, %vm776_vm0 }
 0x1dc   : > { %v650_v24 = vmul.f32 %v630_v13, %v6401_v30  ;;  %v6908_v48 = vadd.f32 %v1383_v9, %v1319_v0  ;;  %v781_v19 = vmul.f32 %v6896_v61, %v780_v20  ;;  %v1124_v13 = vld [vmem:[#allocation10 + $0x2d8] sm:$0xff]  ;;  %v1059_v20 = vld [vmem:[#allocation10 + $0xd0] sm:$0xff]  ;;  %vm787_vm4 = vmor %vm785_vm2, %vm786_vm3 }
 0x1dd   : > { %v6867_v62 = vadd.f32 %v6598_v54, %v885_v22  ;;  %v6885_v53 = vadd.f32 %v6603_v55, %v886_v5  ;;  %v6889_v3 = vmul.f32 0.70710677, %v6880_v16  ;;  %v772_v14 = vmul.f32 0.5, %v771_v29  ;;  %v1128_v5 = vld [vmem:[#allocation10 + $0x2f8] sm:$0xff]  ;;  %v6911_v46 = vpop.eup %5749  ;;  %v1127_v29 = vld [vmem:[#allocation10 + $0x2f0] sm:$0xff]  ;;  %1440 = vmatpush.msrb.mxu0 %v1059_v20 }
 0x1de   : > { %v6913_v10 = vadd.f32 1e-05, %v650_v24  ;;  %1634 = vmatpush.msrb.mxu3 %v1128_v5  ;;  %1504 = vmatpush.msrb.mxu1 %v1127_v29  ;;  %v6920_v0 = vmul.f32 0.70710677, %v6908_v48  ;;  %v782_v24 = vmul.f32 0.5, %v781_v19  ;;  %v790_v9 = vmul.f32 %v6911_v46, %v6891_v4  ;;  %v1056_v20 = vld [vmem:[#allocation10 + $0xb8] sm:$0xff] }
 0x1df   : > { %10613 = vst [vmem:[#allocation32_spill] sm:$0xff] %v6867_v62  ;;  %1214 = vmatmul.f32.gmra.mxu0 %v6867_v62  ;;  %1344 = vmatmul.f32.gmra.mxu2 %v6867_v62  ;;  %v1819_v22 = vmul.f32 %v6889_v3, %v6889_v3  ;;  %v773_v43 = vsub.f32 1.5, %v772_v14  ;;  %vm796_vm6 = vweird.f32 %v6911_v46 }
 0x1e0   : > { %10614 = vst [vmem:[#allocation33_spill] sm:$0xff] %v6885_v53  ;;  %1409 = vmatmul.f32.gmra.mxu3 %v6885_v53  ;;  %1279 = vmatmul.f32.gmra.mxu1 %v6885_v53  ;;  %5751 = vrsqrt.f32 %v6913_v10  ;;  %v1859_v29 = vmul.f32 %v6920_v0, %v6920_v0  ;;  %v783_v27 = vsub.f32 1.5, %v782_v24  ;;  %v791_v19 = vmul.f32 %v6911_v46, %v790_v9  ;;  %vm797_vm7 = vmor %vm795_vm5, %vm796_vm6 }
 0x1e1   : > { %v6906_v57 = vmin.f32 %v1819_v22, 16.0  ;;  %v774_v14 = vmul.f32 %v6874_v42, %v773_v43  ;;  %1635 = vmatpush.msrb.mxu3 %v1124_v13  ;;  %1505 = vmatpush.msrb.mxu1 %v1123_v50  ;;  %v633_v43 = vpop.xlane.xlu0 %632  ;;  %vm805_vm8 = vweird.f32 %v6913_v10 }
 0x1e2   : > { %v651_v13 = vmul.f32 %v633_v43, %v6401_v30  ;;  %1571 = vmatpush.msrb.mxu2 %v1056_v20  ;;  %v636_v20 = vpop.xlane.xlu1 %635 }
 0x1e3   : > { %v1832_v22 = vmul.f32 3.8918573e-05, %v6906_v57  ;;  %v778_v5 = vsel %vm777_vm1, %v6874_v42, %v774_v14  ;;  %v6937_v42 = vmin.f32 %v1859_v29, 16.0  ;;  %v784_v14 = vmul.f32 %v6896_v61, %v783_v27 }
 0x1e4   : > { %v849_v53 = vmul.f32 %v778_v5, %v6564_v31  ;;  %v850_v28 = vmul.f32 %v778_v5, %v6570_v34  ;;  %v6942_v24 = vadd.f32 1e-05, %v651_v13  ;;  %v1191_v5 = vpop.f32.mrf.mxu0  ;;  %v1055_v13 = vld [vmem:[#allocation10 + $0xb0] sm:$0xff] }
 0x1e5   : > { %v1833_v45 = vadd.f32 0.001143296, %v1832_v22  ;;  %v792_v22 = vmul.f32 0.5, %v791_v19  ;;  %v1872_v43 = vmul.f32 3.8918573e-05, %v6937_v42  ;;  %v788_v29 = vsel %vm787_vm4, %v6896_v61, %v784_v14  ;;  %v1120_v19 = vld [vmem:[#allocation10 + $0x2b8] sm:$0xff]  ;;  %1441 = vmatpush.msrb.mxu0 %v1055_v13 }
 0x1e6   : > { %v6933_v50 = vpop.eup %5751  ;;  %v887_v9 = vmul.f32 %v6589_v12, %v849_v53  ;;  %5753 = vrsqrt.f32 %v6942_v24  ;;  %1636 = vmatpush.msrb.mxu3 %v1120_v19  ;;  %v851_v61 = vmul.f32 %v788_v29, %v6632_v33  ;;  %v1052_v33 = vld [vmem:[#allocation10 + $0x98] sm:$0xff]  ;;  %v1256_v19 = vpop.f32.mrf.mxu1  ;;  %vm815_vm11 = vweird.f32 %v6942_v24 }
 0x1e7   : > { %v1834_v62 = vmul.f32 %v1833_v45, %v6906_v57  ;;  %v800_v31 = vmul.f32 %v6933_v50, %v6913_v10  ;;  %v888_v45 = vmul.f32 %v6591_v15, %v850_v28  ;;  %v793_v38 = vsub.f32 1.5, %v792_v22  ;;  %1572 = vmatpush.msrb.mxu2 %v1052_v33 }
 0x1e8   : > { %v6951_v27 = vadd.f32 %v6598_v54, %v887_v9  ;;  %v1192_v28 = vadd.f32 %v1191_v5, %v6864_v2  ;;  %v1873_v22 = vadd.f32 0.001143296, %v1872_v43  ;;  %v1321_v9 = vpop.f32.mrf.mxu2  ;;  %vm806_vm9 = vweird.f32 %v6933_v50 }
 0x1e9   : > { %v1835_v34 = vadd.f32 0.014752088, %v1834_v62  ;;  %v6955_v53 = vadd.f32 %v6603_v55, %v888_v45  ;;  %v1119_v62 = vld [vmem:[#allocation10 + $0x2b0] sm:$0xff]  ;;  %v801_v59 = vmul.f32 %v6933_v50, %v800_v31  ;;  %v852_v31 = vmul.f32 %v788_v29, %v6637_v35  ;;  %vm7016_vm10 = vmor %vm805_vm8, %vm806_vm9 }
 0x1ea   : > { %10615 = vst [vmem:[#allocation34_spill] sm:$0xff] %v6951_v27  ;;  %1217 = vmatmul.f32.gmra.mxu0 %v6951_v27  ;;  %1347 = vmatmul.f32.gmra.mxu2 %v6951_v27  ;;  %v794_v5 = vmul.f32 %v6911_v46, %v793_v38  ;;  %v652_v45 = vmul.f32 %v636_v20, %v6401_v30  ;;  %v1386_v20 = vpop.f32.mrf.mxu3 }
 0x1eb   : > { %10616 = vst [vmem:[#allocation35_spill] sm:$0xff] %v6955_v53  ;;  %v1836_v14 = vmul.f32 %v1835_v34, %v6906_v57  ;;  %1282 = vmatmul.f32.gmra.mxu1 %v6955_v53  ;;  %1412 = vmatmul.f32.gmra.mxu3 %v6955_v53  ;;  %v802_v34 = vmul.f32 0.5, %v801_v59  ;;  %v6970_v13 = vadd.f32 %v1256_v19, %v1192_v28  ;;  %v1115_v19 = vld [vmem:[#allocation10 + $0x290] sm:$0xff] }
 0x1ec   : > { %1506 = vmatpush.msrb.mxu1 %v1119_v62  ;;  %v1322_v43 = vadd.f32 %v1321_v9, %v6893_v39  ;;  %v6973_v27 = vpop.eup %5753  ;;  %v1874_v35 = vmul.f32 %v1873_v22, %v6937_v42  ;;  %v889_v29 = vmul.f32 %v6589_v12, %v851_v61  ;;  %v798_v30 = vsel %vm797_vm7, %v6911_v46, %v794_v5  ;;  %v1194_v33 = vpop.f32.mrf.mxu0 }
 0x1ed   : > { %v1837_v53 = vadd.f32 0.112945676, %v1836_v14  ;;  %v6980_v38 = vadd.f32 1e-05, %v652_v45  ;;  %v890_v59 = vmul.f32 %v6591_v15, %v852_v31  ;;  %v803_v62 = vsub.f32 1.5, %v802_v34 }
 0x1ee   : > { %v6985_v28 = vmul.f32 0.70710677, %v6970_v13  ;;  %v810_v4 = vmul.f32 %v6973_v27, %v6942_v24  ;;  %v6989_v14 = vadd.f32 %v1386_v20, %v1322_v43  ;;  %v853_v46 = vmul.f32 %v798_v30, %v6679_v7  ;;  %v1116_v7 = vld [vmem:[#allocation10 + $0x298] sm:$0xff]  ;;  %1507 = vmatpush.msrb.mxu1 %v1115_v19 }
 0x1ef   : > { %v1838_v61 = vmul.f32 %v1837_v53, %v6906_v57  ;;  %v1875_v22 = vadd.f32 0.014752088, %v1874_v35  ;;  %v6994_v9 = vadd.f32 %v6598_v54, %v889_v29  ;;  %v854_v31 = vmul.f32 %v798_v30, %v6682_v11  ;;  %v1051_v53 = vld [vmem:[#allocation10 + $0x90] sm:$0xff]  ;;  %v1048_v29 = vld [vmem:[#allocation10 + $0x78] sm:$0xff]  ;;  %1637 = vmatpush.msrb.mxu3 %v1116_v7 }
 0x1f0   : > { %5755 = vrsqrt.f32 %v6980_v38  ;;  %v7000_v5 = vadd.f32 %v6603_v55, %v890_v59  ;;  %v1821_v45 = vmul.f32 2.1237322e-06, %v6906_v57  ;;  %v804_v34 = vmul.f32 %v6933_v50, %v803_v62  ;;  %1442 = vmatpush.msrb.mxu0 %v1051_v53  ;;  %1573 = vmatpush.msrb.mxu2 %v1048_v29  ;;  %v1259_v53 = vpop.f32.mrf.mxu1  ;;  %v1044_v29 = vld [vmem:[#allocation10 + $0x58] sm:$0xff] }
 0x1f1   : > { %10617 = vst [vmem:[#allocation36_spill] sm:$0xff] %v6994_v9  ;;  %v1861_v43 = vmul.f32 2.1237322e-06, %v6937_v42  ;;  %v1979_v11 = vmul.f32 %v6985_v28, %v6985_v28  ;;  %v811_v35 = vmul.f32 %v6973_v27, %v810_v4  ;;  %v1839_v59 = vadd.f32 0.4994258, %v1838_v61  ;;  %v1324_v4 = vpop.f32.mrf.mxu2  ;;  %1638 = vmatpush.msrb.mxu3 %v1112_v58  ;;  %1508 = vmatpush.msrb.mxu1 %v1111_v51 }
 0x1f2   : > { %10618 = vst [vmem:[#allocation37_spill] sm:$0xff] %v7000_v5  ;;  %1220 = vmatmul.f32.gmra.mxu0 %v6994_v9  ;;  %1350 = vmatmul.f32.gmra.mxu2 %v6994_v9  ;;  %v1876_v20 = vmul.f32 %v1875_v22, %v6937_v42  ;;  %v7022_v62 = vmul.f32 0.70710677, %v6989_v14  ;;  %v892_v9 = vmul.f32 %v6591_v15, %v854_v31  ;;  %v1822_v10 = vadd.f32 0.00028619796, %v1821_v45 }
 0x1f3   : > { %1285 = vmatmul.f32.gmra.mxu1 %v7000_v5  ;;  %1415 = vmatmul.f32.gmra.mxu3 %v7000_v5  ;;  %v891_v5 = vmul.f32 %v6589_v12, %v853_v46  ;;  %v808_v61 = vsel %vm7016_vm10, %v6933_v50, %v804_v34  ;;  %v1862_v22 = vadd.f32 0.00028619796, %v1861_v43  ;;  %v7031_v32 = vmin.f32 %v1979_v11, 16.0  ;;  %v1389_v43 = vpop.f32.mrf.mxu3 }
 0x1f4   : > { %v812_v7 = vmul.f32 0.5, %v811_v35  ;;  %1443 = vmatpush.msrb.mxu0 %v1047_v44  ;;  %v1840_v46 = vmul.f32 %v1839_v59, %v6906_v57  ;;  %v1877_v31 = vadd.f32 0.112945676, %v1876_v20  ;;  %v2019_v45 = vmul.f32 %v7022_v62, %v7022_v62  ;;  %1574 = vmatpush.msrb.mxu2 %v1044_v29  ;;  %v7059_v20 = vpop.f32.mrf.mxu0 }
 0x1f5   : > { %v7037_v19 = vadd.f32 %v6598_v54, %v891_v5  ;;  %v1195_v50 = vadd.f32 %v1194_v33, %v6864_v2  ;;  %v7041_v34 = vadd.f32 %v6603_v55, %v892_v9  ;;  %v1823_v44 = vmul.f32 %v1822_v10, %v6906_v57 }
 0x1f6   : > { %v7026_v49 = vpop.eup %5755  ;;  %v855_v5 = vmul.f32 %v808_v61, %v6619_v60  ;;  %v1863_v51 = vmul.f32 %v1862_v22, %v6937_v42  ;;  %v1981_v33 = vmul.f32 2.1237322e-06, %v7031_v32  ;;  %v813_v11 = vsub.f32 1.5, %v812_v7 }
 0x1f7   : > { %10621 = vst [vmem:[#allocation38_spill] sm:$0xff] %v7037_v19  ;;  %v820_v58 = vmul.f32 %v7026_v49, %v6980_v38  ;;  %v856_v9 = vmul.f32 %v808_v61, %v6629_v26  ;;  %v7054_v35 = vadd.f32 1.0, %v1840_v46  ;;  %v1878_v30 = vmul.f32 %v1877_v31, %v6937_v42 }
 0x1f8   : > { %10622 = vst [vmem:[#allocation39_spill] sm:$0xff] %v7041_v34  ;;  %v7057_v59 = vmin.f32 %v2019_v45, 16.0  ;;  %vm816_vm12 = vweird.f32 %v6973_v27  ;;  %v7063_v60 = vadd.f32 %v1259_v53, %v1195_v50  ;;  %v1824_v10 = vadd.f32 0.0036580483, %v1823_v44 }
 0x1f9   : > { %v821_v22 = vmul.f32 %v7026_v49, %v820_v58  ;;  %v1325_v7 = vadd.f32 %v1324_v4, %v6893_v39  ;;  %v7067_v26 = vpop.f32.mrf.mxu2  ;;  %v1864_v61 = vadd.f32 0.0036580483, %v1863_v51  ;;  %v1982_v46 = vadd.f32 0.00028619796, %v1981_v33  ;;  %vm7072_vm13 = vmor %vm815_vm11, %vm816_vm12  ;;  %v1108_v58 = vld [vmem:[#allocation10 + $0x258] sm:$0xff]  ;;  %v1043_v51 = vld [vmem:[#allocation10 + $0x50] sm:$0xff] }
 0x1fa   : > { %1223 = vmatmul.f32.gmra.mxu0 %v7037_v19  ;;  %1353 = vmatmul.f32.gmra.mxu2 %v7037_v19  ;;  %v814_v31 = vmul.f32 %v6973_v27, %v813_v11  ;;  %v893_v45 = vmul.f32 %v6589_v12, %v855_v5  ;;  %5757 = vrcp.f32 %v7054_v35  ;;  %v1879_v24 = vadd.f32 0.4994258, %v1878_v30  ;;  %v7087_v30 = vpop.f32.mrf.mxu1 }
 0x1fb   : > { %1288 = vmatmul.f32.gmra.mxu1 %v7041_v34  ;;  %1418 = vmatmul.f32.gmra.mxu3 %v7041_v34  ;;  %v2021_v53 = vmul.f32 2.1237322e-06, %v7057_v59  ;;  %v894_v50 = vmul.f32 %v6591_v15, %v856_v9  ;;  %v7079_v4 = vmul.f32 0.70710677, %v7063_v60  ;;  %v1825_v5 = vmul.f32 %v1824_v10, %v6906_v57  ;;  %v1107_v9 = vld [vmem:[#allocation10 + $0x250] sm:$0xff] }
 0x1fc   : > { %v7082_v44 = vadd.f32 %v6598_v54, %v893_v45  ;;  %v822_v33 = vmul.f32 0.5, %v821_v22  ;;  %v7085_v11 = vadd.f32 %v1389_v43, %v1325_v7  ;;  %1639 = vmatpush.msrb.mxu3 %v1108_v58  ;;  %1444 = vmatpush.msrb.mxu0 %v1043_v51  ;;  %v1865_v19 = vmul.f32 %v1864_v61, %v6937_v42  ;;  %v1040_v43 = vld [vmem:[#allocation10 + $0x38] sm:$0xff]  ;;  %v7100_v7 = vpop.f32.mrf.mxu3 }
 0x1fd   : > { %10625 = vst [vmem:[#allocation40_spill] sm:$0xff] %v7079_v4  ;;  %v7090_v34 = vadd.f32 %v6603_v55, %v894_v50  ;;  %v1983_v45 = vmul.f32 %v1982_v46, %v7031_v32  ;;  %v818_v41 = vsel %vm7072_vm13, %v6973_v27, %v814_v31  ;;  %v1880_v10 = vmul.f32 %v1879_v24, %v6937_v42  ;;  %v7112_v24 = vpop.f32.mrf.mxu0 }
 0x1fe   : > { %10626 = vst [vmem:[#allocation41_spill] sm:$0xff] %v7082_v44  ;;  %v2022_v22 = vadd.f32 0.00028619796, %v2021_v53  ;;  %v2139_v61 = vmul.f32 %v7079_v4, %v7079_v4  ;;  %1509 = vmatpush.msrb.mxu1 %v1107_v9  ;;  %1575 = vmatpush.msrb.mxu2 %v1040_v43  ;;  %v857_v46 = vmul.f32 %v818_v41, %v6713_v56  ;;  %v823_v31 = vsub.f32 1.5, %v822_v33 }
 0x1ff   : > { %10627 = vst [vmem:[#allocation42_spill] sm:$0xff] %v7090_v34  ;;  %v7110_v29 = vmul.f32 0.70710677, %v7085_v11  ;;  %v1826_v53 = vadd.f32 0.05243302, %v1825_v5  ;;  %v858_v51 = vmul.f32 %v818_v41, %v6716_v52  ;;  %vm825_vm14 = vweird.f32 %v6980_v38 }
 0x200   : > { %v7106_v27 = vpop.eup %5757  ;;  %v1866_v50 = vadd.f32 0.05243302, %v1865_v19  ;;  %v1984_v58 = vadd.f32 0.0036580483, %v1983_v45  ;;  %v2023_v9 = vmul.f32 %v2022_v22, %v7057_v59  ;;  %vm826_vm15 = vweird.f32 %v7026_v49  ;;  %1576 = vmatpush.msrb.mxu2 %v1036_v63 }
 0x201   : > { %10628 = vst [vmem:[#allocation43_spill] sm:$0xff] %v7110_v29  ;;  %v7120_v56 = vpop.f32.mrf.mxu2  ;;  %v1843_v33 = vmul.f32 %v7106_v27, %v7054_v35  ;;  %v7124_v43 = vmin.f32 %v2139_v61, 16.0  ;;  %v824_v19 = vmul.f32 %v7026_v49, %v823_v31  ;;  %v2179_v52 = vmul.f32 %v7110_v29, %v7110_v29  ;;  %vm827_vm0 = vmor %vm825_vm14, %vm826_vm15 }
 0x202   : > { %1226 = vmatmul.f32.gmra.mxu0 %v7082_v44  ;;  %1356 = vmatmul.f32.gmra.mxu2 %v7082_v44  ;;  %v895_v41 = vmul.f32 %v6589_v12, %v857_v46  ;;  %v1827_v5 = vmul.f32 %v1826_v53, %v6906_v57  ;;  %v1867_v38 = vmul.f32 %v1866_v50, %v6937_v42  ;;  %v2024_v22 = vadd.f32 0.0036580483, %v2023_v9  ;;  %v7137_v31 = vpop.f32.mrf.mxu1 }
 0x203   : > { %1291 = vmatmul.f32.gmra.mxu1 %v7090_v34  ;;  %1421 = vmatmul.f32.gmra.mxu3 %v7090_v34  ;;  %v7115_v34 = vadd.f32 1.0, %v1880_v10  ;;  %v1985_v45 = vmul.f32 %v1984_v58, %v7031_v32  ;;  %v896_v10 = vmul.f32 %v6591_v15, %v858_v51  ;;  %v1198_v61 = vadd.f32 %v7059_v20, %v6864_v2  ;;  %v1104_v58 = vld [vmem:[#allocation10 + $0x238] sm:$0xff] }
 0x204   : > { %v7140_v44 = vadd.f32 %v6598_v54, %v895_v41  ;;  %v1844_v46 = vsub.f32 1.0, %v1843_v33  ;;  %v2141_v53 = vmul.f32 2.1237322e-06, %v7124_v43  ;;  %v828_v51 = vsel %vm827_vm0, %v7026_v49, %v824_v19  ;;  %v7151_v20 = vpop.f32.mrf.mxu3  ;;  %v1039_v33 = vld [vmem:[#allocation10 + $0x30] sm:$0xff]  ;;  %v1100_v49 = vld [vmem:[#allocation10 + $0x218] sm:$0xff]  ;;  %1640 = vmatpush.msrb.mxu3 %v1104_v58 }
 0x205   : > { %5759 = vrcp.f32 %v7115_v34  ;;  %v7144_v50 = vadd.f32 %v6603_v55, %v896_v10  ;;  %v7147_v29 = vmin.f32 %v2179_v52, 16.0  ;;  %v1328_v9 = vadd.f32 %v7067_v26, %v6893_v39  ;;  %v1103_v41 = vld [vmem:[#allocation10 + $0x230] sm:$0xff]  ;;  %v7161_v4 = vpop.f32.mrf.mxu0  ;;  %1445 = vmatpush.msrb.mxu0 %v1039_v33 }
 0x206   : > { %10629 = vst [vmem:[#allocation44_spill] sm:$0xff] %v7140_v44  ;;  %v1828_v40 = vadd.f32 0.18741608, %v1827_v5  ;;  %v1868_v10 = vadd.f32 0.18741608, %v1867_v38  ;;  %v1035_v19 = vld [vmem:[#allocation10 + $0x10] sm:$0xff]  ;;  %v2025_v26 = vmul.f32 %v2024_v22, %v7057_v59  ;;  %v7159_v8 = vadd.f32 %v7087_v30, %v1198_v61  ;;  %1510 = vmatpush.msrb.mxu1 %v1103_v41  ;;  %1641 = vmatpush.msrb.mxu3 %v1100_v49 }
 0x207   : > { %10630 = vst [vmem:[#allocation45_spill] sm:$0xff] %v7144_v50  ;;  %v1986_v52 = vadd.f32 0.05243302, %v1985_v45  ;;  %v7164_v5 = vmul.f32 0.5, %v6880_v16  ;;  %v1845_v38 = vmul.f32 %v7106_v27, %v1844_v46  ;;  %v2142_v36 = vadd.f32 0.00028619796, %v2141_v53  ;;  %1446 = vmatpush.msrb.mxu0 %v1035_v19 }
 0x208   : > { %v7171_v30 = vmul.f32 0.5, %v6908_v48  ;;  %v860_v22 = vmul.f32 %v828_v51, %v6754_v47  ;;  %v2181_v61 = vmul.f32 2.1237322e-06, %v7147_v29  ;;  %v7176_v58 = vadd.f32 %v7100_v7, %v1328_v9 }
 0x209   : > { %v7178_v16 = vpop.f32.mrf.mxu2  ;;  %v1853_v63 = vand.u32 2147483648, %v7054_v35  ;;  %v1869_v46 = vmul.f32 %v1868_v10, %v6937_v42  ;;  %v7184_v48 = vmul.f32 0.5, %v6970_v13  ;;  %vm1848_vm1 = vweird.f32 %v7106_v27 }
 0x20a   : > { %1229 = vmatmul.f32.gmra.mxu0 %v7140_v44  ;;  %1359 = vmatmul.f32.gmra.mxu2 %v7140_v44  ;;  %v1099_v44 = vld [vmem:[#allocation10 + $0x210] sm:$0xff]  ;;  %v1987_v47 = vmul.f32 %v1986_v52, %v7031_v32  ;;  %v2026_v7 = vadd.f32 0.05243302, %v2025_v26  ;;  %v7189_v53 = vmul.f32 0.70710677, %v7159_v8  ;;  %v1201_v9 = vadd.f32 %v7112_v24, %v6864_v2  ;;  %v7201_v33 = vpop.f32.mrf.mxu1 }
 0x20b   : > { %1294 = vmatmul.f32.gmra.mxu1 %v7144_v50  ;;  %1424 = vmatmul.f32.gmra.mxu3 %v7144_v50  ;;  %v859_v50 = vmul.f32 %v828_v51, %v6751_v6  ;;  %v7168_v45 = vpop.eup %5759  ;;  %v1829_v6 = vmul.f32 %v1828_v40, %v6906_v57  ;;  %10631 = vst [vmem:[#allocation46_spill] sm:$0xff] %v7184_v48  ;;  %v2182_v13 = vadd.f32 0.00028619796, %v2181_v61  ;;  %vm1847_vm2 = vweird.f32 %v7054_v35 }
 0x20c   : > { %1511 = vmatpush.msrb.mxu1 %v1099_v44  ;;  %v1846_v51 = vadd.f32 %v7106_v27, %v1845_v38  ;;  %v1883_v40 = vmul.f32 %v7168_v45, %v7115_v34  ;;  %v2143_v57 = vmul.f32 %v2142_v36, %v7124_v43  ;;  %v7197_v44 = vmul.f32 0.70710677, %v7176_v58  ;;  %vm7211_vm3 = vmor %vm1847_vm2, %vm1848_vm1 }
 0x20d   : > { %v897_v42 = vmul.f32 %v6589_v12, %v859_v50  ;;  %v898_v41 = vmul.f32 %v6591_v15, %v860_v22  ;;  %v1830_v10 = vadd.f32 1.1283791, %v1829_v6  ;;  %v1851_v49 = vand.u32 2147483647, %v7054_v35  ;;  %v7217_v15 = vpop.f32.mrf.mxu3 }
 0x20e   : > { %v1870_v50 = vadd.f32 1.1283791, %v1869_v46  ;;  %v1988_v24 = vadd.f32 0.18741608, %v1987_v47  ;;  %v2299_v19 = vmul.f32 %v7189_v53, %v7189_v53  ;;  %v1884_v35 = vsub.f32 1.0, %v1883_v40  ;;  %v1206_v46 = vpop.f32.mrf.mxu0 }
 0x20f   : > { %v7207_v36 = vadd.f32 %v6598_v54, %v897_v42  ;;  %v7220_v52 = vadd.f32 %v6603_v55, %v898_v41  ;;  %v1850_v54 = vsel %vm7211_vm3, %v7106_v27, %v1846_v51  ;;  %v2027_v26 = vmul.f32 %v2026_v7, %v7057_v59 }
 0x210   : > { %v2144_v38 = vadd.f32 0.0036580483, %v2143_v57  ;;  %v1854_v22 = vor.u32 1.1754944e-38, %v1853_v63  ;;  %v2183_v61 = vmul.f32 %v2182_v13, %v7147_v29  ;;  %v2339_v6 = vmul.f32 %v7197_v44, %v7197_v44 }
 0x211   : > { %10632 = vst [vmem:[#allocation47_spill] sm:$0xff] %v7207_v36  ;;  %v7232_v55 = vadd.f32 %v7137_v31, %v1201_v9  ;;  %v1831_v27 = vmul.f32 %v1830_v10, %v6889_v3  ;;  %vm1852_vm4 = vcmp.eq.f32.partialorder %v1851_v49, 8.507059e+37  ;;  %v7238_v47 = vmul.f32 0.5, %v6989_v14  ;;  %v1336_v57 = vpop.f32.mrf.mxu2 }
 0x212   : > { %10635 = vst [vmem:[#allocation48_spill] sm:$0xff] %v7220_v52  ;;  %1232 = vmatmul.f32.gmra.mxu0 %v7207_v36  ;;  %1362 = vmatmul.f32.gmra.mxu2 %v7207_v36  ;;  %v7241_v63 = vmul.f32 0.5, %v7063_v60  ;;  %v1855_v7 = vsel %vm1852_vm4, %v1854_v22, %v1850_v54  ;;  %v1989_v51 = vmul.f32 %v1988_v24, %v7031_v32  ;;  %v7244_v40 = vmin.f32 %v2299_v19, 16.0  ;;  %v1271_v19 = vpop.f32.mrf.mxu1 }
 0x213   : > { %1297 = vmatmul.f32.gmra.mxu1 %v7220_v52  ;;  %1427 = vmatmul.f32.gmra.mxu3 %v7220_v52  ;;  %10636 = vst [vmem:[#allocation49_spill] sm:$0xff] %v7238_v47  ;;  %v1331_v31 = vadd.f32 %v7120_v56, %v6893_v39  ;;  %v7249_v42 = vmul.f32 %v1870_v50, %v6920_v0  ;;  %v2028_v13 = vadd.f32 0.18741608, %v2027_v26  ;;  %vm1887_vm5 = vweird.f32 %v7115_v34 }
 0x214   : > { %10637 = vst [vmem:[#allocation50_spill] sm:$0xff] %v7241_v63  ;;  %v1885_v3 = vmul.f32 %v7168_v45, %v1884_v35  ;;  %v2145_v14 = vmul.f32 %v2144_v38, %v7124_v43  ;;  %v2184_v60 = vadd.f32 0.0036580483, %v2183_v61  ;;  %v7254_v9 = vmin.f32 %v2339_v6, 16.0 }
 0x215   : > { %v7257_v41 = vmul.f32 0.70710677, %v7232_v55  ;;  %v1856_v10 = vmul.f32 %v1855_v7, %v1831_v27  ;;  %v1891_v56 = vand.u32 2147483647, %v7115_v34  ;;  %v1893_v49 = vand.u32 2147483648, %v7115_v34  ;;  %v1401_v6 = vpop.f32.mrf.mxu3 }
 0x216   : > { %v1204_v0 = vadd.f32 %v7161_v4, %v6864_v2  ;;  %vm1888_vm6 = vweird.f32 %v7168_v45  ;;  %v1990_v12 = vadd.f32 1.1283791, %v1989_v51  ;;  %v2301_v50 = vmul.f32 2.1237322e-06, %v7244_v40 }
 0x217   : > { %v7266_v24 = vadd.f32 %v7151_v20, %v1331_v31  ;;  %v1886_v54 = vadd.f32 %v7168_v45, %v1885_v3  ;;  %v2029_v35 = vmul.f32 %v2028_v13, %v7057_v59  ;;  %v2146_v26 = vadd.f32 0.05243302, %v2145_v14  ;;  %vm7292_vm8 = vmor %vm1887_vm5, %vm1888_vm6 }
 0x218   : > { %v1334_v38 = vadd.f32 %v7178_v16, %v6893_v39  ;;  %v2185_v4 = vmul.f32 %v2184_v60, %v7147_v29  ;;  %v2341_v22 = vmul.f32 2.1237322e-06, %v7254_v9  ;;  %v2459_v20 = vmul.f32 %v7257_v41, %v7257_v41 }
 0x219   : > { %v1207_v61 = vadd.f32 %v1206_v46, %v6864_v2  ;;  %v5529_v27 = vclamps-f32 %v1856_v10, 1.0  ;;  %vm7281_vm7 = vcmp.eq.f32.partialorder %v1891_v56, 8.507059e+37  ;;  %v7286_v7 = vadd.f32 %v7201_v33, %v1204_v0  ;;  %v1209_v33 = vpop.f32.mrf.mxu0 }
 0x21a   : > { %1447 = vmatmul.f32.vlgmr.msrb.gmra.mxu0 %v6643_v21  ;;  %1577 = vmatmul.f32.vlgmr.msrb.gmra.mxu2 %v6643_v21  ;;  %v1894_v21 = vor.u32 1.1754944e-38, %v1893_v49  ;;  %v7297_v51 = vmul.f32 %v1990_v12, %v6985_v28  ;;  %v2302_v31 = vadd.f32 0.00028619796, %v2301_v50  ;;  %v7303_v3 = vmul.f32 0.70710677, %v7266_v24  ;;  %v1339_v49 = vpop.f32.mrf.mxu2 }
 0x21b   : > { %1512 = vmatmul.f32.vlgmr.msrb.gmra.mxu1 %v6646_v23  ;;  %1642 = vmatmul.f32.vlgmr.msrb.gmra.mxu3 %v6646_v23  ;;  %v7300_v23 = vmul.f32 0.5, %v7085_v11  ;;  %v1890_v13 = vsel %vm7292_vm8, %v7168_v45, %v1886_v54  ;;  %v2030_v34 = vadd.f32 1.1283791, %v2029_v35  ;;  %v2147_v14 = vmul.f32 %v2146_v26, %v7124_v43 }
 0x21c   : > { %v7310_v60 = vadd.f32 %v7217_v15, %v1334_v38  ;;  %v2186_v28 = vadd.f32 0.05243302, %v2185_v4  ;;  %v2342_v10 = vadd.f32 0.00028619796, %v2341_v22  ;;  %v7312_v56 = vmin.f32 %v2459_v20, 16.0 }
 0x21d   : > { %10642 = vst [vmem:[#allocation51_spill] sm:$0xff] %v7300_v23  ;;  %v7314_v11 = vadd.f32 %v1271_v19, %v1207_v61  ;;  %v7316_v0 = vadd.f32 1.0, %v5529_v27  ;;  %v7319_v12 = vmul.f32 0.70710677, %v7286_v7  ;;  %v1337_v45 = vadd.f32 %v1336_v57, %v6893_v39 }
 0x21e   : > { %v1210_v50 = vadd.f32 %v1209_v33, %v6864_v2  ;;  %v1895_v15 = vsel %vm7281_vm7, %v1894_v21, %v1890_v13  ;;  %v2303_v54 = vmul.f32 %v2302_v31, %v7244_v40  ;;  %v2499_v35 = vmul.f32 %v7303_v3, %v7303_v3 }
 0x21f   : > { %v1992_v19 = vmul.f32 3.8918573e-05, %v7031_v32  ;;  %v7330_v26 = vmul.f32 %v2030_v34, %v7022_v62  ;;  %v2148_v38 = vadd.f32 0.18741608, %v2147_v14  ;;  %v7333_v4 = vmul.f32 0.70710677, %v7310_v60  ;;  %v1274_v62 = vpop.f32.mrf.mxu1  ;;  %v1404_v34 = vpop.f32.mrf.mxu3 }
 0x220   : > { %v1340_v57 = vadd.f32 %v1339_v49, %v6893_v39  ;;  %v2187_v22 = vmul.f32 %v2186_v28, %v7147_v29  ;;  %v2343_v20 = vmul.f32 %v2342_v10, %v7254_v9  ;;  %v2461_v61 = vmul.f32 2.1237322e-06, %v7312_v56 }
 0x221   : > { %10643 = vst [vmem:[#allocation52_spill] sm:$0xff] %v7330_v26  ;;  %v7342_v27 = vmul.f32 0.70710677, %v7314_v11  ;;  %v1896_v16 = vmul.f32 %v1895_v15, %v7249_v42  ;;  %v2619_v21 = vmul.f32 %v7319_v12, %v7319_v12  ;;  %v7351_v46 = vadd.f32 %v1274_v62, %v1210_v50 }
 0x222   : > { %1450 = vmatmul.f32.gmra.mxu0 %v6685_v25  ;;  %1580 = vmatmul.f32.gmra.mxu2 %v6685_v25  ;;  %v7349_v25 = vadd.f32 %v1401_v6, %v1337_v45  ;;  %v7354_v31 = vmul.f32 0.5, %v7159_v8  ;;  %v2304_v33 = vadd.f32 0.0036580483, %v2303_v54  ;;  %v7356_v13 = vmin.f32 %v2499_v35, 16.0 }
 0x223   : > { %1515 = vmatmul.f32.gmra.mxu1 %v6688_v37  ;;  %1645 = vmatmul.f32.gmra.mxu3 %v6688_v37  ;;  %v1993_v14 = vadd.f32 0.001143296, %v1992_v19  ;;  %v2149_v28 = vmul.f32 %v2148_v38, %v7124_v43  ;;  %v2659_v37 = vmul.f32 %v7333_v4, %v7333_v4  ;;  %v7361_v42 = vadd.f32 %v1404_v34, %v1340_v57 }
 0x224   : > { %10644 = vst [vmem:[#allocation53_spill] sm:$0xff] %v7354_v31  ;;  %v2032_v6 = vmul.f32 3.8918573e-05, %v7057_v59  ;;  %v2188_v10 = vadd.f32 0.18741608, %v2187_v22  ;;  %v2779_v8 = vmul.f32 %v7342_v27, %v7342_v27  ;;  %v5530_v50 = vclamps-f32 %v1896_v16, 1.0 }
 0x225   : > { %v2344_v49 = vadd.f32 0.0036580483, %v2343_v20  ;;  %v2462_v45 = vadd.f32 0.00028619796, %v2461_v61  ;;  %v7366_v15 = vmin.f32 %v2619_v21, 16.0  ;;  %v2305_v19 = vmul.f32 %v2304_v33, %v7244_v40 }
 0x226   : > { %v7369_v54 = vmul.f32 0.70710677, %v7349_v25  ;;  %v7372_v35 = vmul.f32 0.70710677, %v7351_v46  ;;  %v2501_v38 = vmul.f32 2.1237322e-06, %v7356_v13  ;;  %v1994_v57 = vmul.f32 %v1993_v14, %v7031_v32 }
 0x227   : > { %v2152_v22 = vmul.f32 3.8918573e-05, %v7124_v43  ;;  %v7379_v20 = vmul.f32 0.5, %v7176_v58  ;;  %v7381_v61 = vmin.f32 %v2659_v37, 16.0  ;;  %v7384_v62 = vmul.f32 0.70710677, %v7361_v42 }
 0x228   : > { %v2033_v16 = vadd.f32 0.001143296, %v2032_v6  ;;  %v2150_v21 = vadd.f32 1.1283791, %v2149_v28  ;;  %v2345_v33 = vmul.f32 %v2344_v49, %v7254_v9  ;;  %v2463_v34 = vmul.f32 %v2462_v45, %v7312_v56 }
 0x229   : > { %10645 = vst [vmem:[#allocation54_spill] sm:$0xff] %v7379_v20  ;;  %v7390_v14 = vmin.f32 %v2779_v8, 16.0  ;;  %v4380_v58 = vadd.f32 1.0, %v5530_v50  ;;  %v2621_v37 = vmul.f32 2.1237322e-06, %v7366_v15  ;;  %v2819_v20 = vmul.f32 %v7369_v54, %v7369_v54 }
 0x22a   : > { %10646 = vst [vmem:[#allocation55_spill] sm:$0xff] %v7384_v62  ;;  %1453 = vmatmul.f32.gmra.mxu0 %v6725_v17  ;;  %1583 = vmatmul.f32.gmra.mxu2 %v6725_v17  ;;  %v2939_v17 = vmul.f32 %v7372_v35, %v7372_v35  ;;  %v2189_v28 = vmul.f32 %v2188_v10, %v7147_v29  ;;  %v2306_v6 = vadd.f32 0.05243302, %v2305_v19  ;;  %v1995_v49 = vadd.f32 0.014752088, %v1994_v57 }
 0x22b   : > { %1518 = vmatmul.f32.gmra.mxu1 %v6728_v1  ;;  %1648 = vmatmul.f32.gmra.mxu3 %v6728_v1  ;;  %v2153_v45 = vadd.f32 0.001143296, %v2152_v22  ;;  %v2502_v8 = vadd.f32 0.00028619796, %v2501_v38  ;;  %v2661_v31 = vmul.f32 2.1237322e-06, %v7381_v61  ;;  %v2979_v1 = vmul.f32 %v7384_v62, %v7384_v62 }
 0x22c   : > { %v2034_v50 = vmul.f32 %v2033_v16, %v7057_v59  ;;  %v7406_v52 = vmul.f32 %v7316_v0, %v7164_v5  ;;  %v2346_v36 = vadd.f32 0.05243302, %v2345_v33  ;;  %v2464_v23 = vadd.f32 0.0036580483, %v2463_v34 }
 0x22d   : > { %v2781_v63 = vmul.f32 2.1237322e-06, %v7390_v14  ;;  %v7410_v10 = vmul.f32 0.5, %v7232_v55  ;;  %v2622_v19 = vadd.f32 0.00028619796, %v2621_v37  ;;  %v7412_v38 = vmin.f32 %v2819_v20, 16.0 }
 0x22e   : > { %10647 = vst [vmem:[#allocation56_spill] sm:$0xff] %v7406_v52  ;;  %v7414_v57 = vmin.f32 %v2939_v17, 16.0  ;;  %v7416_v22 = vadd.f32 1.1283791, %v2189_v28  ;;  %v1996_v16 = vmul.f32 %v1995_v49, %v7031_v32  ;;  %v2154_v47 = vmul.f32 %v2153_v45, %v7124_v43  ;;  %v10652_v49 = vld [vmem:[#allocation21_spill] sm:$0xff]  ;;  %v4633_v45 = vld [vmem:[#allocation13 + $0x2f0] sm:$0xff] }
 0x22f   : > { %10648 = vst [vmem:[#allocation57_spill] sm:$0xff] %v7410_v10  ;;  %v2192_v5 = vmul.f32 3.8918573e-05, %v7147_v29  ;;  %v2503_v0 = vmul.f32 %v2502_v8, %v7356_v13  ;;  %v2662_v33 = vadd.f32 0.00028619796, %v2661_v31  ;;  %v7422_v34 = vmin.f32 %v2979_v1, 16.0  ;;  %4797 = vmatpush.msra.mxu2 %v4633_v45 }
 0x230   : > { %10649 = vst [vmem:[#allocation58_spill] sm:$0xff] %v7412_v38  ;;  %v2035_v55 = vadd.f32 0.014752088, %v2034_v50  ;;  %v2307_v20 = vmul.f32 %v2306_v6, %v7244_v40  ;;  %v2347_v37 = vmul.f32 %v2346_v36, %v7254_v9  ;;  %v2465_v17 = vmul.f32 %v2464_v23, %v7312_v56  ;;  %v4665_v31 = vld [vmem:[#allocation13 + $0x3f0] sm:$0xff] }
 0x231   : > { %10650 = vst [vmem:[#allocation59_spill] sm:$0xff] %v7414_v57  ;;  %v2782_v28 = vadd.f32 0.00028619796, %v2781_v63  ;;  %v4569_v8 = vld [vmem:[#allocation13 + $0xf0] sm:$0xff]  ;;  %v7432_v1 = vmul.f32 0.5, %v7266_v24  ;;  %4862 = vmatpush.msra.mxu3 %v4665_v31  ;;  %v10654_v63 = vld [vmem:[#allocation40_spill] sm:$0xff]  ;;  %v2663_v24 = vmul.f32 %v2662_v33, %v7381_v61 }
 0x232   : > { %10651 = vst [vmem:[#allocation60_spill] sm:$0xff] %v7422_v34  ;;  %1456 = vmatmul.f32.gmra.mxu0 %v6758_v18  ;;  %1586 = vmatmul.f32.gmra.mxu2 %v6758_v18  ;;  %v2623_v18 = vmul.f32 %v2622_v19, %v7366_v15  ;;  %v2821_v50 = vmul.f32 2.1237322e-06, %v7412_v38  ;;  %v2941_v6 = vmul.f32 2.1237322e-06, %v7414_v57  ;;  %v4601_v36 = vld [vmem:[#allocation13 + $0x1f0] sm:$0xff]  ;;  %v7438_v23 = vmul.f32 %v2150_v21, %v10654_v63 }
 0x233   : > { %1521 = vmatmul.f32.gmra.mxu1 %v10652_v49  ;;  %1651 = vmatmul.f32.gmra.mxu3 %v10652_v49  ;;  %10653 = vst [vmem:[#allocation21_spill] sm:$0xff] %v7432_v1  ;;  %v1997_v49 = vadd.f32 0.112945676, %v1996_v16  ;;  %v2155_v10 = vadd.f32 0.014752088, %v2154_v47  ;;  %v2036_v1 = vmul.f32 %v2035_v55, %v7057_v59  ;;  %v2783_v31 = vmul.f32 %v2782_v28, %v7390_v14 }
 0x234   : > { %4667 = vmatpush.msra.mxu0 %v4569_v8  ;;  %4732 = vmatpush.msra.mxu1 %v4601_v36  ;;  %v2193_v52 = vadd.f32 0.001143296, %v2192_v5  ;;  %v2504_v48 = vadd.f32 0.0036580483, %v2503_v0  ;;  %v2981_v19 = vmul.f32 2.1237322e-06, %v7422_v34  ;;  %v7445_v21 = vmul.f32 %v4380_v58, %v7171_v30 }
 0x235   : > { %v2308_v62 = vadd.f32 0.18741608, %v2307_v20  ;;  %v2348_v26 = vadd.f32 0.18741608, %v2347_v37  ;;  %v2466_v45 = vadd.f32 0.05243302, %v2465_v17  ;;  %v1998_v5 = vmul.f32 %v1997_v49, %v7031_v32 }
 0x236   : > { %10655 = vst [vmem:[#allocation40_spill] sm:$0xff] %v7445_v21  ;;  %v2624_v8 = vadd.f32 0.0036580483, %v2623_v18  ;;  %v2822_v36 = vadd.f32 0.00028619796, %v2821_v50  ;;  %v2156_v0 = vmul.f32 %v2155_v10, %v7124_v43  ;;  %v2194_v33 = vmul.f32 %v2193_v52, %v7147_v29  ;;  %v10656_v17 = vld [vmem:[#allocation22_spill] sm:$0xff] }
 0x237   : > { %v2312_v47 = vmul.f32 3.8918573e-05, %v7244_v40  ;;  %v2942_v16 = vadd.f32 0.00028619796, %v2941_v6  ;;  %v2505_v55 = vmul.f32 %v2504_v48, %v7356_v13  ;;  %v2664_v20 = vadd.f32 0.0036580483, %v2663_v24 }
 0x238   : > { %v2982_v37 = vadd.f32 0.00028619796, %v2981_v19  ;;  %v2037_v30 = vadd.f32 0.112945676, %v2036_v1  ;;  %v2309_v58 = vmul.f32 %v2308_v62, %v7244_v40  ;;  %v2349_v28 = vmul.f32 %v2348_v26, %v7254_v9  ;;  %v10658_v10 = vld [vmem:[#allocation23_spill] sm:$0xff]  ;;  %v4631_v48 = vld [vmem:[#allocation13 + $0x2e0] sm:$0xff] }
 0x239   : > { %v7457_v18 = vmul.f32 0.5, %v7286_v7  ;;  %v2784_v50 = vadd.f32 0.0036580483, %v2783_v31  ;;  %v4663_v52 = vld [vmem:[#allocation13 + $0x3e0] sm:$0xff]  ;;  %v2467_v6 = vmul.f32 %v2466_v45, %v7312_v56  ;;  %v2625_v63 = vmul.f32 %v2624_v8, %v7366_v15  ;;  %4798 = vmatpush.msra.mxu2 %v4631_v48 }
 0x23a   : > { %1459 = vmatmul.f32.gmra.mxu0 %v10656_v17  ;;  %1589 = vmatmul.f32.gmra.mxu2 %v10656_v17  ;;  %v2823_v1 = vmul.f32 %v2822_v36, %v7412_v38  ;;  %v2313_v62 = vadd.f32 0.001143296, %v2312_v47  ;;  %v2943_v26 = vmul.f32 %v2942_v16, %v7414_v57  ;;  %v1999_v7 = vadd.f32 0.4994258, %v1998_v5  ;;  %v10708_v21 = vld [vmem:[#allocation37_spill] sm:$0xff] }
 0x23b   : > { %10657 = vst [vmem:[#allocation22_spill] sm:$0xff] %v7457_v18  ;;  %1524 = vmatmul.f32.gmra.mxu1 %v10658_v10  ;;  %1654 = vmatmul.f32.gmra.mxu3 %v10658_v10  ;;  %v2157_v49 = vadd.f32 0.112945676, %v2156_v0  ;;  %v2195_v24 = vadd.f32 0.014752088, %v2194_v33  ;;  %v2665_v31 = vmul.f32 %v2664_v20, %v7381_v61  ;;  %v2983_v17 = vmul.f32 %v2982_v37, %v7422_v34  ;;  %v4599_v20 = vld [vmem:[#allocation13 + $0x1e0] sm:$0xff] }
 0x23c   : > { %4863 = vmatpush.msra.mxu3 %v4663_v52  ;;  %v2506_v19 = vadd.f32 0.05243302, %v2505_v55  ;;  %v2038_v10 = vmul.f32 %v2037_v30, %v7057_v59  ;;  %v7468_v45 = vadd.f32 1.1283791, %v2309_v58  ;;  %v7470_v8 = vadd.f32 1.1283791, %v2349_v28  ;;  %4733 = vmatpush.msra.mxu1 %v4599_v20 }
 0x23d   : > { %v2785_v36 = vmul.f32 %v2784_v50, %v7390_v14  ;;  %v2352_v47 = vmul.f32 3.8918573e-05, %v7254_v9  ;;  %v2468_v48 = vadd.f32 0.18741608, %v2467_v6  ;;  %v2626_v16 = vadd.f32 0.05243302, %v2625_v63 }
 0x23e   : > { %v2824_v5 = vadd.f32 0.0036580483, %v2823_v1  ;;  %v2314_v0 = vmul.f32 %v2313_v62, %v7244_v40  ;;  %v2944_v33 = vadd.f32 0.0036580483, %v2943_v26  ;;  %v4567_v55 = vld [vmem:[#allocation13 + $0xe0] sm:$0xff]  ;;  %v2000_v37 = vmul.f32 %v1999_v7, %v7031_v32  ;;  %v10659_v18 = vld [vmem:[#allocation24_spill] sm:$0xff] }
 0x23f   : > { %v2158_v30 = vmul.f32 %v2157_v49, %v7124_v43  ;;  %v2196_v58 = vmul.f32 %v2195_v24, %v7147_v29  ;;  %v2507_v28 = vmul.f32 %v2506_v19, %v7356_v13  ;;  %v2666_v52 = vadd.f32 0.05243302, %v2665_v31  ;;  %v10660_v63 = vld [vmem:[#allocation43_spill] sm:$0xff]  ;;  %v10662_v26 = vld [vmem:[#allocation25_spill] sm:$0xff]  ;;  %4668 = vmatpush.msra.mxu0 %v4567_v55 }
 0x240   : > { %v2984_v50 = vadd.f32 0.0036580483, %v2983_v17  ;;  %v2039_v6 = vadd.f32 0.4994258, %v2038_v10  ;;  %v7483_v1 = vmul.f32 %v7416_v22, %v10660_v63  ;;  %v7486_v62 = vmul.f32 0.5, %v7310_v60  ;;  %v4629_v7 = vld [vmem:[#allocation13 + $0x2d0] sm:$0xff] }
 0x241   : > { %v2786_v32 = vadd.f32 0.05243302, %v2785_v36  ;;  %v2353_v49 = vadd.f32 0.001143296, %v2352_v47  ;;  %v2469_v24 = vmul.f32 %v2468_v48, %v7312_v56  ;;  %v2627_v19 = vmul.f32 %v2626_v16, %v7366_v15  ;;  %4799 = vmatpush.msra.mxu2 %v4629_v7 }
 0x242   : > { %1462 = vmatmul.f32.gmra.mxu0 %v10659_v18  ;;  %1592 = vmatmul.f32.gmra.mxu2 %v10659_v18  ;;  %10661 = vst [vmem:[#allocation23_spill] sm:$0xff] %v7486_v62  ;;  %v2825_v18 = vmul.f32 %v2824_v5, %v7412_v38  ;;  %v2315_v22 = vadd.f32 0.014752088, %v2314_v0  ;;  %v2945_v31 = vmul.f32 %v2944_v33, %v7414_v57  ;;  %v7494_v60 = vadd.f32 1.0, %v2000_v37  ;;  %v4661_v0 = vld [vmem:[#allocation13 + $0x3d0] sm:$0xff] }
 0x243   : > { %1527 = vmatmul.f32.gmra.mxu1 %v10662_v26  ;;  %1657 = vmatmul.f32.gmra.mxu3 %v10662_v26  ;;  %v2159_v17 = vadd.f32 0.4994258, %v2158_v30  ;;  %v2197_v10 = vadd.f32 0.112945676, %v2196_v58  ;;  %v2508_v36 = vadd.f32 0.18741608, %v2507_v28  ;;  %v2667_v63 = vmul.f32 %v2666_v52, %v7381_v61 }
 0x244   : > { %v2985_v47 = vmul.f32 %v2984_v50, %v7422_v34  ;;  %v2040_v48 = vmul.f32 %v2039_v6, %v7057_v59  ;;  %v7500_v16 = vmul.f32 0.5, %v7314_v11  ;;  %v2787_v5 = vmul.f32 %v2786_v32, %v7390_v14  ;;  %4864 = vmatpush.msra.mxu3 %v4661_v0  ;;  %v10664_v32 = vld [vmem:[#allocation26_spill] sm:$0xff] }
 0x245   : > { %v2354_v33 = vmul.f32 %v2353_v49, %v7254_v9  ;;  %v2472_v55 = vmul.f32 3.8918573e-05, %v7312_v56  ;;  %v2470_v20 = vadd.f32 1.1283791, %v2469_v24  ;;  %v2628_v37 = vadd.f32 0.18741608, %v2627_v19 }
 0x246   : > { %10663 = vst [vmem:[#allocation24_spill] sm:$0xff] %v7500_v16  ;;  %v2826_v30 = vadd.f32 0.05243302, %v2825_v18  ;;  %v2316_v58 = vmul.f32 %v2315_v22, %v7244_v40  ;;  %v2946_v28 = vadd.f32 0.05243302, %v2945_v31  ;;  %5761 = vrcp.f32 %v7494_v60  ;;  %v10665_v19 = vld [vmem:[#allocation27_spill] sm:$0xff] }
 0x247   : > { %v2160_v59 = vmul.f32 %v2159_v17, %v7124_v43  ;;  %v2198_v11 = vmul.f32 %v2197_v10, %v7147_v29  ;;  %v2509_v52 = vmul.f32 %v2508_v36, %v7356_v13  ;;  %v2668_v50 = vadd.f32 0.18741608, %v2667_v63 }
 0x248   : > { %v2986_v6 = vadd.f32 0.05243302, %v2985_v47  ;;  %v7512_v7 = vadd.f32 1.0, %v2040_v48  ;;  %v7516_v49 = vmul.f32 %v7468_v45, %v7189_v53  ;;  %v2788_v24 = vadd.f32 0.18741608, %v2787_v5 }
 0x249   : > { %v2355_v18 = vadd.f32 0.014752088, %v2354_v33  ;;  %v2473_v22 = vadd.f32 0.001143296, %v2472_v55  ;;  %v2629_v31 = vmul.f32 %v2628_v37, %v7366_v15  ;;  %v7522_v17 = vmul.f32 0.5, %v7349_v25 }
 0x24a   : > { %1465 = vmatmul.f32.gmra.mxu0 %v10664_v32  ;;  %1595 = vmatmul.f32.gmra.mxu2 %v10664_v32  ;;  %v2827_v10 = vmul.f32 %v2826_v30, %v7412_v38  ;;  %v2317_v36 = vadd.f32 0.112945676, %v2316_v58  ;;  %v7527_v53 = vmul.f32 %v7470_v8, %v7197_v44  ;;  %v2947_v45 = vmul.f32 %v2946_v28, %v7414_v57 }
 0x24b   : > { %1530 = vmatmul.f32.gmra.mxu1 %v10665_v19  ;;  %1660 = vmatmul.f32.gmra.mxu3 %v10665_v19  ;;  %10666 = vst [vmem:[#allocation43_spill] sm:$0xff] %v7522_v17  ;;  %v7530_v63 = vadd.f32 1.0, %v2160_v59  ;;  %v2199_v47 = vadd.f32 0.4994258, %v2198_v11  ;;  %v2510_v48 = vadd.f32 1.1283791, %v2509_v52  ;;  %v2669_v5 = vmul.f32 %v2668_v50, %v7381_v61 }
 0x24c   : > { %v2987_v0 = vmul.f32 %v2986_v6, %v7422_v34  ;;  %5763 = vrcp.f32 %v7512_v7  ;;  %v7535_v25 = vpop.eup %5761  ;;  %v7538_v33 = vmul.f32 %v2470_v20, %v7257_v41  ;;  %v2789_v44 = vmul.f32 %v2788_v24, %v7390_v14  ;;  %v10668_v24 = vld [vmem:[#allocation28_spill] sm:$0xff] }
 0x24d   : > { %v2356_v8 = vmul.f32 %v2355_v18, %v7254_v9  ;;  %v2474_v55 = vmul.f32 %v2473_v22, %v7312_v56  ;;  %v2630_v37 = vadd.f32 1.1283791, %v2629_v31  ;;  %v2828_v30 = vadd.f32 0.18741608, %v2827_v10  ;;  %v10669_v22 = vld [vmem:[#allocation29_spill] sm:$0xff] }
 0x24e   : > { %v2318_v28 = vmul.f32 %v2317_v36, %v7244_v40  ;;  %v2512_v59 = vmul.f32 3.8918573e-05, %v7356_v13  ;;  %v2948_v11 = vadd.f32 0.18741608, %v2947_v45  ;;  %5765 = vrcp.f32 %v7530_v63 }
 0x24f   : > { %v2200_v41 = vmul.f32 %v2199_v47, %v7147_v29  ;;  %v2670_v20 = vadd.f32 1.1283791, %v2669_v5  ;;  %v7549_v6 = vmul.f32 0.5, %v7351_v46  ;;  %v2988_v32 = vadd.f32 0.18741608, %v2987_v0 }
 0x250   : > { %v2003_v19 = vmul.f32 %v7535_v25, %v7494_v60  ;;  %v7556_v18 = vmul.f32 %v2510_v48, %v7303_v3  ;;  %v2357_v29 = vadd.f32 0.112945676, %v2356_v8  ;;  %v2475_v31 = vadd.f32 0.014752088, %v2474_v55 }
 0x251   : > { %10667 = vst [vmem:[#allocation25_spill] sm:$0xff] %v7549_v6  ;;  %v2829_v10 = vmul.f32 %v2828_v30, %v7412_v38  ;;  %v7564_v36 = vmul.f32 0.5, %v7361_v42  ;;  %v2319_v47 = vadd.f32 0.4994258, %v2318_v28  ;;  %v2513_v5 = vadd.f32 0.001143296, %v2512_v59 }
 0x252   : > { %1468 = vmatmul.f32.gmra.mxu0 %v10668_v24  ;;  %1598 = vmatmul.f32.gmra.mxu2 %v10668_v24  ;;  %v7560_v46 = vpop.eup %5763  ;;  %v7567_v3 = vmul.f32 %v2630_v37, %v7319_v12  ;;  %v2949_v48 = vmul.f32 %v2948_v11, %v7414_v57  ;;  %v7572_v8 = vadd.f32 1.0, %v2200_v41  ;;  %v7575_v55 = vmul.f32 %v2670_v20, %v7333_v4 }
 0x253   : > { %v1212_v26 = vpop.f32.mrf.mxu0  ;;  %1533 = vmatmul.f32.gmra.mxu1 %v10669_v22  ;;  %1663 = vmatmul.f32.gmra.mxu3 %v10669_v22  ;;  %10670 = vst [vmem:[#allocation26_spill] sm:$0xff] %v7564_v36  ;;  %v2989_v30 = vmul.f32 %v2988_v32, %v7422_v34  ;;  %v2004_v24 = vsub.f32 1.0, %v2003_v19  ;;  %v2358_v37 = vmul.f32 %v2357_v29, %v7254_v9  ;;  %v2830_v11 = vadd.f32 1.1283791, %v2829_v10  ;;  %v10674_v19 = vld [vmem:[#allocation30_spill] sm:$0xff]  ;;  %v4627_v36 = vld [vmem:[#allocation13 + $0x2c0] sm:$0xff] }
 0x254   : > { %v1277_v43 = vpop.f32.mrf.mxu1  ;;  %v1213_v52 = vadd.f32 %v1212_v26, %v6864_v2  ;;  %v2790_v26 = vadd.f32 1.1283791, %v2789_v44  ;;  %10671 = vst [vmem:[#allocation27_spill] sm:$0xff] %v7567_v3  ;;  %v7579_v28 = vpop.eup %5765  ;;  %v2476_v59 = vmul.f32 %v2475_v31, %v7312_v56  ;;  %v2011_v4 = vand.u32 2147483647, %v7494_v60  ;;  %v10675_v31 = vld [vmem:[#allocation31_spill] sm:$0xff]  ;;  %4800 = vmatpush.msra.mxu2 %v4627_v36 }
 0x255   : > { %10672 = vst [vmem:[#allocation28_spill] sm:$0xff] %v7575_v55  ;;  %v2950_v41 = vadd.f32 1.1283791, %v2949_v48  ;;  %5767 = vrcp.f32 %v7572_v8  ;;  %v7596_v32 = vadd.f32 1.1283791, %v2989_v30  ;;  %v2163_v29 = vmul.f32 %v7579_v28, %v7530_v63 }
 0x256   : > { %v7570_v0 = vadd.f32 %v1277_v43, %v1213_v52  ;;  %v7582_v12 = vmul.f32 %v2790_v26, %v7342_v27  ;;  %v2043_v43 = vmul.f32 %v7560_v46, %v7512_v7  ;;  %v2320_v52 = vmul.f32 %v2319_v47, %v7244_v40 }
 0x257   : > { %v2013_v27 = vand.u32 2147483648, %v7494_v60  ;;  %v2005_v40 = vmul.f32 %v7535_v25, %v2004_v24  ;;  %v2359_v48 = vadd.f32 0.4994258, %v2358_v37  ;;  %v2477_v30 = vadd.f32 0.112945676, %v2476_v59 }
 0x258   : > { %10673 = vst [vmem:[#allocation29_spill] sm:$0xff] %v7582_v12  ;;  %v7592_v20 = vmul.f32 0.70710677, %v7570_v0  ;;  %vm2007_vm9 = vweird.f32 %v7494_v60  ;;  %v7612_v24 = vadd.f32 1.0, %v2320_v52  ;;  %v7615_v17 = vmul.f32 %v2950_v41, %v7372_v35 }
 0x259   : > { %v1342_v58 = vpop.f32.mrf.mxu2  ;;  %vm7619_vm10 = vcmp.eq.f32.partialorder %v2011_v4, 8.507059e+37  ;;  %v2053_v37 = vand.u32 2147483648, %v7512_v7  ;;  %vm2008_vm11 = vweird.f32 %v7535_v25  ;;  %v2051_v35 = vand.u32 2147483647, %v7512_v7 }
 0x25a   : > { %v1407_v50 = vpop.f32.mrf.mxu3  ;;  %v1343_v42 = vadd.f32 %v1342_v58, %v6893_v39  ;;  %v2514_v58 = vmul.f32 %v2513_v5, %v7356_v13  ;;  %1471 = vmatmul.f32.gmra.mxu0 %v10674_v19  ;;  %1601 = vmatmul.f32.gmra.mxu2 %v10674_v19  ;;  %v2044_v5 = vsub.f32 1.0, %v2043_v43  ;;  %v7609_v19 = vmul.f32 %v2830_v11, %v7369_v54  ;;  %vm7658_vm13 = vmor %vm2007_vm9, %vm2008_vm11  ;;  %v4595_v43 = vld [vmem:[#allocation13 + $0x1c0] sm:$0xff] }
 0x25b   : > { %1536 = vmatmul.f32.gmra.mxu1 %v10675_v31  ;;  %1666 = vmatmul.f32.gmra.mxu3 %v10675_v31  ;;  %10677 = vst [vmem:[#allocation31_spill] sm:$0xff] %v7615_v17  ;;  %v2014_v54 = vor.u32 1.1754944e-38, %v2013_v27  ;;  %v2164_v52 = vsub.f32 1.0, %v2163_v29  ;;  %v2006_v31 = vadd.f32 %v7535_v25, %v2005_v40  ;;  %5769 = vrcp.f32 %v7612_v24 }
 0x25c   : > { %v1215_v45 = vpop.f32.mrf.mxu0  ;;  %v7600_v26 = vadd.f32 %v1407_v50, %v1343_v42  ;;  %10676 = vst [vmem:[#allocation30_spill] sm:$0xff] %v7609_v19  ;;  %v4565_v50 = vld [vmem:[#allocation13 + $0xd0] sm:$0xff]  ;;  %v2515_v6 = vadd.f32 0.014752088, %v2514_v58  ;;  %v7631_v58 = vpop.eup %5767  ;;  %v2360_v36 = vmul.f32 %v2359_v48, %v7254_v9  ;;  %vm2047_vm12 = vweird.f32 %v7512_v7  ;;  %v4659_v9 = vld [vmem:[#allocation13 + $0x3c0] sm:$0xff] }
 0x25d   : > { %v1280_v44 = vpop.f32.mrf.mxu1  ;;  %v1216_v10 = vadd.f32 %v1215_v45, %v6864_v2  ;;  %v4597_v42 = vld [vmem:[#allocation13 + $0x1d0] sm:$0xff]  ;;  %v3099_v45 = vmul.f32 %v7592_v20, %v7592_v20  ;;  %4669 = vmatpush.msra.mxu0 %v4565_v50  ;;  %v2045_v50 = vmul.f32 %v7560_v46, %v2044_v5  ;;  %vm2048_vm14 = vweird.f32 %v7560_v46  ;;  %4865 = vmatpush.msra.mxu3 %v4659_v9 }
 0x25e   : > { %4734 = vmatpush.msra.mxu1 %v4597_v42  ;;  %v7625_v59 = vmul.f32 0.70710677, %v7600_v26  ;;  %v2478_v42 = vmul.f32 %v2477_v30, %v7312_v56  ;;  %v2516_v29 = vmul.f32 %v2515_v6, %v7356_v13  ;;  %vm7663_vm15 = vcmp.eq.f32.partialorder %v2051_v35, 8.507059e+37  ;;  %vm7702_vm2 = vmor %vm2047_vm12, %vm2048_vm14  ;;  %v4563_v6 = vld [vmem:[#allocation13 + $0xc0] sm:$0xff] }
 0x25f   : > { %v7633_v4 = vadd.f32 %v1280_v44, %v1216_v10  ;;  %v7644_v17 = vmin.f32 %v3099_v45, 16.0  ;;  %v7647_v44 = vor.u32 1.1754944e-38, %v2053_v37  ;;  %v10681_v10 = vld [vmem:[#allocation32_spill] sm:$0xff]  ;;  %v2165_v48 = vmul.f32 %v7579_v28, %v2164_v52  ;;  %v10686_v37 = vld [vmem:[#allocation33_spill] sm:$0xff]  ;;  %4670 = vmatpush.msra.mxu0 %v4563_v6  ;;  %v10697_v6 = vld [vmem:[#allocation35_spill] sm:$0xff] }
 0x260   : > { %v3139_v40 = vmul.f32 %v7625_v59, %v7625_v59  ;;  %v2203_v30 = vmul.f32 %v7631_v58, %v7572_v8  ;;  %v2010_v35 = vsel %vm7658_vm13, %v7535_v25, %v2006_v31  ;;  %vm2167_vm0 = vweird.f32 %v7530_v63  ;;  %4735 = vmatpush.msra.mxu1 %v4595_v43 }
 0x261   : > { %10680 = vst [vmem:[#allocation61_spill] sm:$0xff] %v7644_v17  ;;  %v7671_v45 = vmul.f32 0.70710677, %v7633_v4  ;;  %v7684_v52 = vadd.f32 1.0, %v2360_v36  ;;  %v2479_v34 = vadd.f32 0.4994258, %v2478_v42  ;;  %vm2168_vm1 = vweird.f32 %v7579_v28 }
 0x262   : > { %v1345_v22 = vpop.f32.mrf.mxu2  ;;  %1474 = vmatmul.f32.gmra.mxu0 %v10681_v10  ;;  %1604 = vmatmul.f32.gmra.mxu2 %v10681_v10  ;;  %v2046_v10 = vadd.f32 %v7560_v46, %v2045_v50  ;;  %v2517_v16 = vadd.f32 0.112945676, %v2516_v29  ;;  %v3101_v57 = vmul.f32 2.1237322e-06, %v7644_v17  ;;  %v2211_v25 = vand.u32 2147483647, %v7572_v8  ;;  %vm7731_vm3 = vmor %vm2167_vm0, %vm2168_vm1 }
 0x263   : > { %v1410_v47 = vpop.f32.mrf.mxu3  ;;  %v1346_v41 = vadd.f32 %v1345_v22, %v6893_v39  ;;  %v2171_v22 = vand.u32 2147483647, %v7530_v63  ;;  %1539 = vmatmul.f32.gmra.mxu1 %v10686_v37  ;;  %1669 = vmatmul.f32.gmra.mxu3 %v10686_v37  ;;  %v7694_v31 = vmin.f32 %v3139_v40, 16.0  ;;  %v2015_v50 = vsel %vm7619_vm10, %v2014_v54, %v2010_v35  ;;  %v4625_v54 = vld [vmem:[#allocation13 + $0x2b0] sm:$0xff] }
 0x264   : > { %v2166_v42 = vadd.f32 %v7579_v28, %v2165_v48  ;;  %v2204_v29 = vsub.f32 1.0, %v2203_v30  ;;  %v3259_v9 = vmul.f32 %v7671_v45, %v7671_v45  ;;  %v2050_v7 = vsel %vm7702_vm2, %v7560_v46, %v2046_v10  ;;  %4801 = vmatpush.msra.mxu2 %v4625_v54  ;;  %v4657_v10 = vld [vmem:[#allocation13 + $0x3b0] sm:$0xff] }
 0x265   : > { %v7675_v60 = vadd.f32 %v1410_v47, %v1346_v41  ;;  %v2173_v47 = vand.u32 2147483648, %v7530_v63  ;;  %v7692_v41 = vpop.eup %5769  ;;  %10687 = vst [vmem:[#allocation32_spill] sm:$0xff] %v7694_v31  ;;  %v2213_v35 = vand.u32 2147483648, %v7572_v8  ;;  %5771 = vrcp.f32 %v7684_v52  ;;  %4866 = vmatpush.msra.mxu3 %v4657_v10 }
 0x266   : > { %v2480_v48 = vmul.f32 %v2479_v34, %v7312_v56  ;;  %v2518_v30 = vmul.f32 %v2517_v16, %v7356_v13  ;;  %v2632_v38 = vmul.f32 3.8918573e-05, %v7366_v15  ;;  %v3102_v62 = vadd.f32 0.00028619796, %v3101_v57  ;;  %v10695_v16 = vld [vmem:[#allocation34_spill] sm:$0xff] }
 0x267   : > { %v7627_v11 = vpop.f32.mrf.mxu0  ;;  %v7710_v40 = vmul.f32 0.70710677, %v7675_v60  ;;  %v7725_v46 = vmul.f32 %v2015_v50, %v7297_v51  ;;  %vm7735_vm4 = vcmp.eq.f32.partialorder %v2171_v22, 8.507059e+37  ;;  %v2323_v57 = vmul.f32 %v7692_v41, %v7612_v24 }
 0x268   : > { %v7636_v27 = vpop.f32.mrf.mxu1  ;;  %v3141_v34 = vmul.f32 2.1237322e-06, %v7694_v31  ;;  %v2170_v51 = vsel %vm7731_vm3, %v7579_v28, %v2166_v42  ;;  %v2174_v63 = vor.u32 1.1754944e-38, %v2173_v47  ;;  %v2205_v50 = vmul.f32 %v7631_v58, %v2204_v29 }
 0x269   : > { %10690 = vst [vmem:[#allocation33_spill] sm:$0xff] %v7710_v40  ;;  %v7748_v22 = vmin.f32 %v3259_v9, 16.0  ;;  %v3299_v36 = vmul.f32 %v7710_v40, %v7710_v40  ;;  %v2055_v43 = vsel %vm7663_vm15, %v7647_v44, %v2050_v7  ;;  %v2214_v54 = vor.u32 1.1754944e-38, %v2213_v35 }
 0x26a   : > { %1477 = vmatmul.f32.gmra.mxu0 %v10695_v16  ;;  %1607 = vmatmul.f32.gmra.mxu2 %v10695_v16  ;;  %vm2208_vm5 = vweird.f32 %v7631_v58  ;;  %vm7758_vm6 = vcmp.eq.f32.partialorder %v2211_v25, 8.507059e+37  ;;  %v7762_v47 = vadd.f32 1.0, %v2480_v48  ;;  %v2519_v42 = vadd.f32 0.4994258, %v2518_v30 }
 0x26b   : > { %10696 = vst [vmem:[#allocation34_spill] sm:$0xff] %v7748_v22  ;;  %1542 = vmatmul.f32.gmra.mxu1 %v10697_v6  ;;  %1672 = vmatmul.f32.gmra.mxu3 %v10697_v6  ;;  %v2633_v29 = vadd.f32 0.001143296, %v2632_v38  ;;  %v3103_v9 = vmul.f32 %v3102_v62, %v7644_v17  ;;  %v5533_v16 = vclamps-f32 %v7725_v46, 1.0  ;;  %v2175_v5 = vsel %vm7735_vm4, %v2174_v63, %v2170_v51  ;;  %v7768_v7 = vpop.eup %5771  ;;  %v10700_v6 = vld [vmem:[#allocation52_spill] sm:$0xff]  ;;  %v10701_v62 = vld [vmem:[#allocation55_spill] sm:$0xff] }
 0x26c   : > { %v2324_v44 = vsub.f32 1.0, %v2323_v57  ;;  %v3142_v35 = vadd.f32 0.00028619796, %v3141_v34  ;;  %v2056_v48 = vmul.f32 %v2055_v43, %v10700_v6  ;;  %v2206_v30 = vadd.f32 %v7631_v58, %v2205_v50  ;;  %v4561_v34 = vld [vmem:[#allocation13 + $0xb0] sm:$0xff]  ;;  %v4623_v63 = vld [vmem:[#allocation13 + $0x2a0] sm:$0xff] }
 0x26d   : > { %v7681_v19 = vpop.f32.mrf.mxu2  ;;  %v2672_v38 = vmul.f32 3.8918573e-05, %v7381_v61  ;;  %v7777_v3 = vmul.f32 %v7596_v32, %v10701_v62  ;;  %v3261_v46 = vmul.f32 2.1237322e-06, %v7748_v22  ;;  %v7780_v56 = vmin.f32 %v3299_v36, 16.0  ;;  %v4593_v51 = vld [vmem:[#allocation13 + $0x1b0] sm:$0xff]  ;;  %4671 = vmatpush.msra.mxu0 %v4561_v34  ;;  %4802 = vmatpush.msra.mxu2 %v4623_v63 }
 0x26e   : > { %v7687_v37 = vpop.f32.mrf.mxu3  ;;  %vm2207_vm7 = vweird.f32 %v7572_v8  ;;  %4736 = vmatpush.msra.mxu1 %v4593_v51  ;;  %v2176_v50 = vmul.f32 %v2175_v5, %v7438_v23  ;;  %5773 = vrcp.f32 %v7762_v47  ;;  %v2520_v32 = vmul.f32 %v2519_v42, %v7356_v13  ;;  %v10706_v13 = vld [vmem:[#allocation36_spill] sm:$0xff] }
 0x26f   : > { %v7716_v12 = vpop.f32.mrf.mxu0  ;;  %10702 = vst [vmem:[#allocation35_spill] sm:$0xff] %v7777_v3  ;;  %v2634_v43 = vmul.f32 %v2633_v29, %v7366_v15  ;;  %v3104_v10 = vadd.f32 0.0036580483, %v3103_v9  ;;  %vm7793_vm8 = vmor %vm2207_vm7, %vm2208_vm5  ;;  %v2325_v8 = vmul.f32 %v7692_v41, %v2324_v44  ;;  %v2331_v23 = vand.u32 2147483647, %v7612_v24 }
 0x270   : > { %v7722_v55 = vpop.f32.mrf.mxu1  ;;  %10703 = vst [vmem:[#allocation52_spill] sm:$0xff] %v7780_v56  ;;  %v2363_v5 = vmul.f32 %v7768_v7, %v7684_v52  ;;  %v5534_v29 = vclamps-f32 %v2056_v48, 1.0  ;;  %v2210_v9 = vsel %vm7793_vm8, %v7631_v58, %v2206_v30  ;;  %v2333_v62 = vand.u32 2147483648, %v7612_v24 }
 0x271   : > { %v2673_v34 = vadd.f32 0.001143296, %v2672_v38  ;;  %v7810_v44 = vmul.f32 0.5, %v7570_v0  ;;  %v3143_v51 = vmul.f32 %v3142_v35, %v7694_v31  ;;  %v3262_v63 = vadd.f32 0.00028619796, %v3261_v46 }
 0x272   : > { %1480 = vmatmul.f32.gmra.mxu0 %v10706_v13  ;;  %1610 = vmatmul.f32.gmra.mxu2 %v10706_v13  ;;  %v3301_v3 = vmul.f32 2.1237322e-06, %v7780_v56  ;;  %v5537_v48 = vclamps-f32 %v2176_v50, 1.0  ;;  %vm2328_vm9 = vweird.f32 %v7692_v41  ;;  %v7817_v6 = vadd.f32 1.0, %v2520_v32  ;;  %v4655_v13 = vld [vmem:[#allocation13 + $0x3a0] sm:$0xff] }
 0x273   : > { %10707 = vst [vmem:[#allocation55_spill] sm:$0xff] %v7810_v44  ;;  %1545 = vmatmul.f32.gmra.mxu1 %v10708_v21  ;;  %1675 = vmatmul.f32.gmra.mxu3 %v10708_v21  ;;  %v2635_v58 = vadd.f32 0.014752088, %v2634_v43  ;;  %v3105_v30 = vmul.f32 %v3104_v10, %v7644_v17  ;;  %v2215_v0 = vsel %vm7758_vm6, %v2214_v54, %v2210_v9  ;;  %v2364_v38 = vsub.f32 1.0, %v2363_v5  ;;  %v4559_v54 = vld [vmem:[#allocation13 + $0xa0] sm:$0xff] }
 0x274   : > { %v2326_v35 = vadd.f32 %v7692_v41, %v2325_v8  ;;  %v7823_v46 = vpop.eup %5773  ;;  %v4383_v44 = vadd.f32 1.0, %v5533_v16  ;;  %v4384_v40 = vadd.f32 1.0, %v5534_v29  ;;  %vm7825_vm10 = vcmp.eq.f32.partialorder %v2331_v23, 8.507059e+37  ;;  %4867 = vmatpush.msra.mxu3 %v4655_v13  ;;  %v4591_v8 = vld [vmem:[#allocation13 + $0x1a0] sm:$0xff]  ;;  %4672 = vmatpush.msra.mxu0 %v4559_v54  ;;  %v4621_v16 = vld [vmem:[#allocation13 + $0x290] sm:$0xff]  ;;  %v10715_v13 = vld [vmem:[#allocation46_spill] sm:$0xff] }
 0x275   : > { %v7770_v25 = vpop.f32.mrf.mxu2  ;;  %v2674_v50 = vmul.f32 %v2673_v34, %v7381_v61  ;;  %v3144_v32 = vadd.f32 0.0036580483, %v3143_v51  ;;  %v3263_v43 = vmul.f32 %v3262_v63, %v7748_v22  ;;  %v3302_v10 = vadd.f32 0.00028619796, %v3301_v3  ;;  %4737 = vmatpush.msra.mxu1 %v4591_v8  ;;  %4803 = vmatpush.msra.mxu2 %v4621_v16 }
 0x276   : > { %v7782_v57 = vpop.f32.mrf.mxu3  ;;  %vm2327_vm11 = vweird.f32 %v7612_v24  ;;  %v4387_v23 = vadd.f32 1.0, %v5537_v48  ;;  %v2216_v29 = vmul.f32 %v2215_v0, %v7483_v1  ;;  %5775 = vrcp.f32 %v7817_v6  ;;  %v4557_v24 = vld [vmem:[#allocation13 + $0x90] sm:$0xff]  ;;  %v10714_v48 = vld [vmem:[#allocation38_spill] sm:$0xff] }
 0x277   : > { %v7789_v36 = vpop.f32.mrf.mxu0  ;;  %vm7839_vm12 = vmor %vm2327_vm11, %vm2328_vm9  ;;  %v2636_v3 = vmul.f32 %v2635_v58, %v7366_v15  ;;  %v3106_v34 = vadd.f32 0.05243302, %v3105_v30  ;;  %v2365_v63 = vmul.f32 %v7768_v7, %v2364_v38  ;;  %v2483_v1 = vmul.f32 %v7823_v46, %v7762_v47  ;;  %v4589_v0 = vld [vmem:[#allocation13 + $0x190] sm:$0xff]  ;;  %v10717_v58 = vld [vmem:[#allocation49_spill] sm:$0xff]  ;;  %4673 = vmatpush.msra.mxu0 %v4557_v24 }
 0x278   : > { %v7803_v42 = vpop.f32.mrf.mxu1  ;;  %v2330_v51 = vsel %vm7839_vm12, %v7692_v41, %v2326_v35  ;;  %v7854_v54 = vmul.f32 %v4383_v44, %v10715_v13  ;;  %v7857_v30 = vmul.f32 %v4384_v40, %v10717_v58  ;;  %v2334_v8 = vor.u32 1.1754944e-38, %v2333_v62  ;;  %v4555_v44 = vld [vmem:[#allocation13 + $0x80] sm:$0xff]  ;;  %4738 = vmatpush.msra.mxu1 %v4589_v0  ;;  %v10722_v62 = vld [vmem:[#allocation50_spill] sm:$0xff]  ;;  %v4553_v58 = vld [vmem:[#allocation13 + $0x70] sm:$0xff] }
 0x279   : > { %v2675_v16 = vadd.f32 0.014752088, %v2674_v50  ;;  %v7860_v41 = vmul.f32 0.5, %v7600_v26  ;;  %v3145_v35 = vmul.f32 %v3144_v32, %v7694_v31  ;;  %v3264_v38 = vadd.f32 0.0036580483, %v3263_v43  ;;  %v4587_v40 = vld [vmem:[#allocation13 + $0x180] sm:$0xff]  ;;  %4674 = vmatpush.msra.mxu0 %v4555_v44 }
 0x27a   : > { %1483 = vmatmul.f32.gmra.mxu0 %v10714_v48  ;;  %1613 = vmatmul.f32.gmra.mxu2 %v10714_v48  ;;  %10716 = vst [vmem:[#allocation37_spill] sm:$0xff] %v7854_v54  ;;  %v3303_v9 = vmul.f32 %v3302_v10, %v7780_v56  ;;  %v7871_v26 = vmul.f32 %v4387_v23, %v10722_v62  ;;  %v5538_v50 = vclamps-f32 %v2216_v29, 1.0  ;;  %v2637_v43 = vadd.f32 0.112945676, %v2636_v3  ;;  %v4585_v24 = vld [vmem:[#allocation13 + $0x170] sm:$0xff] }
 0x27b   : > { %10718 = vst [vmem:[#allocation38_spill] sm:$0xff] %v7857_v30  ;;  %v2335_v32 = vsel %vm7825_vm10, %v2334_v8, %v2330_v51  ;;  %v3107_v10 = vmul.f32 %v3106_v34, %v7644_v17  ;;  %vm2368_vm13 = vweird.f32 %v7768_v7  ;;  %4739 = vmatpush.msra.mxu1 %v4587_v40  ;;  %vm2367_vm14 = vweird.f32 %v7684_v52  ;;  %4675 = vmatpush.msra.mxu0 %v4553_v58 }
 0x27c   : > { %10719 = vst [vmem:[#allocation46_spill] sm:$0xff] %v7860_v41  ;;  %v2484_v41 = vsub.f32 1.0, %v2483_v1  ;;  %v2371_v23 = vand.u32 2147483647, %v7684_v52  ;;  %v2373_v21 = vand.u32 2147483648, %v7684_v52  ;;  %v2676_v29 = vmul.f32 %v2675_v16, %v7381_v61  ;;  %vm7894_vm15 = vmor %vm2367_vm14, %vm2368_vm13 }
 0x27d   : > { %v7831_v28 = vpop.f32.mrf.mxu2  ;;  %v3146_v3 = vadd.f32 0.05243302, %v3145_v35  ;;  %v3265_v34 = vmul.f32 %v3264_v38, %v7748_v22  ;;  %v3304_v51 = vadd.f32 0.0036580483, %v3303_v9  ;;  %v2336_v1 = vmul.f32 %v2335_v32, %v7516_v49  ;;  %4740 = vmatpush.msra.mxu1 %v4585_v24  ;;  %v4583_v38 = vld [vmem:[#allocation13 + $0x160] sm:$0xff]  ;;  %v10730_v24 = vld [vmem:[#allocation42_spill] sm:$0xff] }
 0x27e   : > { %v7834_v5 = vpop.f32.mrf.mxu3  ;;  %v1219_v0 = vadd.f32 %v7627_v11, %v6864_v2  ;;  %v1349_v8 = vadd.f32 %v7681_v19, %v6893_v39  ;;  %v7890_v44 = vadd.f32 1.0, %v5538_v50  ;;  %v2638_v16 = vmul.f32 %v2637_v43, %v7366_v15  ;;  %v4551_v11 = vld [vmem:[#allocation13 + $0x60] sm:$0xff] }
 0x27f   : > { %10711 = vst [vmem:[#allocation36_spill] sm:$0xff] %v7834_v5  ;;  %v10720_v5 = vld [vmem:[#allocation39_spill] sm:$0xff]  ;;  %v7866_v48 = vpop.f32.mrf.mxu0  ;;  %v3108_v35 = vadd.f32 0.18741608, %v3107_v10  ;;  %v2485_v9 = vmul.f32 %v7823_v46, %v2484_v41  ;;  %v7908_v62 = vmul.f32 0.5, %v7633_v4  ;;  %v10727_v50 = vld [vmem:[#allocation41_spill] sm:$0xff]  ;;  %v3147_v41 = vmul.f32 %v3146_v3, %v7694_v31  ;;  %4676 = vmatpush.msra.mxu0 %v4551_v11  ;;  %4741 = vmatpush.msra.mxu1 %v4583_v38 }
 0x280   : > { %1548 = vmatmul.f32.gmra.mxu1 %v10720_v5  ;;  %1678 = vmatmul.f32.gmra.mxu3 %v10720_v5  ;;  %v7868_v13 = vpop.f32.mrf.mxu1  ;;  %10723 = vst [vmem:[#allocation39_spill] sm:$0xff] %v7871_v26  ;;  %v2366_v5 = vadd.f32 %v7768_v7, %v2365_v63  ;;  %v4653_v63 = vld [vmem:[#allocation13 + $0x390] sm:$0xff]  ;;  %vm7914_vm0 = vcmp.eq.f32.partialorder %v2371_v23, 8.507059e+37  ;;  %v2374_v10 = vor.u32 1.1754944e-38, %v2373_v21  ;;  %v3266_v58 = vadd.f32 0.05243302, %v3265_v34 }
 0x281   : > { %10721 = vst [vmem:[#allocation49_spill] sm:$0xff] %v7868_v13  ;;  %v7878_v13 = vpop.eup %5775  ;;  %4868 = vmatpush.msra.mxu3 %v4653_v63  ;;  %v4549_v4 = vld [vmem:[#allocation13 + $0x50] sm:$0xff]  ;;  %v5541_v52 = vclamps-f32 %v2336_v1, 1.0  ;;  %v7926_v23 = vadd.f32 %v7687_v37, %v1349_v8  ;;  %v4619_v21 = vld [vmem:[#allocation13 + $0x280] sm:$0xff]  ;;  %v2639_v3 = vadd.f32 0.4994258, %v2638_v16  ;;  %v3109_v34 = vmul.f32 %v3108_v35, %v7644_v17 }
 0x282   : > { %v2370_v19 = vsel %vm7894_vm15, %v7768_v7, %v2366_v5  ;;  %v2523_v40 = vmul.f32 %v7878_v13, %v7817_v6  ;;  %10726 = vst [vmem:[#allocation50_spill] sm:$0xff] %v7908_v62  ;;  %1486 = vmatmul.f32.gmra.mxu0 %v10727_v50  ;;  %1616 = vmatmul.f32.gmra.mxu2 %v10727_v50  ;;  %v2677_v7 = vadd.f32 0.112945676, %v2676_v29  ;;  %v4581_v63 = vld [vmem:[#allocation13 + $0x150] sm:$0xff]  ;;  %v4579_v1 = vld [vmem:[#allocation13 + $0x140] sm:$0xff]  ;;  %vm2488_vm1 = vweird.f32 %v7823_v46 }
 0x283   : > { %v3305_v5 = vmul.f32 %v3304_v51, %v7780_v56  ;;  %v7923_v50 = vadd.f32 %v7636_v27, %v1219_v0  ;;  %v2375_v29 = vsel %vm7914_vm0, %v2374_v10, %v2370_v19  ;;  %4804 = vmatpush.msra.mxu2 %v4619_v21  ;;  %v2486_v27 = vadd.f32 %v7823_v46, %v2485_v9  ;;  %v10734_v21 = vld [vmem:[#allocation44_spill] sm:$0xff] }
 0x284   : > { %v2524_v37 = vsub.f32 1.0, %v2523_v40  ;;  %4677 = vmatpush.msra.mxu0 %v4549_v4  ;;  %4742 = vmatpush.msra.mxu1 %v4581_v63  ;;  %vm2487_vm2 = vweird.f32 %v7762_v47  ;;  %v2491_v8 = vand.u32 2147483647, %v7762_v47  ;;  %v2493_v16 = vand.u32 2147483648, %v7762_v47 }
 0x285   : > { %v7899_v49 = vpop.f32.mrf.mxu2  ;;  %v2678_v35 = vmul.f32 %v2677_v7, %v7381_v61  ;;  %v3148_v11 = vadd.f32 0.18741608, %v3147_v41  ;;  %v3267_v38 = vmul.f32 %v3266_v58, %v7748_v22  ;;  %v3306_v19 = vadd.f32 0.05243302, %v3305_v5  ;;  %vm7953_vm3 = vmor %vm2487_vm2, %vm2488_vm1  ;;  %v4651_v58 = vld [vmem:[#allocation13 + $0x380] sm:$0xff]  ;;  %v4545_v5 = vld [vmem:[#allocation13 + $0x30] sm:$0xff] }
 0x286   : > { %v7912_v32 = vpop.f32.mrf.mxu3  ;;  %v2376_v9 = vmul.f32 %v2375_v29, %v7527_v53  ;;  %v7944_v40 = vmul.f32 0.70710677, %v7923_v50  ;;  %v7947_v43 = vmul.f32 0.70710677, %v7926_v23  ;;  %4743 = vmatpush.msra.mxu1 %v4579_v1  ;;  %v7949_v10 = vadd.f32 1.0, %v5541_v52  ;;  %v10737_v1 = vld [vmem:[#allocation45_spill] sm:$0xff]  ;;  %4869 = vmatpush.msra.mxu3 %v4651_v58 }
 0x287   : > { %v7931_v51 = vpop.f32.mrf.mxu0  ;;  %v2640_v7 = vmul.f32 %v2639_v3, %v7366_v15  ;;  %v7958_v41 = vadd.f32 1.1283791, %v3109_v34  ;;  %v1222_v53 = vadd.f32 %v7716_v12, %v6864_v2  ;;  %v2490_v4 = vsel %vm7953_vm3, %v7823_v46, %v2486_v27  ;;  %v4577_v15 = vld [vmem:[#allocation13 + $0x130] sm:$0xff]  ;;  %v4543_v27 = vld [vmem:[#allocation13 + $0x20] sm:$0xff] }
 0x288   : > { %1551 = vmatmul.f32.gmra.mxu1 %v10730_v24  ;;  %1681 = vmatmul.f32.gmra.mxu3 %v10730_v24  ;;  %v4547_v24 = vld [vmem:[#allocation13 + $0x40] sm:$0xff]  ;;  %v7935_v0 = vpop.f32.mrf.mxu1  ;;  %v2525_v63 = vmul.f32 %v7878_v13, %v2524_v37  ;;  %v7967_v52 = vmul.f32 0.5, %v7675_v60  ;;  %vm7971_vm4 = vcmp.eq.f32.partialorder %v2491_v8, 8.507059e+37  ;;  %v2494_v12 = vor.u32 1.1754944e-38, %v2493_v16 }
 0x289   : > { %4678 = vmatpush.msra.mxu0 %v4547_v24  ;;  %v2679_v3 = vadd.f32 0.4994258, %v2678_v35  ;;  %v3149_v34 = vmul.f32 %v3148_v11, %v7694_v31  ;;  %v3268_v24 = vadd.f32 0.18741608, %v3267_v38  ;;  %v3307_v46 = vmul.f32 %v3306_v19, %v7780_v56  ;;  %v4575_v11 = vld [vmem:[#allocation13 + $0x120] sm:$0xff]  ;;  %4744 = vmatpush.msra.mxu1 %v4577_v15 }
 0x28a   : > { %10733 = vst [vmem:[#allocation41_spill] sm:$0xff] %v7967_v52  ;;  %1489 = vmatmul.f32.gmra.mxu0 %v10734_v21  ;;  %1619 = vmatmul.f32.gmra.mxu2 %v10734_v21  ;;  %v5542_v37 = vclamps-f32 %v2376_v9, 1.0  ;;  %v3419_v8 = vmul.f32 %v7944_v40, %v7944_v40  ;;  %v3459_v16 = vmul.f32 %v7947_v43, %v7947_v43  ;;  %v7989_v19 = vadd.f32 1.0, %v2640_v7  ;;  %v4541_v9 = vld [vmem:[#allocation13 + $0x10] sm:$0xff] }
 0x28b   : > { %4679 = vmatpush.msra.mxu0 %v4545_v5  ;;  %v2495_v38 = vsel %vm7971_vm4, %v2494_v12, %v2490_v4  ;;  %v7992_v47 = vadd.f32 %v7722_v55, %v1222_v53  ;;  %v2526_v21 = vadd.f32 %v7878_v13, %v2525_v63  ;;  %vm2527_vm5 = vweird.f32 %v7817_v6  ;;  %v4573_v5 = vld [vmem:[#allocation13 + $0x110] sm:$0xff]  ;;  %4745 = vmatpush.msra.mxu1 %v4575_v11 }
 0x28c   : > { %vm2528_vm6 = vweird.f32 %v7878_v13  ;;  %v1352_v58 = vadd.f32 %v7770_v25, %v6893_v39  ;;  %v2531_v4 = vand.u32 2147483647, %v7817_v6  ;;  %v2533_v7 = vand.u32 2147483648, %v7817_v6  ;;  %v4617_v63 = vld [vmem:[#allocation13 + $0x270] sm:$0xff] }
 0x28d   : > { %v7979_v60 = vpop.f32.mrf.mxu2  ;;  %4680 = vmatpush.msra.mxu0 %v4543_v27  ;;  %v2680_v55 = vmul.f32 %v2679_v3, %v7381_v61  ;;  %v3269_v53 = vmul.f32 %v3268_v24, %v7748_v22  ;;  %v3308_v15 = vadd.f32 0.18741608, %v3307_v46  ;;  %v2496_v12 = vmul.f32 %v2495_v38, %v7538_v33  ;;  %4805 = vmatpush.msra.mxu2 %v4617_v63  ;;  %vm8017_vm7 = vmor %vm2527_vm5, %vm2528_vm6  ;;  %v4539_v46 = vld [vmem:[#allocation13] sm:$0xff]  ;;  %v10742_v38 = vld [vmem:[#allocation47_spill] sm:$0xff] }
 0x28e   : > { %v7985_v35 = vpop.f32.mrf.mxu3  ;;  %v8007_v25 = vmin.f32 %v3419_v8, 16.0  ;;  %v8009_v27 = vmin.f32 %v3459_v16, 16.0  ;;  %v4392_v61 = vadd.f32 1.0, %v5542_v37  ;;  %5777 = vrcp.f32 %v7989_v19  ;;  %4746 = vmatpush.msra.mxu1 %v4573_v5  ;;  %v4571_v8 = vld [vmem:[#allocation13 + $0x100] sm:$0xff]  ;;  %v10740_v16 = vld [vmem:[#allocation51_spill] sm:$0xff] }
 0x28f   : > { %v8003_v29 = vpop.f32.mrf.mxu0  ;;  %4681 = vmatpush.msra.mxu0 %v4541_v9  ;;  %v3150_v33 = vadd.f32 1.1283791, %v3149_v34  ;;  %v8023_v24 = vmul.f32 0.70710677, %v7992_v47  ;;  %v8027_v37 = vmul.f32 %v7890_v44, %v10740_v16  ;;  %v2530_v6 = vsel %vm8017_vm7, %v7878_v13, %v2526_v21  ;;  %v10745_v16 = vld [vmem:[#allocation48_spill] sm:$0xff]  ;;  %v10750_v34 = vld [vmem:[#allocation54_spill] sm:$0xff] }
 0x290   : > { %1554 = vmatmul.f32.gmra.mxu1 %v10737_v1  ;;  %1684 = vmatmul.f32.gmra.mxu3 %v10737_v1  ;;  %v2792_v1 = vmul.f32 3.8918573e-05, %v7390_v14  ;;  %v8011_v52 = vpop.f32.mrf.mxu1  ;;  %v8033_v11 = vadd.f32 %v7782_v57, %v1352_v58  ;;  %vm8037_vm8 = vcmp.eq.f32.partialorder %v2531_v4, 8.507059e+37  ;;  %v2534_v9 = vor.u32 1.1754944e-38, %v2533_v7  ;;  %v4649_v4 = vld [vmem:[#allocation13 + $0x370] sm:$0xff] }
 0x291   : > { %10741 = vst [vmem:[#allocation42_spill] sm:$0xff] %v8027_v37  ;;  %v8041_v5 = vadd.f32 1.0, %v2680_v55  ;;  %v3270_v44 = vadd.f32 1.1283791, %v3269_v53  ;;  %v3309_v63 = vmul.f32 %v3308_v15, %v7780_v56  ;;  %v5545_v57 = vclamps-f32 %v2496_v12, 1.0  ;;  %4682 = vmatpush.msra.mxu0 %v4539_v46  ;;  %4747 = vmatpush.msra.mxu1 %v4571_v8 }
 0x292   : > { %1492 = vmatmul.f32.gmra.mxu0 %v10742_v38  ;;  %1622 = vmatmul.f32.gmra.mxu2 %v10742_v38  ;;  %v2793_v13 = vadd.f32 0.001143296, %v2792_v1  ;;  %v3421_v21 = vmul.f32 2.1237322e-06, %v8007_v25  ;;  %v3461_v58 = vmul.f32 2.1237322e-06, %v8009_v27  ;;  %v2535_v7 = vsel %vm8037_vm8, %v2534_v9, %v2530_v6 }
 0x293   : > { %v5885_v3 = vld [vmem:[#allocation12] sm:$0xf]  ;;  %v8054_v55 = vmul.f32 %v7958_v41, %v7592_v20  ;;  %v3579_v53 = vmul.f32 %v8023_v24, %v8023_v24  ;;  %v1225_v15 = vadd.f32 %v7789_v36, %v6864_v2  ;;  %4870 = vmatpush.msra.mxu3 %v4649_v4  ;;  %v10747_v1 = vld [vmem:[#allocation53_spill] sm:$0xff]  ;;  %v8069_v6 = vmul.f32 %v3150_v33, %v7625_v59 }
 0x294   : > { %v8048_v38 = vperm.slane %v5885_v3, 2  ;;  %v8064_v46 = vmul.f32 %v7949_v10, %v10747_v1  ;;  %v8066_v8 = vpop.eup %5777  ;;  %v8072_v20 = vmul.f32 0.70710677, %v8033_v11  ;;  %v8077_v9 = vmul.f32 %v4392_v61, %v10750_v34 }
 0x295   : > { %10746 = vst [vmem:[#allocation44_spill] sm:$0xff] %v8054_v55  ;;  %v8060_v12 = vpop.f32.mrf.mxu2  ;;  %5779 = vrcp.f32 %v8041_v5  ;;  %v3310_v36 = vadd.f32 1.1283791, %v3309_v63  ;;  %v4395_v4 = vadd.f32 1.0, %v5545_v57  ;;  %v2536_v10 = vmul.f32 %v2535_v7, %v7556_v18 }
 0x296   : > { %10748 = vst [vmem:[#allocation45_spill] sm:$0xff] %v8064_v46  ;;  %v8074_v41 = vpop.f32.mrf.mxu3  ;;  %v2794_v1 = vmul.f32 %v2793_v13, %v7390_v14  ;;  %v8083_v59 = vmul.f32 %v3270_v44, %v7671_v45  ;;  %v3422_v33 = vadd.f32 0.00028619796, %v3421_v21  ;;  %v3462_v62 = vadd.f32 0.00028619796, %v3461_v58  ;;  %v10755_v21 = vld [vmem:[#allocation56_spill] sm:$0xff] }
 0x297   : > { %10749 = vst [vmem:[#allocation51_spill] sm:$0xff] %v8069_v6  ;;  %v8087_v55 = vmul.f32 0.5, %v7923_v50  ;;  %v8089_v61 = vmin.f32 %v3579_v53, 16.0  ;;  %v8092_v63 = vadd.f32 %v7803_v42, %v1225_v15  ;;  %v2643_v18 = vmul.f32 %v8066_v8, %v7989_v19  ;;  %v10756_v58 = vld [vmem:[#allocation33_spill] sm:$0xff]  ;;  %v10758_v42 = vld [vmem:[#allocation40_spill] sm:$0xff] }
 0x298   : > { %1557 = vmatmul.f32.gmra.mxu1 %v10745_v16  ;;  %1687 = vmatmul.f32.gmra.mxu3 %v10745_v16  ;;  %10751 = vst [vmem:[#allocation47_spill] sm:$0xff] %v8077_v9  ;;  %v1448_v16 = vpop.f32.mrf.mxu0  ;;  %v1513_v57 = vpop.f32.mrf.mxu1  ;;  %v3619_v45 = vmul.f32 %v8072_v20, %v8072_v20  ;;  %v1355_v44 = vadd.f32 %v7831_v28, %v6893_v39  ;;  %v8103_v50 = vperm.slane %v5885_v3, 3  ;;  %v10759_v53 = vld [vmem:[#allocation57_spill] sm:$0xff]  ;;  %v5546_v34 = vclamps-f32 %v2536_v10, 1.0 }
 0x299   : > { %10752 = vst [vmem:[#allocation48_spill] sm:$0xff] %v8083_v59  ;;  %v1449_v6 = vadd.f32 %v1448_v16, %v8048_v38  ;;  %v8106_v7 = vmul.f32 %v3310_v36, %v10756_v58  ;;  %v8110_v15 = vmul.f32 %v4395_v4, %v10759_v53  ;;  %v2795_v16 = vadd.f32 0.014752088, %v2794_v1 }
 0x29a   : > { %10753 = vst [vmem:[#allocation53_spill] sm:$0xff] %v8087_v55  ;;  %4683 = vmatmul.f32.vlgmr.msra.gmra.mxu0 %v10755_v21  ;;  %v3423_v28 = vmul.f32 %v3422_v33, %v8007_v25  ;;  %v3463_v3 = vmul.f32 %v3462_v62, %v8009_v27  ;;  %v3581_v36 = vmul.f32 2.1237322e-06, %v8089_v61  ;;  %v8124_v58 = vmul.f32 0.70710677, %v8092_v63  ;;  %v10763_v33 = vld [vmem:[#allocation36_spill] sm:$0xff] }
 0x29b   : > { %v8100_v13 = vadd.f32 %v1513_v57, %v1449_v6  ;;  %10757 = vst [vmem:[#allocation33_spill] sm:$0xff] %v8106_v7  ;;  %v8112_v55 = vpop.eup %5779  ;;  %v8116_v6 = vmul.f32 0.5, %v7926_v23  ;;  %v2644_v10 = vsub.f32 1.0, %v2643_v18  ;;  %v2653_v1 = vand.u32 2147483648, %v7989_v19 }
 0x29c   : > { %10760 = vst [vmem:[#allocation57_spill] sm:$0xff] %v8110_v15  ;;  %v8127_v53 = vmin.f32 %v3619_v45, 16.0  ;;  %vm2647_vm9 = vweird.f32 %v7989_v19  ;;  %v2651_v7 = vand.u32 2147483647, %v7989_v19  ;;  %v2683_v18 = vmul.f32 %v8112_v55, %v8041_v5 }
 0x29d   : > { %10754 = vst [vmem:[#allocation54_spill] sm:$0xff] %v8100_v13  ;;  %v8120_v57 = vmul.f32 0.70710677, %v8100_v13  ;;  %v1578_v4 = vpop.f32.mrf.mxu2  ;;  %v2796_v45 = vmul.f32 %v2795_v16, %v7390_v14  ;;  %v3424_v59 = vadd.f32 0.0036580483, %v3423_v28  ;;  %v2654_v31 = vor.u32 1.1754944e-38, %v2653_v1 }
 0x29e   : > { %10761 = vst [vmem:[#allocation62_spill] sm:$0xff] %v8116_v6  ;;  %v1579_v23 = vadd.f32 %v1578_v4, %v8103_v50  ;;  %v1643_v21 = vpop.f32.mrf.mxu3  ;;  %v4396_v6 = vadd.f32 1.0, %v5546_v34  ;;  %v3464_v56 = vadd.f32 0.0036580483, %v3463_v3  ;;  %v3582_v22 = vadd.f32 0.00028619796, %v3581_v36 }
 0x29f   : > { %10762 = vst [vmem:[#allocation63_spill] sm:$0xff] %v8120_v57  ;;  %v1899_v62 = vmul.f32 %v8120_v57, %v8120_v57  ;;  %v3739_v4 = vmul.f32 %v8124_v58, %v8124_v58  ;;  %v2645_v34 = vmul.f32 %v8066_v8, %v2644_v10  ;;  %v8148_v17 = vmul.f32 0.5, %v7992_v47  ;;  %v10767_v3 = vld [vmem:[#allocation21_spill] sm:$0xff] }
 0x2a0   : > { %4748 = vmatmul.f32.vlgmr.msra.gmra.mxu1 %v10758_v42  ;;  %v8130_v42 = vadd.f32 %v10763_v33, %v1355_v44  ;;  %v8142_v33 = vadd.f32 %v1643_v21, %v1579_v23  ;;  %v3621_v13 = vmul.f32 2.1237322e-06, %v8127_v53  ;;  %v1228_v28 = vadd.f32 %v7866_v48, %v6864_v2 }
 0x2a1   : > { %v8140_v44 = vmin.f32 %v1899_v62, 16.0  ;;  %10765 = vst [vmem:[#allocation64_spill] sm:$0xff] %v8148_v17  ;;  %v8160_v36 = vmul.f32 %v4396_v6, %v10767_v3  ;;  %v2684_v10 = vsub.f32 1.0, %v2683_v18  ;;  %v8162_v47 = vadd.f32 0.112945676, %v2796_v45 }
 0x2a2   : > { %10764 = vst [vmem:[#allocation36_spill] sm:$0xff] %v8142_v33  ;;  %v8152_v16 = vmul.f32 0.70710677, %v8130_v42  ;;  %4686 = vmatmul.f32.gmra.mxu0 %v7854_v54  ;;  %v3425_v1 = vmul.f32 %v3424_v59, %v8007_v25  ;;  %v3465_v62 = vmul.f32 %v3464_v56, %v8009_v27  ;;  %v8167_v23 = vmul.f32 0.70710677, %v8142_v33  ;;  %v10772_v59 = vld [vmem:[#allocation49_spill] sm:$0xff] }
 0x2a3   : > { %v1912_v21 = vmul.f32 3.8918573e-05, %v8140_v44  ;;  %10768 = vst [vmem:[#allocation21_spill] sm:$0xff] %v8160_v36  ;;  %vm2648_vm10 = vweird.f32 %v8066_v8  ;;  %vm8170_vm11 = vcmp.eq.f32.partialorder %v2651_v7, 8.507059e+37  ;;  %v8175_v6 = vmin.f32 %v3739_v4, 16.0 }
 0x2a4   : > { %10766 = vst [vmem:[#allocation65_spill] sm:$0xff] %v8152_v16  ;;  %v2646_v45 = vadd.f32 %v8066_v8, %v2645_v34  ;;  %v3622_v3 = vadd.f32 0.00028619796, %v3621_v13  ;;  %v3779_v56 = vmul.f32 %v8152_v16, %v8152_v16  ;;  %v8181_v54 = vadd.f32 %v10772_v59, %v1228_v28  ;;  %vm8196_vm12 = vmor %vm2647_vm9, %vm2648_vm10  ;;  %v4615_v16 = vld [vmem:[#allocation13 + $0x260] sm:$0xff] }
 0x2a5   : > { %10769 = vst [vmem:[#allocation66_spill] sm:$0xff] %v8167_v23  ;;  %v1913_v18 = vadd.f32 0.001143296, %v1912_v21  ;;  %v1939_v7 = vmul.f32 %v8167_v23, %v8167_v23  ;;  %v1358_v17 = vadd.f32 %v7899_v49, %v6893_v39  ;;  %v2685_v4 = vmul.f32 %v8112_v55, %v2684_v10  ;;  %4806 = vmatpush.msra.mxu2 %v4615_v16 }
 0x2a6   : > { %v2691_v21 = vand.u32 2147483647, %v8041_v5  ;;  %v3426_v34 = vadd.f32 0.05243302, %v3425_v1  ;;  %v3466_v13 = vadd.f32 0.05243302, %v3465_v62  ;;  %vm2687_vm13 = vweird.f32 %v8041_v5 }
 0x2a7   : > { %v8190_v33 = vmin.f32 %v1939_v7, 16.0  ;;  %v2650_v1 = vsel %vm8196_vm12, %v8066_v8, %v2646_v45  ;;  %v3623_v62 = vmul.f32 %v3622_v3, %v8127_v53  ;;  %v8206_v59 = vmin.f32 %v3779_v56, 16.0 }
 0x2a8   : > { %4751 = vmatmul.f32.gmra.mxu1 %v7857_v30  ;;  %v3583_v30 = vmul.f32 %v3582_v22, %v8089_v61  ;;  %v1914_v22 = vmul.f32 %v1913_v18, %v8140_v44  ;;  %v3741_v18 = vmul.f32 2.1237322e-06, %v8175_v6  ;;  %v8209_v19 = vmul.f32 0.70710677, %v8181_v54 }
 0x2a9   : > { %10775 = vst [vmem:[#allocation49_spill] sm:$0xff] %v8206_v59  ;;  %v1952_v7 = vmul.f32 3.8918573e-05, %v8190_v33  ;;  %v2686_v8 = vadd.f32 %v8112_v55, %v2685_v4  ;;  %vm2688_vm14 = vweird.f32 %v8112_v55  ;;  %v3427_v45 = vmul.f32 %v3426_v34, %v8007_v25 }
 0x2aa   : > { %v3584_v49 = vadd.f32 0.0036580483, %v3583_v30  ;;  %v1915_v10 = vadd.f32 0.014752088, %v1914_v22  ;;  %10776 = vst [vmem:[#allocation67_spill] sm:$0xff] %v8209_v19  ;;  %4689 = vmatmul.f32.gmra.mxu0 %v7871_v26  ;;  %v8214_v30 = vadd.f32 %v7912_v32, %v1358_v17  ;;  %v8222_v3 = vmul.f32 0.5, %v8033_v11  ;;  %vm8235_vm15 = vmor %vm2687_vm13, %vm2688_vm14 }
 0x2ab   : > { %v1953_v56 = vadd.f32 0.001143296, %v1952_v7  ;;  %v2693_v28 = vand.u32 2147483648, %v8041_v5  ;;  %v3742_v17 = vadd.f32 0.00028619796, %v3741_v18  ;;  %v3899_v34 = vmul.f32 %v8209_v19, %v8209_v19  ;;  %v10780_v5 = vld [vmem:[#allocation27_spill] sm:$0xff] }
 0x2ac   : > { %v1916_v22 = vmul.f32 %v1915_v10, %v8140_v44  ;;  %10777 = vst [vmem:[#allocation68_spill] sm:$0xff] %v8222_v3  ;;  %v3585_v26 = vmul.f32 %v3584_v49, %v8089_v61  ;;  %v2655_v10 = vsel %vm8170_vm11, %v2654_v31, %v2650_v1  ;;  %v3781_v4 = vmul.f32 2.1237322e-06, %v8206_v59  ;;  %v10782_v7 = vld [vmem:[#allocation28_spill] sm:$0xff] }
 0x2ad   : > { %v1954_v11 = vmul.f32 %v1953_v56, %v8190_v33  ;;  %v3624_v49 = vadd.f32 0.0036580483, %v3623_v62  ;;  %v8240_v48 = vmul.f32 0.70710677, %v8214_v30  ;;  %v1231_v31 = vadd.f32 %v7931_v51, %v6864_v2 }
 0x2ae   : > { %v1917_v32 = vadd.f32 0.112945676, %v1916_v22  ;;  %v2656_v22 = vmul.f32 %v2655_v10, %v10780_v5  ;;  %v2694_v56 = vor.u32 1.1754944e-38, %v2693_v28  ;;  %v3428_v3 = vadd.f32 0.18741608, %v3427_v45 }
 0x2af   : > { %v1955_v1 = vadd.f32 0.014752088, %v1954_v11  ;;  %v3586_v19 = vadd.f32 0.05243302, %v3585_v26  ;;  %v3743_v62 = vmul.f32 %v3742_v17, %v8175_v6  ;;  %vm2692_vm0 = vcmp.eq.f32.partialorder %v2691_v21, 8.507059e+37  ;;  %v4613_v11 = vld [vmem:[#allocation13 + $0x250] sm:$0xff] }
 0x2b0   : > { %4754 = vmatmul.f32.gmra.mxu1 %v8027_v37  ;;  %v3467_v37 = vmul.f32 %v3466_v13, %v8009_v27  ;;  %v2690_v13 = vsel %vm8235_vm15, %v8112_v55, %v2686_v8  ;;  %v1918_v18 = vmul.f32 %v1917_v32, %v8140_v44  ;;  %v3782_v23 = vadd.f32 0.00028619796, %v3781_v4  ;;  %4807 = vmatpush.msra.mxu2 %v4613_v11 }
 0x2b1   : > { %v8250_v57 = vmin.f32 %v3899_v34, 16.0  ;;  %v1956_v51 = vmul.f32 %v1955_v1, %v8190_v33  ;;  %v2695_v16 = vsel %vm2692_vm0, %v2694_v56, %v2690_v13  ;;  %v3625_v8 = vmul.f32 %v3624_v49, %v8127_v53  ;;  %v4647_v34 = vld [vmem:[#allocation13 + $0x360] sm:$0xff] }
 0x2b2   : > { %4692 = vmatmul.f32.gmra.mxu0 %v8064_v46  ;;  %v8254_v55 = vadd.f32 0.18741608, %v3467_v37  ;;  %v3939_v28 = vmul.f32 %v8240_v48, %v8240_v48  ;;  %v8260_v26 = vadd.f32 %v7935_v0, %v1231_v31  ;;  %v1361_v21 = vadd.f32 %v7979_v60, %v6893_v39  ;;  %4871 = vmatpush.msra.mxu3 %v4647_v34  ;;  %v4611_v1 = vld [vmem:[#allocation13 + $0x240] sm:$0xff] }
 0x2b3   : > { %10781 = vst [vmem:[#allocation27_spill] sm:$0xff] %v8250_v57  ;;  %v1919_v45 = vadd.f32 0.4994258, %v1918_v18  ;;  %v1957_v17 = vadd.f32 0.112945676, %v1956_v51  ;;  %v5549_v32 = vclamps-f32 %v2656_v22, 1.0  ;;  %v3587_v10 = vmul.f32 %v3586_v19, %v8089_v61  ;;  %4808 = vmatpush.msra.mxu2 %v4611_v1 }
 0x2b4   : > { %v3744_v37 = vadd.f32 0.0036580483, %v3743_v62  ;;  %v1901_v4 = vmul.f32 2.1237322e-06, %v8140_v44  ;;  %v2696_v49 = vmul.f32 %v2695_v16, %v10782_v7  ;;  %v3783_v0 = vmul.f32 %v3782_v23, %v8206_v59  ;;  %v4645_v18 = vld [vmem:[#allocation13 + $0x350] sm:$0xff]  ;;  %v10785_v1 = vld [vmem:[#allocation22_spill] sm:$0xff] }
 0x2b5   : > { %v3901_v31 = vmul.f32 2.1237322e-06, %v8250_v57  ;;  %v1941_v13 = vmul.f32 2.1237322e-06, %v8190_v33  ;;  %v1958_v60 = vmul.f32 %v1957_v17, %v8190_v33  ;;  %v3626_v19 = vadd.f32 0.05243302, %v3625_v8  ;;  %4872 = vmatpush.msra.mxu3 %v4645_v18 }
 0x2b6   : > { %v8272_v5 = vmin.f32 %v3939_v28, 16.0  ;;  %v8275_v22 = vmul.f32 0.70710677, %v8260_v26  ;;  %v2798_v56 = vmul.f32 %v8162_v47, %v7390_v14  ;;  %v8280_v23 = vadd.f32 %v7985_v35, %v1361_v21  ;;  %v4643_v21 = vld [vmem:[#allocation13 + $0x340] sm:$0xff] }
 0x2b7   : > { %v1234_v62 = vadd.f32 %v8003_v29, %v6864_v2  ;;  %v1920_v51 = vmul.f32 %v1919_v45, %v8140_v44  ;;  %v1959_v16 = vadd.f32 0.4994258, %v1958_v60  ;;  %v3745_v8 = vmul.f32 %v3744_v37, %v8175_v6  ;;  %4873 = vmatpush.msra.mxu3 %v4643_v21 }
 0x2b8   : > { %4757 = vmatmul.f32.gmra.mxu1 %v8077_v9  ;;  %10783 = vst [vmem:[#allocation28_spill] sm:$0xff] %v8272_v5  ;;  %v1902_v28 = vadd.f32 0.00028619796, %v1901_v4  ;;  %v4399_v17 = vadd.f32 1.0, %v5549_v32  ;;  %v5550_v34 = vclamps-f32 %v2696_v49, 1.0  ;;  %v3429_v35 = vmul.f32 %v3428_v3, %v8007_v25 }
 0x2b9   : > { %v3784_v11 = vadd.f32 0.0036580483, %v3783_v0  ;;  %v3902_v7 = vadd.f32 0.00028619796, %v3901_v31  ;;  %v1942_v9 = vadd.f32 0.00028619796, %v1941_v13  ;;  %v1960_v47 = vmul.f32 %v1959_v16, %v8190_v33 }
 0x2ba   : > { %4695 = vmatmul.f32.gmra.mxu0 %v8110_v15  ;;  %v8290_v2 = vmul.f32 0.5, %v8092_v63  ;;  %v3941_v29 = vmul.f32 2.1237322e-06, %v8272_v5  ;;  %v2799_v45 = vadd.f32 0.4994258, %v2798_v56  ;;  %v4059_v32 = vmul.f32 %v8275_v22, %v8275_v22  ;;  %v4609_v16 = vld [vmem:[#allocation13 + $0x230] sm:$0xff] }
 0x2bb   : > { %v8297_v37 = vmul.f32 0.70710677, %v8280_v23  ;;  %v8300_v4 = vadd.f32 %v8011_v52, %v1234_v62  ;;  %v8302_v49 = vadd.f32 1.0, %v1920_v51  ;;  %v3588_v63 = vadd.f32 0.18741608, %v3587_v10  ;;  %4809 = vmatpush.msra.mxu2 %v4609_v16 }
 0x2bc   : > { %10784 = vst [vmem:[#allocation69_spill] sm:$0xff] %v8290_v2  ;;  %v1903_v3 = vmul.f32 %v1902_v28, %v8140_v44  ;;  %v8305_v0 = vadd.f32 1.0, %v1960_v47  ;;  %v4400_v31 = vadd.f32 1.0, %v5550_v34  ;;  %v3627_v13 = vmul.f32 %v3626_v19, %v8127_v53 }
 0x2bd   : > { %v3746_v60 = vadd.f32 0.05243302, %v3745_v8  ;;  %v1943_v18 = vmul.f32 %v1942_v9, %v8190_v33  ;;  %v8310_v56 = vmul.f32 %v4399_v17, %v10785_v1  ;;  %v3785_v52 = vmul.f32 %v3784_v11, %v8206_v59  ;;  %v10788_v17 = vld [vmem:[#allocation23_spill] sm:$0xff] }
 0x2be   : > { %v3903_v62 = vmul.f32 %v3902_v7, %v8250_v57  ;;  %v3942_v51 = vadd.f32 0.00028619796, %v3941_v29  ;;  %v2800_v10 = vmul.f32 %v2799_v45, %v7390_v14  ;;  %v8315_v28 = vmin.f32 %v4059_v32, 16.0 }
 0x2bf   : > { %10786 = vst [vmem:[#allocation22_spill] sm:$0xff] %v8310_v56  ;;  %v4099_v34 = vmul.f32 %v8297_v37, %v8297_v37  ;;  %v8320_v19 = vmul.f32 0.70710677, %v8300_v4  ;;  %5781 = vrcp.f32 %v8302_v49  ;;  %v1364_v9 = vadd.f32 %v8060_v12, %v6893_v39 }
 0x2c0   : > { %4760 = vmatmul.f32.gmra.mxu1 %v8160_v36  ;;  %10787 = vst [vmem:[#allocation70_spill] sm:$0xff] %v8315_v28  ;;  %v1904_v8 = vadd.f32 0.0036580483, %v1903_v3  ;;  %5783 = vrcp.f32 %v8305_v0  ;;  %v8327_v11 = vmul.f32 %v4400_v31, %v10788_v17  ;;  %v3430_v14 = vadd.f32 1.1283791, %v3429_v35  ;;  %v4641_v31 = vld [vmem:[#allocation13 + $0x330] sm:$0xff] }
 0x2c1   : > { %v3469_v7 = vmul.f32 %v8254_v55, %v8009_v27  ;;  %v3747_v47 = vmul.f32 %v3746_v60, %v8175_v6  ;;  %v1944_v29 = vadd.f32 0.0036580483, %v1943_v18  ;;  %v3589_v21 = vmul.f32 %v3588_v63, %v8089_v61  ;;  %4874 = vmatpush.msra.mxu3 %v4641_v31 }
 0x2c2   : > { %10789 = vst [vmem:[#allocation23_spill] sm:$0xff] %v8327_v11  ;;  %4698 = vmatmul.f32.gmra.mxu0 %v8310_v56  ;;  %v3786_v45 = vadd.f32 0.05243302, %v3785_v52  ;;  %v3904_v32 = vadd.f32 0.0036580483, %v3903_v62  ;;  %v8335_v39 = vadd.f32 1.0, %v2800_v10  ;;  %v3943_v35 = vmul.f32 %v3942_v51, %v8272_v5  ;;  %v1451_v56 = vpop.f32.mrf.mxu0 }
 0x2c3   : > { %v8338_v12 = vmul.f32 0.5, %v8130_v42  ;;  %v4061_v55 = vmul.f32 2.1237322e-06, %v8315_v28  ;;  %v8342_v3 = vmin.f32 %v4099_v34, 16.0  ;;  %v3628_v60 = vadd.f32 0.18741608, %v3627_v13 }
 0x2c4   : > { %v4219_v63 = vmul.f32 %v8320_v19, %v8320_v19  ;;  %v8347_v18 = vadd.f32 %v8074_v41, %v1364_v9  ;;  %v1905_v1 = vmul.f32 %v1904_v8, %v8140_v44  ;;  %v3470_v42 = vadd.f32 1.1283791, %v3469_v7 }
 0x2c5   : > { %10790 = vst [vmem:[#allocation71_spill] sm:$0xff] %v8338_v12  ;;  %v8350_v52 = vpop.eup %5781  ;;  %v3748_v62 = vadd.f32 0.18741608, %v3747_v47  ;;  %v8353_v51 = vmul.f32 0.5, %v8181_v54  ;;  %v1945_v16 = vmul.f32 %v1944_v29, %v8190_v33  ;;  %v3590_v13 = vadd.f32 1.1283791, %v3589_v21 }
 0x2c6   : > { %10791 = vst [vmem:[#allocation72_spill] sm:$0xff] %v8342_v3  ;;  %v8356_v10 = vpop.eup %5783  ;;  %v3787_v34 = vmul.f32 %v3786_v45, %v8206_v59  ;;  %v3905_v41 = vmul.f32 %v3904_v32, %v8250_v57  ;;  %5785 = vrcp.f32 %v8335_v39  ;;  %v8362_v9 = vmul.f32 %v3430_v14, %v7944_v40  ;;  %v4607_v14 = vld [vmem:[#allocation13 + $0x220] sm:$0xff] }
 0x2c7   : > { %10792 = vst [vmem:[#allocation73_spill] sm:$0xff] %v8353_v51  ;;  %v3944_v8 = vadd.f32 0.0036580483, %v3943_v35  ;;  %v4062_v17 = vadd.f32 0.00028619796, %v4061_v55  ;;  %v3629_v54 = vmul.f32 %v3628_v60, %v8127_v53  ;;  %v8366_v47 = vmin.f32 %v4219_v63, 16.0  ;;  %4810 = vmatpush.msra.mxu2 %v4607_v14 }
 0x2c8   : > { %4763 = vmatmul.f32.gmra.mxu1 %v8327_v11  ;;  %v4101_v7 = vmul.f32 2.1237322e-06, %v8342_v3  ;;  %v8369_v29 = vmul.f32 0.70710677, %v8347_v18  ;;  %v1906_v21 = vadd.f32 0.05243302, %v1905_v1  ;;  %v3749_v45 = vmul.f32 %v3748_v62, %v8175_v6 }
 0x2c9   : > { %10793 = vst [vmem:[#allocation74_spill] sm:$0xff] %v8366_v47  ;;  %v1923_v32 = vmul.f32 %v8350_v52, %v8302_v49  ;;  %v1946_v31 = vadd.f32 0.05243302, %v1945_v16  ;;  %v1963_v40 = vmul.f32 %v8356_v10, %v8305_v0  ;;  %v8377_v35 = vmul.f32 %v3470_v42, %v7947_v43  ;;  %v4639_v51 = vld [vmem:[#allocation13 + $0x320] sm:$0xff] }
 0x2ca   : > { %v3788_v55 = vadd.f32 0.18741608, %v3787_v34  ;;  %v3906_v60 = vadd.f32 0.05243302, %v3905_v41  ;;  %v8380_v63 = vmul.f32 0.5, %v8214_v30  ;;  %v8383_v1 = vmul.f32 %v3590_v13, %v8023_v24  ;;  %4875 = vmatpush.msra.mxu3 %v4639_v51 }
 0x2cb   : > { %v3945_v62 = vmul.f32 %v3944_v8, %v8272_v5  ;;  %v4063_v16 = vmul.f32 %v4062_v17, %v8315_v28  ;;  %v4102_v11 = vadd.f32 0.00028619796, %v4101_v7  ;;  %v3630_v15 = vadd.f32 1.1283791, %v3629_v54 }
 0x2cc   : > { %10794 = vst [vmem:[#allocation75_spill] sm:$0xff] %v8380_v63  ;;  %v8387_v36 = vpop.eup %5785  ;;  %v4221_v43 = vmul.f32 2.1237322e-06, %v8366_v47  ;;  %v4259_v42 = vmul.f32 %v8369_v29, %v8369_v29  ;;  %v1907_v30 = vmul.f32 %v1906_v21, %v8140_v44  ;;  %v3750_v34 = vadd.f32 1.1283791, %v3749_v45 }
 0x2cd   : > { %10795 = vst [vmem:[#allocation76_spill] sm:$0xff] %v8383_v1  ;;  %v1924_v41 = vsub.f32 1.0, %v1923_v32  ;;  %v1947_v24 = vmul.f32 %v1946_v31, %v8190_v33  ;;  %v1964_v13 = vsub.f32 1.0, %v1963_v40  ;;  %v3789_v8 = vmul.f32 %v3788_v55, %v8206_v59 }
 0x2ce   : > { %v3907_v17 = vmul.f32 %v3906_v60, %v8250_v57  ;;  %v8397_v7 = vmul.f32 0.5, %v8260_v26  ;;  %v1452_v54 = vadd.f32 %v1451_v56, %v8048_v38  ;;  %v3946_v14 = vadd.f32 0.05243302, %v3945_v62  ;;  %v1516_v60 = vpop.f32.mrf.mxu1 }
 0x2cf   : > { %v4064_v46 = vadd.f32 0.0036580483, %v4063_v16  ;;  %v4103_v63 = vmul.f32 %v4102_v11, %v8342_v3  ;;  %v2803_v21 = vmul.f32 %v8387_v36, %v8335_v39  ;;  %v8404_v45 = vmul.f32 %v3630_v15, %v8072_v20 }
 0x2d0   : > { %10796 = vst [vmem:[#allocation77_spill] sm:$0xff] %v8397_v7  ;;  %v4222_v32 = vadd.f32 0.00028619796, %v4221_v43  ;;  %v8406_v31 = vmin.f32 %v4259_v42, 16.0  ;;  %v1908_v40 = vadd.f32 0.18741608, %v1907_v30  ;;  %v8409_v26 = vmul.f32 %v3750_v34, %v8124_v58 }
 0x2d1   : > { %10797 = vst [vmem:[#allocation78_spill] sm:$0xff] %v8404_v45  ;;  %v1925_v56 = vmul.f32 %v8350_v52, %v1924_v41  ;;  %v1948_v55 = vadd.f32 0.18741608, %v1947_v24  ;;  %v1965_v11 = vmul.f32 %v8356_v10, %v1964_v13  ;;  %v8413_v62 = vadd.f32 1.1283791, %v3789_v8  ;;  %v4605_v43 = vld [vmem:[#allocation13 + $0x210] sm:$0xff] }
 0x2d2   : > { %10798 = vst [vmem:[#allocation79_spill] sm:$0xff] %v8406_v31  ;;  %v3908_v16 = vadd.f32 0.18741608, %v3907_v17  ;;  %v8416_v20 = vmul.f32 0.5, %v8280_v23  ;;  %v8418_v15 = vadd.f32 %v1516_v60, %v1452_v54  ;;  %v3947_v51 = vmul.f32 %v3946_v14, %v8272_v5  ;;  %4811 = vmatpush.msra.mxu2 %v4605_v43  ;;  %v1646_v60 = vpop.f32.mrf.mxu3 }
 0x2d3   : > { %10799 = vst [vmem:[#allocation80_spill] sm:$0xff] %v8409_v26  ;;  %v4065_v58 = vmul.f32 %v4064_v46, %v8315_v28  ;;  %v4104_v42 = vadd.f32 0.0036580483, %v4103_v63  ;;  %v2804_v30 = vsub.f32 1.0, %v2803_v21  ;;  %v4223_v34 = vmul.f32 %v4222_v32, %v8366_v47  ;;  %v1581_v21 = vpop.f32.mrf.mxu2 }
 0x2d4   : > { %10800 = vst [vmem:[#allocation81_spill] sm:$0xff] %v8416_v20  ;;  %v4261_v41 = vmul.f32 2.1237322e-06, %v8406_v31  ;;  %v1909_v24 = vmul.f32 %v1908_v40, %v8140_v44  ;;  %vm1928_vm1 = vweird.f32 %v8350_v52  ;;  %v1926_v23 = vadd.f32 %v8350_v52, %v1925_v56  ;;  %v4637_v44 = vld [vmem:[#allocation13 + $0x310] sm:$0xff] }
 0x2d5   : > { %v1949_v13 = vmul.f32 %v1948_v55, %v8190_v33  ;;  %v1966_v8 = vadd.f32 %v8356_v10, %v1965_v11  ;;  %vm1968_vm2 = vweird.f32 %v8356_v10  ;;  %vm1927_vm3 = vweird.f32 %v8302_v49  ;;  %4876 = vmatpush.msra.mxu3 %v4637_v44  ;;  %v1454_v44 = vpop.f32.mrf.mxu0 }
 0x2d6   : > { %v1933_v46 = vand.u32 2147483648, %v8302_v49  ;;  %v1973_v63 = vand.u32 2147483648, %v8305_v0  ;;  %v8434_v17 = vmul.f32 0.70710677, %v8418_v15  ;;  %vm8436_vm4 = vmor %vm1927_vm3, %vm1928_vm1  ;;  %v1931_v33 = vand.u32 2147483647, %v8302_v49 }
 0x2d7   : > { %vm1967_vm5 = vweird.f32 %v8305_v0  ;;  %v1971_v14 = vand.u32 2147483647, %v8305_v0  ;;  %v2805_v32 = vmul.f32 %v8387_v36, %v2804_v30  ;;  %v4066_v40 = vadd.f32 0.05243302, %v4065_v58 }
 0x2d8   : > { %v4105_v56 = vmul.f32 %v4104_v42, %v8342_v3  ;;  %v4224_v55 = vadd.f32 0.0036580483, %v4223_v34  ;;  %v4262_v11 = vadd.f32 0.00028619796, %v4261_v41  ;;  %vm8447_vm6 = vmor %vm1967_vm5, %vm1968_vm2  ;;  %v1910_v49 = vadd.f32 1.1283791, %v1909_v24 }
 0x2d9   : > { %v1930_v0 = vsel %vm8436_vm4, %v8350_v52, %v1926_v23  ;;  %v1950_v43 = vadd.f32 1.1283791, %v1949_v13  ;;  %v1970_v58 = vsel %vm8447_vm6, %v8356_v10, %v1966_v8  ;;  %v1934_v30 = vor.u32 1.1754944e-38, %v1933_v46  ;;  %v10805_v8 = vld [vmem:[#allocation63_spill] sm:$0xff] }
 0x2da   : > { %v1974_v42 = vor.u32 1.1754944e-38, %v1973_v63  ;;  %v2059_v34 = vmul.f32 %v8434_v17, %v8434_v17  ;;  %v1582_v41 = vadd.f32 %v1581_v21, %v8103_v50  ;;  %vm1932_vm7 = vcmp.eq.f32.partialorder %v1931_v33, 8.507059e+37  ;;  %v10806_v63 = vld [vmem:[#allocation66_spill] sm:$0xff] }
 0x2db   : > { %vm1972_vm8 = vcmp.eq.f32.partialorder %v1971_v14, 8.507059e+37  ;;  %v2806_v24 = vadd.f32 %v8387_v36, %v2805_v32  ;;  %vm2808_vm9 = vweird.f32 %v8387_v36  ;;  %v4263_v52 = vmul.f32 %v4262_v11, %v8406_v31 }
 0x2dc   : > { %v1935_v23 = vsel %vm1932_vm7, %v1934_v30, %v1930_v0  ;;  %v1975_v13 = vsel %vm1972_vm8, %v1974_v42, %v1970_v58  ;;  %v2813_v10 = vand.u32 2147483648, %v8335_v39  ;;  %v1911_v46 = vmul.f32 %v1910_v49, %v10805_v8  ;;  %v10810_v42 = vld [vmem:[#allocation58_spill] sm:$0xff] }
 0x2dd   : > { %v1951_v54 = vmul.f32 %v1950_v43, %v10806_v63  ;;  %vm2807_vm10 = vweird.f32 %v8335_v39  ;;  %v2811_v33 = vand.u32 2147483647, %v8335_v39  ;;  %v8469_v14 = vmul.f32 %v3908_v16, %v8250_v57  ;;  %v10837_v57 = vld [vmem:[#allocation35_spill] sm:$0xff] }
 0x2de   : > { %v8472_v21 = vmul.f32 0.5, %v8300_v4  ;;  %v8474_v32 = vmin.f32 %v2059_v34, 16.0  ;;  %v8476_v11 = vadd.f32 %v1646_v60, %v1582_v41  ;;  %vm8480_vm11 = vmor %vm2807_vm10, %vm2808_vm9  ;;  %v4067_v0 = vmul.f32 %v4066_v40, %v8315_v28  ;;  %v1584_v60 = vpop.f32.mrf.mxu2 }
 0x2df   : > { %v1936_v43 = vmul.f32 %v1935_v23, %v1911_v46  ;;  %v1976_v39 = vmul.f32 %v1975_v13, %v1951_v54  ;;  %v2810_v16 = vsel %vm8480_vm11, %v8387_v36, %v2806_v24  ;;  %v3948_v4 = vadd.f32 0.18741608, %v3947_v51  ;;  %v1519_v13 = vpop.f32.mrf.mxu1  ;;  %v10811_v24 = vld [vmem:[#allocation54_spill] sm:$0xff] }
 0x2e0   : > { %10807 = vst [vmem:[#allocation63_spill] sm:$0xff] %v8472_v21  ;;  %v1455_v58 = vadd.f32 %v1454_v44, %v8048_v38  ;;  %v2814_v30 = vor.u32 1.1754944e-38, %v2813_v10  ;;  %v2832_v34 = vmul.f32 3.8918573e-05, %v10810_v42  ;;  %v4106_v41 = vadd.f32 0.05243302, %v4105_v56 }
 0x2e1   : > { %v4225_v8 = vmul.f32 %v4224_v55, %v8366_v47  ;;  %v4264_v63 = vadd.f32 0.0036580483, %v4263_v52  ;;  %vm2812_vm12 = vcmp.eq.f32.partialorder %v2811_v33, 8.507059e+37  ;;  %v2061_v40 = vmul.f32 2.1237322e-06, %v8474_v32  ;;  %v10812_v55 = vld [vmem:[#allocation29_spill] sm:$0xff] }
 0x2e2   : > { %v8493_v23 = vmul.f32 0.70710677, %v8476_v11  ;;  %v2815_v46 = vsel %vm2812_vm12, %v2814_v30, %v2810_v16  ;;  %v2833_v36 = vadd.f32 0.001143296, %v2832_v34  ;;  %v4068_v51 = vadd.f32 0.18741608, %v4067_v0 }
 0x2e3   : > { %v1693_v44 = vmul.f32 0.5, %v10811_v24  ;;  %v5531_v10 = vclamps-f32 %v1936_v43, 1.0  ;;  %v5532_v54 = vclamps-f32 %v1976_v39, 1.0  ;;  %v8496_v49 = vadd.f32 %v1519_v13, %v1455_v58  ;;  %v10813_v16 = vld [vmem:[#allocation59_spill] sm:$0xff]  ;;  %v1457_v39 = vpop.f32.mrf.mxu0 }
 0x2e4   : > { %v1585_v56 = vadd.f32 %v1584_v60, %v8103_v50  ;;  %v2816_v52 = vmul.f32 %v2815_v46, %v10812_v55  ;;  %v2834_v33 = vmul.f32 %v2833_v36, %v10810_v42  ;;  %v4107_v21 = vmul.f32 %v4106_v41, %v8342_v3  ;;  %v10814_v60 = vld [vmem:[#allocation36_spill] sm:$0xff]  ;;  %v1649_v55 = vpop.f32.mrf.mxu3 }
 0x2e5   : > { %v4226_v20 = vadd.f32 0.05243302, %v4225_v8  ;;  %v4265_v7 = vmul.f32 %v4264_v63, %v8406_v31  ;;  %v2952_v30 = vmul.f32 3.8918573e-05, %v10813_v16  ;;  %v2062_v0 = vadd.f32 0.00028619796, %v2061_v40 }
 0x2e6   : > { %v2099_v43 = vmul.f32 %v8493_v23, %v8493_v23  ;;  %v5553_v58 = vclamps-f32 %v2816_v52, 1.0  ;;  %v2835_v34 = vadd.f32 0.014752088, %v2834_v33  ;;  %v4381_v13 = vadd.f32 1.0, %v5531_v10 }
 0x2e7   : > { %v1694_v24 = vmul.f32 0.5, %v10814_v60  ;;  %v4382_v46 = vadd.f32 1.0, %v5532_v54  ;;  %v2953_v36 = vadd.f32 0.001143296, %v2952_v30  ;;  %v8508_v41 = vmul.f32 0.70710677, %v8496_v49 }
 0x2e8   : > { %v8510_v8 = vadd.f32 %v1649_v55, %v1585_v56  ;;  %v4403_v63 = vadd.f32 1.0, %v5553_v58  ;;  %v2836_v40 = vmul.f32 %v2835_v34, %v10810_v42  ;;  %v4227_v12 = vmul.f32 %v4226_v20, %v8366_v47  ;;  %v10815_v30 = vld [vmem:[#allocation24_spill] sm:$0xff] }
 0x2e9   : > { %v4266_v2 = vadd.f32 0.05243302, %v4265_v7  ;;  %v1458_v52 = vadd.f32 %v1457_v39, %v8048_v38  ;;  %v2954_v10 = vmul.f32 %v2953_v36, %v10813_v16  ;;  %v2063_v33 = vmul.f32 %v2062_v0, %v8474_v32  ;;  %v10819_v55 = vld [vmem:[#allocation60_spill] sm:$0xff]  ;;  %v10820_v7 = vld [vmem:[#allocation65_spill] sm:$0xff]  ;;  %v1522_v36 = vpop.f32.mrf.mxu1 }
 0x2ea   : > { %v8517_v54 = vmin.f32 %v2099_v43, 16.0  ;;  %v8520_v60 = vmul.f32 %v4403_v63, %v10815_v30  ;;  %v2837_v26 = vadd.f32 0.112945676, %v2836_v40  ;;  %v8522_v56 = vmul.f32 %v4381_v13, %v1693_v44  ;;  %v1587_v63 = vpop.f32.mrf.mxu2  ;;  %v4603_v40 = vld [vmem:[#allocation13 + $0x200] sm:$0xff] }
 0x2eb   : > { %v8524_v58 = vmul.f32 %v4382_v46, %v1694_v24  ;;  %v2955_v34 = vadd.f32 0.014752088, %v2954_v10  ;;  %v2992_v20 = vmul.f32 3.8918573e-05, %v10819_v55  ;;  %v8529_v39 = vmul.f32 %v8413_v62, %v10820_v7  ;;  %v4635_v62 = vld [vmem:[#allocation13 + $0x300] sm:$0xff]  ;;  %4812 = vmatpush.msra.mxu2 %v4603_v40 }
 0x2ec   : > { %10816 = vst [vmem:[#allocation66_spill] sm:$0xff] %v8520_v60  ;;  %v2219_v0 = vmul.f32 %v8508_v41, %v8508_v41  ;;  %v8534_v43 = vmul.f32 0.70710677, %v8510_v8  ;;  %4701 = vmatmul.f32.gmra.mxu0 %v8520_v60  ;;  %v2838_v44 = vmul.f32 %v2837_v26, %v10810_v42  ;;  %v3949_v13 = vmul.f32 %v3948_v4, %v8272_v5 }
 0x2ed   : > { %10817 = vst [vmem:[#allocation58_spill] sm:$0xff] %v8522_v56  ;;  %v4108_v24 = vadd.f32 0.18741608, %v4107_v21  ;;  %v8539_v46 = vadd.f32 %v1522_v36, %v1458_v52  ;;  %v2956_v10 = vmul.f32 %v2955_v34, %v10813_v16  ;;  %v4069_v30 = vmul.f32 %v4068_v51, %v8315_v28  ;;  %4877 = vmatpush.msra.mxu3 %v4635_v62 }
 0x2ee   : > { %10818 = vst [vmem:[#allocation54_spill] sm:$0xff] %v8524_v58  ;;  %v2064_v7 = vadd.f32 0.0036580483, %v2063_v33  ;;  %v2839_v45 = vadd.f32 0.4994258, %v2838_v44  ;;  %v4267_v26 = vmul.f32 %v4266_v2, %v8406_v31  ;;  %4813 = vmatmul.f32.vlgmr.msra.gmra.mxu2 %v8522_v56  ;;  %4878 = vmatmul.f32.vlgmr.msra.gmra.mxu3 %v8524_v58  ;;  %v8547_v52 = vmin.f32 %v2219_v0, 16.0 }
 0x2ef   : > { %10821 = vst [vmem:[#allocation29_spill] sm:$0xff] %v8529_v39  ;;  %v2101_v39 = vmul.f32 2.1237322e-06, %v8517_v54  ;;  %v4228_v60 = vadd.f32 0.18741608, %v4227_v12  ;;  %v2259_v51 = vmul.f32 %v8534_v43, %v8534_v43  ;;  %v1588_v33 = vadd.f32 %v1587_v63, %v8103_v50 }
 0x2f0   : > { %v2957_v21 = vadd.f32 0.112945676, %v2956_v10  ;;  %v2993_v4 = vadd.f32 0.001143296, %v2992_v20  ;;  %v2840_v34 = vmul.f32 %v2839_v45, %v10810_v42  ;;  %v3910_v36 = vadd.f32 1.1283791, %v8469_v14  ;;  %v1652_v45 = vpop.f32.mrf.mxu3 }
 0x2f1   : > { %v3950_v12 = vadd.f32 1.1283791, %v3949_v13  ;;  %v4109_v2 = vmul.f32 %v4108_v24, %v8342_v3  ;;  %v8556_v44 = vmul.f32 0.70710677, %v8539_v46  ;;  %v2065_v20 = vmul.f32 %v2064_v7, %v8474_v32 }
 0x2f2   : > { %v2102_v40 = vadd.f32 0.00028619796, %v2101_v39  ;;  %v8559_v0 = vadd.f32 1.0, %v2840_v34  ;;  %v2958_v62 = vmul.f32 %v2957_v21, %v10813_v16  ;;  %v4070_v10 = vadd.f32 1.1283791, %v4069_v30  ;;  %v10822_v39 = vld [vmem:[#allocation67_spill] sm:$0xff] }
 0x2f3   : > { %v4229_v63 = vmul.f32 %v4228_v60, %v8366_v47  ;;  %v4268_v58 = vadd.f32 0.18741608, %v4267_v26  ;;  %v2994_v14 = vmul.f32 %v2993_v4, %v10819_v55  ;;  %v2221_v42 = vmul.f32 2.1237322e-06, %v8547_v52 }
 0x2f4   : > { %v8565_v13 = vmin.f32 %v2259_v51, 16.0  ;;  %v8567_v24 = vadd.f32 %v1652_v45, %v1588_v33  ;;  %5787 = vrcp.f32 %v8559_v0  ;;  %v8571_v7 = vmul.f32 %v3910_v36, %v10822_v39 }
 0x2f5   : > { %v4110_v34 = vadd.f32 1.1283791, %v4109_v2  ;;  %v8574_v30 = vmul.f32 0.5, %v8347_v18  ;;  %v2379_v60 = vmul.f32 %v8556_v44, %v8556_v44  ;;  %v8579_v26 = vmul.f32 %v3950_v12, %v8240_v48  ;;  %v1460_v2 = vpop.f32.mrf.mxu0 }
 0x2f6   : > { %10823 = vst [vmem:[#allocation59_spill] sm:$0xff] %v8571_v7  ;;  %v2066_v21 = vadd.f32 0.05243302, %v2065_v20  ;;  %v2103_v4 = vmul.f32 %v2102_v40, %v8517_v54  ;;  %v2959_v51 = vadd.f32 0.4994258, %v2958_v62  ;;  %v8583_v33 = vmul.f32 %v4070_v10, %v8275_v22 }
 0x2f7   : > { %10824 = vst [vmem:[#allocation36_spill] sm:$0xff] %v8574_v30  ;;  %v4230_v45 = vadd.f32 1.1283791, %v4229_v63  ;;  %v4269_v36 = vmul.f32 %v4268_v58, %v8406_v31  ;;  %v2995_v39 = vadd.f32 0.014752088, %v2994_v14  ;;  %v8592_v12 = vmul.f32 %v4110_v34, %v8297_v37 }
 0x2f8   : > { %10825 = vst [vmem:[#allocation24_spill] sm:$0xff] %v8579_v26  ;;  %v2222_v18 = vadd.f32 0.00028619796, %v2221_v42  ;;  %v2261_v56 = vmul.f32 2.1237322e-06, %v8565_v13  ;;  %v2960_v48 = vmul.f32 %v2959_v51, %v10813_v16  ;;  %v8595_v20 = vmul.f32 0.5, %v8418_v15  ;;  %v1525_v51 = vpop.f32.mrf.mxu1  ;;  %v1655_v3 = vpop.f32.mrf.mxu3 }
 0x2f9   : > { %10826 = vst [vmem:[#allocation60_spill] sm:$0xff] %v8583_v33  ;;  %v8588_v30 = vmul.f32 0.70710677, %v8567_v24  ;;  %v8597_v22 = vmin.f32 %v2379_v60, 16.0  ;;  %v2996_v58 = vmul.f32 %v2995_v39, %v10819_v55  ;;  %v2067_v62 = vmul.f32 %v2066_v21, %v8474_v32 }
 0x2fa   : > { %10827 = vst [vmem:[#allocation65_spill] sm:$0xff] %v8592_v12  ;;  %v5788_v40 = vpop.eup %5787  ;;  %v2104_v10 = vadd.f32 0.0036580483, %v2103_v4  ;;  %v1461_v63 = vadd.f32 %v1460_v2, %v8048_v38  ;;  %v8602_v14 = vadd.f32 1.0, %v2960_v48  ;;  %v8605_v16 = vmul.f32 %v4230_v45, %v8320_v19 }
 0x2fb   : > { %v4270_v37 = vadd.f32 1.1283791, %v4269_v36  ;;  %v8608_v42 = vmul.f32 0.5, %v8476_v11  ;;  %v2843_v15 = vmul.f32 %v5788_v40, %v8559_v0  ;;  %v2223_v34 = vmul.f32 %v2222_v18, %v8547_v52 }
 0x2fc   : > { %10828 = vst [vmem:[#allocation67_spill] sm:$0xff] %v8605_v16  ;;  %v2262_v60 = vadd.f32 0.00028619796, %v2261_v56  ;;  %v2419_v21 = vmul.f32 %v8588_v30, %v8588_v30  ;;  %5789 = vrcp.f32 %v8602_v14  ;;  %v8616_v4 = vmul.f32 0.5, %v8496_v49 }
 0x2fd   : > { %v2381_v19 = vmul.f32 2.1237322e-06, %v8597_v22  ;;  %v2844_v45 = vsub.f32 1.0, %v2843_v15  ;;  %v2997_v36 = vadd.f32 0.112945676, %v2996_v58  ;;  %v2105_v2 = vmul.f32 %v2104_v10, %v8517_v54 }
 0x2fe   : > { %v2068_v11 = vadd.f32 0.18741608, %v2067_v62  ;;  %v8620_v39 = vadd.f32 %v1525_v51, %v1461_v63  ;;  %v2853_v56 = vand.u32 2147483648, %v8559_v0  ;;  %vm2848_vm13 = vweird.f32 %v5788_v40  ;;  %v4634_v51 = vld [vmem:[#allocation13 + $0x2f8] sm:$0xff] }
 0x2ff   : > { %v2845_v18 = vmul.f32 %v5788_v40, %v2844_v45  ;;  %v2851_v48 = vand.u32 2147483647, %v8559_v0  ;;  %v2998_v16 = vmul.f32 %v2997_v36, %v10819_v55  ;;  %v2224_v49 = vadd.f32 0.0036580483, %v2223_v34  ;;  %5057 = vmatpush.msrb.mxu2 %v4634_v51  ;;  %v10830_v51 = vld [vmem:[#allocation30_spill] sm:$0xff] }
 0x300   : > { %v8626_v12 = vmul.f32 0.5, %v8510_v8  ;;  %v2263_v15 = vmul.f32 %v2262_v60, %v8565_v13  ;;  %v8629_v58 = vmin.f32 %v2419_v21, 16.0  ;;  %v2382_v62 = vadd.f32 0.00028619796, %v2381_v19  ;;  %v4666_v60 = vld [vmem:[#allocation13 + $0x3f8] sm:$0xff] }
 0x301   : > { %v2846_v10 = vadd.f32 %v5788_v40, %v2845_v18  ;;  %vm2847_vm14 = vweird.f32 %v8559_v0  ;;  %v2999_v63 = vadd.f32 0.4994258, %v2998_v16  ;;  %v8633_v31 = vmul.f32 %v4270_v37, %v8369_v29  ;;  %5122 = vmatpush.msrb.mxu3 %v4666_v60 }
 0x302   : > { %v5790_v45 = vpop.eup %5789  ;;  %v2106_v33 = vadd.f32 0.05243302, %v2105_v2  ;;  %v8636_v34 = vmul.f32 0.70710677, %v8620_v39  ;;  %vm2849_vm15 = vmor %vm2847_vm14, %vm2848_vm13  ;;  %v2854_v8 = vor.u32 1.1754944e-38, %v2853_v56  ;;  %v2069_v21 = vmul.f32 %v2068_v11, %v8474_v32  ;;  %v1590_v56 = vpop.f32.mrf.mxu2 }
 0x303   : > { %10829 = vst [vmem:[#allocation82_spill] sm:$0xff] %v8633_v31  ;;  %v2850_v19 = vsel %vm2849_vm15, %v5788_v40, %v2846_v10  ;;  %vm2852_vm0 = vcmp.eq.f32.partialorder %v2851_v48, 8.507059e+37  ;;  %v2963_v0 = vmul.f32 %v5790_v45, %v8602_v14  ;;  %v2264_v16 = vadd.f32 0.0036580483, %v2263_v15 }
 0x304   : > { %v2421_v29 = vmul.f32 2.1237322e-06, %v8629_v58  ;;  %v2855_v37 = vsel %vm2852_vm0, %v2854_v8, %v2850_v19  ;;  %v3000_v36 = vmul.f32 %v2999_v63, %v10819_v55  ;;  %v2225_v2 = vmul.f32 %v2224_v49, %v8547_v52 }
 0x305   : > { %v2383_v18 = vmul.f32 %v2382_v62, %v8597_v22  ;;  %v2856_v31 = vmul.f32 %v2855_v37, %v10830_v51  ;;  %v2964_v47 = vsub.f32 1.0, %v2963_v0  ;;  %v2107_v40 = vmul.f32 %v2106_v33, %v8517_v54 }
 0x306   : > { %v2539_v11 = vmul.f32 %v8636_v34, %v8636_v34  ;;  %v2973_v48 = vand.u32 2147483648, %v8602_v14  ;;  %v8650_v15 = vadd.f32 1.0, %v3000_v36  ;;  %vm2968_vm1 = vweird.f32 %v5790_v45 }
 0x307   : > { %v5554_v10 = vclamps-f32 %v2856_v31, 1.0  ;;  %v2965_v8 = vmul.f32 %v5790_v45, %v2964_v47  ;;  %v2971_v55 = vand.u32 2147483647, %v8602_v14  ;;  %v2265_v49 = vmul.f32 %v2264_v16, %v8565_v13  ;;  %v1463_v47 = vpop.f32.mrf.mxu0  ;;  %v10831_v16 = vld [vmem:[#allocation43_spill] sm:$0xff] }
 0x308   : > { %v2422_v62 = vadd.f32 0.00028619796, %v2421_v29  ;;  %v1591_v63 = vadd.f32 %v1590_v56, %v8103_v50  ;;  %5791 = vrcp.f32 %v8650_v15  ;;  %v2384_v33 = vadd.f32 0.0036580483, %v2383_v18 }
 0x309   : > { %v4404_v60 = vadd.f32 1.0, %v5554_v10  ;;  %v2966_v19 = vadd.f32 %v5790_v45, %v2965_v8  ;;  %vm2967_vm2 = vweird.f32 %v8602_v14  ;;  %v2070_v0 = vadd.f32 1.1283791, %v2069_v21 }
 0x30a   : > { %v2226_v37 = vadd.f32 0.05243302, %v2225_v2  ;;  %v8657_v36 = vmin.f32 %v2539_v11, 16.0  ;;  %vm2969_vm3 = vmor %vm2967_vm2, %vm2968_vm1  ;;  %v2974_v31 = vor.u32 1.1754944e-38, %v2973_v48  ;;  %v2108_v51 = vadd.f32 0.18741608, %v2107_v40 }
 0x30b   : > { %v8660_v29 = vmul.f32 %v4404_v60, %v10831_v16  ;;  %v2970_v56 = vsel %vm2969_vm3, %v5790_v45, %v2966_v19  ;;  %vm2972_vm4 = vcmp.eq.f32.partialorder %v2971_v55, 8.507059e+37  ;;  %v2266_v26 = vadd.f32 0.05243302, %v2265_v49  ;;  %v10833_v11 = vld [vmem:[#allocation31_spill] sm:$0xff] }
 0x30c   : > { %v2423_v18 = vmul.f32 %v2422_v62, %v8629_v58  ;;  %v8663_v10 = vadd.f32 %v1655_v3, %v1591_v63  ;;  %v2975_v14 = vsel %vm2972_vm4, %v2974_v31, %v2970_v56  ;;  %v2385_v21 = vmul.f32 %v2384_v33, %v8597_v22  ;;  %v1593_v33 = vpop.f32.mrf.mxu2 }
 0x30d   : > { %10832 = vst [vmem:[#allocation30_spill] sm:$0xff] %v8660_v29  ;;  %v1464_v2 = vadd.f32 %v1463_v47, %v8048_v38  ;;  %4766 = vmatmul.f32.gmra.mxu1 %v8660_v29  ;;  %v2976_v40 = vmul.f32 %v2975_v14, %v10833_v11  ;;  %v2072_v48 = vmul.f32 3.8918573e-05, %v8474_v32  ;;  %v8671_v45 = vmul.f32 %v2070_v0, %v8434_v17  ;;  %v10835_v29 = vld [vmem:[#allocation25_spill] sm:$0xff] }
 0x30e   : > { %v5792_v8 = vpop.eup %5791  ;;  %v8674_v55 = vmul.f32 0.5, %v8539_v46  ;;  %v8677_v3 = vmul.f32 0.5, %v8567_v24  ;;  %v2541_v49 = vmul.f32 2.1237322e-06, %v8657_v36  ;;  %v2109_v62 = vmul.f32 %v2108_v51, %v8517_v54  ;;  %v1528_v46 = vpop.f32.mrf.mxu1 }
 0x30f   : > { %v2227_v63 = vmul.f32 %v2226_v37, %v8547_v52  ;;  %v5557_v60 = vclamps-f32 %v2976_v40, 1.0  ;;  %v3003_v19 = vmul.f32 %v5792_v8, %v8650_v15  ;;  %v2267_v47 = vmul.f32 %v2266_v26, %v8565_v13 }
 0x310   : > { %10834 = vst [vmem:[#allocation43_spill] sm:$0xff] %v8677_v3  ;;  %v2424_v17 = vadd.f32 0.0036580483, %v2423_v18  ;;  %v8685_v0 = vmul.f32 0.70710677, %v8663_v10  ;;  %v8687_v16 = vadd.f32 %v1528_v46, %v1464_v2  ;;  %v1594_v37 = vadd.f32 %v1593_v33, %v8103_v50 }
 0x311   : > { %v2073_v31 = vadd.f32 0.001143296, %v2072_v48  ;;  %v2386_v24 = vadd.f32 0.05243302, %v2385_v21  ;;  %v4407_v56 = vadd.f32 1.0, %v5557_v60  ;;  %v3004_v14 = vsub.f32 1.0, %v3003_v19 }
 0x312   : > { %v2542_v51 = vadd.f32 0.00028619796, %v2541_v49  ;;  %v3013_v11 = vand.u32 2147483648, %v8650_v15  ;;  %vm3008_vm5 = vweird.f32 %v5792_v8  ;;  %v3011_v7 = vand.u32 2147483647, %v8650_v15 }
 0x313   : > { %v2074_v40 = vmul.f32 %v2073_v31, %v8474_v32  ;;  %v8693_v26 = vmul.f32 %v4407_v56, %v10835_v29  ;;  %v3005_v18 = vmul.f32 %v5792_v8, %v3004_v14  ;;  %v2228_v48 = vadd.f32 0.18741608, %v2227_v63  ;;  %v1658_v63 = vpop.f32.mrf.mxu3  ;;  %v1466_v31 = vpop.f32.mrf.mxu0 }
 0x314   : > { %v2425_v21 = vmul.f32 %v2424_v17, %v8629_v58  ;;  %v2579_v2 = vmul.f32 %v8685_v0, %v8685_v0  ;;  %v2110_v60 = vadd.f32 1.1283791, %v2109_v62  ;;  %v2387_v33 = vmul.f32 %v2386_v24, %v8597_v22 }
 0x315   : > { %10836 = vst [vmem:[#allocation31_spill] sm:$0xff] %v8693_v26  ;;  %v2075_v49 = vadd.f32 0.014752088, %v2074_v40  ;;  %4704 = vmatmul.f32.gmra.mxu0 %v8693_v26  ;;  %v3006_v19 = vadd.f32 %v5792_v8, %v3005_v18  ;;  %vm3007_vm6 = vweird.f32 %v8650_v15  ;;  %v2543_v29 = vmul.f32 %v2542_v51, %v8657_v36 }
 0x316   : > { %v8704_v46 = vmul.f32 0.70710677, %v8687_v16  ;;  %vm3009_vm7 = vmor %vm3007_vm6, %vm3008_vm5  ;;  %v3014_v17 = vor.u32 1.1754944e-38, %v3013_v11  ;;  %v2268_v62 = vadd.f32 0.18741608, %v2267_v47  ;;  %v1659_v14 = vadd.f32 %v1658_v63, %v1594_v37 }
 0x317   : > { %v2076_v56 = vmul.f32 %v2075_v49, %v8474_v32  ;;  %v3010_v24 = vsel %vm3009_vm7, %v5792_v8, %v3006_v19  ;;  %vm3012_vm8 = vcmp.eq.f32.partialorder %v3011_v7, 8.507059e+37  ;;  %v2426_v40 = vadd.f32 0.05243302, %v2425_v21  ;;  %v10838_v8 = vld [vmem:[#allocation61_spill] sm:$0xff]  ;;  %v4570_v49 = vld [vmem:[#allocation13 + $0xf8] sm:$0xff] }
 0x318   : > { %v8708_v18 = vmin.f32 %v2579_v2, 16.0  ;;  %v3015_v15 = vsel %vm3012_vm8, %v3014_v17, %v3010_v24  ;;  %v2229_v51 = vmul.f32 %v2228_v48, %v8547_v52  ;;  %v2388_v28 = vadd.f32 0.18741608, %v2387_v33  ;;  %v4602_v33 = vld [vmem:[#allocation13 + $0x1f8] sm:$0xff]  ;;  %4927 = vmatpush.msrb.mxu0 %v4570_v49 }
 0x319   : > { %v2077_v26 = vadd.f32 0.112945676, %v2076_v56  ;;  %v1467_v5 = vadd.f32 %v1466_v31, %v8048_v38  ;;  %v3016_v3 = vmul.f32 %v3015_v15, %v10837_v57  ;;  %v2544_v59 = vadd.f32 0.0036580483, %v2543_v29  ;;  %4992 = vmatpush.msrb.mxu1 %v4602_v33  ;;  %v10840_v15 = vld [vmem:[#allocation26_spill] sm:$0xff] }
 0x31a   : > { %v2699_v11 = vmul.f32 %v8704_v46, %v8704_v46  ;;  %v3112_v7 = vmul.f32 3.8918573e-05, %v10838_v8  ;;  %v2269_v37 = vmul.f32 %v2268_v62, %v8565_v13  ;;  %v8719_v21 = vmul.f32 0.5, %v8620_v39 }
 0x31b   : > { %v2078_v47 = vmul.f32 %v2077_v26, %v8474_v32  ;;  %v8721_v2 = vmul.f32 0.70710677, %v1659_v14  ;;  %v5558_v48 = vclamps-f32 %v3016_v3, 1.0  ;;  %v8724_v57 = vmul.f32 %v2110_v60, %v8493_v23  ;;  %v1531_v26 = vpop.f32.mrf.mxu1 }
 0x31c   : > { %10839 = vst [vmem:[#allocation25_spill] sm:$0xff] %v8719_v21  ;;  %v2427_v19 = vmul.f32 %v2426_v40, %v8629_v58  ;;  %v2581_v29 = vmul.f32 2.1237322e-06, %v8708_v18  ;;  %v2230_v31 = vadd.f32 1.1283791, %v2229_v51  ;;  %v1532_v17 = vadd.f32 %v1531_v26, %v1467_v5 }
 0x31d   : > { %v2079_v63 = vadd.f32 0.4994258, %v2078_v47  ;;  %v4408_v39 = vadd.f32 1.0, %v5558_v48  ;;  %v3113_v56 = vadd.f32 0.001143296, %v3112_v7  ;;  %v2389_v62 = vmul.f32 %v2388_v28, %v8597_v22 }
 0x31e   : > { %v2545_v3 = vmul.f32 %v2544_v59, %v8657_v36  ;;  %v8730_v24 = vmin.f32 %v2699_v11, 16.0  ;;  %v2270_v60 = vadd.f32 1.1283791, %v2269_v37  ;;  %v2739_v40 = vmul.f32 %v8721_v2, %v8721_v2  ;;  %v10844_v37 = vld [vmem:[#allocation32_spill] sm:$0xff] }
 0x31f   : > { %v2080_v23 = vmul.f32 %v2079_v63, %v8474_v32  ;;  %v8736_v47 = vmul.f32 %v4408_v39, %v10840_v15  ;;  %v3114_v51 = vmul.f32 %v3113_v56, %v10838_v8  ;;  %v2428_v5 = vadd.f32 0.18741608, %v2427_v19 }
 0x320   : > { %v8740_v7 = vmul.f32 0.5, %v8663_v10  ;;  %v2582_v28 = vadd.f32 0.00028619796, %v2581_v29  ;;  %v8745_v59 = vmul.f32 %v2230_v31, %v8508_v41  ;;  %v8747_v32 = vmul.f32 0.70710677, %v1532_v17 }
 0x321   : > { %10841 = vst [vmem:[#allocation35_spill] sm:$0xff] %v8736_v47  ;;  %v8742_v48 = vadd.f32 1.0, %v2080_v23  ;;  %4769 = vmatmul.f32.gmra.mxu1 %v8736_v47  ;;  %v3115_v11 = vadd.f32 0.014752088, %v3114_v51  ;;  %v3152_v49 = vmul.f32 3.8918573e-05, %v10844_v37  ;;  %v8760_v31 = vmul.f32 %v2270_v60, %v8534_v43 }
 0x322   : > { %10842 = vst [vmem:[#allocation61_spill] sm:$0xff] %v8740_v7  ;;  %v2390_v33 = vadd.f32 1.1283791, %v2389_v62  ;;  %v2546_v26 = vadd.f32 0.05243302, %v2545_v3  ;;  %v8754_v10 = vmul.f32 0.5, %v8687_v16  ;;  %v2429_v39 = vmul.f32 %v2428_v5, %v8629_v58 }
 0x323   : > { %10843 = vst [vmem:[#allocation26_spill] sm:$0xff] %v8747_v32  ;;  %v2701_v19 = vmul.f32 2.1237322e-06, %v8730_v24  ;;  %5793 = vrcp.f32 %v8742_v48  ;;  %v8756_v29 = vmin.f32 %v2739_v40, 16.0  ;;  %v3116_v41 = vmul.f32 %v3115_v11, %v10838_v8  ;;  %v10846_v62 = vld [vmem:[#allocation34_spill] sm:$0xff] }
 0x324   : > { %10845 = vst [vmem:[#allocation32_spill] sm:$0xff] %v8754_v10  ;;  %v3153_v63 = vadd.f32 0.001143296, %v3152_v49  ;;  %v2583_v56 = vmul.f32 %v2582_v28, %v8708_v18  ;;  %v3272_v3 = vmul.f32 3.8918573e-05, %v10846_v62  ;;  %v8765_v23 = vmul.f32 0.5, %v1659_v14 }
 0x325   : > { %v2859_v16 = vmul.f32 %v8747_v32, %v8747_v32  ;;  %v3117_v15 = vadd.f32 0.112945676, %v3116_v41  ;;  %v8771_v51 = vmul.f32 %v2390_v33, %v8556_v44  ;;  %v2547_v43 = vmul.f32 %v2546_v26, %v8657_v36 }
 0x326   : > { %10847 = vst [vmem:[#allocation34_spill] sm:$0xff] %v8765_v23  ;;  %v3154_v40 = vmul.f32 %v3153_v63, %v10844_v37  ;;  %v2702_v60 = vadd.f32 0.00028619796, %v2701_v19  ;;  %v3273_v11 = vadd.f32 0.001143296, %v3272_v3  ;;  %v8775_v28 = vmul.f32 0.5, %v1532_v17 }
 0x327   : > { %v2741_v5 = vmul.f32 2.1237322e-06, %v8756_v29  ;;  %v3118_v14 = vmul.f32 %v3117_v15, %v10838_v8  ;;  %v2430_v23 = vadd.f32 1.1283791, %v2429_v39  ;;  %v2584_v10 = vadd.f32 0.0036580483, %v2583_v56 }
 0x328   : > { %10848 = vst [vmem:[#allocation83_spill] sm:$0xff] %v8775_v28  ;;  %v3155_v49 = vadd.f32 0.014752088, %v3154_v40  ;;  %v3274_v41 = vmul.f32 %v3273_v11, %v10846_v62  ;;  %v10849_v63 = vld [vmem:[#allocation52_spill] sm:$0xff]  ;;  %v8780_v44 = vmin.f32 %v2859_v16, 16.0  ;;  %v2703_v17 = vmul.f32 %v2702_v60, %v8730_v24 }
 0x329   : > { %v5794_v47 = vpop.eup %5793  ;;  %v3312_v7 = vmul.f32 3.8918573e-05, %v10849_v63  ;;  %v3119_v26 = vadd.f32 0.4994258, %v3118_v14  ;;  %v2548_v3 = vadd.f32 0.18741608, %v2547_v43  ;;  %vm2087_vm10 = vweird.f32 %v8742_v48 }
 0x32a   : > { %v2083_v33 = vmul.f32 %v5794_v47, %v8742_v48  ;;  %v3156_v19 = vmul.f32 %v3155_v49, %v10844_v37  ;;  %v3275_v28 = vadd.f32 0.014752088, %v3274_v41  ;;  %v2742_v40 = vadd.f32 0.00028619796, %v2741_v5 }
 0x32b   : > { %v3313_v15 = vadd.f32 0.001143296, %v3312_v7  ;;  %v3120_v39 = vmul.f32 %v3119_v26, %v10838_v8  ;;  %v2091_v11 = vand.u32 2147483647, %v8742_v48  ;;  %v2093_v16 = vand.u32 2147483648, %v8742_v48 }
 0x32c   : > { %v2084_v21 = vsub.f32 1.0, %v2083_v33  ;;  %v3157_v56 = vadd.f32 0.112945676, %v3156_v19  ;;  %v3276_v1 = vmul.f32 %v3275_v28, %v10846_v62  ;;  %vm2088_vm9 = vweird.f32 %v5794_v47  ;;  %v4632_v28 = vld [vmem:[#allocation13 + $0x2e8] sm:$0xff] }
 0x32d   : > { %v3314_v14 = vmul.f32 %v3313_v15, %v10849_v63  ;;  %v8790_v43 = vadd.f32 1.0, %v3120_v39  ;;  %v2585_v7 = vmul.f32 %v2584_v10, %v8708_v18  ;;  %v2704_v5 = vadd.f32 0.0036580483, %v2703_v17  ;;  %vm2089_vm11 = vmor %vm2087_vm10, %vm2088_vm9  ;;  %5058 = vmatpush.msrb.mxu2 %v4632_v28 }
 0x32e   : > { %v2085_v32 = vmul.f32 %v5794_v47, %v2084_v21  ;;  %v3158_v60 = vmul.f32 %v3157_v56, %v10844_v37  ;;  %v3277_v49 = vadd.f32 0.112945676, %v3276_v1  ;;  %v2861_v41 = vmul.f32 2.1237322e-06, %v8780_v44 }
 0x32f   : > { %v3315_v8 = vadd.f32 0.014752088, %v3314_v14  ;;  %5795 = vrcp.f32 %v8790_v43  ;;  %v2549_v21 = vmul.f32 %v2548_v3, %v8657_v36  ;;  %v2094_v26 = vor.u32 1.1754944e-38, %v2093_v16 }
 0x330   : > { %v2086_v33 = vadd.f32 %v5794_v47, %v2085_v32  ;;  %v3159_v19 = vadd.f32 0.4994258, %v3158_v60  ;;  %v2112_v15 = vmul.f32 3.8918573e-05, %v8517_v54  ;;  %vm2092_vm12 = vcmp.eq.f32.partialorder %v2091_v11, 8.507059e+37  ;;  %v1596_v11 = vpop.f32.mrf.mxu2 }
 0x331   : > { %v3278_v1 = vmul.f32 %v3277_v49, %v10846_v62  ;;  %v3316_v17 = vmul.f32 %v3315_v8, %v10849_v63  ;;  %v2586_v32 = vadd.f32 0.05243302, %v2585_v7  ;;  %v2743_v48 = vmul.f32 %v2742_v40, %v8756_v29 }
 0x332   : > { %v2090_v10 = vsel %vm2089_vm11, %v5794_v47, %v2086_v33  ;;  %v3160_v56 = vmul.f32 %v3159_v19, %v10844_v37  ;;  %v2113_v14 = vadd.f32 0.001143296, %v2112_v15  ;;  %v8805_v28 = vmul.f32 %v2430_v23, %v8588_v30 }
 0x333   : > { %v2095_v39 = vsel %vm2092_vm12, %v2094_v26, %v2090_v10  ;;  %v3279_v16 = vadd.f32 0.4994258, %v3278_v1  ;;  %v3317_v60 = vadd.f32 0.112945676, %v3316_v17  ;;  %v2705_v47 = vmul.f32 %v2704_v5, %v8730_v24 }
 0x334   : > { %v2096_v3 = vmul.f32 %v2095_v39, %v8671_v45  ;;  %v8808_v49 = vadd.f32 1.0, %v3160_v56  ;;  %v3432_v7 = vmul.f32 3.8918573e-05, %v8007_v25  ;;  %v2114_v33 = vmul.f32 %v2113_v14, %v8517_v54  ;;  %v1469_v14 = vpop.f32.mrf.mxu0 }
 0x335   : > { %v5796_v8 = vpop.eup %5795  ;;  %v3280_v37 = vmul.f32 %v3279_v16, %v10846_v62  ;;  %v3318_v45 = vmul.f32 %v3317_v60, %v10849_v63  ;;  %v2550_v26 = vadd.f32 1.1283791, %v2549_v21  ;;  %v2862_v19 = vadd.f32 0.00028619796, %v2861_v41 }
 0x336   : > { %v5535_v40 = vclamps-f32 %v2096_v3, 1.0  ;;  %v3123_v30 = vmul.f32 %v5796_v8, %v8790_v43  ;;  %5797 = vrcp.f32 %v8808_v49  ;;  %v2587_v23 = vmul.f32 %v2586_v32, %v8708_v18 }
 0x337   : > { %v8817_v5 = vadd.f32 0.0036580483, %v2743_v48  ;;  %v1597_v15 = vadd.f32 %v1596_v11, %v8103_v50  ;;  %v2115_v17 = vadd.f32 0.014752088, %v2114_v33  ;;  %v8820_v39 = vadd.f32 1.0, %v3280_v37 }
 0x338   : > { %v4385_v10 = vadd.f32 1.0, %v5535_v40  ;;  %v3124_v1 = vsub.f32 1.0, %v3123_v30  ;;  %v3319_v62 = vadd.f32 0.4994258, %v3318_v45  ;;  %v3131_v41 = vand.u32 2147483647, %v8790_v43  ;;  %v1661_v45 = vpop.f32.mrf.mxu3 }
 0x339   : > { %v3133_v21 = vand.u32 2147483648, %v8790_v43  ;;  %v3433_v3 = vadd.f32 0.001143296, %v3432_v7  ;;  %vm3128_vm13 = vweird.f32 %v5796_v8  ;;  %v2116_v48 = vmul.f32 %v2115_v17, %v8517_v54  ;;  %v4664_v17 = vld [vmem:[#allocation13 + $0x3e8] sm:$0xff] }
 0x33a   : > { %v8823_v56 = vmul.f32 %v4385_v10, %v8595_v20  ;;  %v3125_v32 = vmul.f32 %v5796_v8, %v3124_v1  ;;  %5799 = vrcp.f32 %v8820_v39  ;;  %v8830_v16 = vmul.f32 %v2550_v26, %v8636_v34  ;;  %5123 = vmatpush.msrb.mxu3 %v4664_v17 }
 0x33b   : > { %v2706_v60 = vadd.f32 0.05243302, %v2705_v47  ;;  %v8833_v11 = vmul.f32 %v2862_v19, %v8780_v44  ;;  %v3320_v20 = vmul.f32 %v3319_v62, %v10849_v63  ;;  %v8837_v7 = vadd.f32 0.18741608, %v2587_v23 }
 0x33c   : > { %10850 = vst [vmem:[#allocation52_spill] sm:$0xff] %v8823_v56  ;;  %4816 = vmatmul.f32.gmra.mxu2 %v8823_v56  ;;  %v5798_v40 = vpop.eup %5797  ;;  %v3126_v33 = vadd.f32 %v5796_v8, %v3125_v32  ;;  %vm3127_vm14 = vweird.f32 %v8790_v43  ;;  %v2117_v37 = vadd.f32 0.112945676, %v2116_v48  ;;  %v1470_v30 = vadd.f32 %v1469_v14, %v8048_v38  ;;  %v10852_v32 = vld [vmem:[#allocation44_spill] sm:$0xff] }
 0x33d   : > { %10851 = vst [vmem:[#allocation84_spill] sm:$0xff] %v8830_v16  ;;  %vm3129_vm15 = vmor %vm3127_vm14, %vm3128_vm13  ;;  %v3134_v34 = vor.u32 1.1754944e-38, %v3133_v21  ;;  %v3163_v47 = vmul.f32 %v5798_v40, %v8808_v49  ;;  %v3434_v26 = vmul.f32 %v3433_v3, %v8007_v25  ;;  %v8844_v19 = vadd.f32 %v1661_v45, %v1597_v15 }
 0x33e   : > { %v3130_v63 = vsel %vm3129_vm15, %v5796_v8, %v3126_v33  ;;  %vm3132_vm0 = vcmp.eq.f32.partialorder %v3131_v41, 8.507059e+37  ;;  %v2118_v23 = vmul.f32 %v2117_v37, %v8517_v54  ;;  %v3171_v43 = vand.u32 2147483647, %v8808_v49 }
 0x33f   : > { %v3135_v10 = vsel %vm3132_vm0, %v3134_v34, %v3130_v63  ;;  %v3164_v1 = vsub.f32 1.0, %v3163_v47  ;;  %v8848_v62 = vadd.f32 1.0, %v3320_v20  ;;  %v3173_v48 = vand.u32 2147483648, %v8808_v49 }
 0x340   : > { %v5800_v14 = vpop.eup %5799  ;;  %v3136_v21 = vmul.f32 %v3135_v10, %v10852_v32  ;;  %v2119_v56 = vadd.f32 0.4994258, %v2118_v23  ;;  %v2232_v15 = vmul.f32 3.8918573e-05, %v8547_v52  ;;  %vm3168_vm1 = vweird.f32 %v5798_v40 }
 0x341   : > { %v3165_v8 = vmul.f32 %v5798_v40, %v3164_v1  ;;  %v3283_v41 = vmul.f32 %v5800_v14, %v8820_v39  ;;  %v3435_v3 = vadd.f32 0.014752088, %v3434_v26  ;;  %vm3167_vm2 = vweird.f32 %v8808_v49 }
 0x342   : > { %v5561_v33 = vclamps-f32 %v3136_v21, 1.0  ;;  %v2120_v20 = vmul.f32 %v2119_v56, %v8517_v54  ;;  %v2233_v37 = vadd.f32 0.001143296, %v2232_v15  ;;  %vm3172_vm3 = vcmp.eq.f32.partialorder %v3171_v43, 8.507059e+37  ;;  %vm3169_vm4 = vmor %vm3167_vm2, %vm3168_vm1  ;;  %v10853_v54 = vld [vmem:[#allocation55_spill] sm:$0xff] }
 0x343   : > { %v3166_v45 = vadd.f32 %v5798_v40, %v3165_v8  ;;  %v3284_v34 = vsub.f32 1.0, %v3283_v41  ;;  %5801 = vrcp.f32 %v8848_v62  ;;  %v3174_v63 = vor.u32 1.1754944e-38, %v3173_v48  ;;  %v1534_v48 = vpop.f32.mrf.mxu1  ;;  %v10855_v15 = vld [vmem:[#allocation51_spill] sm:$0xff] }
 0x344   : > { %v4411_v47 = vadd.f32 1.0, %v5561_v33  ;;  %v8857_v23 = vadd.f32 1.0, %v2120_v20  ;;  %v3291_v10 = vand.u32 2147483647, %v8820_v39  ;;  %v2234_v26 = vmul.f32 %v2233_v37, %v8547_v52 }
 0x345   : > { %v3170_v1 = vsel %vm3169_vm4, %v5798_v40, %v3166_v45  ;;  %v3285_v17 = vmul.f32 %v5800_v14, %v3284_v34  ;;  %v3293_v49 = vand.u32 2147483648, %v8820_v39  ;;  %vm3288_vm5 = vweird.f32 %v5800_v14 }
 0x346   : > { %v8863_v56 = vmul.f32 %v4411_v47, %v10853_v54  ;;  %v3175_v43 = vsel %vm3172_vm3, %v3174_v63, %v3170_v1  ;;  %5803 = vrcp.f32 %v8857_v23  ;;  %v8867_v32 = vmul.f32 %v2706_v60, %v8730_v24 }
 0x347   : > { %v8871_v21 = vmul.f32 %v8817_v5, %v8756_v29  ;;  %v8874_v40 = vmul.f32 0.70710677, %v8844_v19  ;;  %v3176_v8 = vmul.f32 %v3175_v43, %v10855_v15  ;;  %v8877_v41 = vadd.f32 %v1534_v48, %v1470_v30  ;;  %v10856_v43 = vld [vmem:[#allocation48_spill] sm:$0xff]  ;;  %v10857_v48 = vld [vmem:[#allocation46_spill] sm:$0xff] }
 0x348   : > { %10854 = vst [vmem:[#allocation44_spill] sm:$0xff] %v8863_v56  ;;  %4707 = vmatmul.f32.gmra.mxu0 %v8863_v56  ;;  %v2235_v33 = vadd.f32 0.014752088, %v2234_v26  ;;  %v3286_v20 = vadd.f32 %v5800_v14, %v3285_v17  ;;  %vm3287_vm6 = vweird.f32 %v8820_v39  ;;  %v8882_v37 = vadd.f32 0.0036580483, %v8833_v11 }
 0x349   : > { %v5802_v60 = vpop.eup %5801  ;;  %v5562_v5 = vclamps-f32 %v3176_v8, 1.0  ;;  %vm3289_vm7 = vmor %vm3287_vm6, %vm3288_vm5  ;;  %v3294_v45 = vor.u32 1.1754944e-38, %v3293_v49  ;;  %v3436_v34 = vmul.f32 %v3435_v3, %v8007_v25  ;;  %vm3292_vm8 = vcmp.eq.f32.partialorder %v3291_v10, 8.507059e+37  ;;  %v1599_v3 = vpop.f32.mrf.mxu2 }
 0x34a   : > { %v2236_v47 = vmul.f32 %v2235_v33, %v8547_v52  ;;  %v3290_v63 = vsel %vm3289_vm7, %v5800_v14, %v3286_v20  ;;  %v3323_v30 = vmul.f32 %v5802_v60, %v8848_v62  ;;  %v8889_v1 = vmul.f32 %v8837_v7, %v8708_v18 }
 0x34b   : > { %v2899_v39 = vmul.f32 %v8874_v40, %v8874_v40  ;;  %v4412_v11 = vadd.f32 1.0, %v5562_v5  ;;  %v3295_v26 = vsel %vm3292_vm8, %v3294_v45, %v3290_v63  ;;  %v8894_v49 = vmul.f32 0.70710677, %v8877_v41 }
 0x34c   : > { %v5804_v17 = vpop.eup %5803  ;;  %v2237_v54 = vadd.f32 0.112945676, %v2236_v47  ;;  %v3296_v14 = vmul.f32 %v3295_v26, %v10856_v43  ;;  %v3324_v10 = vsub.f32 1.0, %v3323_v30  ;;  %v2133_v8 = vand.u32 2147483648, %v8857_v23  ;;  %v4568_v26 = vld [vmem:[#allocation13 + $0xe8] sm:$0xff] }
 0x34d   : > { %v8898_v15 = vmul.f32 %v4412_v11, %v10857_v48  ;;  %v2123_v7 = vmul.f32 %v5804_v17, %v8857_v23  ;;  %v3437_v33 = vadd.f32 0.112945676, %v3436_v34  ;;  %vm3328_vm9 = vweird.f32 %v5802_v60  ;;  %v4600_v30 = vld [vmem:[#allocation13 + $0x1e8] sm:$0xff]  ;;  %4928 = vmatpush.msrb.mxu0 %v4568_v26 }
 0x34e   : > { %v2238_v20 = vmul.f32 %v2237_v54, %v8547_v52  ;;  %v5565_v5 = vclamps-f32 %v3296_v14, 1.0  ;;  %v3325_v45 = vmul.f32 %v5802_v60, %v3324_v10  ;;  %v1600_v63 = vadd.f32 %v1599_v3, %v8103_v50  ;;  %4993 = vmatpush.msrb.mxu1 %v4600_v30  ;;  %v4630_v54 = vld [vmem:[#allocation13 + $0x2d8] sm:$0xff]  ;;  %v10861_v30 = vld [vmem:[#allocation33_spill] sm:$0xff] }
 0x34f   : > { %10858 = vst [vmem:[#allocation55_spill] sm:$0xff] %v8898_v15  ;;  %4772 = vmatmul.f32.gmra.mxu1 %v8898_v15  ;;  %v2124_v47 = vsub.f32 1.0, %v2123_v7  ;;  %v3331_v11 = vand.u32 2147483647, %v8848_v62  ;;  %v3333_v43 = vand.u32 2147483648, %v8848_v62  ;;  %vm3327_vm10 = vweird.f32 %v8848_v62  ;;  %5059 = vmatpush.msrb.mxu2 %v4630_v54  ;;  %v10859_v15 = vld [vmem:[#allocation50_spill] sm:$0xff] }
 0x350   : > { %v2239_v48 = vadd.f32 0.4994258, %v2238_v20  ;;  %v4415_v34 = vadd.f32 1.0, %v5565_v5  ;;  %v3326_v56 = vadd.f32 %v5802_v60, %v3325_v45  ;;  %vm2128_vm11 = vweird.f32 %v5804_v17  ;;  %vm3329_vm12 = vmor %vm3327_vm10, %vm3328_vm9 }
 0x351   : > { %v2125_v14 = vmul.f32 %v5804_v17, %v2124_v47  ;;  %v2131_v3 = vand.u32 2147483647, %v8857_v23  ;;  %v3334_v10 = vor.u32 1.1754944e-38, %v3333_v43  ;;  %vm3332_vm13 = vcmp.eq.f32.partialorder %v3331_v11, 8.507059e+37 }
 0x352   : > { %v2240_v7 = vmul.f32 %v2239_v48, %v8547_v52  ;;  %v8912_v16 = vmul.f32 %v4415_v34, %v10859_v15  ;;  %v3330_v20 = vsel %vm3329_vm12, %v5802_v60, %v3326_v56  ;;  %vm2127_vm14 = vweird.f32 %v8857_v23  ;;  %v1664_v48 = vpop.f32.mrf.mxu3 }
 0x353   : > { %v2126_v5 = vadd.f32 %v5804_v17, %v2125_v14  ;;  %v3335_v62 = vsel %vm3332_vm13, %v3334_v10, %v3330_v20  ;;  %v2272_v45 = vmul.f32 3.8918573e-05, %v8565_v13  ;;  %vm2129_vm15 = vmor %vm2127_vm14, %vm2128_vm11  ;;  %v2134_v47 = vor.u32 1.1754944e-38, %v2133_v8  ;;  %v1472_v20 = vpop.f32.mrf.mxu0 }
 0x354   : > { %10860 = vst [vmem:[#allocation51_spill] sm:$0xff] %v8912_v16  ;;  %v8916_v26 = vadd.f32 1.0, %v2240_v7  ;;  %4710 = vmatmul.f32.gmra.mxu0 %v8912_v16  ;;  %v3336_v43 = vmul.f32 %v3335_v62, %v10861_v30  ;;  %v3438_v52 = vmul.f32 %v3437_v33, %v8007_v25  ;;  %v2746_v15 = vadd.f32 0.05243302, %v8871_v21  ;;  %v10862_v30 = vld [vmem:[#allocation41_spill] sm:$0xff] }
 0x355   : > { %v2130_v56 = vsel %vm2129_vm15, %v5804_v17, %v2126_v5  ;;  %vm2132_vm0 = vcmp.eq.f32.partialorder %v2131_v3, 8.507059e+37  ;;  %v2273_v60 = vadd.f32 0.001143296, %v2272_v45  ;;  %v8922_v11 = vmin.f32 %v2899_v39, 16.0 }
 0x356   : > { %v3019_v23 = vmul.f32 %v8894_v49, %v8894_v49  ;;  %v2135_v8 = vsel %vm2132_vm0, %v2134_v47, %v2130_v56  ;;  %5805 = vrcp.f32 %v8916_v26  ;;  %v8927_v34 = vadd.f32 %v1664_v48, %v1600_v63 }
 0x357   : > { %v2136_v54 = vmul.f32 %v2135_v8, %v8724_v57  ;;  %v5566_v14 = vclamps-f32 %v3336_v43, 1.0  ;;  %v3472_v33 = vmul.f32 3.8918573e-05, %v8009_v27  ;;  %v2708_v21 = vadd.f32 0.18741608, %v8867_v32 }
 0x358   : > { %v2865_v39 = vmul.f32 %v8882_v37, %v8780_v44  ;;  %v2274_v17 = vmul.f32 %v2273_v60, %v8565_v13  ;;  %v3439_v3 = vadd.f32 0.4994258, %v3438_v52  ;;  %v2590_v10 = vadd.f32 1.1283791, %v8889_v1 }
 0x359   : > { %v2747_v7 = vmul.f32 %v2746_v15, %v8756_v29  ;;  %v5536_v63 = vclamps-f32 %v2136_v54, 1.0  ;;  %v4416_v5 = vadd.f32 1.0, %v5566_v14  ;;  %v2901_v57 = vmul.f32 2.1237322e-06, %v8922_v11 }
 0x35a   : > { %v8938_v62 = vmin.f32 %v3019_v23, 16.0  ;;  %v2275_v45 = vadd.f32 0.014752088, %v2274_v17  ;;  %v3440_v32 = vmul.f32 %v3439_v3, %v8007_v25  ;;  %v8942_v47 = vmul.f32 0.70710677, %v8927_v34 }
 0x35b   : > { %v4386_v37 = vadd.f32 1.0, %v5536_v63  ;;  %v8945_v43 = vmul.f32 %v4416_v5, %v10862_v30  ;;  %v3473_v1 = vadd.f32 0.001143296, %v3472_v33  ;;  %v2709_v15 = vmul.f32 %v2708_v21, %v8730_v24 }
 0x35c   : > { %v5806_v52 = vpop.eup %5805  ;;  %v1473_v56 = vadd.f32 %v1472_v20, %v8048_v38  ;;  %v2276_v60 = vmul.f32 %v2275_v45, %v8565_v13  ;;  %v8950_v23 = vadd.f32 1.0, %v3440_v32  ;;  %v2866_v48 = vadd.f32 0.05243302, %v2865_v39  ;;  %v1537_v39 = vpop.f32.mrf.mxu1  ;;  %v4662_v45 = vld [vmem:[#allocation13 + $0x3d8] sm:$0xff] }
 0x35d   : > { %10863 = vst [vmem:[#allocation48_spill] sm:$0xff] %v8945_v43  ;;  %v8953_v25 = vmul.f32 %v4386_v37, %v8608_v42  ;;  %v2243_v8 = vmul.f32 %v5806_v52, %v8916_v26  ;;  %4775 = vmatmul.f32.gmra.mxu1 %v8945_v43  ;;  %v3474_v54 = vmul.f32 %v3473_v1, %v8009_v27  ;;  %v2902_v33 = vadd.f32 0.00028619796, %v2901_v57 }
 0x35e   : > { %v8959_v14 = vmul.f32 %v2590_v10, %v8685_v0  ;;  %v2277_v21 = vadd.f32 0.112945676, %v2276_v60  ;;  %5807 = vrcp.f32 %v8950_v23  ;;  %v2748_v17 = vadd.f32 0.18741608, %v2747_v7  ;;  %5124 = vmatpush.msrb.mxu3 %v4662_v45 }
 0x35f   : > { %10864 = vst [vmem:[#allocation46_spill] sm:$0xff] %v8953_v25  ;;  %v3021_v3 = vmul.f32 2.1237322e-06, %v8938_v62  ;;  %v3059_v42 = vmul.f32 %v8942_v47, %v8942_v47  ;;  %4881 = vmatmul.f32.gmra.mxu3 %v8953_v25  ;;  %v2244_v20 = vsub.f32 1.0, %v2243_v8  ;;  %v8966_v63 = vadd.f32 %v1537_v39, %v1473_v56 }
 0x360   : > { %v2253_v5 = vand.u32 2147483648, %v8916_v26  ;;  %v2278_v0 = vmul.f32 %v2277_v21, %v8565_v13  ;;  %v3475_v10 = vadd.f32 0.014752088, %v3474_v54  ;;  %vm2248_vm1 = vweird.f32 %v5806_v52 }
 0x361   : > { %v2245_v57 = vmul.f32 %v5806_v52, %v2244_v20  ;;  %v2251_v7 = vand.u32 2147483647, %v8916_v26  ;;  %v2392_v32 = vmul.f32 3.8918573e-05, %v8597_v22  ;;  %v2710_v37 = vadd.f32 1.1283791, %v2709_v15 }
 0x362   : > { %v2903_v30 = vmul.f32 %v2902_v33, %v8922_v11  ;;  %v2279_v1 = vadd.f32 0.4994258, %v2278_v0  ;;  %v3476_v56 = vmul.f32 %v3475_v10, %v8009_v27  ;;  %v3022_v60 = vadd.f32 0.00028619796, %v3021_v3 }
 0x363   : > { %v2246_v8 = vadd.f32 %v5806_v52, %v2245_v57  ;;  %vm2247_vm2 = vweird.f32 %v8916_v26  ;;  %v2393_v21 = vadd.f32 0.001143296, %v2392_v32  ;;  %v8977_v39 = vmin.f32 %v3059_v42, 16.0 }
 0x364   : > { %v8975_v54 = vpop.eup %5807  ;;  %v8980_v20 = vmul.f32 0.70710677, %v8966_v63  ;;  %vm2249_vm3 = vmor %vm2247_vm2, %vm2248_vm1  ;;  %v2254_v15 = vor.u32 1.1754944e-38, %v2253_v5  ;;  %v2280_v33 = vmul.f32 %v2279_v1, %v8565_v13  ;;  %vm2252_vm4 = vcmp.eq.f32.partialorder %v2251_v7, 8.507059e+37 }
 0x365   : > { %v2250_v0 = vsel %vm2249_vm3, %v5806_v52, %v2246_v8  ;;  %v2394_v3 = vmul.f32 %v2393_v21, %v8597_v22  ;;  %v3443_v26 = vmul.f32 %v8975_v54, %v8950_v23  ;;  %v2867_v10 = vmul.f32 %v2866_v48, %v8780_v44 }
 0x366   : > { %v2255_v57 = vsel %vm2252_vm4, %v2254_v15, %v2250_v0  ;;  %v8988_v42 = vadd.f32 1.0, %v2280_v33  ;;  %v3477_v45 = vadd.f32 0.112945676, %v3476_v56  ;;  %v2904_v32 = vadd.f32 0.0036580483, %v2903_v30 }
 0x367   : > { %v2256_v25 = vmul.f32 %v2255_v57, %v8745_v59  ;;  %v2395_v43 = vadd.f32 0.014752088, %v2394_v3  ;;  %v3444_v5 = vsub.f32 1.0, %v3443_v26  ;;  %v8992_v13 = vmul.f32 %v2710_v37, %v8704_v46 }
 0x368   : > { %v8995_v52 = vmul.f32 %v2748_v17, %v8756_v29  ;;  %v3179_v7 = vmul.f32 %v8980_v20, %v8980_v20  ;;  %5809 = vrcp.f32 %v8988_v42  ;;  %v3023_v48 = vmul.f32 %v3022_v60, %v8938_v62 }
 0x369   : > { %v3061_v1 = vmul.f32 2.1237322e-06, %v8977_v39  ;;  %v5539_v30 = vclamps-f32 %v2256_v25, 1.0  ;;  %v2396_v59 = vmul.f32 %v2395_v43, %v8597_v22  ;;  %v3445_v56 = vmul.f32 %v8975_v54, %v3444_v5  ;;  %v4566_v5 = vld [vmem:[#allocation13 + $0xd8] sm:$0xff] }
 0x36a   : > { %vm3448_vm5 = vweird.f32 %v8975_v54  ;;  %v3453_v46 = vand.u32 2147483648, %v8950_v23  ;;  %v3478_v17 = vmul.f32 %v3477_v45, %v8009_v27  ;;  %v2905_v37 = vmul.f32 %v2904_v32, %v8922_v11  ;;  %v1602_v32 = vpop.f32.mrf.mxu2  ;;  %4929 = vmatpush.msrb.mxu0 %v4566_v5 }
 0x36b   : > { %v4389_v8 = vadd.f32 1.0, %v5539_v30  ;;  %v2397_v21 = vadd.f32 0.112945676, %v2396_v59  ;;  %v3451_v15 = vand.u32 2147483647, %v8950_v23  ;;  %v9009_v60 = vmin.f32 %v3179_v7, 16.0 }
 0x36c   : > { %v3446_v25 = vadd.f32 %v8975_v54, %v3445_v56  ;;  %vm3447_vm6 = vweird.f32 %v8950_v23  ;;  %v3479_v43 = vadd.f32 0.4994258, %v3478_v17  ;;  %v2868_v33 = vadd.f32 0.18741608, %v2867_v10  ;;  %v4598_v7 = vld [vmem:[#allocation13 + $0x1d8] sm:$0xff] }
 0x36d   : > { %v3024_v0 = vadd.f32 0.0036580483, %v3023_v48  ;;  %v9014_v3 = vmul.f32 %v4389_v8, %v8616_v4  ;;  %v2398_v26 = vmul.f32 %v2397_v21, %v8597_v22  ;;  %vm9019_vm7 = vmor %vm3447_vm6, %vm3448_vm5  ;;  %v3454_v10 = vor.u32 1.1754944e-38, %v3453_v46  ;;  %v4628_v48 = vld [vmem:[#allocation13 + $0x2c8] sm:$0xff]  ;;  %4994 = vmatpush.msrb.mxu1 %v4598_v7 }
 0x36e   : > { %v5810_v45 = vpop.eup %5809  ;;  %v3450_v23 = vsel %vm9019_vm7, %v8975_v54, %v3446_v25  ;;  %v3480_v4 = vmul.f32 %v3479_v43, %v8009_v27  ;;  %v3592_v30 = vmul.f32 3.8918573e-05, %v8089_v61  ;;  %v2906_v59 = vadd.f32 0.05243302, %v2905_v37  ;;  %5060 = vmatpush.msrb.mxu2 %v4628_v48  ;;  %v1667_v48 = vpop.f32.mrf.mxu3 }
 0x36f   : > { %10865 = vst [vmem:[#allocation50_spill] sm:$0xff] %v9014_v3  ;;  %4819 = vmatmul.f32.gmra.mxu2 %v9014_v3  ;;  %v2283_v56 = vmul.f32 %v5810_v45, %v8988_v42  ;;  %v2399_v17 = vadd.f32 0.4994258, %v2398_v26  ;;  %vm3452_vm8 = vcmp.eq.f32.partialorder %v3451_v15, 8.507059e+37  ;;  %v3062_v8 = vadd.f32 0.00028619796, %v3061_v1 }
 0x370   : > { %v3181_v21 = vmul.f32 2.1237322e-06, %v9009_v60  ;;  %v3455_v57 = vsel %vm3452_vm8, %v3454_v10, %v3450_v23  ;;  %v9031_v54 = vadd.f32 1.0, %v3480_v4  ;;  %v1603_v27 = vadd.f32 %v1602_v32, %v8103_v50 }
 0x371   : > { %v2284_v46 = vsub.f32 1.0, %v2283_v56  ;;  %v2400_v37 = vmul.f32 %v2399_v17, %v8597_v22  ;;  %v3456_v25 = vmul.f32 %v3455_v57, %v8362_v9  ;;  %v2291_v43 = vand.u32 2147483647, %v8988_v42 }
 0x372   : > { %v2293_v26 = vand.u32 2147483648, %v8988_v42  ;;  %5811 = vrcp.f32 %v9031_v54  ;;  %v3593_v1 = vadd.f32 0.001143296, %v3592_v30  ;;  %vm2288_vm9 = vweird.f32 %v5810_v45 }
 0x373   : > { %v2285_v15 = vmul.f32 %v5810_v45, %v2284_v46  ;;  %v9039_v5 = vadd.f32 1.0, %v2400_v37  ;;  %v5569_v7 = vclamps-f32 %v3456_v25, 1.0  ;;  %v2907_v23 = vmul.f32 %v2906_v59, %v8922_v11  ;;  %v10868_v25 = vld [vmem:[#allocation53_spill] sm:$0xff] }
 0x374   : > { %v3025_v32 = vmul.f32 %v3024_v0, %v8938_v62  ;;  %v3063_v22 = vmul.f32 %v3062_v8, %v8977_v39  ;;  %v2432_v9 = vmul.f32 3.8918573e-05, %v8629_v58  ;;  %v3182_v10 = vadd.f32 0.00028619796, %v3181_v21 }
 0x375   : > { %v2286_v4 = vadd.f32 %v5810_v45, %v2285_v15  ;;  %vm2287_vm10 = vweird.f32 %v8988_v42  ;;  %5813 = vrcp.f32 %v9039_v5  ;;  %v2294_v30 = vor.u32 1.1754944e-38, %v2293_v26 }
 0x376   : > { %vm2289_vm11 = vmor %vm2287_vm10, %vm2288_vm9  ;;  %v4419_v56 = vadd.f32 1.0, %v5569_v7  ;;  %v3594_v17 = vmul.f32 %v3593_v1, %v8089_v61  ;;  %v3632_v59 = vmul.f32 3.8918573e-05, %v8127_v53  ;;  %v9049_v57 = vadd.f32 %v1667_v48, %v1603_v27 }
 0x377   : > { %v2290_v0 = vsel %vm2289_vm11, %v5810_v45, %v2286_v4  ;;  %vm2292_vm12 = vcmp.eq.f32.partialorder %v2291_v43, 8.507059e+37  ;;  %v2433_v8 = vadd.f32 0.001143296, %v2432_v9  ;;  %v9052_v21 = vmul.f32 %v2868_v33, %v8780_v44 }
 0x378   : > { %v5812_v46 = vpop.eup %5811  ;;  %v9054_v42 = vadd.f32 0.05243302, %v3025_v32  ;;  %v2295_v37 = vsel %vm2292_vm12, %v2294_v30, %v2290_v0  ;;  %v9057_v15 = vmul.f32 %v4419_v56, %v10868_v25  ;;  %v9059_v26 = vadd.f32 0.18741608, %v2907_v23 }
 0x379   : > { %v3064_v1 = vadd.f32 0.0036580483, %v3063_v22  ;;  %v2296_v7 = vmul.f32 %v2295_v37, %v8760_v31  ;;  %v3483_v27 = vmul.f32 %v5812_v46, %v9031_v54  ;;  %v3493_v45 = vand.u32 2147483648, %v9031_v54 }
 0x37a   : > { %10869 = vst [vmem:[#allocation33_spill] sm:$0xff] %v9057_v15  ;;  %4713 = vmatmul.f32.gmra.mxu0 %v9057_v15  ;;  %v2434_v33 = vmul.f32 %v2433_v8, %v8629_v58  ;;  %v3595_v43 = vadd.f32 0.014752088, %v3594_v17  ;;  %v3633_v32 = vadd.f32 0.001143296, %v3632_v59  ;;  %v3183_v4 = vmul.f32 %v3182_v10, %v9009_v60 }
 0x37b   : > { %v5814_v9 = vpop.eup %5813  ;;  %v9068_v48 = vmul.f32 0.70710677, %v9049_v57  ;;  %v5540_v23 = vclamps-f32 %v2296_v7, 1.0  ;;  %v3484_v22 = vsub.f32 1.0, %v3483_v27  ;;  %vm3487_vm13 = vweird.f32 %v9031_v54 }
 0x37c   : > { %v2403_v31 = vmul.f32 %v5814_v9, %v9039_v5  ;;  %v3491_v30 = vand.u32 2147483647, %v9031_v54  ;;  %v2435_v56 = vadd.f32 0.014752088, %v2434_v33  ;;  %vm3488_vm14 = vweird.f32 %v5812_v46  ;;  %v4660_v54 = vld [vmem:[#allocation13 + $0x3c8] sm:$0xff] }
 0x37d   : > { %v4390_v0 = vadd.f32 1.0, %v5540_v23  ;;  %v3485_v37 = vmul.f32 %v5812_v46, %v3484_v22  ;;  %v3596_v17 = vmul.f32 %v3595_v43, %v8089_v61  ;;  %v3494_v8 = vor.u32 1.1754944e-38, %v3493_v45  ;;  %vm3489_vm0 = vmor %vm3487_vm13, %vm3488_vm14  ;;  %5125 = vmatpush.msrb.mxu3 %v4660_v54 }
 0x37e   : > { %v2404_v59 = vsub.f32 1.0, %v2403_v31  ;;  %v2436_v10 = vmul.f32 %v2435_v56, %v8629_v58  ;;  %v3634_v25 = vmul.f32 %v3633_v32, %v8127_v53  ;;  %v2413_v27 = vand.u32 2147483648, %v9039_v5 }
 0x37f   : > { %v9077_v7 = vmul.f32 %v4390_v0, %v8626_v12  ;;  %v3486_v3 = vadd.f32 %v5812_v46, %v3485_v37  ;;  %v3597_v15 = vadd.f32 0.112945676, %v3596_v17  ;;  %vm2408_vm15 = vweird.f32 %v5814_v9 }
 0x380   : > { %v2405_v16 = vmul.f32 %v5814_v9, %v2404_v59  ;;  %v2411_v33 = vand.u32 2147483647, %v9039_v5  ;;  %v2437_v43 = vadd.f32 0.112945676, %v2436_v10  ;;  %vm2407_vm1 = vweird.f32 %v9039_v5 }
 0x381   : > { %10870 = vst [vmem:[#allocation41_spill] sm:$0xff] %v9077_v7  ;;  %4884 = vmatmul.f32.gmra.mxu3 %v9077_v7  ;;  %v3490_v45 = vsel %vm3489_vm0, %v5812_v46, %v3486_v3  ;;  %vm3492_vm2 = vcmp.eq.f32.partialorder %v3491_v30, 8.507059e+37  ;;  %v3598_v12 = vmul.f32 %v3597_v15, %v8089_v61  ;;  %v3635_v31 = vadd.f32 0.014752088, %v3634_v25  ;;  %vm2409_vm3 = vmor %vm2407_vm1, %vm2408_vm15  ;;  %v1475_v46 = vpop.f32.mrf.mxu0 }
 0x382   : > { %v2406_v32 = vadd.f32 %v5814_v9, %v2405_v16  ;;  %v3495_v23 = vsel %vm3492_vm2, %v3494_v8, %v3490_v45  ;;  %v2438_v22 = vmul.f32 %v2437_v43, %v8629_v58  ;;  %v2414_v56 = vor.u32 1.1754944e-38, %v2413_v27 }
 0x383   : > { %v3496_v0 = vmul.f32 %v3495_v23, %v8377_v35  ;;  %v2552_v37 = vmul.f32 3.8918573e-05, %v8657_v36  ;;  %v3599_v17 = vadd.f32 0.4994258, %v3598_v12  ;;  %vm2412_vm4 = vcmp.eq.f32.partialorder %v2411_v33, 8.507059e+37 }
 0x384   : > { %v2410_v59 = vsel %vm2409_vm3, %v5814_v9, %v2406_v32  ;;  %v2439_v5 = vadd.f32 0.4994258, %v2438_v22  ;;  %v3752_v3 = vmul.f32 3.8918573e-05, %v8175_v6  ;;  %v3065_v10 = vmul.f32 %v3064_v1, %v8977_v39  ;;  %v10871_v1 = vld [vmem:[#allocation62_spill] sm:$0xff] }
 0x385   : > { %v2415_v16 = vsel %vm2412_vm4, %v2414_v56, %v2410_v59  ;;  %v5570_v15 = vclamps-f32 %v3496_v0, 1.0  ;;  %v2553_v30 = vadd.f32 0.001143296, %v2552_v37  ;;  %v3600_v8 = vmul.f32 %v3599_v17, %v8089_v61  ;;  %v1540_v17 = vpop.f32.mrf.mxu1  ;;  %v1605_v59 = vpop.f32.mrf.mxu2 }
 0x386   : > { %v2416_v35 = vmul.f32 %v2415_v16, %v8771_v51  ;;  %v2440_v25 = vmul.f32 %v2439_v5, %v8629_v58  ;;  %v3636_v27 = vmul.f32 %v3635_v31, %v8127_v53  ;;  %v3184_v9 = vadd.f32 0.0036580483, %v3183_v4 }
 0x387   : > { %v4420_v33 = vadd.f32 1.0, %v5570_v15  ;;  %v2554_v43 = vmul.f32 %v2553_v30, %v8657_v36  ;;  %v9096_v45 = vadd.f32 1.0, %v3600_v8  ;;  %v3219_v12 = vmul.f32 %v9068_v48, %v9068_v48 }
 0x388   : > { %v1476_v32 = vadd.f32 %v1475_v46, %v8048_v38  ;;  %v5543_v61 = vclamps-f32 %v2416_v35, 1.0  ;;  %v9101_v23 = vadd.f32 1.0, %v2440_v25  ;;  %v3753_v4 = vadd.f32 0.001143296, %v3752_v3 }
 0x389   : > { %v9104_v51 = vmul.f32 %v4420_v33, %v10871_v1  ;;  %v2555_v58 = vadd.f32 0.014752088, %v2554_v43  ;;  %5815 = vrcp.f32 %v9096_v45  ;;  %v2750_v22 = vadd.f32 1.1283791, %v8995_v52  ;;  %v10874_v43 = vld [vmem:[#allocation26_spill] sm:$0xff] }
 0x38a   : > { %v4393_v31 = vadd.f32 1.0, %v5543_v61  ;;  %5817 = vrcp.f32 %v9101_v23  ;;  %v3637_v56 = vadd.f32 0.112945676, %v3636_v27  ;;  %v2909_v0 = vmul.f32 %v9059_v26, %v8922_v11  ;;  %v4596_v61 = vld [vmem:[#allocation13 + $0x1c8] sm:$0xff] }
 0x38b   : > { %10872 = vst [vmem:[#allocation53_spill] sm:$0xff] %v9104_v51  ;;  %v3027_v54 = vmul.f32 %v9054_v42, %v8938_v62  ;;  %v3185_v37 = vmul.f32 %v3184_v9, %v9009_v60  ;;  %4778 = vmatmul.f32.gmra.mxu1 %v9104_v51  ;;  %v2556_v5 = vmul.f32 %v2555_v58, %v8657_v36  ;;  %v2870_v52 = vadd.f32 1.1283791, %v9052_v21 }
 0x38c   : > { %v9117_v3 = vmin.f32 %v3219_v12, 16.0  ;;  %v9119_v46 = vadd.f32 %v1540_v17, %v1476_v32  ;;  %v9122_v16 = vmul.f32 %v4393_v31, %v8674_v55  ;;  %v9125_v26 = vmul.f32 0.5, %v8844_v19  ;;  %v4564_v32 = vld [vmem:[#allocation13 + $0xc8] sm:$0xff]  ;;  %4995 = vmatpush.msrb.mxu1 %v4596_v61 }
 0x38d   : > { %v3066_v42 = vadd.f32 0.05243302, %v3065_v10  ;;  %v2557_v15 = vadd.f32 0.112945676, %v2556_v5  ;;  %v3754_v30 = vmul.f32 %v3753_v4, %v8175_v6  ;;  %v9129_v8 = vmul.f32 %v2750_v22, %v8721_v2  ;;  %v1670_v4 = vpop.f32.mrf.mxu3  ;;  %4930 = vmatpush.msrb.mxu0 %v4564_v32 }
 0x38e   : > { %10873 = vst [vmem:[#allocation62_spill] sm:$0xff] %v9122_v16  ;;  %v9132_v35 = vmul.f32 0.5, %v8877_v41  ;;  %v1606_v21 = vadd.f32 %v1605_v59, %v8103_v50  ;;  %4822 = vmatmul.f32.gmra.mxu2 %v9122_v16  ;;  %v3638_v55 = vmul.f32 %v3637_v56, %v8127_v53  ;;  %v2910_v27 = vadd.f32 1.1283791, %v2909_v0  ;;  %v4626_v56 = vld [vmem:[#allocation13 + $0x2b8] sm:$0xff] }
 0x38f   : > { %v5816_v25 = vpop.eup %5815  ;;  %v3028_v19 = vadd.f32 0.18741608, %v3027_v54  ;;  %v3186_v9 = vadd.f32 0.05243302, %v3185_v37  ;;  %v2558_v10 = vmul.f32 %v2557_v15, %v8657_v36  ;;  %v9139_v12 = vmul.f32 %v2870_v52, %v10874_v43  ;;  %5061 = vmatpush.msrb.mxu2 %v4626_v56 }
 0x390   : > { %v5818_v33 = vpop.eup %5817  ;;  %v3221_v2 = vmul.f32 2.1237322e-06, %v9117_v3  ;;  %v9143_v41 = vmul.f32 0.70710677, %v9119_v46  ;;  %v3603_v1 = vmul.f32 %v5816_v25, %v9096_v45  ;;  %v3067_v58 = vmul.f32 %v3066_v42, %v8977_v39 }
 0x391   : > { %v2443_v22 = vmul.f32 %v5818_v33, %v9101_v23  ;;  %v2559_v31 = vadd.f32 0.4994258, %v2558_v10  ;;  %v3755_v0 = vadd.f32 0.014752088, %v3754_v30  ;;  %v9148_v54 = vadd.f32 %v1670_v4, %v1606_v21 }
 0x392   : > { %v2451_v37 = vand.u32 2147483647, %v9101_v23  ;;  %v3604_v17 = vsub.f32 1.0, %v3603_v1  ;;  %v3639_v59 = vadd.f32 0.4994258, %v3638_v55  ;;  %v2453_v52 = vand.u32 2147483648, %v9101_v23 }
 0x393   : > { %v2444_v5 = vsub.f32 1.0, %v2443_v22  ;;  %v2560_v42 = vmul.f32 %v2559_v31, %v8657_v36  ;;  %v3613_v15 = vand.u32 2147483648, %v9096_v45  ;;  %vm3608_vm5 = vweird.f32 %v5816_v25 }
 0x394   : > { %v3605_v43 = vmul.f32 %v5816_v25, %v3604_v17  ;;  %v3611_v10 = vand.u32 2147483647, %v9096_v45  ;;  %v3640_v30 = vmul.f32 %v3639_v59, %v8127_v53  ;;  %vm2448_vm6 = vweird.f32 %v5818_v33 }
 0x395   : > { %v2445_v21 = vmul.f32 %v5818_v33, %v2444_v5  ;;  %v9156_v32 = vadd.f32 1.0, %v2560_v42  ;;  %v3756_v55 = vmul.f32 %v3755_v0, %v8175_v6  ;;  %vm2447_vm7 = vweird.f32 %v9101_v23  ;;  %v10876_v5 = vld [vmem:[#allocation76_spill] sm:$0xff] }
 0x396   : > { %v3606_v61 = vadd.f32 %v5816_v25, %v3605_v43  ;;  %vm3607_vm8 = vweird.f32 %v9096_v45  ;;  %v9161_v36 = vadd.f32 1.0, %v3640_v30  ;;  %v2454_v4 = vor.u32 1.1754944e-38, %v2453_v52  ;;  %vm2449_vm10 = vmor %vm2447_vm7, %vm2448_vm6  ;;  %v1478_v43 = vpop.f32.mrf.mxu0 }
 0x397   : > { %v2446_v1 = vadd.f32 %v5818_v33, %v2445_v21  ;;  %5819 = vrcp.f32 %v9156_v32  ;;  %vm3609_vm9 = vmor %vm3607_vm8, %vm3608_vm5  ;;  %v3614_v22 = vor.u32 1.1754944e-38, %v3613_v15  ;;  %vm3612_vm11 = vcmp.eq.f32.partialorder %v3611_v10, 8.507059e+37 }
 0x398   : > { %v3610_v53 = vsel %vm3609_vm9, %v5816_v25, %v3606_v61  ;;  %5821 = vrcp.f32 %v9161_v36  ;;  %v2592_v31 = vmul.f32 3.8918573e-05, %v8708_v18  ;;  %vm2452_vm12 = vcmp.eq.f32.partialorder %v2451_v37, 8.507059e+37 }
 0x399   : > { %v2450_v56 = vsel %vm2449_vm10, %v5818_v33, %v2446_v1  ;;  %v3615_v23 = vsel %vm3612_vm11, %v3614_v22, %v3610_v53  ;;  %v3757_v0 = vadd.f32 0.112945676, %v3756_v55  ;;  %v9167_v45 = vmul.f32 0.5, %v8927_v34 }
 0x39a   : > { %v9170_v17 = vmul.f32 0.70710677, %v9148_v54  ;;  %v2455_v59 = vsel %vm2452_vm12, %v2454_v4, %v2450_v56  ;;  %v3616_v52 = vmul.f32 %v3615_v23, %v10876_v5  ;;  %v9174_v25 = vmul.f32 %v2910_v27, %v8874_v40  ;;  %v10879_v23 = vld [vmem:[#allocation64_spill] sm:$0xff]  ;;  %v10881_v5 = vld [vmem:[#allocation43_spill] sm:$0xff] }
 0x39b   : > { %10875 = vst [vmem:[#allocation26_spill] sm:$0xff] %v9167_v45  ;;  %v9177_v42 = vmul.f32 %v3028_v19, %v8938_v62  ;;  %v9180_v33 = vmul.f32 0.5, %v8966_v63  ;;  %v2456_v37 = vmul.f32 %v2455_v59, %v8805_v28  ;;  %v9183_v15 = vadd.f32 0.18741608, %v3067_v58 }
 0x39c   : > { %v9186_v34 = vmul.f32 %v3186_v9, %v9009_v60  ;;  %v5573_v10 = vclamps-f32 %v3616_v52, 1.0  ;;  %v2593_v30 = vadd.f32 0.001143296, %v2592_v31  ;;  %v3222_v55 = vadd.f32 0.00028619796, %v3221_v2  ;;  %v10878_v9 = vld [vmem:[#allocation49_spill] sm:$0xff] }
 0x39d   : > { %10877 = vst [vmem:[#allocation76_spill] sm:$0xff] %v9180_v33  ;;  %v5820_v21 = vpop.eup %5819  ;;  %v3339_v40 = vmul.f32 %v9143_v41, %v9143_v41  ;;  %v5544_v27 = vclamps-f32 %v2456_v37, 1.0  ;;  %v3758_v19 = vmul.f32 %v3757_v0, %v8175_v6  ;;  %v3379_v28 = vmul.f32 %v9170_v17, %v9170_v17 }
 0x39e   : > { %v5822_v63 = vpop.eup %5821  ;;  %v2563_v58 = vmul.f32 %v5820_v21, %v9156_v32  ;;  %v4423_v61 = vadd.f32 1.0, %v5573_v10  ;;  %v3792_v1 = vmul.f32 3.8918573e-05, %v10878_v9  ;;  %v1479_v4 = vadd.f32 %v1478_v43, %v8048_v38 }
 0x39f   : > { %v4394_v22 = vadd.f32 1.0, %v5544_v27  ;;  %v2571_v2 = vand.u32 2147483647, %v9156_v32  ;;  %v3643_v53 = vmul.f32 %v5822_v63, %v9161_v36  ;;  %v2573_v56 = vand.u32 2147483648, %v9156_v32 }
 0x3a0   : > { %v2564_v31 = vsub.f32 1.0, %v2563_v58  ;;  %v9200_v0 = vmul.f32 %v4423_v61, %v10879_v23  ;;  %v2594_v59 = vmul.f32 %v2593_v30, %v8708_v18  ;;  %v3653_v10 = vand.u32 2147483648, %v9161_v36 }
 0x3a1   : > { %v9204_v52 = vmul.f32 %v4394_v22, %v10881_v5  ;;  %v3644_v37 = vsub.f32 1.0, %v3643_v53  ;;  %v3759_v43 = vadd.f32 0.4994258, %v3758_v19  ;;  %vm2568_vm13 = vweird.f32 %v5820_v21 }
 0x3a2   : > { %10880 = vst [vmem:[#allocation49_spill] sm:$0xff] %v9200_v0  ;;  %v2565_v27 = vmul.f32 %v5820_v21, %v2564_v31  ;;  %4716 = vmatmul.f32.gmra.mxu0 %v9200_v0  ;;  %v2595_v16 = vadd.f32 0.014752088, %v2594_v59  ;;  %v3793_v58 = vadd.f32 0.001143296, %v3792_v1  ;;  %vm3648_vm14 = vweird.f32 %v5822_v63  ;;  %v4594_v0 = vld [vmem:[#allocation13 + $0x1b8] sm:$0xff] }
 0x3a3   : > { %10882 = vst [vmem:[#allocation64_spill] sm:$0xff] %v9204_v52  ;;  %4887 = vmatmul.f32.gmra.mxu3 %v9204_v52  ;;  %v3645_v7 = vmul.f32 %v5822_v63, %v3644_v37  ;;  %v3651_v61 = vand.u32 2147483647, %v9161_v36  ;;  %v3760_v30 = vmul.f32 %v3759_v43, %v8175_v6  ;;  %vm2567_vm15 = vweird.f32 %v9156_v32  ;;  %v10883_v32 = vld [vmem:[#allocation84_spill] sm:$0xff]  ;;  %4996 = vmatpush.msrb.mxu1 %v4594_v0 }
 0x3a4   : > { %v2566_v22 = vadd.f32 %v5820_v21, %v2565_v27  ;;  %vm3647_vm0 = vweird.f32 %v9161_v36  ;;  %v2596_v19 = vmul.f32 %v2595_v16, %v8708_v18  ;;  %vm2569_vm1 = vmor %vm2567_vm15, %vm2568_vm13  ;;  %vm2572_vm2 = vcmp.eq.f32.partialorder %v2571_v2, 8.507059e+37 }
 0x3a5   : > { %v2574_v53 = vor.u32 1.1754944e-38, %v2573_v56  ;;  %v3646_v31 = vadd.f32 %v5822_v63, %v3645_v7  ;;  %v9214_v1 = vadd.f32 1.0, %v3760_v30  ;;  %vm3649_vm3 = vmor %vm3647_vm0, %vm3648_vm14  ;;  %v3654_v59 = vor.u32 1.1754944e-38, %v3653_v10  ;;  %v10884_v56 = vld [vmem:[#allocation27_spill] sm:$0xff]  ;;  %v10885_v10 = vld [vmem:[#allocation78_spill] sm:$0xff] }
 0x3a6   : > { %v2570_v23 = vsel %vm2569_vm1, %v5820_v21, %v2566_v22  ;;  %v2597_v5 = vadd.f32 0.112945676, %v2596_v19  ;;  %v3794_v37 = vmul.f32 %v3793_v58, %v10878_v9  ;;  %vm3652_vm4 = vcmp.eq.f32.partialorder %v3651_v61, 8.507059e+37  ;;  %v4658_v22 = vld [vmem:[#allocation13 + $0x3b8] sm:$0xff]  ;;  %v1543_v61 = vpop.f32.mrf.mxu1 }
 0x3a7   : > { %v2575_v6 = vsel %vm2572_vm2, %v2574_v53, %v2570_v23  ;;  %v3650_v43 = vsel %vm3649_vm3, %v5822_v63, %v3646_v31  ;;  %5823 = vrcp.f32 %v9214_v1  ;;  %v3912_v7 = vmul.f32 3.8918573e-05, %v10884_v56  ;;  %5126 = vmatpush.msrb.mxu3 %v4658_v22 }
 0x3a8   : > { %v2576_v36 = vmul.f32 %v2575_v6, %v10883_v32  ;;  %v3655_v16 = vsel %vm3652_vm4, %v3654_v59, %v3650_v43  ;;  %v2598_v2 = vmul.f32 %v2597_v5, %v8708_v18  ;;  %v3223_v27 = vmul.f32 %v3222_v55, %v9117_v3 }
 0x3a9   : > { %v9222_v21 = vmin.f32 %v3339_v40, 16.0  ;;  %v3656_v30 = vmul.f32 %v3655_v16, %v10885_v10  ;;  %v2712_v58 = vmul.f32 3.8918573e-05, %v8730_v24  ;;  %v9226_v63 = vmin.f32 %v3379_v28, 16.0 }
 0x3aa   : > { %v5547_v19 = vclamps-f32 %v2576_v36, 1.0  ;;  %v2599_v53 = vadd.f32 0.4994258, %v2598_v2  ;;  %v3795_v31 = vadd.f32 0.014752088, %v3794_v37  ;;  %v3069_v23 = vmul.f32 %v9183_v15, %v8977_v39 }
 0x3ab   : > { %10886 = vst [vmem:[#allocation43_spill] sm:$0xff] %v9226_v63  ;;  %v9230_v59 = vadd.f32 %v1543_v61, %v1479_v4  ;;  %v5574_v55 = vclamps-f32 %v3656_v30, 1.0  ;;  %v2713_v40 = vadd.f32 0.001143296, %v2712_v58  ;;  %v3188_v5 = vadd.f32 0.18741608, %v9186_v34 }
 0x3ac   : > { %v4397_v6 = vadd.f32 1.0, %v5547_v19  ;;  %v2600_v43 = vmul.f32 %v2599_v53, %v8708_v18  ;;  %v3913_v32 = vadd.f32 0.001143296, %v3912_v7  ;;  %v3224_v16 = vadd.f32 0.0036580483, %v3223_v27  ;;  %v10887_v4 = vld [vmem:[#allocation25_spill] sm:$0xff] }
 0x3ad   : > { %v9234_v28 = vpop.eup %5823  ;;  %v3341_v36 = vmul.f32 2.1237322e-06, %v9222_v21  ;;  %v4424_v2 = vadd.f32 1.0, %v5574_v55  ;;  %v2714_v37 = vmul.f32 %v2713_v40, %v8730_v24  ;;  %v3381_v15 = vmul.f32 2.1237322e-06, %v9226_v63  ;;  %v10890_v7 = vld [vmem:[#allocation68_spill] sm:$0xff] }
 0x3ae   : > { %v9240_v10 = vmul.f32 %v4397_v6, %v10887_v4  ;;  %v9242_v30 = vadd.f32 1.0, %v2600_v43  ;;  %v3796_v34 = vmul.f32 %v3795_v31, %v10878_v9  ;;  %v9246_v18 = vmul.f32 0.70710677, %v9230_v59  ;;  %v10892_v6 = vld [vmem:[#allocation28_spill] sm:$0xff] }
 0x3af   : > { %v9249_v22 = vmul.f32 %v4424_v2, %v10890_v7  ;;  %v2715_v27 = vadd.f32 0.014752088, %v2714_v37  ;;  %v3763_v58 = vmul.f32 %v9234_v28, %v9214_v1  ;;  %v9254_v61 = vadd.f32 1.1283791, %v9177_v42 }
 0x3b0   : > { %10888 = vst [vmem:[#allocation84_spill] sm:$0xff] %v9240_v10  ;;  %v9256_v19 = vadd.f32 1.1283791, %v3069_v23  ;;  %4825 = vmatmul.f32.gmra.mxu2 %v9240_v10  ;;  %5825 = vrcp.f32 %v9242_v30  ;;  %v3914_v53 = vmul.f32 %v3913_v32, %v10884_v56  ;;  %v3342_v31 = vadd.f32 0.00028619796, %v3341_v36 }
 0x3b1   : > { %10889 = vst [vmem:[#allocation27_spill] sm:$0xff] %v9246_v18  ;;  %4781 = vmatmul.f32.gmra.mxu1 %v9249_v22  ;;  %v2716_v55 = vmul.f32 %v2715_v27, %v8730_v24  ;;  %v3764_v40 = vsub.f32 1.0, %v3763_v58  ;;  %v3952_v43 = vmul.f32 3.8918573e-05, %v10892_v6  ;;  %v9265_v2 = vmul.f32 %v3188_v5, %v9009_v60 }
 0x3b2   : > { %10891 = vst [vmem:[#allocation78_spill] sm:$0xff] %v9249_v22  ;;  %v3225_v42 = vmul.f32 %v3224_v16, %v9117_v3  ;;  %v3382_v23 = vadd.f32 0.00028619796, %v3381_v15  ;;  %v3797_v37 = vadd.f32 0.112945676, %v3796_v34  ;;  %v3499_v4 = vmul.f32 %v9246_v18, %v9246_v18  ;;  %v1608_v16 = vpop.f32.mrf.mxu2  ;;  %v4562_v22 = vld [vmem:[#allocation13 + $0xb8] sm:$0xff] }
 0x3b3   : > { %v2717_v7 = vadd.f32 0.112945676, %v2716_v55  ;;  %v3765_v32 = vmul.f32 %v9234_v28, %v3764_v40  ;;  %v3773_v36 = vand.u32 2147483648, %v9214_v1  ;;  %vm3768_vm5 = vweird.f32 %v9234_v28  ;;  %v4624_v18 = vld [vmem:[#allocation13 + $0x2a8] sm:$0xff]  ;;  %4931 = vmatpush.msrb.mxu0 %v4562_v22  ;;  %v10894_v22 = vld [vmem:[#allocation80_spill] sm:$0xff] }
 0x3b4   : > { %v3771_v27 = vand.u32 2147483647, %v9214_v1  ;;  %v3798_v58 = vmul.f32 %v3797_v37, %v10878_v9  ;;  %v3915_v5 = vadd.f32 0.014752088, %v3914_v53  ;;  %v3343_v10 = vmul.f32 %v3342_v31, %v9222_v21  ;;  %5062 = vmatpush.msrb.mxu2 %v4624_v18 }
 0x3b5   : > { %v2718_v15 = vmul.f32 %v2717_v7, %v8730_v24  ;;  %v3766_v34 = vadd.f32 %v9234_v28, %v3765_v32  ;;  %v3953_v52 = vadd.f32 0.001143296, %v3952_v43  ;;  %v3383_v40 = vmul.f32 %v3382_v23, %v9226_v63 }
 0x3b6   : > { %v5826_v55 = vpop.eup %5825  ;;  %vm3767_vm6 = vweird.f32 %v9214_v1  ;;  %v3799_v51 = vadd.f32 0.4994258, %v3798_v58  ;;  %v3916_v37 = vmul.f32 %v3915_v5, %v10884_v56  ;;  %v9281_v53 = vmin.f32 %v3499_v4, 16.0 }
 0x3b7   : > { %v2603_v31 = vmul.f32 %v5826_v55, %v9242_v30  ;;  %v2719_v33 = vadd.f32 0.4994258, %v2718_v15  ;;  %vm3769_vm7 = vmor %vm3767_vm6, %vm3768_vm5  ;;  %v3774_v43 = vor.u32 1.1754944e-38, %v3773_v36  ;;  %v1609_v23 = vadd.f32 %v1608_v16, %v8103_v50 }
 0x3b8   : > { %10893 = vst [vmem:[#allocation25_spill] sm:$0xff] %v9281_v53  ;;  %v3770_v7 = vsel %vm3769_vm7, %v9234_v28, %v3766_v34  ;;  %vm3772_vm8 = vcmp.eq.f32.partialorder %v3771_v27, 8.507059e+37  ;;  %v3800_v1 = vmul.f32 %v3799_v51, %v10878_v9  ;;  %v2613_v4 = vand.u32 2147483648, %v9242_v30  ;;  %v1673_v34 = vpop.f32.mrf.mxu3 }
 0x3b9   : > { %v2604_v32 = vsub.f32 1.0, %v2603_v31  ;;  %v2720_v58 = vmul.f32 %v2719_v33, %v8730_v24  ;;  %v3775_v5 = vsel %vm3772_vm8, %v3774_v43, %v3770_v7  ;;  %v3917_v45 = vadd.f32 0.112945676, %v3916_v37 }
 0x3ba   : > { %v3776_v0 = vmul.f32 %v3775_v5, %v10894_v22  ;;  %v9292_v15 = vadd.f32 1.0, %v3800_v1  ;;  %v3954_v36 = vmul.f32 %v3953_v52, %v10892_v6  ;;  %vm2608_vm9 = vweird.f32 %v5826_v55 }
 0x3bb   : > { %v2605_v16 = vmul.f32 %v5826_v55, %v2604_v32  ;;  %v2611_v28 = vand.u32 2147483647, %v9242_v30  ;;  %v9296_v27 = vadd.f32 1.0, %v2720_v58  ;;  %v3226_v51 = vadd.f32 0.05243302, %v3225_v42  ;;  %v10895_v32 = vld [vmem:[#allocation69_spill] sm:$0xff] }
 0x3bc   : > { %v3344_v9 = vadd.f32 0.0036580483, %v3343_v10  ;;  %v5577_v18 = vclamps-f32 %v3776_v0, 1.0  ;;  %5827 = vrcp.f32 %v9292_v15  ;;  %v3384_v24 = vadd.f32 0.0036580483, %v3383_v40 }
 0x3bd   : > { %v2606_v33 = vadd.f32 %v5826_v55, %v2605_v16  ;;  %vm2607_vm10 = vweird.f32 %v9242_v30  ;;  %5829 = vrcp.f32 %v9296_v27  ;;  %v2614_v52 = vor.u32 1.1754944e-38, %v2613_v4 }
 0x3be   : > { %vm2609_vm11 = vmor %vm2607_vm10, %vm2608_vm9  ;;  %v4427_v37 = vadd.f32 1.0, %v5577_v18  ;;  %v3918_v31 = vmul.f32 %v3917_v45, %v10884_v56  ;;  %v3955_v43 = vadd.f32 0.014752088, %v3954_v36  ;;  %v3501_v7 = vmul.f32 2.1237322e-06, %v9281_v53 }
 0x3bf   : > { %v9303_v42 = vadd.f32 %v1673_v34, %v1609_v23  ;;  %v2610_v10 = vsel %vm2609_vm11, %v5826_v55, %v2606_v33  ;;  %vm2612_vm12 = vcmp.eq.f32.partialorder %v2611_v28, 8.507059e+37  ;;  %v9307_v40 = vmul.f32 %v9254_v61, %v8894_v49 }
 0x3c0   : > { %v9311_v30 = vmul.f32 %v9256_v19, %v8942_v47  ;;  %v2615_v1 = vsel %vm2612_vm12, %v2614_v52, %v2610_v10  ;;  %v9314_v4 = vmul.f32 %v4427_v37, %v10895_v32  ;;  %v9317_v45 = vadd.f32 1.1283791, %v9265_v2 }
 0x3c1   : > { %v3227_v23 = vmul.f32 %v3226_v51, %v9117_v3  ;;  %v3345_v55 = vmul.f32 %v3344_v9, %v9222_v21  ;;  %v2616_v58 = vmul.f32 %v2615_v1, %v8959_v14  ;;  %v3385_v49 = vmul.f32 %v3384_v24, %v9226_v63 }
 0x3c2   : > { %10896 = vst [vmem:[#allocation68_spill] sm:$0xff] %v9314_v4  ;;  %v5828_v5 = vpop.eup %5827  ;;  %4719 = vmatmul.f32.gmra.mxu0 %v9314_v4  ;;  %v2752_v47 = vmul.f32 3.8918573e-05, %v8756_v29  ;;  %v3919_v61 = vadd.f32 0.4994258, %v3918_v31  ;;  %v3956_v19 = vmul.f32 %v3955_v43, %v10892_v6  ;;  %v2733_v24 = vand.u32 2147483648, %v9296_v27 }
 0x3c3   : > { %v5830_v22 = vpop.eup %5829  ;;  %v3502_v0 = vadd.f32 0.00028619796, %v3501_v7  ;;  %v9327_v2 = vmul.f32 0.70710677, %v9303_v42  ;;  %v5548_v36 = vclamps-f32 %v2616_v58, 1.0  ;;  %v3803_v16 = vmul.f32 %v5828_v5, %v9292_v15  ;;  %v10897_v7 = vld [vmem:[#allocation61_spill] sm:$0xff] }
 0x3c4   : > { %v2723_v14 = vmul.f32 %v5830_v22, %v9296_v27  ;;  %v2731_v28 = vand.u32 2147483647, %v9296_v27  ;;  %v3811_v51 = vand.u32 2147483647, %v9292_v15  ;;  %v2753_v9 = vadd.f32 0.001143296, %v2752_v47 }
 0x3c5   : > { %v4398_v18 = vadd.f32 1.0, %v5548_v36  ;;  %v3804_v33 = vsub.f32 1.0, %v3803_v16  ;;  %v3920_v34 = vmul.f32 %v3919_v61, %v10884_v56  ;;  %v3813_v37 = vand.u32 2147483648, %v9292_v15  ;;  %v10899_v61 = vld [vmem:[#allocation70_spill] sm:$0xff] }
 0x3c6   : > { %v2724_v52 = vsub.f32 1.0, %v2723_v14  ;;  %v2754_v31 = vmul.f32 %v2753_v9, %v8756_v29  ;;  %v3957_v43 = vadd.f32 0.112945676, %v3956_v19  ;;  %vm3808_vm13 = vweird.f32 %v5828_v5 }
 0x3c7   : > { %v9338_v10 = vmul.f32 %v4398_v18, %v10897_v7  ;;  %v3805_v1 = vmul.f32 %v5828_v5, %v3804_v33  ;;  %v9340_v32 = vadd.f32 1.0, %v3920_v34  ;;  %vm2728_vm14 = vweird.f32 %v5830_v22  ;;  %v1481_v18 = vpop.f32.mrf.mxu0 }
 0x3c8   : > { %v2725_v58 = vmul.f32 %v5830_v22, %v2724_v52  ;;  %v2755_v47 = vadd.f32 0.014752088, %v2754_v31  ;;  %v3958_v36 = vmul.f32 %v3957_v43, %v10892_v6  ;;  %vm3807_vm15 = vweird.f32 %v9292_v15 }
 0x3c9   : > { %10898 = vst [vmem:[#allocation28_spill] sm:$0xff] %v9338_v10  ;;  %4890 = vmatmul.f32.gmra.mxu3 %v9338_v10  ;;  %v3806_v56 = vadd.f32 %v5828_v5, %v3805_v1  ;;  %5831 = vrcp.f32 %v9340_v32  ;;  %v4072_v19 = vmul.f32 3.8918573e-05, %v10899_v61  ;;  %vm2727_vm0 = vweird.f32 %v9296_v27  ;;  %vm3809_vm1 = vmor %vm3807_vm15, %vm3808_vm13  ;;  %v10900_v27 = vld [vmem:[#allocation29_spill] sm:$0xff] }
 0x3ca   : > { %v2726_v16 = vadd.f32 %v5830_v22, %v2725_v58  ;;  %v3814_v14 = vor.u32 1.1754944e-38, %v3813_v37  ;;  %v2756_v9 = vmul.f32 %v2755_v47, %v8756_v29  ;;  %vm2729_vm2 = vmor %vm2727_vm0, %vm2728_vm14  ;;  %v2734_v33 = vor.u32 1.1754944e-38, %v2733_v24 }
 0x3cb   : > { %v3810_v34 = vsel %vm3809_vm1, %v5828_v5, %v3806_v56  ;;  %vm3812_vm3 = vcmp.eq.f32.partialorder %v3811_v51, 8.507059e+37  ;;  %v3959_v52 = vadd.f32 0.4994258, %v3958_v36  ;;  %vm2732_vm4 = vcmp.eq.f32.partialorder %v2731_v28, 8.507059e+37  ;;  %v4656_v28 = vld [vmem:[#allocation13 + $0x3a8] sm:$0xff] }
 0x3cc   : > { %v2730_v31 = vsel %vm2729_vm2, %v5830_v22, %v2726_v16  ;;  %v3815_v15 = vsel %vm3812_vm3, %v3814_v14, %v3810_v34  ;;  %v2757_v43 = vadd.f32 0.112945676, %v2756_v9  ;;  %v3228_v7 = vadd.f32 0.18741608, %v3227_v23  ;;  %5127 = vmatpush.msrb.mxu3 %v4656_v28 }
 0x3cd   : > { %v3539_v1 = vmul.f32 %v9327_v2, %v9327_v2  ;;  %v2735_v58 = vsel %vm2732_vm4, %v2734_v33, %v2730_v31  ;;  %v3816_v10 = vmul.f32 %v3815_v15, %v10900_v27  ;;  %v3346_v37 = vadd.f32 0.05243302, %v3345_v55 }
 0x3ce   : > { %v1482_v47 = vadd.f32 %v1481_v18, %v8048_v38  ;;  %v2736_v4 = vmul.f32 %v2735_v58, %v8992_v13  ;;  %v2758_v5 = vmul.f32 %v2757_v43, %v8756_v29  ;;  %v3386_v24 = vadd.f32 0.05243302, %v3385_v49  ;;  %v1546_v18 = vpop.f32.mrf.mxu1  ;;  %v10903_v43 = vld [vmem:[#allocation32_spill] sm:$0xff] }
 0x3cf   : > { %v5832_v51 = vpop.eup %5831  ;;  %v5578_v22 = vclamps-f32 %v3816_v10, 1.0  ;;  %v2872_v36 = vmul.f32 3.8918573e-05, %v8780_v44  ;;  %v3960_v23 = vmul.f32 %v3959_v52, %v10892_v6  ;;  %v3503_v56 = vmul.f32 %v3502_v0, %v9281_v53  ;;  %v10901_v52 = vld [vmem:[#allocation71_spill] sm:$0xff] }
 0x3d0   : > { %v5551_v16 = vclamps-f32 %v2736_v4, 1.0  ;;  %v2759_v14 = vadd.f32 0.4994258, %v2758_v5  ;;  %v4073_v55 = vadd.f32 0.001143296, %v4072_v19  ;;  %v9358_v9 = vmin.f32 %v3539_v1, 16.0 }
 0x3d1   : > { %v4428_v13 = vadd.f32 1.0, %v5578_v22  ;;  %v2873_v33 = vadd.f32 0.001143296, %v2872_v36  ;;  %v3923_v34 = vmul.f32 %v5832_v51, %v9340_v32  ;;  %v9361_v49 = vadd.f32 %v1546_v18, %v1482_v47 }
 0x3d2   : > { %v4401_v10 = vadd.f32 1.0, %v5551_v16  ;;  %v2760_v31 = vmul.f32 %v2759_v14, %v8756_v29  ;;  %v3931_v6 = vand.u32 2147483647, %v9340_v32  ;;  %v9369_v15 = vadd.f32 1.0, %v3960_v23 }
 0x3d3   : > { %v9366_v0 = vmul.f32 %v4428_v13, %v10901_v52  ;;  %v2874_v4 = vmul.f32 %v2873_v33, %v8780_v44  ;;  %v3924_v19 = vsub.f32 1.0, %v3923_v34  ;;  %v3933_v27 = vand.u32 2147483648, %v9340_v32 }
 0x3d4   : > { %v9372_v1 = vmul.f32 %v4401_v10, %v10903_v43  ;;  %v9374_v58 = vadd.f32 1.0, %v2760_v31  ;;  %v4074_v47 = vmul.f32 %v4073_v55, %v10899_v61  ;;  %vm3928_vm5 = vweird.f32 %v5832_v51 }
 0x3d5   : > { %10902 = vst [vmem:[#allocation80_spill] sm:$0xff] %v9366_v0  ;;  %4784 = vmatmul.f32.gmra.mxu1 %v9366_v0  ;;  %v2875_v29 = vadd.f32 0.014752088, %v2874_v4  ;;  %v3925_v5 = vmul.f32 %v5832_v51, %v3924_v19  ;;  %5833 = vrcp.f32 %v9369_v15  ;;  %v3347_v22 = vmul.f32 %v3346_v37, %v9222_v21  ;;  %v10907_v19 = vld [vmem:[#allocation59_spill] sm:$0xff] }
 0x3d6   : > { %10904 = vst [vmem:[#allocation69_spill] sm:$0xff] %v9372_v1  ;;  %v3387_v28 = vmul.f32 %v3386_v24, %v9226_v63  ;;  %v3504_v36 = vadd.f32 0.0036580483, %v3503_v56  ;;  %4828 = vmatmul.f32.gmra.mxu2 %v9372_v1  ;;  %5835 = vrcp.f32 %v9374_v58  ;;  %v3541_v23 = vmul.f32 2.1237322e-06, %v9358_v9 }
 0x3d7   : > { %v2876_v16 = vmul.f32 %v2875_v29, %v8780_v44  ;;  %v3926_v14 = vadd.f32 %v5832_v51, %v3925_v5  ;;  %vm3927_vm6 = vweird.f32 %v9340_v32  ;;  %v9389_v55 = vmul.f32 %v9317_v45, %v8980_v20  ;;  %v1611_v20 = vpop.f32.mrf.mxu2  ;;  %v4622_v29 = vld [vmem:[#allocation13 + $0x298] sm:$0xff] }
 0x3d8   : > { %v9392_v37 = vmul.f32 0.70710677, %v9361_v49  ;;  %vm3929_vm7 = vmor %vm3927_vm6, %vm3928_vm5  ;;  %v3934_v24 = vor.u32 1.1754944e-38, %v3933_v27  ;;  %v4075_v56 = vadd.f32 0.014752088, %v4074_v47  ;;  %v9395_v18 = vmul.f32 0.5, %v9049_v57  ;;  %5063 = vmatpush.msrb.mxu2 %v4622_v29 }
 0x3d9   : > { %v2877_v13 = vadd.f32 0.112945676, %v2876_v16  ;;  %v3930_v33 = vsel %vm3929_vm7, %v5832_v51, %v3926_v14  ;;  %vm3932_vm8 = vcmp.eq.f32.partialorder %v3931_v6, 8.507059e+37  ;;  %v3229_v34 = vmul.f32 %v3228_v7, %v9117_v3  ;;  %v4560_v7 = vld [vmem:[#allocation13 + $0xa8] sm:$0xff]  ;;  %v10908_v29 = vld [vmem:[#allocation73_spill] sm:$0xff] }
 0x3da   : > { %10905 = vst [vmem:[#allocation61_spill] sm:$0xff] %v9395_v18  ;;  %v9399_v32 = vmul.f32 0.5, %v9119_v46  ;;  %v9401_v10 = vadd.f32 0.18741608, %v3347_v22  ;;  %v3935_v45 = vsel %vm3932_vm8, %v3934_v24, %v3930_v33  ;;  %v9403_v52 = vadd.f32 0.18741608, %v3387_v28  ;;  %4932 = vmatpush.msrb.mxu0 %v4560_v7  ;;  %v1676_v7 = vpop.f32.mrf.mxu3 }
 0x3db   : > { %v5834_v31 = vpop.eup %5833  ;;  %v9406_v4 = vmul.f32 %v3504_v36, %v9281_v53  ;;  %v2878_v57 = vmul.f32 %v2877_v13, %v8780_v44  ;;  %v3936_v51 = vmul.f32 %v3935_v45, %v10907_v19  ;;  %v3542_v43 = vadd.f32 0.00028619796, %v3541_v23  ;;  %v4592_v27 = vld [vmem:[#allocation13 + $0x1a8] sm:$0xff] }
 0x3dc   : > { %10906 = vst [vmem:[#allocation70_spill] sm:$0xff] %v9399_v32  ;;  %v5836_v6 = vpop.eup %5835  ;;  %v3659_v46 = vmul.f32 %v9392_v37, %v9392_v37  ;;  %v3963_v47 = vmul.f32 %v5834_v31, %v9369_v15  ;;  %v4076_v5 = vmul.f32 %v4075_v56, %v10899_v61  ;;  %v1612_v22 = vadd.f32 %v1611_v20, %v8103_v50 }
 0x3dd   : > { %v2763_v28 = vmul.f32 %v5836_v6, %v9374_v58  ;;  %v2771_v36 = vand.u32 2147483647, %v9374_v58  ;;  %v2879_v16 = vadd.f32 0.4994258, %v2878_v57  ;;  %4997 = vmatpush.msrb.mxu1 %v4592_v27  ;;  %v2773_v23 = vand.u32 2147483648, %v9374_v58 }
 0x3de   : > { %v5581_v14 = vclamps-f32 %v3936_v51, 1.0  ;;  %v3964_v24 = vsub.f32 1.0, %v3963_v47  ;;  %v2912_v13 = vmul.f32 3.8918573e-05, %v8922_v11  ;;  %v3971_v56 = vand.u32 2147483647, %v9369_v15 }
 0x3df   : > { %v2764_v33 = vsub.f32 1.0, %v2763_v28  ;;  %v2880_v45 = vmul.f32 %v2879_v16, %v8780_v44  ;;  %v3973_v20 = vand.u32 2147483648, %v9369_v15  ;;  %vm3968_vm9 = vweird.f32 %v5834_v31 }
 0x3e0   : > { %v4431_v19 = vadd.f32 1.0, %v5581_v14  ;;  %v3965_v1 = vmul.f32 %v5834_v31, %v3964_v24  ;;  %v4077_v57 = vadd.f32 0.112945676, %v4076_v5  ;;  %vm2768_vm10 = vweird.f32 %v5836_v6 }
 0x3e1   : > { %v2765_v27 = vmul.f32 %v5836_v6, %v2764_v33  ;;  %v9422_v0 = vadd.f32 1.0, %v2880_v45  ;;  %v2913_v51 = vadd.f32 0.001143296, %v2912_v13  ;;  %v9424_v47 = vadd.f32 %v1676_v7, %v1612_v22  ;;  %v1484_v45 = vpop.f32.mrf.mxu0 }
 0x3e2   : > { %v9427_v28 = vmul.f32 %v4431_v19, %v10908_v29  ;;  %v3966_v44 = vadd.f32 %v5834_v31, %v3965_v1  ;;  %vm3967_vm11 = vweird.f32 %v9369_v15  ;;  %vm2767_vm12 = vweird.f32 %v9374_v58 }
 0x3e3   : > { %v2766_v16 = vadd.f32 %v5836_v6, %v2765_v27  ;;  %5837 = vrcp.f32 %v9422_v0  ;;  %vm3969_vm13 = vmor %vm3967_vm11, %vm3968_vm9  ;;  %v3974_v5 = vor.u32 1.1754944e-38, %v3973_v20  ;;  %v2774_v14 = vor.u32 1.1754944e-38, %v2773_v23  ;;  %v10910_v20 = vld [vmem:[#allocation24_spill] sm:$0xff] }
 0x3e4   : > { %10909 = vst [vmem:[#allocation29_spill] sm:$0xff] %v9427_v28  ;;  %vm2769_vm14 = vmor %vm2767_vm12, %vm2768_vm10  ;;  %4722 = vmatmul.f32.gmra.mxu0 %v9427_v28  ;;  %v3970_v24 = vsel %vm3969_vm13, %v5834_v31, %v3966_v44  ;;  %vm3972_vm15 = vcmp.eq.f32.partialorder %v3971_v56, 8.507059e+37  ;;  %v4078_v22 = vmul.f32 %v4077_v57, %v10899_v61  ;;  %vm2772_vm0 = vcmp.eq.f32.partialorder %v2771_v36, 8.507059e+37  ;;  %v10912_v44 = vld [vmem:[#allocation72_spill] sm:$0xff] }
 0x3e5   : > { %v2770_v13 = vsel %vm2769_vm14, %v5836_v6, %v2766_v16  ;;  %v3975_v1 = vsel %vm3972_vm15, %v3974_v5, %v3970_v24  ;;  %v2914_v15 = vmul.f32 %v2913_v51, %v8922_v11  ;;  %v9435_v33 = vadd.f32 1.1283791, %v3229_v34 }
 0x3e6   : > { %v3543_v58 = vmul.f32 %v3542_v43, %v9358_v9  ;;  %v2775_v19 = vsel %vm2772_vm0, %v2774_v14, %v2770_v13  ;;  %v3976_v7 = vmul.f32 %v3975_v1, %v10910_v20  ;;  %v9439_v23 = vmin.f32 %v3659_v46, 16.0  ;;  %v1549_v1 = vpop.f32.mrf.mxu1 }
 0x3e7   : > { %v9442_v31 = vmul.f32 0.70710677, %v9424_v47  ;;  %v2776_v56 = vmul.f32 %v2775_v19, %v9129_v8  ;;  %v2915_v6 = vadd.f32 0.014752088, %v2914_v15  ;;  %v3349_v36 = vmul.f32 %v9401_v10, %v9222_v21  ;;  %v10913_v19 = vld [vmem:[#allocation75_spill] sm:$0xff] }
 0x3e8   : > { %v3389_v34 = vmul.f32 %v9403_v52, %v9226_v63  ;;  %v5582_v57 = vclamps-f32 %v3976_v7, 1.0  ;;  %v4079_v43 = vadd.f32 0.4994258, %v4078_v22  ;;  %v3506_v51 = vadd.f32 0.05243302, %v9406_v4  ;;  %v10915_v7 = vld [vmem:[#allocation34_spill] sm:$0xff] }
 0x3e9   : > { %10911 = vst [vmem:[#allocation71_spill] sm:$0xff] %v9442_v31  ;;  %v5838_v27 = vpop.eup %5837  ;;  %v5552_v29 = vclamps-f32 %v2776_v56, 1.0  ;;  %v2916_v46 = vmul.f32 %v2915_v6, %v8922_v11  ;;  %v4112_v16 = vmul.f32 3.8918573e-05, %v10912_v44  ;;  %v3544_v5 = vadd.f32 0.0036580483, %v3543_v58 }
 0x3ea   : > { %v2883_v8 = vmul.f32 %v5838_v27, %v9422_v0  ;;  %v4432_v14 = vadd.f32 1.0, %v5582_v57  ;;  %v4080_v24 = vmul.f32 %v4079_v43, %v10899_v61  ;;  %v3661_v10 = vmul.f32 2.1237322e-06, %v9439_v23 }
 0x3eb   : > { %v3699_v52 = vmul.f32 %v9442_v31, %v9442_v31  ;;  %v4402_v22 = vadd.f32 1.0, %v5552_v29  ;;  %v2917_v13 = vadd.f32 0.112945676, %v2916_v46  ;;  %v2891_v15 = vand.u32 2147483647, %v9422_v0  ;;  %v4654_v29 = vld [vmem:[#allocation13 + $0x398] sm:$0xff] }
 0x3ec   : > { %v2884_v4 = vsub.f32 1.0, %v2883_v8  ;;  %v9459_v20 = vmul.f32 %v4432_v14, %v10913_v19  ;;  %v9461_v58 = vadd.f32 1.0, %v4080_v24  ;;  %v2893_v61 = vand.u32 2147483648, %v9422_v0  ;;  %5128 = vmatpush.msrb.mxu3 %v4654_v29  ;;  %v4586_v31 = vld [vmem:[#allocation13 + $0x178] sm:$0xff] }
 0x3ed   : > { %v9464_v56 = vmul.f32 %v4402_v22, %v10915_v7  ;;  %v2918_v6 = vmul.f32 %v2917_v13, %v8922_v11  ;;  %v4113_v57 = vadd.f32 0.001143296, %v4112_v16  ;;  %vm2888_vm1 = vweird.f32 %v5838_v27  ;;  %v1614_v22 = vpop.f32.mrf.mxu2  ;;  %v1487_v13 = vpop.f32.mrf.mxu0 }
 0x3ee   : > { %10914 = vst [vmem:[#allocation32_spill] sm:$0xff] %v9459_v20  ;;  %v2885_v43 = vmul.f32 %v5838_v27, %v2884_v4  ;;  %4787 = vmatmul.f32.gmra.mxu1 %v9459_v20  ;;  %v3032_v46 = vmul.f32 3.8918573e-05, %v8938_v62  ;;  %5839 = vrcp.f32 %v9461_v58  ;;  %v3507_v8 = vmul.f32 %v3506_v51, %v9281_v53 }
 0x3ef   : > { %10916 = vst [vmem:[#allocation59_spill] sm:$0xff] %v9464_v56  ;;  %v3545_v14 = vmul.f32 %v3544_v5, %v9358_v9  ;;  %v3662_v24 = vadd.f32 0.00028619796, %v3661_v10  ;;  %4893 = vmatmul.f32.gmra.mxu3 %v9464_v56  ;;  %v2919_v19 = vadd.f32 0.4994258, %v2918_v6  ;;  %v1485_v16 = vadd.f32 %v1484_v45, %v8048_v38 }
 0x3f0   : > { %v2886_v4 = vadd.f32 %v5838_v27, %v2885_v43  ;;  %vm2887_vm2 = vweird.f32 %v9422_v0  ;;  %v3033_v7 = vadd.f32 0.001143296, %v3032_v46  ;;  %v9476_v20 = vmin.f32 %v3699_v52, 16.0 }
 0x3f1   : > { %vm2889_vm3 = vmor %vm2887_vm2, %vm2888_vm1  ;;  %v2894_v51 = vor.u32 1.1754944e-38, %v2893_v61  ;;  %v2920_v5 = vmul.f32 %v2919_v19, %v8922_v11  ;;  %v4114_v10 = vmul.f32 %v4113_v57, %v10912_v44  ;;  %v1615_v56 = vadd.f32 %v1614_v22, %v8103_v50  ;;  %v1679_v19 = vpop.f32.mrf.mxu3 }
 0x3f2   : > { %v2890_v6 = vsel %vm2889_vm3, %v5838_v27, %v2886_v4  ;;  %vm2892_vm4 = vcmp.eq.f32.partialorder %v2891_v15, 8.507059e+37  ;;  %v3034_v45 = vmul.f32 %v3033_v7, %v8938_v62  ;;  %v3663_v43 = vmul.f32 %v3662_v24, %v9439_v23  ;;  %v1552_v7 = vpop.f32.mrf.mxu1 }
 0x3f3   : > { %v1488_v0 = vadd.f32 %v1487_v13, %v8048_v38  ;;  %v2895_v29 = vsel %vm2892_vm4, %v2894_v51, %v2890_v6  ;;  %v9485_v52 = vadd.f32 1.0, %v2920_v5  ;;  %v9489_v61 = vadd.f32 1.1283791, %v3349_v36 }
 0x3f4   : > { %v9487_v46 = vpop.eup %5839  ;;  %v9491_v11 = vadd.f32 %v1549_v1, %v1485_v16  ;;  %v2896_v57 = vmul.f32 %v2895_v29, %v9139_v12  ;;  %v3035_v22 = vadd.f32 0.014752088, %v3034_v45  ;;  %v9494_v27 = vadd.f32 1.1283791, %v3389_v34  ;;  %v10919_v29 = vld [vmem:[#allocation83_spill] sm:$0xff] }
 0x3f5   : > { %v3701_v15 = vmul.f32 2.1237322e-06, %v9476_v20  ;;  %5841 = vrcp.f32 %v9485_v52  ;;  %v4115_v24 = vadd.f32 0.014752088, %v4114_v10  ;;  %v9498_v13 = vadd.f32 0.18741608, %v3507_v8 }
 0x3f6   : > { %v9500_v4 = vadd.f32 %v1679_v19, %v1615_v56  ;;  %v5555_v36 = vclamps-f32 %v2896_v57, 1.0  ;;  %v3036_v1 = vmul.f32 %v3035_v22, %v8938_v62  ;;  %v3546_v16 = vadd.f32 0.05243302, %v3545_v14 }
 0x3f7   : > { %v3664_v51 = vadd.f32 0.0036580483, %v3663_v43  ;;  %v9503_v12 = vadd.f32 %v1552_v7, %v1488_v0  ;;  %v4083_v34 = vmul.f32 %v9487_v46, %v9461_v58  ;;  %v9509_v5 = vmul.f32 %v9435_v33, %v9068_v48  ;;  %v4558_v7 = vld [vmem:[#allocation13 + $0x98] sm:$0xff] }
 0x3f8   : > { %v9512_v8 = vmul.f32 0.70710677, %v9491_v11  ;;  %v4405_v56 = vadd.f32 1.0, %v5555_v36  ;;  %v3037_v10 = vadd.f32 0.112945676, %v3036_v1  ;;  %v4116_v43 = vmul.f32 %v4115_v24, %v10912_v44  ;;  %v4590_v36 = vld [vmem:[#allocation13 + $0x198] sm:$0xff]  ;;  %4933 = vmatpush.msrb.mxu0 %v4558_v7 }
 0x3f9   : > { %10917 = vst [vmem:[#allocation73_spill] sm:$0xff] %v9509_v5  ;;  %v9514_v6 = vadd.f32 0.00028619796, %v3701_v15  ;;  %v4084_v45 = vsub.f32 1.0, %v4083_v34  ;;  %v4091_v14 = vand.u32 2147483647, %v9461_v58  ;;  %v9527_v19 = vmul.f32 %v3546_v16, %v9358_v9  ;;  %4998 = vmatpush.msrb.mxu1 %v4590_v36 }
 0x3fa   : > { %10918 = vst [vmem:[#allocation24_spill] sm:$0xff] %v9512_v8  ;;  %v9519_v0 = vmul.f32 0.70710677, %v9500_v4  ;;  %v9522_v57 = vmul.f32 %v4405_v56, %v10919_v29  ;;  %v3038_v48 = vmul.f32 %v3037_v10, %v8938_v62  ;;  %v4093_v33 = vand.u32 2147483648, %v9461_v58  ;;  %v4556_v24 = vld [vmem:[#allocation13 + $0x88] sm:$0xff] }
 0x3fb   : > { %v5842_v22 = vpop.eup %5841  ;;  %v9530_v15 = vmul.f32 0.70710677, %v9503_v12  ;;  %v4085_v1 = vmul.f32 %v9487_v46, %v4084_v45  ;;  %vm4088_vm5 = vweird.f32 %v9487_v46  ;;  %v3819_v34 = vmul.f32 %v9512_v8, %v9512_v8  ;;  %v4588_v16 = vld [vmem:[#allocation13 + $0x188] sm:$0xff]  ;;  %4934 = vmatpush.msrb.mxu0 %v4556_v24  ;;  %v4554_v8 = vld [vmem:[#allocation13 + $0x78] sm:$0xff] }
 0x3fc   : > { %10920 = vst [vmem:[#allocation72_spill] sm:$0xff] %v9522_v57  ;;  %4831 = vmatmul.f32.gmra.mxu2 %v9522_v57  ;;  %v2923_v56 = vmul.f32 %v5842_v22, %v9485_v52  ;;  %v3039_v10 = vadd.f32 0.4994258, %v3038_v48  ;;  %v10922_v29 = vld [vmem:[#allocation74_spill] sm:$0xff]  ;;  %vm4087_vm6 = vweird.f32 %v9461_v58  ;;  %vm4092_vm7 = vcmp.eq.f32.partialorder %v4091_v14, 8.507059e+37  ;;  %4999 = vmatpush.msrb.mxu1 %v4588_v16 }
 0x3fd   : > { %10921 = vst [vmem:[#allocation75_spill] sm:$0xff] %v9530_v15  ;;  %v4232_v28 = vmul.f32 3.8918573e-05, %v10922_v29  ;;  %v4086_v32 = vadd.f32 %v9487_v46, %v4085_v1  ;;  %v4117_v45 = vadd.f32 0.112945676, %v4116_v43  ;;  %vm4089_vm8 = vmor %vm4087_vm6, %vm4088_vm5  ;;  %v4094_v48 = vor.u32 1.1754944e-38, %v4093_v33  ;;  %4935 = vmatpush.msrb.mxu0 %v4554_v8 }
 0x3fe   : > { %v2924_v18 = vsub.f32 1.0, %v2923_v56  ;;  %v2931_v5 = vand.u32 2147483647, %v9485_v52  ;;  %v3040_v63 = vmul.f32 %v3039_v10, %v8938_v62  ;;  %vm2928_vm9 = vweird.f32 %v5842_v22  ;;  %v10923_v10 = vld [vmem:[#allocation60_spill] sm:$0xff]  ;;  %v4620_v16 = vld [vmem:[#allocation13 + $0x288] sm:$0xff]  ;;  %5000 = vmatpush.msrb.mxu1 %v4586_v31 }
 0x3ff   : > { %v2933_v7 = vand.u32 2147483648, %v9485_v52  ;;  %v4090_v36 = vsel %vm4089_vm8, %v9487_v46, %v4086_v32  ;;  %v4118_v58 = vmul.f32 %v4117_v45, %v10912_v44  ;;  %v4233_v56 = vadd.f32 0.001143296, %v4232_v28  ;;  %5064 = vmatpush.msrb.mxu2 %v4620_v16  ;;  %v1617_v45 = vpop.f32.mrf.mxu2 }
 0x400   : > { %v2925_v14 = vmul.f32 %v5842_v22, %v2924_v18  ;;  %v9548_v43 = vadd.f32 1.0, %v3040_v63  ;;  %v4095_v1 = vsel %vm4092_vm7, %v4094_v48, %v4090_v36  ;;  %v3665_v62 = vmul.f32 %v3664_v51, %v9439_v23 }
 0x401   : > { %v3859_v24 = vmul.f32 %v9519_v0, %v9519_v0  ;;  %v4096_v33 = vmul.f32 %v4095_v1, %v10923_v10  ;;  %v4119_v57 = vadd.f32 0.4994258, %v4118_v58  ;;  %v3979_v32 = vmul.f32 %v9530_v15, %v9530_v15  ;;  %v10924_v58 = vld [vmem:[#allocation79_spill] sm:$0xff] }
 0x402   : > { %v2926_v46 = vadd.f32 %v5842_v22, %v2925_v14  ;;  %vm2927_vm10 = vweird.f32 %v9485_v52  ;;  %5843 = vrcp.f32 %v9548_v43  ;;  %v9558_v63 = vmin.f32 %v3819_v34, 16.0 }
 0x403   : > { %vm2929_vm11 = vmor %vm2927_vm10, %vm2928_vm9  ;;  %v2934_v18 = vor.u32 1.1754944e-38, %v2933_v7  ;;  %v5585_v28 = vclamps-f32 %v4096_v33, 1.0  ;;  %v4120_v51 = vmul.f32 %v4119_v57, %v10912_v44  ;;  %vm2932_vm12 = vcmp.eq.f32.partialorder %v2931_v5, 8.507059e+37 }
 0x404   : > { %v2930_v48 = vsel %vm2929_vm11, %v5842_v22, %v2926_v46  ;;  %v3072_v36 = vmul.f32 3.8918573e-05, %v8977_v39  ;;  %v4234_v52 = vmul.f32 %v4233_v56, %v10922_v29  ;;  %v3703_v8 = vmul.f32 %v9514_v6, %v9476_v20  ;;  %v10925_v56 = vld [vmem:[#allocation77_spill] sm:$0xff] }
 0x405   : > { %v2935_v31 = vsel %vm2932_vm12, %v2934_v18, %v2930_v48  ;;  %v4435_v34 = vadd.f32 1.0, %v5585_v28  ;;  %v4272_v14 = vmul.f32 3.8918573e-05, %v10924_v58  ;;  %v9567_v1 = vmin.f32 %v3859_v24, 16.0  ;;  %v1682_v48 = vpop.f32.mrf.mxu3 }
 0x406   : > { %v9569_v7 = vmin.f32 %v3979_v32, 16.0  ;;  %v2936_v44 = vmul.f32 %v2935_v31, %v9174_v25  ;;  %v9572_v57 = vadd.f32 1.0, %v4120_v51  ;;  %v3821_v5 = vmul.f32 2.1237322e-06, %v9558_v63 }
 0x407   : > { %v1618_v22 = vadd.f32 %v1617_v45, %v8103_v50  ;;  %v9577_v10 = vmul.f32 %v4435_v34, %v10925_v56  ;;  %v3073_v6 = vadd.f32 0.001143296, %v3072_v36  ;;  %v3548_v16 = vadd.f32 0.18741608, %v9527_v19 }
 0x408   : > { %v5844_v33 = vpop.eup %5843  ;;  %v5556_v46 = vclamps-f32 %v2936_v44, 1.0  ;;  %5845 = vrcp.f32 %v9572_v57  ;;  %v4235_v24 = vadd.f32 0.014752088, %v4234_v52  ;;  %v9581_v32 = vadd.f32 0.05243302, %v3665_v62 }
 0x409   : > { %10926 = vst [vmem:[#allocation34_spill] sm:$0xff] %v9577_v10  ;;  %v9583_v25 = vadd.f32 0.0036580483, %v3703_v8  ;;  %v3043_v18 = vmul.f32 %v5844_v33, %v9548_v43  ;;  %4725 = vmatmul.f32.gmra.mxu0 %v9577_v10  ;;  %v4273_v28 = vadd.f32 0.001143296, %v4272_v14  ;;  %v9588_v51 = vmul.f32 0.5, %v9148_v54 }
 0x40a   : > { %v3861_v45 = vmul.f32 2.1237322e-06, %v9567_v1  ;;  %v3981_v19 = vmul.f32 2.1237322e-06, %v9569_v7  ;;  %v4406_v36 = vadd.f32 1.0, %v5556_v46  ;;  %v9594_v62 = vadd.f32 %v1682_v48, %v1618_v22 }
 0x40b   : > { %10927 = vst [vmem:[#allocation83_spill] sm:$0xff] %v9588_v51  ;;  %v9592_v31 = vadd.f32 0.00028619796, %v3821_v5  ;;  %v3044_v52 = vsub.f32 1.0, %v3043_v18  ;;  %v3074_v8 = vmul.f32 %v3073_v6, %v8977_v39  ;;  %v3051_v14 = vand.u32 2147483647, %v9548_v43 }
 0x40c   : > { %v9598_v34 = vmul.f32 %v4406_v36, %v9125_v26  ;;  %v3053_v54 = vand.u32 2147483648, %v9548_v43  ;;  %v4236_v44 = vmul.f32 %v4235_v24, %v10922_v29  ;;  %vm3048_vm13 = vweird.f32 %v5844_v33 }
 0x40d   : > { %v3045_v56 = vmul.f32 %v5844_v33, %v3044_v52  ;;  %v3075_v10 = vadd.f32 0.014752088, %v3074_v8  ;;  %v4274_v5 = vmul.f32 %v4273_v28, %v10924_v58  ;;  %v3509_v22 = vmul.f32 %v9498_v13, %v9281_v53 }
 0x40e   : > { %10928 = vst [vmem:[#allocation74_spill] sm:$0xff] %v9598_v34  ;;  %v5846_v46 = vpop.eup %5845  ;;  %v9606_v18 = vadd.f32 0.00028619796, %v3861_v45  ;;  %v9608_v6 = vadd.f32 0.00028619796, %v3981_v19  ;;  %4896 = vmatmul.f32.gmra.mxu3 %v9598_v34  ;;  %vm3047_vm14 = vweird.f32 %v9548_v43  ;;  %vm3052_vm0 = vcmp.eq.f32.partialorder %v3051_v14, 8.507059e+37 }
 0x40f   : > { %v4237_v26 = vadd.f32 0.112945676, %v4236_v44  ;;  %v3046_v48 = vadd.f32 %v5844_v33, %v3045_v56  ;;  %v4123_v24 = vmul.f32 %v5846_v46, %v9572_v57  ;;  %v3076_v36 = vmul.f32 %v3075_v10, %v8977_v39  ;;  %vm3049_vm15 = vmor %vm3047_vm14, %vm3048_vm13 }
 0x410   : > { %v9615_v28 = vmul.f32 0.70710677, %v9594_v62  ;;  %v3054_v13 = vor.u32 1.1754944e-38, %v3053_v54  ;;  %v4275_v34 = vadd.f32 0.014752088, %v4274_v5  ;;  %v4133_v43 = vand.u32 2147483648, %v9572_v57 }
 0x411   : > { %v4238_v45 = vmul.f32 %v4237_v26, %v10922_v29  ;;  %v3050_v19 = vsel %vm3049_vm15, %v5844_v33, %v3046_v48  ;;  %v4124_v52 = vsub.f32 1.0, %v4123_v24  ;;  %v3077_v8 = vadd.f32 0.112945676, %v3076_v36  ;;  %v4552_v33 = vld [vmem:[#allocation13 + $0x68] sm:$0xff]  ;;  %v1490_v24 = vpop.f32.mrf.mxu0 }
 0x412   : > { %v3055_v44 = vsel %vm3052_vm0, %v3054_v13, %v3050_v19  ;;  %v4131_v56 = vand.u32 2147483647, %v9572_v57  ;;  %vm4128_vm1 = vweird.f32 %v5846_v46  ;;  %v3549_v14 = vmul.f32 %v3548_v16, %v9358_v9  ;;  %v4584_v54 = vld [vmem:[#allocation13 + $0x168] sm:$0xff]  ;;  %4936 = vmatpush.msrb.mxu0 %v4552_v33  ;;  %v1620_v33 = vpop.f32.mrf.mxu2 }
 0x413   : > { %v4239_v51 = vadd.f32 0.4994258, %v4238_v45  ;;  %v3056_v10 = vmul.f32 %v3055_v44, %v9307_v40  ;;  %v4125_v15 = vmul.f32 %v5846_v46, %v4124_v52  ;;  %v3078_v53 = vmul.f32 %v3077_v8, %v8977_v39  ;;  %v4652_v26 = vld [vmem:[#allocation13 + $0x388] sm:$0xff]  ;;  %5001 = vmatpush.msrb.mxu1 %v4584_v54 }
 0x414   : > { %vm4127_vm2 = vweird.f32 %v9572_v57  ;;  %v3192_v5 = vmul.f32 3.8918573e-05, %v9009_v60  ;;  %v4276_v40 = vmul.f32 %v4275_v34, %v10924_v58  ;;  %v4019_v16 = vmul.f32 %v9615_v28, %v9615_v28  ;;  %5129 = vmatpush.msrb.mxu3 %v4652_v26 }
 0x415   : > { %v4240_v48 = vmul.f32 %v4239_v51, %v10922_v29  ;;  %v5559_v36 = vclamps-f32 %v3056_v10, 1.0  ;;  %v4126_v13 = vadd.f32 %v5846_v46, %v4125_v15  ;;  %v3079_v45 = vadd.f32 0.4994258, %v3078_v53  ;;  %vm4129_vm3 = vmor %vm4127_vm2, %vm4128_vm1 }
 0x416   : > { %v4134_v57 = vor.u32 1.1754944e-38, %v4133_v43  ;;  %v3193_v19 = vadd.f32 0.001143296, %v3192_v5  ;;  %vm4132_vm4 = vcmp.eq.f32.partialorder %v4131_v56, 8.507059e+37  ;;  %v1491_v53 = vadd.f32 %v1490_v24, %v8048_v38  ;;  %v10930_v43 = vld [vmem:[#allocation65_spill] sm:$0xff] }
 0x417   : > { %v9630_v52 = vadd.f32 1.0, %v4240_v48  ;;  %v4409_v8 = vadd.f32 1.0, %v5559_v36  ;;  %v4130_v29 = vsel %vm4129_vm3, %v5846_v46, %v4126_v13  ;;  %v3080_v15 = vmul.f32 %v3079_v45, %v8977_v39 }
 0x418   : > { %v4135_v51 = vsel %vm4132_vm4, %v4134_v57, %v4130_v29  ;;  %v3194_v34 = vmul.f32 %v3193_v19, %v9009_v60  ;;  %v4277_v26 = vadd.f32 0.112945676, %v4276_v40  ;;  %v9642_v46 = vadd.f32 1.1283791, %v3509_v22 }
 0x419   : > { %5847 = vrcp.f32 %v9630_v52  ;;  %v9637_v44 = vmul.f32 %v4409_v8, %v9132_v35  ;;  %v4136_v10 = vmul.f32 %v4135_v51, %v10930_v43  ;;  %v9640_v54 = vadd.f32 1.0, %v3080_v15  ;;  %v10931_v51 = vld [vmem:[#allocation81_spill] sm:$0xff] }
 0x41a   : > { %v3667_v39 = vmul.f32 %v9581_v32, %v9439_v23  ;;  %v3823_v56 = vmul.f32 %v9592_v31, %v9558_v63  ;;  %v3195_v5 = vadd.f32 0.014752088, %v3194_v34  ;;  %v3705_v48 = vmul.f32 %v9583_v25, %v9476_v20  ;;  %v1555_v32 = vpop.f32.mrf.mxu1 }
 0x41b   : > { %10929 = vst [vmem:[#allocation60_spill] sm:$0xff] %v9637_v44  ;;  %v3863_v35 = vmul.f32 %v9606_v18, %v9567_v1  ;;  %4834 = vmatmul.f32.gmra.mxu2 %v9637_v44  ;;  %v5586_v24 = vclamps-f32 %v4136_v10, 1.0  ;;  %5849 = vrcp.f32 %v9640_v54  ;;  %v3983_v22 = vmul.f32 %v9608_v6, %v9569_v7 }
 0x41c   : > { %v9656_v36 = vmin.f32 %v4019_v16, 16.0  ;;  %v1621_v31 = vadd.f32 %v1620_v33, %v8103_v50  ;;  %v3196_v13 = vmul.f32 %v3195_v5, %v9009_v60  ;;  %v9660_v45 = vadd.f32 1.1283791, %v3549_v14 }
 0x41d   : > { %v9662_v25 = vadd.f32 %v1555_v32, %v1491_v53  ;;  %v4436_v18 = vadd.f32 1.0, %v5586_v24  ;;  %v4278_v40 = vmul.f32 %v4277_v26, %v10924_v58  ;;  %v9669_v19 = vmul.f32 %v9489_v61, %v9143_v41  ;;  %v1685_v53 = vpop.f32.mrf.mxu3  ;;  %v4550_v24 = vld [vmem:[#allocation13 + $0x58] sm:$0xff] }
 0x41e   : > { %v3668_v6 = vadd.f32 0.18741608, %v3667_v39  ;;  %v3824_v16 = vadd.f32 0.0036580483, %v3823_v56  ;;  %v3197_v8 = vadd.f32 0.112945676, %v3196_v13  ;;  %v9683_v41 = vadd.f32 %v1685_v53, %v1621_v31  ;;  %4937 = vmatpush.msrb.mxu0 %v4550_v24 }
 0x41f   : > { %v9665_v57 = vpop.eup %5847  ;;  %v9671_v29 = vadd.f32 0.05243302, %v3705_v48  ;;  %v3864_v15 = vadd.f32 0.0036580483, %v3863_v35  ;;  %v9674_v14 = vmul.f32 %v4436_v18, %v10931_v51  ;;  %v9678_v43 = vadd.f32 0.0036580483, %v3983_v22 }
 0x420   : > { %v4243_v34 = vmul.f32 %v9665_v57, %v9630_v52  ;;  %v9681_v10 = vmul.f32 2.1237322e-06, %v9656_v36  ;;  %10933 = vst [vmem:[#allocation77_spill] sm:$0xff] %v9683_v41  ;;  %v3198_v61 = vmul.f32 %v3197_v8, %v9009_v60  ;;  %v9689_v26 = vmul.f32 0.5, %v9230_v59  ;;  %v4582_v22 = vld [vmem:[#allocation13 + $0x158] sm:$0xff]  ;;  %v4548_v13 = vld [vmem:[#allocation13 + $0x48] sm:$0xff] }
 0x421   : > { %10932 = vst [vmem:[#allocation79_spill] sm:$0xff] %v9674_v14  ;;  %v9686_v33 = vpop.eup %5849  ;;  %v9692_v39 = vmul.f32 0.70710677, %v9662_v25  ;;  %4790 = vmatmul.f32.gmra.mxu1 %v9674_v14  ;;  %v4279_v5 = vadd.f32 0.4994258, %v4278_v40  ;;  %v3825_v48 = vmul.f32 %v3824_v16, %v9558_v63  ;;  %v4253_v31 = vand.u32 2147483648, %v9630_v52  ;;  %4938 = vmatpush.msrb.mxu0 %v4548_v13 }
 0x422   : > { %v4244_v56 = vsub.f32 1.0, %v4243_v34  ;;  %v3083_v35 = vmul.f32 %v9686_v33, %v9640_v54  ;;  %v4251_v32 = vand.u32 2147483647, %v9630_v52  ;;  %v3199_v59 = vadd.f32 0.4994258, %v3198_v61  ;;  %5002 = vmatpush.msrb.mxu1 %v4582_v22  ;;  %v4580_v18 = vld [vmem:[#allocation13 + $0x148] sm:$0xff] }
 0x423   : > { %vm4248_vm5 = vweird.f32 %v9665_v57  ;;  %v4280_v40 = vmul.f32 %v4279_v5, %v10924_v58  ;;  %v3865_v16 = vmul.f32 %v3864_v15, %v9567_v1  ;;  %v9705_v51 = vmul.f32 0.70710677, %v9683_v41  ;;  %v4546_v34 = vld [vmem:[#allocation13 + $0x38] sm:$0xff] }
 0x424   : > { %v4245_v8 = vmul.f32 %v9665_v57, %v4244_v56  ;;  %v3084_v53 = vsub.f32 1.0, %v3083_v35  ;;  %vm4247_vm6 = vweird.f32 %v9630_v52  ;;  %v4578_v61 = vld [vmem:[#allocation13 + $0x138] sm:$0xff]  ;;  %v3093_v22 = vand.u32 2147483648, %v9640_v54  ;;  %5003 = vmatpush.msrb.mxu1 %v4580_v18  ;;  %4939 = vmatpush.msrb.mxu0 %v4546_v34 }
 0x425   : > { %v4618_v24 = vld [vmem:[#allocation13 + $0x278] sm:$0xff]  ;;  %v3200_v44 = vmul.f32 %v3199_v59, %v9009_v60  ;;  %v9711_v58 = vadd.f32 1.0, %v4280_v40  ;;  %vm3088_vm7 = vweird.f32 %v9686_v33  ;;  %v3091_v5 = vand.u32 2147483647, %v9640_v54  ;;  %vm4249_vm8 = vmor %vm4247_vm6, %vm4248_vm5  ;;  %v10934_v40 = vld [vmem:[#allocation67_spill] sm:$0xff] }
 0x426   : > { %v4246_v56 = vadd.f32 %v9665_v57, %v4245_v8  ;;  %v3085_v15 = vmul.f32 %v9686_v33, %v3084_v53  ;;  %v4254_v52 = vor.u32 1.1754944e-38, %v4253_v31  ;;  %5065 = vmatpush.msrb.mxu2 %v4618_v24  ;;  %vm4252_vm9 = vcmp.eq.f32.partialorder %v4251_v32, 8.507059e+37  ;;  %5004 = vmatpush.msrb.mxu1 %v4578_v61 }
 0x427   : > { %v9718_v35 = vadd.f32 1.0, %v3200_v44  ;;  %5851 = vrcp.f32 %v9711_v58  ;;  %v4139_v59 = vmul.f32 %v9692_v39, %v9692_v39  ;;  %vm3087_vm10 = vweird.f32 %v9640_v54 }
 0x428   : > { %v4250_v60 = vsel %vm4249_vm8, %v9665_v57, %v4246_v56  ;;  %v3086_v13 = vadd.f32 %v9686_v33, %v3085_v15  ;;  %v3669_v31 = vmul.f32 %v3668_v6, %v9439_v23  ;;  %v4179_v44 = vmul.f32 %v9705_v51, %v9705_v51  ;;  %vm3089_vm11 = vmor %vm3087_vm10, %vm3088_vm7 }
 0x429   : > { %v4255_v18 = vsel %vm4252_vm9, %v4254_v52, %v4250_v60  ;;  %v3094_v57 = vor.u32 1.1754944e-38, %v3093_v22  ;;  %5853 = vrcp.f32 %v9718_v35  ;;  %v3707_v32 = vmul.f32 %v9671_v29, %v9476_v20 }
 0x42a   : > { %v3090_v8 = vsel %vm3089_vm11, %v9686_v33, %v3086_v13  ;;  %vm3092_vm12 = vcmp.eq.f32.partialorder %v3091_v5, 8.507059e+37  ;;  %v4256_v54 = vmul.f32 %v4255_v18, %v10934_v40  ;;  %v3826_v53 = vadd.f32 0.05243302, %v3825_v48 }
 0x42b   : > { %v3866_v34 = vadd.f32 0.05243302, %v3865_v16  ;;  %v3985_v6 = vmul.f32 %v9678_v43, %v9569_v7  ;;  %v3095_v61 = vsel %vm3092_vm12, %v3094_v57, %v3090_v8  ;;  %v4022_v24 = vadd.f32 0.00028619796, %v9681_v10  ;;  %v10935_v8 = vld [vmem:[#allocation63_spill] sm:$0xff] }
 0x42c   : > { %v9739_v56 = vmin.f32 %v4139_v59, 16.0  ;;  %v3096_v22 = vmul.f32 %v3095_v61, %v9311_v30  ;;  %v5589_v15 = vclamps-f32 %v4256_v54, 1.0  ;;  %v9744_v29 = vmul.f32 %v9494_v27, %v9170_v17 }
 0x42d   : > { %v5852_v52 = vpop.eup %5851  ;;  %v9746_v33 = vadd.f32 1.1283791, %v3669_v31  ;;  %v9748_v48 = vmin.f32 %v4179_v44, 16.0  ;;  %v3232_v16 = vmul.f32 3.8918573e-05, %v9117_v3  ;;  %v3827_v30 = vmul.f32 %v3826_v53, %v9558_v63  ;;  %v10937_v53 = vld [vmem:[#allocation26_spill] sm:$0xff] }
 0x42e   : > { %v9751_v43 = vadd.f32 0.18741608, %v3707_v32  ;;  %v5560_v5 = vclamps-f32 %v3096_v22, 1.0  ;;  %v4439_v10 = vadd.f32 1.0, %v5589_v15  ;;  %v4283_v60 = vmul.f32 %v5852_v52, %v9711_v58 }
 0x42f   : > { %v5854_v59 = vpop.eup %5853  ;;  %v3867_v13 = vmul.f32 %v3866_v34, %v9567_v1  ;;  %v3986_v18 = vadd.f32 0.05243302, %v3985_v6  ;;  %v3233_v17 = vadd.f32 0.001143296, %v3232_v16  ;;  %v4023_v27 = vmul.f32 %v4022_v24, %v9656_v36 }
 0x430   : > { %v4141_v31 = vmul.f32 2.1237322e-06, %v9739_v56  ;;  %v4410_v44 = vadd.f32 1.0, %v5560_v5  ;;  %v3203_v57 = vmul.f32 %v5854_v59, %v9718_v35  ;;  %v4181_v32 = vmul.f32 2.1237322e-06, %v9748_v48 }
 0x431   : > { %v9761_v40 = vmul.f32 %v4439_v10, %v10935_v8  ;;  %v4284_v54 = vsub.f32 1.0, %v4283_v60  ;;  %v3234_v61 = vmul.f32 %v3233_v17, %v9117_v3  ;;  %v4291_v6 = vand.u32 2147483647, %v9711_v58 }
 0x432   : > { %v9765_v22 = vmul.f32 %v4410_v44, %v10937_v53  ;;  %v3204_v34 = vsub.f32 1.0, %v3203_v57  ;;  %v4293_v24 = vand.u32 2147483648, %v9711_v58  ;;  %v3213_v15 = vand.u32 2147483648, %v9718_v35 }
 0x433   : > { %10936 = vst [vmem:[#allocation65_spill] sm:$0xff] %v9761_v40  ;;  %4728 = vmatmul.f32.gmra.mxu0 %v9761_v40  ;;  %v4285_v16 = vmul.f32 %v5852_v52, %v4284_v54  ;;  %vm4288_vm13 = vweird.f32 %v5852_v52  ;;  %v3235_v5 = vadd.f32 0.014752088, %v3234_v61  ;;  %v4142_v10 = vadd.f32 0.00028619796, %v4141_v31  ;;  %v1493_v61 = vpop.f32.mrf.mxu0 }
 0x434   : > { %10938 = vst [vmem:[#allocation81_spill] sm:$0xff] %v9765_v22  ;;  %4899 = vmatmul.f32.gmra.mxu3 %v9765_v22  ;;  %v3205_v60 = vmul.f32 %v5854_v59, %v3204_v34  ;;  %vm3208_vm14 = vweird.f32 %v5854_v59  ;;  %v3211_v17 = vand.u32 2147483647, %v9718_v35  ;;  %v4182_v44 = vadd.f32 0.00028619796, %v4181_v32 }
 0x435   : > { %v4286_v57 = vadd.f32 %v5852_v52, %v4285_v16  ;;  %vm4287_vm15 = vweird.f32 %v9711_v58  ;;  %v3236_v8 = vmul.f32 %v3235_v5, %v9117_v3  ;;  %v4024_v53 = vadd.f32 0.0036580483, %v4023_v27  ;;  %v10939_v27 = vld [vmem:[#allocation82_spill] sm:$0xff] }
 0x436   : > { %v3206_v14 = vadd.f32 %v5854_v59, %v3205_v60  ;;  %vm3207_vm0 = vweird.f32 %v9718_v35  ;;  %vm4289_vm1 = vmor %vm4287_vm15, %vm4288_vm13  ;;  %v4294_v54 = vor.u32 1.1754944e-38, %v4293_v24  ;;  %v3214_v31 = vor.u32 1.1754944e-38, %v3213_v15  ;;  %v4576_v15 = vld [vmem:[#allocation13 + $0x128] sm:$0xff] }
 0x437   : > { %vm3209_vm2 = vmor %vm3207_vm0, %vm3208_vm14  ;;  %v4290_v22 = vsel %vm4289_vm1, %v5852_v52, %v4286_v57  ;;  %vm4292_vm3 = vcmp.eq.f32.partialorder %v4291_v6, 8.507059e+37  ;;  %v3237_v34 = vadd.f32 0.112945676, %v3236_v8  ;;  %v4143_v40 = vmul.f32 %v4142_v10, %v9739_v56  ;;  %v4544_v6 = vld [vmem:[#allocation13 + $0x28] sm:$0xff]  ;;  %v4650_v57 = vld [vmem:[#allocation13 + $0x378] sm:$0xff]  ;;  %5005 = vmatpush.msrb.mxu1 %v4576_v15 }
 0x438   : > { %v3210_v32 = vsel %vm3209_vm2, %v5854_v59, %v3206_v14  ;;  %vm3212_vm4 = vcmp.eq.f32.partialorder %v3211_v17, 8.507059e+37  ;;  %v4295_v16 = vsel %vm4292_vm3, %v4294_v54, %v4290_v22  ;;  %v4183_v58 = vmul.f32 %v4182_v44, %v9748_v48  ;;  %4940 = vmatpush.msrb.mxu0 %v4544_v6  ;;  %5130 = vmatpush.msrb.mxu3 %v4650_v57 }
 0x439   : > { %v3215_v5 = vsel %vm3212_vm4, %v3214_v31, %v3210_v32  ;;  %v4296_v60 = vmul.f32 %v4295_v16, %v10939_v27  ;;  %v3238_v35 = vmul.f32 %v3237_v34, %v9117_v3  ;;  %v4025_v24 = vmul.f32 %v4024_v53, %v9656_v36 }
 0x43a   : > { %v1494_v41 = vadd.f32 %v1493_v61, %v8048_v38  ;;  %v3216_v52 = vmul.f32 %v3215_v5, %v9389_v55  ;;  %v3352_v14 = vmul.f32 3.8918573e-05, %v9222_v21  ;;  %v9785_v59 = vmul.f32 0.5, %v9303_v42  ;;  %v1558_v61 = vpop.f32.mrf.mxu1  ;;  %v10940_v5 = vld [vmem:[#allocation36_spill] sm:$0xff] }
 0x43b   : > { %v3828_v22 = vadd.f32 0.18741608, %v3827_v30  ;;  %v5590_v10 = vclamps-f32 %v4296_v60, 1.0  ;;  %v3239_v17 = vadd.f32 0.4994258, %v3238_v35  ;;  %v3987_v8 = vmul.f32 %v3986_v18, %v9569_v7 }
 0x43c   : > { %v3868_v44 = vadd.f32 0.18741608, %v3867_v13  ;;  %v5563_v53 = vclamps-f32 %v3216_v52, 1.0  ;;  %v3353_v38 = vadd.f32 0.001143296, %v3352_v14  ;;  %v9789_v42 = vadd.f32 %v1558_v61, %v1494_v41 }
 0x43d   : > { %v4144_v55 = vadd.f32 0.0036580483, %v4143_v40  ;;  %v4184_v54 = vadd.f32 0.0036580483, %v4183_v58  ;;  %v4440_v31 = vadd.f32 1.0, %v5590_v10  ;;  %v3240_v34 = vmul.f32 %v3239_v17, %v9117_v3  ;;  %v10942_v3 = vld [vmem:[#allocation76_spill] sm:$0xff] }
 0x43e   : > { %v4026_v32 = vadd.f32 0.05243302, %v4025_v24  ;;  %v4413_v30 = vadd.f32 1.0, %v5563_v53  ;;  %v3354_v16 = vmul.f32 %v3353_v38, %v9222_v21  ;;  %v3709_v13 = vmul.f32 %v9751_v43, %v9476_v20  ;;  %v10944_v24 = vld [vmem:[#allocation27_spill] sm:$0xff] }
 0x43f   : > { %v3829_v18 = vmul.f32 %v3828_v22, %v9558_v63  ;;  %v9796_v27 = vmul.f32 %v4440_v31, %v10940_v5  ;;  %v9798_v40 = vadd.f32 1.0, %v3240_v34  ;;  %v3869_v58 = vmul.f32 %v3868_v44, %v9567_v1  ;;  %v10945_v34 = vld [vmem:[#allocation71_spill] sm:$0xff] }
 0x440   : > { %v3988_v60 = vadd.f32 0.18741608, %v3987_v8  ;;  %v9802_v35 = vmul.f32 %v4413_v30, %v10942_v3  ;;  %v3355_v41 = vadd.f32 0.014752088, %v3354_v16  ;;  %v9806_v52 = vmul.f32 %v9642_v46, %v10944_v24  ;;  %v4542_v16 = vld [vmem:[#allocation13 + $0x18] sm:$0xff]  ;;  %v1623_v3 = vpop.f32.mrf.mxu2 }
 0x441   : > { %10941 = vst [vmem:[#allocation67_spill] sm:$0xff] %v9796_v27  ;;  %v4145_v43 = vmul.f32 %v4144_v55, %v9739_v56  ;;  %v4185_v6 = vmul.f32 %v4184_v54, %v9748_v48  ;;  %4793 = vmatmul.f32.gmra.mxu1 %v9796_v27  ;;  %5855 = vrcp.f32 %v9798_v40  ;;  %v9813_v15 = vmul.f32 0.5, %v9361_v49  ;;  %4941 = vmatpush.msrb.mxu0 %v4542_v16 }
 0x442   : > { %10943 = vst [vmem:[#allocation63_spill] sm:$0xff] %v9802_v35  ;;  %v4027_v57 = vmul.f32 %v4026_v32, %v9656_v36  ;;  %v9817_v14 = vmul.f32 0.70710677, %v9789_v42  ;;  %4837 = vmatmul.f32.gmra.mxu2 %v9802_v35  ;;  %v3356_v46 = vmul.f32 %v3355_v41, %v9222_v21  ;;  %v9823_v22 = vmul.f32 %v9660_v45, %v9327_v2 }
 0x443   : > { %v9826_v10 = vmul.f32 0.5, %v9424_v47  ;;  %v3710_v17 = vadd.f32 1.1283791, %v3709_v13  ;;  %v3830_v44 = vadd.f32 1.1283791, %v3829_v18  ;;  %v9830_v49 = vmul.f32 %v9746_v33, %v9392_v37  ;;  %v4574_v13 = vld [vmem:[#allocation13 + $0x118] sm:$0xff] }
 0x444   : > { %v3870_v8 = vadd.f32 1.1283791, %v3869_v58  ;;  %v3989_v53 = vmul.f32 %v3988_v60, %v9569_v7  ;;  %v3357_v38 = vadd.f32 0.112945676, %v3356_v46  ;;  %v9834_v55 = vmul.f32 0.5, %v9491_v11  ;;  %v10946_v11 = vld [vmem:[#allocation24_spill] sm:$0xff]  ;;  %5006 = vmatpush.msrb.mxu1 %v4574_v13 }
 0x445   : > { %v9837_v54 = vmul.f32 0.5, %v9500_v4  ;;  %v4146_v2 = vadd.f32 0.05243302, %v4145_v43  ;;  %v4186_v45 = vadd.f32 0.05243302, %v4185_v6  ;;  %v9840_v47 = vmul.f32 0.5, %v9503_v12 }
 0x446   : > { %v4028_v61 = vadd.f32 0.18741608, %v4027_v57  ;;  %v4299_v37 = vmul.f32 %v9817_v14, %v9817_v14  ;;  %v3358_v33 = vmul.f32 %v3357_v38, %v9222_v21  ;;  %v9846_v32 = vmul.f32 %v3710_v17, %v10945_v34  ;;  %v4540_v12 = vld [vmem:[#allocation13 + $0x8] sm:$0xff]  ;;  %v10947_v18 = vld [vmem:[#allocation43_spill] sm:$0xff]  ;;  %v10948_v17 = vld [vmem:[#allocation25_spill] sm:$0xff] }
 0x447   : > { %v5856_v31 = vpop.eup %5855  ;;  %v9849_v30 = vmul.f32 %v3830_v44, %v10946_v11  ;;  %v9852_v4 = vmul.f32 0.5, %v9594_v62  ;;  %v3392_v5 = vmul.f32 3.8918573e-05, %v10947_v18  ;;  %v9856_v58 = vmul.f32 %v3870_v8, %v9519_v0  ;;  %v4572_v43 = vld [vmem:[#allocation13 + $0x108] sm:$0xff]  ;;  %4942 = vmatpush.msrb.mxu0 %v4540_v12 }
 0x448   : > { %v3990_v60 = vadd.f32 1.1283791, %v3989_v53  ;;  %v3243_v41 = vmul.f32 %v5856_v31, %v9798_v40  ;;  %v3359_v24 = vadd.f32 0.4994258, %v3358_v33  ;;  %v4616_v6 = vld [vmem:[#allocation13 + $0x268] sm:$0xff]  ;;  %v4147_v62 = vmul.f32 %v4146_v2, %v9739_v56  ;;  %5007 = vmatpush.msrb.mxu1 %v4572_v43  ;;  %v10949_v2 = vld [vmem:[#allocation56_spill] sm:$0xff] }
 0x449   : > { %v4187_v57 = vmul.f32 %v4186_v45, %v9748_v48  ;;  %5066 = vmatpush.msrb.mxu2 %v4616_v6  ;;  %v3393_v46 = vadd.f32 0.001143296, %v3392_v5  ;;  %v3512_v44 = vmul.f32 3.8918573e-05, %v10948_v17  ;;  %v4029_v0 = vmul.f32 %v4028_v61, %v9656_v36  ;;  %4943 = vmatmul.f32.vlgmr.msrb.gmra.mxu0 %v10949_v2  ;;  %v10950_v45 = vld [vmem:[#allocation40_spill] sm:$0xff] }
 0x44a   : > { %v9863_v8 = vmin.f32 %v4299_v37, 16.0  ;;  %v3244_v53 = vsub.f32 1.0, %v3243_v41  ;;  %v3360_v38 = vmul.f32 %v3359_v24, %v9222_v21  ;;  %v1624_v33 = vadd.f32 %v1623_v3, %v8103_v50  ;;  %5008 = vmatmul.f32.vlgmr.msrb.gmra.mxu1 %v10950_v45  ;;  %v1688_v24 = vpop.f32.mrf.mxu3 }
 0x44b   : > { %v3253_v34 = vand.u32 2147483648, %v9798_v40  ;;  %v3394_v11 = vmul.f32 %v3393_v46, %v10947_v18  ;;  %v3513_v16 = vadd.f32 0.001143296, %v3512_v44  ;;  %vm3248_vm5 = vweird.f32 %v5856_v31 }
 0x44c   : > { %v3245_v13 = vmul.f32 %v5856_v31, %v3244_v53  ;;  %v3251_v61 = vand.u32 2147483647, %v9798_v40  ;;  %v9872_v37 = vadd.f32 1.0, %v3360_v38  ;;  %v4148_v21 = vadd.f32 0.18741608, %v4147_v62  ;;  %v10951_v62 = vld [vmem:[#allocation75_spill] sm:$0xff] }
 0x44d   : > { %v4188_v12 = vadd.f32 0.18741608, %v4187_v57  ;;  %v3395_v5 = vadd.f32 0.014752088, %v3394_v11  ;;  %v3514_v50 = vmul.f32 %v3513_v16, %v10948_v17  ;;  %v4301_v3 = vmul.f32 2.1237322e-06, %v9863_v8 }
 0x44e   : > { %v3246_v41 = vadd.f32 %v5856_v31, %v3245_v13  ;;  %vm3247_vm6 = vweird.f32 %v9798_v40  ;;  %5857 = vrcp.f32 %v9872_v37  ;;  %v3254_v43 = vor.u32 1.1754944e-38, %v3253_v34  ;;  %v10952_v16 = vld [vmem:[#allocation73_spill] sm:$0xff] }
 0x44f   : > { %vm3249_vm7 = vmor %vm3247_vm6, %vm3248_vm5  ;;  %v3396_v6 = vmul.f32 %v3395_v5, %v10947_v18  ;;  %v3515_v46 = vadd.f32 0.014752088, %v3514_v50  ;;  %v3552_v44 = vmul.f32 3.8918573e-05, %v9358_v9  ;;  %v9881_v57 = vmul.f32 %v3990_v60, %v10951_v62 }
 0x450   : > { %v9883_v53 = vadd.f32 %v1688_v24, %v1624_v33  ;;  %v3250_v38 = vsel %vm3249_vm7, %v5856_v31, %v3246_v41  ;;  %vm3252_vm8 = vcmp.eq.f32.partialorder %v3251_v61, 8.507059e+37  ;;  %v9885_v2 = vadd.f32 1.1283791, %v4029_v0  ;;  %v10953_v61 = vld [vmem:[#allocation37_spill] sm:$0xff]  ;;  %v10954_v0 = vld [vmem:[#allocation38_spill] sm:$0xff] }
 0x451   : > { %v3255_v40 = vsel %vm3252_vm8, %v3254_v43, %v3250_v38  ;;  %v3397_v45 = vadd.f32 0.112945676, %v3396_v6  ;;  %v3516_v11 = vmul.f32 %v3515_v46, %v10948_v17  ;;  %v4149_v34 = vmul.f32 %v4148_v21, %v9739_v56  ;;  %4946 = vmatmul.f32.gmra.mxu0 %v10953_v61  ;;  %v4648_v43 = vld [vmem:[#allocation13 + $0x368] sm:$0xff] }
 0x452   : > { %v3256_v13 = vmul.f32 %v3255_v40, %v10952_v16  ;;  %v3553_v5 = vadd.f32 0.001143296, %v3552_v44  ;;  %v3672_v50 = vmul.f32 3.8918573e-05, %v9439_v23  ;;  %v4189_v60 = vmul.f32 %v4188_v12, %v9748_v48  ;;  %5011 = vmatmul.f32.gmra.mxu1 %v10954_v0  ;;  %5131 = vmatpush.msrb.mxu3 %v4648_v43  ;;  %v10955_v0 = vld [vmem:[#allocation61_spill] sm:$0xff] }
 0x453   : > { %v4302_v62 = vadd.f32 0.00028619796, %v4301_v3  ;;  %v3398_v33 = vmul.f32 %v3397_v45, %v10947_v18  ;;  %v3517_v31 = vadd.f32 0.112945676, %v3516_v11  ;;  %v9896_v24 = vmul.f32 0.70710677, %v9883_v53 }
 0x454   : > { %v5858_v41 = vpop.eup %5857  ;;  %v5564_v21 = vclamps-f32 %v3256_v13, 1.0  ;;  %v3554_v6 = vmul.f32 %v3553_v5, %v9358_v9  ;;  %v3673_v46 = vadd.f32 0.001143296, %v3672_v50  ;;  %v3371_v12 = vand.u32 2147483647, %v9872_v37  ;;  %v4614_v5 = vld [vmem:[#allocation13 + $0x258] sm:$0xff] }
 0x455   : > { %v3363_v44 = vmul.f32 %v5858_v41, %v9872_v37  ;;  %v3373_v3 = vand.u32 2147483648, %v9872_v37  ;;  %v3399_v38 = vadd.f32 0.4994258, %v3398_v33  ;;  %v3518_v45 = vmul.f32 %v3517_v31, %v10948_v17  ;;  %5067 = vmatpush.msrb.mxu2 %v4614_v5 }
 0x456   : > { %v4414_v40 = vadd.f32 1.0, %v5564_v21  ;;  %v3555_v11 = vadd.f32 0.014752088, %v3554_v6  ;;  %v3674_v16 = vmul.f32 %v3673_v46, %v9439_v23  ;;  %vm3368_vm9 = vweird.f32 %v5858_v41 }
 0x457   : > { %v3364_v61 = vsub.f32 1.0, %v3363_v44  ;;  %v3400_v13 = vmul.f32 %v3399_v38, %v10947_v18  ;;  %v3712_v50 = vmul.f32 3.8918573e-05, %v9476_v20  ;;  %v3519_v27 = vadd.f32 0.4994258, %v3518_v45 }
 0x458   : > { %v9907_v35 = vmul.f32 %v4414_v40, %v10955_v0  ;;  %v3556_v33 = vmul.f32 %v3555_v11, %v9358_v9  ;;  %v3675_v21 = vadd.f32 0.014752088, %v3674_v16  ;;  %v3832_v46 = vmul.f32 3.8918573e-05, %v9558_v63  ;;  %v10956_v16 = vld [vmem:[#allocation39_spill] sm:$0xff] }
 0x459   : > { %v3365_v43 = vmul.f32 %v5858_v41, %v3364_v61  ;;  %v9910_v31 = vadd.f32 1.0, %v3400_v13  ;;  %v3713_v6 = vadd.f32 0.001143296, %v3712_v50  ;;  %v4303_v44 = vmul.f32 %v4302_v62, %v9863_v8  ;;  %4949 = vmatmul.f32.gmra.mxu0 %v10956_v16  ;;  %v10957_v61 = vld [vmem:[#allocation42_spill] sm:$0xff] }
 0x45a   : > { %4902 = vmatmul.f32.gmra.mxu3 %v9907_v35  ;;  %v3520_v18 = vmul.f32 %v3519_v27, %v10948_v17  ;;  %v3557_v38 = vadd.f32 0.112945676, %v3556_v33  ;;  %v3676_v40 = vmul.f32 %v3675_v21, %v9439_v23  ;;  %v4339_v45 = vmul.f32 %v9896_v24, %v9896_v24  ;;  %5014 = vmatmul.f32.gmra.mxu1 %v10957_v61 }
 0x45b   : > { %v3366_v11 = vadd.f32 %v5858_v41, %v3365_v43  ;;  %vm3367_vm10 = vweird.f32 %v9872_v37  ;;  %5859 = vrcp.f32 %v9910_v31  ;;  %v3374_v62 = vor.u32 1.1754944e-38, %v3373_v3  ;;  %v4646_v3 = vld [vmem:[#allocation13 + $0x358] sm:$0xff] }
 0x45c   : > { %vm3369_vm11 = vmor %vm3367_vm10, %vm3368_vm9  ;;  %v9924_v13 = vadd.f32 1.0, %v3520_v18  ;;  %v3558_v27 = vmul.f32 %v3557_v38, %v9358_v9  ;;  %v3677_v17 = vadd.f32 0.112945676, %v3676_v40  ;;  %vm3372_vm12 = vcmp.eq.f32.partialorder %v3371_v12, 8.507059e+37  ;;  %5132 = vmatpush.msrb.mxu3 %v4646_v3 }
 0x45d   : > { %v3370_v5 = vsel %vm3369_vm11, %v5858_v41, %v3366_v11  ;;  %v3714_v50 = vmul.f32 %v3713_v6, %v9476_v20  ;;  %v3833_v0 = vadd.f32 0.001143296, %v3832_v46  ;;  %v9930_v37 = vmul.f32 %v9885_v2, %v9615_v28 }
 0x45e   : > { %v9932_v33 = vadd.f32 1.1283791, %v4149_v34  ;;  %v3375_v21 = vsel %vm3372_vm12, %v3374_v62, %v3370_v5  ;;  %5861 = vrcp.f32 %v9924_v13  ;;  %v9935_v43 = vadd.f32 1.1283791, %v4189_v60  ;;  %v10960_v5 = vld [vmem:[#allocation45_spill] sm:$0xff] }
 0x45f   : > { %v3376_v18 = vmul.f32 %v3375_v21, %v9669_v19  ;;  %v3411_v41 = vand.u32 2147483647, %v9910_v31  ;;  %v3559_v12 = vadd.f32 0.4994258, %v3558_v27  ;;  %v9939_v6 = vadd.f32 0.0036580483, %v4303_v44 }
 0x460   : > { %v3678_v46 = vmul.f32 %v3677_v17, %v9439_v23  ;;  %v3715_v28 = vadd.f32 0.014752088, %v3714_v50  ;;  %v3834_v2 = vmul.f32 %v3833_v0, %v9558_v63  ;;  %v9943_v38 = vmin.f32 %v4339_v45, 16.0  ;;  %v4612_v44 = vld [vmem:[#allocation13 + $0x248] sm:$0xff] }
 0x461   : > { %v5860_v34 = vpop.eup %5859  ;;  %v5567_v40 = vclamps-f32 %v3376_v18, 1.0  ;;  %vm3407_vm13 = vweird.f32 %v9910_v31  ;;  %v3560_v60 = vmul.f32 %v3559_v12, %v9358_v9  ;;  %v3413_v11 = vand.u32 2147483648, %v9910_v31  ;;  %5068 = vmatpush.msrb.mxu2 %v4612_v44  ;;  %4952 = vmatmul.f32.gmra.mxu0 %v10960_v5  ;;  %v10961_v18 = vld [vmem:[#allocation47_spill] sm:$0xff]  ;;  %v10962_v12 = vld [vmem:[#allocation70_spill] sm:$0xff] }
 0x462   : > { %v3403_v19 = vmul.f32 %v5860_v34, %v9910_v31  ;;  %v3679_v16 = vadd.f32 0.4994258, %v3678_v46  ;;  %v3716_v61 = vmul.f32 %v3715_v28, %v9476_v20  ;;  %vm9950_vm14 = vcmp.eq.f32.partialorder %v3411_v41, 8.507059e+37  ;;  %5017 = vmatmul.f32.gmra.mxu1 %v10961_v18  ;;  %v4644_v18 = vld [vmem:[#allocation13 + $0x348] sm:$0xff] }
 0x463   : > { %v4417_v62 = vadd.f32 1.0, %v5567_v40  ;;  %v9954_v45 = vadd.f32 1.0, %v3560_v60  ;;  %v3835_v17 = vadd.f32 0.014752088, %v3834_v2  ;;  %v3531_v0 = vand.u32 2147483647, %v9924_v13  ;;  %5133 = vmatpush.msrb.mxu3 %v4644_v18 }
 0x464   : > { %v5862_v9 = vpop.eup %5861  ;;  %v3404_v50 = vsub.f32 1.0, %v3403_v19  ;;  %v3680_v21 = vmul.f32 %v3679_v16, %v9439_v23  ;;  %v3717_v3 = vadd.f32 0.112945676, %v3716_v61  ;;  %v3872_v28 = vmul.f32 3.8918573e-05, %v9567_v1 }
 0x465   : > { %v9961_v41 = vmul.f32 %v4417_v62, %v10962_v12  ;;  %v3523_v46 = vmul.f32 %v5862_v9, %v9924_v13  ;;  %5863 = vrcp.f32 %v9954_v45  ;;  %vm3408_vm15 = vweird.f32 %v5860_v34 }
 0x466   : > { %v3405_v2 = vmul.f32 %v5860_v34, %v3404_v50  ;;  %v3414_v40 = vor.u32 1.1754944e-38, %v3413_v11  ;;  %v3533_v60 = vand.u32 2147483648, %v9924_v13  ;;  %v9968_v19 = vadd.f32 1.0, %v3680_v21  ;;  %vm3409_vm2 = vmor %vm3407_vm13, %vm3408_vm15 }
 0x467   : > { %10963 = vst [vmem:[#allocation26_spill] sm:$0xff] %v9961_v41  ;;  %4840 = vmatmul.f32.gmra.mxu2 %v9961_v41  ;;  %v3524_v23 = vsub.f32 1.0, %v3523_v46  ;;  %v3718_v16 = vmul.f32 %v3717_v3, %v9476_v20  ;;  %v3836_v44 = vmul.f32 %v3835_v17, %v9558_v63  ;;  %vm3527_vm0 = vweird.f32 %v9924_v13 }
 0x468   : > { %v3406_v61 = vadd.f32 %v5860_v34, %v3405_v2  ;;  %vm9973_vm1 = vcmp.eq.f32.partialorder %v3531_v0, 8.507059e+37  ;;  %v3571_v11 = vand.u32 2147483647, %v9954_v45  ;;  %vm3528_vm3 = vweird.f32 %v5862_v9 }
 0x469   : > { %v3525_v5 = vmul.f32 %v5862_v9, %v3524_v23  ;;  %5865 = vrcp.f32 %v9968_v19  ;;  %v3873_v50 = vadd.f32 0.001143296, %v3872_v28  ;;  %v3534_v3 = vor.u32 1.1754944e-38, %v3533_v60  ;;  %v10966_v23 = vld [vmem:[#allocation57_spill] sm:$0xff]  ;;  %vm3529_vm5 = vmor %vm3527_vm0, %vm3528_vm3 }
 0x46a   : > { %v3410_v21 = vsel %vm3409_vm2, %v5860_v34, %v3406_v61  ;;  %v3719_v17 = vadd.f32 0.4994258, %v3718_v16  ;;  %v3837_v12 = vadd.f32 0.112945676, %v3836_v44  ;;  %vm3567_vm4 = vweird.f32 %v9954_v45  ;;  %4955 = vmatmul.f32.gmra.mxu0 %v10966_v23 }
 0x46b   : > { %v5864_v46 = vpop.eup %5863  ;;  %v3415_v0 = vsel %vm9950_vm14, %v3414_v40, %v3410_v21  ;;  %v3526_v2 = vadd.f32 %v5862_v9, %v3525_v5  ;;  %v3992_v31 = vmul.f32 3.8918573e-05, %v9569_v7  ;;  %vm9991_vm6 = vcmp.eq.f32.partialorder %v3571_v11, 8.507059e+37  ;;  %v10969_v40 = vld [vmem:[#allocation21_spill] sm:$0xff] }
 0x46c   : > { %v3416_v41 = vmul.f32 %v3415_v0, %v9744_v29  ;;  %v3563_v34 = vmul.f32 %v5864_v46, %v9954_v45  ;;  %v3573_v27 = vand.u32 2147483648, %v9954_v45  ;;  %5020 = vmatmul.f32.gmra.mxu1 %v10969_v40  ;;  %v3720_v16 = vmul.f32 %v3719_v17, %v9476_v20  ;;  %v4610_v17 = vld [vmem:[#allocation13 + $0x238] sm:$0xff] }
 0x46d   : > { %v3530_v60 = vsel %vm3529_vm5, %v5862_v9, %v3526_v2  ;;  %v3838_v44 = vmul.f32 %v3837_v12, %v9558_v63  ;;  %v3874_v29 = vmul.f32 %v3873_v50, %v9567_v1  ;;  %vm3568_vm7 = vweird.f32 %v5864_v46  ;;  %5069 = vmatpush.msrb.mxu2 %v4610_v17 }
 0x46e   : > { %v5568_v61 = vclamps-f32 %v3416_v41, 1.0  ;;  %v3535_v13 = vsel %vm9973_vm1, %v3534_v3, %v3530_v60  ;;  %v3564_v5 = vsub.f32 1.0, %v3563_v34  ;;  %v10003_v18 = vadd.f32 1.0, %v3720_v16  ;;  %v10970_v3 = vld [vmem:[#allocation83_spill] sm:$0xff]  ;;  %vm3569_vm8 = vmor %vm3567_vm4, %vm3568_vm7 }
 0x46f   : > { %v5866_v11 = vpop.eup %5865  ;;  %v3536_v21 = vmul.f32 %v3535_v13, %v9806_v52  ;;  %v3839_v0 = vadd.f32 0.4994258, %v3838_v44  ;;  %v3875_v23 = vadd.f32 0.014752088, %v3874_v29  ;;  %v3993_v12 = vadd.f32 0.001143296, %v3992_v31 }
 0x470   : > { %v4418_v9 = vadd.f32 1.0, %v5568_v61  ;;  %v3565_v2 = vmul.f32 %v5864_v46, %v3564_v5  ;;  %v3683_v20 = vmul.f32 %v5866_v11, %v9968_v19  ;;  %v3574_v41 = vor.u32 1.1754944e-38, %v3573_v27  ;;  %v10971_v44 = vld [vmem:[#allocation22_spill] sm:$0xff] }
 0x471   : > { %v5571_v50 = vclamps-f32 %v3536_v21, 1.0  ;;  %v3691_v62 = vand.u32 2147483647, %v9968_v19  ;;  %5867 = vrcp.f32 %v10003_v18  ;;  %v3693_v60 = vand.u32 2147483648, %v9968_v19  ;;  %v10972_v21 = vld [vmem:[#allocation23_spill] sm:$0xff] }
 0x472   : > { %v10009_v34 = vmul.f32 %v4418_v9, %v10970_v3  ;;  %v3566_v52 = vadd.f32 %v5864_v46, %v3565_v2  ;;  %v3684_v40 = vsub.f32 1.0, %v3683_v20  ;;  %vm3688_vm9 = vweird.f32 %v5866_v11  ;;  %4958 = vmatmul.f32.gmra.mxu0 %v10971_v44  ;;  %v10975_v44 = vld [vmem:[#allocation66_spill] sm:$0xff] }
 0x473   : > { %v4421_v16 = vadd.f32 1.0, %v5571_v50  ;;  %v3840_v31 = vmul.f32 %v3839_v0, %v9558_v63  ;;  %v3876_v27 = vmul.f32 %v3875_v23, %v9567_v1  ;;  %v3731_v13 = vand.u32 2147483647, %v10003_v18 }
 0x474   : > { %4905 = vmatmul.f32.gmra.mxu3 %v10009_v34  ;;  %v3570_v29 = vsel %vm3569_vm8, %v5864_v46, %v3566_v52  ;;  %v3685_v61 = vmul.f32 %v5866_v11, %v3684_v40  ;;  %v3994_v5 = vmul.f32 %v3993_v12, %v9569_v7  ;;  %5023 = vmatmul.f32.gmra.mxu1 %v10972_v21  ;;  %vm3687_vm10 = vweird.f32 %v9968_v19  ;;  %v10976_v21 = vld [vmem:[#allocation30_spill] sm:$0xff] }
 0x475   : > { %v10023_v45 = vmul.f32 %v4421_v16, %v9689_v26  ;;  %v3575_v63 = vsel %vm9991_vm6, %v3574_v41, %v3570_v29  ;;  %v10027_v0 = vadd.f32 1.0, %v3840_v31  ;;  %v3877_v23 = vadd.f32 0.112945676, %v3876_v27  ;;  %vm3689_vm11 = vmor %vm3687_vm10, %vm3688_vm9 }
 0x476   : > { %v3576_v9 = vmul.f32 %v3575_v63, %v9823_v22  ;;  %v3686_v2 = vadd.f32 %v5866_v11, %v3685_v61  ;;  %v3995_v46 = vadd.f32 0.014752088, %v3994_v5  ;;  %vm3692_vm12 = vcmp.eq.f32.partialorder %v3691_v62, 8.507059e+37  ;;  %v10051_v63 = vpop.f32.mrf.mxu0 }
 0x477   : > { %v5868_v20 = vpop.eup %5867  ;;  %4843 = vmatmul.f32.gmra.mxu2 %v10023_v45  ;;  %v3694_v26 = vor.u32 1.1754944e-38, %v3693_v60  ;;  %5869 = vrcp.f32 %v10027_v0  ;;  %v4032_v28 = vmul.f32 3.8918573e-05, %v9656_v36  ;;  %vm3727_vm13 = vweird.f32 %v10003_v18  ;;  %v4642_v60 = vld [vmem:[#allocation13 + $0x338] sm:$0xff] }
 0x478   : > { %v5572_v17 = vclamps-f32 %v3576_v9, 1.0  ;;  %v3690_v12 = vsel %vm3689_vm11, %v5866_v11, %v3686_v2  ;;  %v3723_v50 = vmul.f32 %v5868_v20, %v10003_v18  ;;  %vm10037_vm14 = vcmp.eq.f32.partialorder %v3731_v13, 8.507059e+37  ;;  %5134 = vmatpush.msrb.mxu3 %v4642_v60 }
 0x479   : > { %v3695_v22 = vsel %vm3692_vm12, %v3694_v26, %v3690_v12  ;;  %v3733_v41 = vand.u32 2147483648, %v10003_v18  ;;  %v3878_v62 = vmul.f32 %v3877_v23, %v9567_v1  ;;  %v3996_v11 = vmul.f32 %v3995_v46, %v9569_v7  ;;  %v10056_v26 = vpop.f32.mrf.mxu1 }
 0x47a   : > { %v4422_v3 = vadd.f32 1.0, %v5572_v17  ;;  %v3696_v52 = vmul.f32 %v3695_v22, %v9830_v49  ;;  %v3724_v40 = vsub.f32 1.0, %v3723_v50  ;;  %vm3728_vm15 = vweird.f32 %v5868_v20  ;;  %4961 = vmatmul.f32.gmra.mxu0 %v10975_v44 }
 0x47b   : > { %v3879_v16 = vadd.f32 0.4994258, %v3878_v62  ;;  %v4033_v31 = vadd.f32 0.001143296, %v4032_v28  ;;  %v4152_v27 = vmul.f32 3.8918573e-05, %v9739_v56  ;;  %vm3729_vm0 = vmor %vm3727_vm13, %vm3728_vm15  ;;  %vm3847_vm2 = vweird.f32 %v10027_v0 }
 0x47c   : > { %v10048_v29 = vmul.f32 %v4422_v3, %v9785_v59  ;;  %v5575_v61 = vclamps-f32 %v3696_v52, 1.0  ;;  %v3725_v13 = vmul.f32 %v5868_v20, %v3724_v40  ;;  %v3997_v5 = vadd.f32 0.112945676, %v3996_v11  ;;  %5026 = vmatmul.f32.gmra.mxu1 %v10976_v21 }
 0x47d   : > { %v5870_v49 = vpop.eup %5869  ;;  %v3880_v23 = vmul.f32 %v3879_v16, %v9567_v1  ;;  %v4034_v9 = vmul.f32 %v4033_v31, %v9656_v36  ;;  %v4153_v2 = vadd.f32 0.001143296, %v4152_v27  ;;  %v4192_v46 = vmul.f32 3.8918573e-05, %v9748_v48  ;;  %v4608_v27 = vld [vmem:[#allocation13 + $0x228] sm:$0xff] }
 0x47e   : > { %4908 = vmatmul.f32.gmra.mxu3 %v10048_v29  ;;  %v4425_v59 = vadd.f32 1.0, %v5575_v61  ;;  %v3726_v28 = vadd.f32 %v5868_v20, %v3725_v13  ;;  %v3734_v17 = vor.u32 1.1754944e-38, %v3733_v41  ;;  %v3843_v12 = vmul.f32 %v5870_v49, %v10027_v0  ;;  %5070 = vmatpush.msrb.mxu2 %v4608_v27  ;;  %v10977_v13 = vld [vmem:[#allocation31_spill] sm:$0xff] }
 0x47f   : > { %v10063_v50 = vadd.f32 1.0, %v3880_v23  ;;  %v3998_v1 = vmul.f32 %v3997_v5, %v9569_v7  ;;  %v4035_v22 = vadd.f32 0.014752088, %v4034_v9  ;;  %v4154_v62 = vmul.f32 %v4153_v2, %v9739_v56  ;;  %v10978_v23 = vld [vmem:[#allocation35_spill] sm:$0xff] }
 0x480   : > { %v10068_v3 = vmul.f32 %v4425_v59, %v9813_v15  ;;  %v3730_v52 = vsel %vm3729_vm0, %v5868_v20, %v3726_v28  ;;  %v3844_v40 = vsub.f32 1.0, %v3843_v12  ;;  %v4193_v60 = vadd.f32 0.001143296, %v4192_v46 }
 0x481   : > { %v3735_v41 = vsel %vm10037_vm14, %v3734_v17, %v3730_v52  ;;  %v3851_v11 = vand.u32 2147483647, %v10027_v0  ;;  %v3853_v18 = vand.u32 2147483648, %v10027_v0  ;;  %5871 = vrcp.f32 %v10063_v50 }
 0x482   : > { %4846 = vmatmul.f32.gmra.mxu2 %v10068_v3  ;;  %v3736_v16 = vmul.f32 %v3735_v41, %v9846_v32  ;;  %v3845_v31 = vmul.f32 %v5870_v49, %v3844_v40  ;;  %vm3848_vm1 = vweird.f32 %v5870_v49  ;;  %v3999_v15 = vadd.f32 0.4994258, %v3998_v1  ;;  %4964 = vmatmul.f32.gmra.mxu0 %v10977_v13  ;;  %v10091_v40 = vpop.f32.mrf.mxu1 }
 0x483   : > { %v4341_v20 = vmul.f32 2.1237322e-06, %v9943_v38  ;;  %v4036_v19 = vmul.f32 %v4035_v22, %v9656_v36  ;;  %v4155_v44 = vadd.f32 0.014752088, %v4154_v62  ;;  %v4194_v61 = vmul.f32 %v4193_v60, %v9748_v48  ;;  %vm3849_vm3 = vmor %vm3847_vm2, %vm3848_vm1  ;;  %v10087_v22 = vpop.f32.mrf.mxu0 }
 0x484   : > { %v5576_v5 = vclamps-f32 %v3736_v16, 1.0  ;;  %v3846_v21 = vadd.f32 %v5870_v49, %v3845_v31  ;;  %v4000_v32 = vmul.f32 %v3999_v15, %v9569_v7  ;;  %5029 = vmatmul.f32.gmra.mxu1 %v10978_v23  ;;  %v3854_v9 = vor.u32 1.1754944e-38, %v3853_v18  ;;  %v4640_v31 = vld [vmem:[#allocation13 + $0x328] sm:$0xff]  ;;  %v10980_v23 = vld [vmem:[#allocation55_spill] sm:$0xff] }
 0x485   : > { %v4037_v2 = vadd.f32 0.112945676, %v4036_v19  ;;  %v4156_v46 = vmul.f32 %v4155_v44, %v9739_v56  ;;  %v4195_v59 = vadd.f32 0.014752088, %v4194_v61  ;;  %vm3852_vm4 = vcmp.eq.f32.partialorder %v3851_v11, 8.507059e+37  ;;  %5135 = vmatpush.msrb.mxu3 %v4640_v31 }
 0x486   : > { %v4426_v28 = vadd.f32 1.0, %v5576_v5  ;;  %v3850_v17 = vsel %vm3849_vm3, %v5870_v49, %v3846_v21  ;;  %v10085_v12 = vadd.f32 1.0, %v4000_v32  ;;  %v4312_v11 = vmul.f32 3.8918573e-05, %v9863_v8 }
 0x487   : > { %v5872_v1 = vpop.eup %5871  ;;  %v3855_v62 = vsel %vm3852_vm4, %v3854_v9, %v3850_v17  ;;  %v4038_v0 = vmul.f32 %v4037_v2, %v9656_v36  ;;  %v4157_v7 = vadd.f32 0.112945676, %v4156_v46  ;;  %v4196_v52 = vmul.f32 %v4195_v59, %v9748_v48  ;;  %v4606_v46 = vld [vmem:[#allocation13 + $0x218] sm:$0xff] }
 0x488   : > { %v10094_v60 = vmul.f32 %v4426_v28, %v9826_v10  ;;  %v3856_v41 = vmul.f32 %v3855_v62, %v9849_v30  ;;  %v3883_v49 = vmul.f32 %v5872_v1, %v10063_v50  ;;  %v4305_v18 = vmul.f32 %v9939_v6, %v9863_v8  ;;  %5071 = vmatpush.msrb.mxu2 %v4606_v46 }
 0x489   : > { %v4342_v16 = vadd.f32 0.00028619796, %v4341_v20  ;;  %5873 = vrcp.f32 %v10085_v12  ;;  %v4352_v15 = vmul.f32 3.8918573e-05, %v9943_v38  ;;  %v3891_v19 = vand.u32 2147483647, %v10063_v50 }
 0x48a   : > { %4911 = vmatmul.f32.gmra.mxu3 %v10094_v60  ;;  %v5579_v27 = vclamps-f32 %v3856_v41, 1.0  ;;  %v3884_v10 = vsub.f32 1.0, %v3883_v49  ;;  %v4039_v30 = vadd.f32 0.4994258, %v4038_v0  ;;  %vm3888_vm5 = vweird.f32 %v5872_v1  ;;  %v10979_v20 = vld [vmem:[#allocation44_spill] sm:$0xff] }
 0x48b   : > { %v3893_v44 = vand.u32 2147483648, %v10063_v50  ;;  %v4158_v61 = vmul.f32 %v4157_v7, %v9739_v56  ;;  %v4197_v6 = vadd.f32 0.112945676, %v4196_v52  ;;  %4967 = vmatmul.f32.gmra.mxu0 %v10979_v20  ;;  %v4313_v32 = vadd.f32 0.001143296, %v4312_v11  ;;  %v10124_v31 = vpop.f32.mrf.mxu0 }
 0x48c   : > { %v4429_v13 = vadd.f32 1.0, %v5579_v27  ;;  %v3885_v5 = vmul.f32 %v5872_v1, %v3884_v10  ;;  %v4040_v21 = vmul.f32 %v4039_v30, %v9656_v36  ;;  %5032 = vmatmul.f32.gmra.mxu1 %v10980_v23  ;;  %v4343_v9 = vmul.f32 %v4342_v16, %v9943_v38  ;;  %v4638_v27 = vld [vmem:[#allocation13 + $0x318] sm:$0xff] }
 0x48d   : > { %v4159_v2 = vadd.f32 0.4994258, %v4158_v61  ;;  %v4198_v59 = vmul.f32 %v4197_v6, %v9748_v48  ;;  %v4353_v28 = vadd.f32 0.001143296, %v4352_v15  ;;  %vm3887_vm6 = vweird.f32 %v10063_v50  ;;  %5136 = vmatpush.msrb.mxu3 %v4638_v27 }
 0x48e   : > { %v10113_v17 = vmul.f32 %v4429_v13, %v9834_v55  ;;  %v3886_v62 = vadd.f32 %v5872_v1, %v3885_v5  ;;  %v10116_v0 = vadd.f32 1.0, %v4040_v21  ;;  %vm3889_vm7 = vmor %vm3887_vm6, %vm3888_vm5  ;;  %v3894_v7 = vor.u32 1.1754944e-38, %v3893_v44  ;;  %v10981_v13 = vld [vmem:[#allocation51_spill] sm:$0xff] }
 0x48f   : > { %v5874_v36 = vpop.eup %5873  ;;  %v4160_v52 = vmul.f32 %v4159_v2, %v9739_v56  ;;  %v4199_v41 = vadd.f32 0.4994258, %v4198_v59  ;;  %v4314_v49 = vmul.f32 %v4313_v32, %v9863_v8  ;;  %vm3892_vm8 = vcmp.eq.f32.partialorder %v3891_v19, 8.507059e+37  ;;  %v10127_v56 = vpop.f32.mrf.mxu1 }
 0x490   : > { %4849 = vmatmul.f32.gmra.mxu2 %v10113_v17  ;;  %v3890_v11 = vsel %vm3889_vm7, %v5872_v1, %v3886_v62  ;;  %v4003_v55 = vmul.f32 %v5874_v36, %v10085_v12  ;;  %5875 = vrcp.f32 %v10116_v0  ;;  %v4306_v50 = vadd.f32 0.05243302, %v4305_v18 }
 0x491   : > { %v4344_v16 = vadd.f32 0.0036580483, %v4343_v9  ;;  %v3895_v15 = vsel %vm3892_vm8, %v3894_v7, %v3890_v11  ;;  %v4354_v10 = vmul.f32 %v4353_v28, %v9943_v38  ;;  %v10130_v61 = vadd.f32 1.0, %v4160_v52 }
 0x492   : > { %v3896_v30 = vmul.f32 %v3895_v15, %v9856_v58  ;;  %v4004_v44 = vsub.f32 1.0, %v4003_v55  ;;  %v4200_v1 = vmul.f32 %v4199_v41, %v9748_v48  ;;  %v10135_v18 = vmul.f32 %v9932_v33, %v9692_v39  ;;  %v10982_v58 = vld [vmem:[#allocation48_spill] sm:$0xff] }
 0x493   : > { %v4011_v19 = vand.u32 2147483647, %v10085_v12  ;;  %v4013_v6 = vand.u32 2147483648, %v10085_v12  ;;  %v4315_v20 = vadd.f32 0.014752088, %v4314_v49  ;;  %4970 = vmatmul.f32.gmra.mxu0 %v10981_v13  ;;  %vm4008_vm9 = vweird.f32 %v5874_v36  ;;  %v10986_v13 = vld [vmem:[#allocation53_spill] sm:$0xff] }
 0x494   : > { %v5580_v5 = vclamps-f32 %v3896_v30, 1.0  ;;  %v4005_v21 = vmul.f32 %v5874_v36, %v4004_v44  ;;  %5877 = vrcp.f32 %v10130_v61  ;;  %5035 = vmatmul.f32.gmra.mxu1 %v10982_v58  ;;  %v10143_v48 = vmul.f32 %v4306_v50, %v9863_v8  ;;  %v10985_v44 = vld [vmem:[#allocation33_spill] sm:$0xff] }
 0x495   : > { %v4345_v39 = vmul.f32 %v4344_v16, %v9943_v38  ;;  %vm4007_vm10 = vweird.f32 %v10085_v12  ;;  %v10147_v33 = vadd.f32 1.0, %v4200_v1  ;;  %v4316_v2 = vmul.f32 %v4315_v20, %v9863_v8 }
 0x496   : > { %v5876_v32 = vpop.eup %5875  ;;  %v4430_v23 = vadd.f32 1.0, %v5580_v5  ;;  %v4006_v9 = vadd.f32 %v5874_v36, %v4005_v21  ;;  %v4355_v46 = vadd.f32 0.014752088, %v4354_v10  ;;  %vm4009_vm11 = vmor %vm4007_vm10, %vm4008_vm9  ;;  %vm4012_vm12 = vcmp.eq.f32.partialorder %v4011_v19, 8.507059e+37 }
 0x497   : > { %v4014_v59 = vor.u32 1.1754944e-38, %v4013_v6  ;;  %v4043_v28 = vmul.f32 %v5876_v32, %v10116_v0  ;;  %v4051_v62 = vand.u32 2147483647, %v10116_v0  ;;  %v4053_v12 = vand.u32 2147483648, %v10116_v0  ;;  %v10170_v1 = vpop.f32.mrf.mxu1 }
 0x498   : > { %v10153_v7 = vmul.f32 %v4430_v23, %v9837_v54  ;;  %v4010_v52 = vsel %vm4009_vm11, %v5874_v36, %v4006_v9  ;;  %5879 = vrcp.f32 %v10147_v33  ;;  %v4346_v41 = vadd.f32 0.05243302, %v4345_v39  ;;  %v10162_v36 = vpop.f32.mrf.mxu0  ;;  %v4604_v39 = vld [vmem:[#allocation13 + $0x208] sm:$0xff] }
 0x499   : > { %v4015_v49 = vsel %vm4012_vm12, %v4014_v59, %v4010_v52  ;;  %v4044_v11 = vsub.f32 1.0, %v4043_v28  ;;  %vm4047_vm13 = vweird.f32 %v10116_v0  ;;  %v4171_v16 = vand.u32 2147483647, %v10130_v61  ;;  %5072 = vmatpush.msrb.mxu2 %v4604_v39  ;;  %v4814_v39 = vpop.f32.mrf.mxu2 }
 0x49a   : > { %v5878_v55 = vpop.eup %5877  ;;  %4914 = vmatmul.f32.gmra.mxu3 %v10153_v7  ;;  %v4016_v50 = vmul.f32 %v4015_v49, %v9881_v57  ;;  %v4317_v15 = vadd.f32 0.112945676, %v4316_v2  ;;  %v4356_v54 = vmul.f32 %v4355_v46, %v9943_v38  ;;  %vm4048_vm14 = vweird.f32 %v5876_v32 }
 0x49b   : > { %v4045_v27 = vmul.f32 %v5876_v32, %v4044_v11  ;;  %vm10164_vm15 = vcmp.eq.f32.partialorder %v4051_v62, 8.507059e+37  ;;  %v4163_v30 = vmul.f32 %v5878_v55, %v10130_v61  ;;  %4973 = vmatmul.f32.gmra.mxu0 %v10985_v44  ;;  %v4054_v19 = vor.u32 1.1754944e-38, %v4053_v12  ;;  %vm4049_vm1 = vmor %vm4047_vm13, %vm4048_vm14 }
 0x49c   : > { %v5583_v57 = vclamps-f32 %v4016_v50, 1.0  ;;  %v4318_v6 = vmul.f32 %v4317_v15, %v9863_v8  ;;  %v4357_v20 = vadd.f32 0.112945676, %v4356_v54  ;;  %5038 = vmatmul.f32.gmra.mxu1 %v10986_v13  ;;  %vm4167_vm0 = vweird.f32 %v10130_v61  ;;  %v10990_v13 = vld [vmem:[#allocation78_spill] sm:$0xff] }
 0x49d   : > { %v4046_v5 = vadd.f32 %v5876_v32, %v4045_v27  ;;  %v4164_v21 = vsub.f32 1.0, %v4163_v30  ;;  %v4173_v58 = vand.u32 2147483648, %v10130_v61  ;;  %vm10179_vm2 = vcmp.eq.f32.partialorder %v4171_v16, 8.507059e+37  ;;  %v4636_v27 = vld [vmem:[#allocation13 + $0x308] sm:$0xff] }
 0x49e   : > { %v5880_v23 = vpop.eup %5879  ;;  %v4433_v9 = vadd.f32 1.0, %v5583_v57  ;;  %v4319_v46 = vadd.f32 0.4994258, %v4318_v6  ;;  %v4358_v59 = vmul.f32 %v4357_v20, %v9943_v38  ;;  %vm4168_vm3 = vweird.f32 %v5878_v55  ;;  %5137 = vmatpush.msrb.mxu3 %v4636_v27 }
 0x49f   : > { %v4050_v28 = vsel %vm4049_vm1, %v5876_v32, %v4046_v5  ;;  %v4165_v62 = vmul.f32 %v5878_v55, %v4164_v21  ;;  %v4203_v52 = vmul.f32 %v5880_v23, %v10147_v33  ;;  %v4174_v15 = vor.u32 1.1754944e-38, %v4173_v58  ;;  %vm4169_vm4 = vmor %vm4167_vm0, %vm4168_vm3 }
 0x4a0   : > { %v10186_v12 = vmul.f32 %v4433_v9, %v9840_v47  ;;  %v4055_v0 = vsel %vm10164_vm15, %v4054_v19, %v4050_v28  ;;  %v4320_v49 = vmul.f32 %v4319_v46, %v9863_v8  ;;  %v4359_v11 = vadd.f32 0.4994258, %v4358_v59  ;;  %v10989_v19 = vld [vmem:[#allocation49_spill] sm:$0xff]  ;;  %v10207_v5 = vpop.f32.mrf.mxu0 }
 0x4a1   : > { %v4056_v50 = vmul.f32 %v4055_v0, %v9930_v37  ;;  %v4166_v16 = vadd.f32 %v5878_v55, %v4165_v62  ;;  %v4204_v54 = vsub.f32 1.0, %v4203_v52  ;;  %v4211_v47 = vand.u32 2147483647, %v10147_v33 }
 0x4a2   : > { %4852 = vmatmul.f32.gmra.mxu2 %v10186_v12  ;;  %v4213_v32 = vand.u32 2147483648, %v10147_v33  ;;  %v10197_v10 = vadd.f32 1.0, %v4320_v49  ;;  %v4360_v30 = vmul.f32 %v4359_v11, %v9943_v38  ;;  %vm4208_vm5 = vweird.f32 %v5880_v23 }
 0x4a3   : > { %v5584_v44 = vclamps-f32 %v4056_v50, 1.0  ;;  %v4170_v37 = vsel %vm4169_vm4, %v5878_v55, %v4166_v16  ;;  %v4205_v57 = vmul.f32 %v5880_v23, %v4204_v54  ;;  %4976 = vmatmul.f32.gmra.mxu0 %v10989_v19  ;;  %v4308_v6 = vadd.f32 0.18741608, %v10143_v48 }
 0x4a4   : > { %v4347_v61 = vmul.f32 %v4346_v41, %v9943_v38  ;;  %v4175_v20 = vsel %vm10179_vm2, %v4174_v15, %v4170_v37  ;;  %5881 = vrcp.f32 %v10197_v10  ;;  %5041 = vmatmul.f32.gmra.mxu1 %v10990_v13  ;;  %vm4207_vm6 = vweird.f32 %v10147_v33  ;;  %v10213_v41 = vpop.f32.mrf.mxu1  ;;  %v10992_v15 = vld [vmem:[#allocation80_spill] sm:$0xff] }
 0x4a5   : > { %v4434_v21 = vadd.f32 1.0, %v5584_v44  ;;  %v4176_v55 = vmul.f32 %v4175_v20, %v10135_v18  ;;  %v4206_v58 = vadd.f32 %v5880_v23, %v4205_v57  ;;  %v4191_v48 = vmul.f32 %v9935_v43, %v9705_v51  ;;  %vm4209_vm7 = vmor %vm4207_vm6, %vm4208_vm5 }
 0x4a6   : > { %v4214_v9 = vor.u32 1.1754944e-38, %v4213_v32  ;;  %v10216_v2 = vadd.f32 1.0, %v4360_v30  ;;  %vm4212_vm8 = vcmp.eq.f32.partialorder %v4211_v47, 8.507059e+37  ;;  %v4309_v18 = vmul.f32 %v4308_v6, %v9863_v8  ;;  %v10991_v8 = vld [vmem:[#allocation68_spill] sm:$0xff]  ;;  %v4817_v30 = vpop.f32.mrf.mxu2 }
 0x4a7   : > { %v10219_v46 = vmul.f32 %v4434_v21, %v9852_v4  ;;  %v5587_v59 = vclamps-f32 %v4176_v55, 1.0  ;;  %v4210_v28 = vsel %vm4209_vm7, %v5880_v23, %v4206_v58  ;;  %v1749_v51 = vmul.f32 0.5, %v9662_v25  ;;  %v10993_v25 = vld [vmem:[#allocation77_spill] sm:$0xff] }
 0x4a8   : > { %v4215_v33 = vsel %vm4212_vm8, %v4214_v9, %v4210_v28  ;;  %5883 = vrcp.f32 %v10216_v2  ;;  %v4348_v43 = vadd.f32 0.18741608, %v4347_v61  ;;  %v4750_v4 = vadd.f32 %v10056_v26, %v10051_v63  ;;  %v4879_v63 = vpop.f32.mrf.mxu3  ;;  %v10238_v26 = vld [vmem:[%s10431_s6] sm:$0x3] }
 0x4a9   : > { %4917 = vmatmul.f32.gmra.mxu3 %v10219_v46  ;;  %v4437_v62 = vadd.f32 1.0, %v5587_v59  ;;  %v4216_v52 = vmul.f32 %v4215_v33, %v4191_v48  ;;  %v4310_v50 = vadd.f32 1.1283791, %v4309_v18  ;;  %v1750_v54 = vmul.f32 0.5, %v10993_v25 }
 0x4aa   : > { %v5882_v0 = vpop.eup %5881  ;;  %v4815_v16 = vadd.f32 %v4814_v39, %v4750_v4  ;;  %v4349_v27 = vmul.f32 %v4348_v43, %v9943_v38  ;;  %v4331_v37 = vand.u32 2147483647, %v10197_v10  ;;  %v4333_v57 = vand.u32 2147483648, %v10197_v10  ;;  %v10245_v38 = vpop.f32.mrf.mxu0 }
 0x4ab   : > { %v10227_v49 = vmul.f32 %v4437_v62, %v1749_v51  ;;  %v5588_v23 = vclamps-f32 %v4216_v52, 1.0  ;;  %v4323_v11 = vmul.f32 %v5882_v0, %v10197_v10  ;;  %4979 = vmatmul.f32.gmra.mxu0 %v10991_v8  ;;  %v10243_v6 = vperm.slane %v10238_v26, 0 }
 0x4ac   : > { %5044 = vmatmul.f32.gmra.mxu1 %v10992_v15  ;;  %v4880_v19 = vadd.f32 %v4879_v63, %v4815_v16  ;;  %vm4328_vm9 = vweird.f32 %v5882_v0  ;;  %v4311_v21 = vmul.f32 %v4310_v50, %v9817_v14  ;;  %v10251_v55 = vpop.f32.mrf.mxu1  ;;  %v4350_v39 = vadd.f32 1.1283791, %v4349_v27 }
 0x4ad   : > { %4855 = vmatmul.f32.gmra.mxu2 %v10227_v49  ;;  %v4438_v47 = vadd.f32 1.0, %v5588_v23  ;;  %v4324_v32 = vsub.f32 1.0, %v4323_v11  ;;  %vm4327_vm10 = vweird.f32 %v10197_v10  ;;  %v4753_v59 = vadd.f32 %v10091_v40, %v10087_v22  ;;  %v10994_v10 = vld [vmem:[#allocation29_spill] sm:$0xff]  ;;  %v10995_v22 = vld [vmem:[#allocation32_spill] sm:$0xff] }
 0x4ae   : > { %v5884_v44 = vpop.eup %5883  ;;  %v5292_v58 = vadd.f32 %v10243_v6, %v4880_v19  ;;  %vm4329_vm11 = vmor %vm4327_vm10, %vm4328_vm9  ;;  %vm4332_vm12 = vcmp.eq.f32.partialorder %v4331_v37, 8.507059e+37  ;;  %v4334_v28 = vor.u32 1.1754944e-38, %v4333_v57  ;;  %v4373_v18 = vand.u32 2147483648, %v10216_v2  ;;  %v4820_v23 = vpop.f32.mrf.mxu2  ;;  %v10996_v37 = vld [vmem:[#allocation34_spill] sm:$0xff]  ;;  %v10997_v57 = vld [vmem:[#allocation79_spill] sm:$0xff] }
 0x4af   : > { %v10247_v61 = vmul.f32 %v4438_v47, %v1750_v54  ;;  %v4325_v20 = vmul.f32 %v5882_v0, %v4324_v32  ;;  %v4363_v13 = vmul.f32 %v5884_v44, %v10216_v2  ;;  %vm4368_vm13 = vweird.f32 %v5884_v44 }
 0x4b0   : > { %5324 = vst [vmem:[%s10261_s3] sm:$0xff] %v5292_v58  ;;  %v4371_v51 = vand.u32 2147483647, %v10216_v2  ;;  %v4818_v62 = vadd.f32 %v4817_v30, %v4753_v59  ;;  %vm4367_vm14 = vweird.f32 %v10216_v2  ;;  %v4882_v4 = vpop.f32.mrf.mxu3  ;;  %v4374_v11 = vor.u32 1.1754944e-38, %v4373_v18  ;;  %v10999_v59 = vld [vmem:[#allocation67_spill] sm:$0xff] }
 0x4b1   : > { %4920 = vmatmul.f32.gmra.mxu3 %v10247_v61  ;;  %v4326_v48 = vadd.f32 %v5882_v0, %v4325_v20  ;;  %v4364_v9 = vsub.f32 1.0, %v4363_v13  ;;  %vm4369_vm15 = vmor %vm4367_vm14, %vm4368_vm13  ;;  %v4351_v8 = vmul.f32 %v4350_v39, %v9896_v24  ;;  %v1753_v54 = vmul.f32 0.5, %v9789_v42 }
 0x4b2   : > { %vm4372_vm0 = vcmp.eq.f32.partialorder %v4371_v51, 8.507059e+37  ;;  %v4702_v27 = vpop.f32.mrf.mxu0  ;;  %v4756_v2 = vadd.f32 %v10127_v56, %v10124_v31  ;;  %v1754_v19 = vmul.f32 0.5, %v9883_v53  ;;  %v4759_v58 = vadd.f32 %v10170_v1, %v10162_v36 }
 0x4b3   : > { %v4330_v14 = vsel %vm4329_vm11, %v5882_v0, %v4326_v48  ;;  %v4365_v33 = vmul.f32 %v5884_v44, %v4364_v9  ;;  %4982 = vmatmul.f32.gmra.mxu0 %v10994_v10  ;;  %v4883_v0 = vadd.f32 %v4882_v4, %v4818_v62  ;;  %v10998_v48 = vld [vmem:[#allocation65_spill] sm:$0xff]  ;;  %v11001_v10 = vld [vmem:[#allocation54_spill] sm:$0xff]  ;;  %v4762_v36 = vadd.f32 %v10213_v41, %v10207_v5 }
 0x4b4   : > { %v4335_v43 = vsel %vm4332_vm12, %v4334_v28, %v4330_v14  ;;  %5047 = vmatmul.f32.gmra.mxu1 %v10995_v22  ;;  %v4767_v63 = vpop.f32.mrf.mxu1  ;;  %v11000_v28 = vld [vmem:[#allocation58_spill] sm:$0xff] }
 0x4b5   : > { %v4336_v40 = vmul.f32 %v4335_v43, %v4311_v21  ;;  %v4366_v52 = vadd.f32 %v5884_v44, %v4365_v33  ;;  %v5294_v25 = vadd.f32 %v10243_v6, %v4883_v0  ;;  %v11002_v43 = vld [vmem:[#allocation52_spill] sm:$0xff]  ;;  %v11003_v4 = vld [vmem:[#allocation46_spill] sm:$0xff] }
 0x4b6   : > { %v4823_v13 = vpop.f32.mrf.mxu2  ;;  %v11004_v0 = vld [vmem:[#allocation50_spill] sm:$0xff] }
 0x4b7   : > { %v5591_v50 = vclamps-f32 %v4336_v40, 1.0  ;;  %v4370_v16 = vsel %vm4369_vm15, %v5884_v44, %v4366_v52  ;;  %5326 = vst [vmem:[%s10261_s3 + $0x10] sm:$0xff] %v5294_v25  ;;  %v4821_v44 = vadd.f32 %v4820_v23, %v4756_v2  ;;  %v4824_v9 = vadd.f32 %v4823_v13, %v4759_v58  ;;  %v11005_v25 = vld [vmem:[#allocation41_spill] sm:$0xff] }
 0x4b8   : > { %v4375_v15 = vsel %vm4372_vm0, %v4374_v11, %v4370_v16  ;;  %v4885_v20 = vpop.f32.mrf.mxu3  ;;  %v4765_v23 = vadd.f32 %v10251_v55, %v10245_v38 }
 0x4b9   : > { %v4441_v47 = vadd.f32 1.0, %v5591_v50  ;;  %v4376_v32 = vmul.f32 %v4375_v15, %v4351_v8  ;;  %v4886_v21 = vadd.f32 %v4885_v20, %v4821_v44  ;;  %v11007_v44 = vld [vmem:[#allocation64_spill] sm:$0xff] }
 0x4ba   : > { %v4705_v39 = vpop.f32.mrf.mxu0  ;;  %v11008_v20 = vld [vmem:[#allocation84_spill] sm:$0xff] }
 0x4bb   : > { %v10274_v30 = vmul.f32 %v4441_v47, %v1753_v54  ;;  %v5592_v24 = vclamps-f32 %v4376_v32, 1.0  ;;  %4985 = vmatmul.f32.gmra.mxu0 %v10996_v37  ;;  %v5296_v56 = vadd.f32 %v10243_v6, %v4886_v21  ;;  %v4768_v54 = vadd.f32 %v4767_v63, %v4702_v27  ;;  %v11006_v32 = vld [vmem:[#allocation62_spill] sm:$0xff]  ;;  %v11009_v21 = vld [vmem:[#allocation28_spill] sm:$0xff] }
 0x4bc   : > { %5050 = vmatmul.f32.gmra.mxu1 %v10997_v57  ;;  %v4770_v53 = vpop.f32.mrf.mxu1 }
 0x4bd   : > { %4858 = vmatmul.f32.gmra.mxu2 %v10274_v30  ;;  %v4442_v42 = vadd.f32 1.0, %v5592_v24  ;;  %5328 = vst [vmem:[%s10261_s3 + $0x20] sm:$0xff] %v5296_v56  ;;  %v4771_v57 = vadd.f32 %v4770_v53, %v4705_v39 }
 0x4be   : > { %v4826_v14 = vpop.f32.mrf.mxu2 }
 0x4bf   : > { %v10280_v31 = vmul.f32 %v4442_v42, %v1754_v19  ;;  %v4827_v1 = vadd.f32 %v4826_v14, %v4762_v36  ;;  %v11011_v14 = vld [vmem:[#allocation59_spill] sm:$0xff]  ;;  %v11012_v36 = vld [vmem:[#allocation72_spill] sm:$0xff] }
 0x4c0   : > { %v4888_v18 = vpop.f32.mrf.mxu3 }
 0x4c1   : > { %4923 = vmatmul.f32.gmra.mxu3 %v10280_v31  ;;  %v4889_v33 = vadd.f32 %v4888_v18, %v4824_v9 }
 0x4c2   : > { %v4708_v50 = vpop.f32.mrf.mxu0 }
 0x4c3   : > { %4988 = vmatmul.f32.gmra.mxu0 %v10998_v48  ;;  %v5298_v51 = vadd.f32 %v10243_v6, %v4889_v33 }
 0x4c4   : > { %5053 = vmatmul.f32.gmra.mxu1 %v10999_v59  ;;  %v4773_v16 = vpop.f32.mrf.mxu1 }
 0x4c5   : > { %5073 = vmatmul.f32.vlgmr.msrb.gmra.mxu2 %v11000_v28  ;;  %5330 = vst [vmem:[%s10261_s3 + $0x30] sm:$0xff] %v5298_v51  ;;  %v4774_v58 = vadd.f32 %v4773_v16, %v4708_v50  ;;  %v11010_v28 = vld [vmem:[#allocation69_spill] sm:$0xff] }
 0x4c6   : > { %v4829_v22 = vpop.f32.mrf.mxu2 }
 0x4c7   : > { %v4830_v11 = vadd.f32 %v4829_v22, %v4765_v23 }
 0x4c8   : > { %v4891_v62 = vpop.f32.mrf.mxu3 }
 0x4c9   : > { %5138 = vmatmul.f32.vlgmr.msrb.gmra.mxu3 %v11001_v10  ;;  %v4892_v40 = vadd.f32 %v4891_v62, %v4827_v1 }
 0x4ca   : > { %v4711_v37 = vpop.f32.mrf.mxu0 }
 0x4cb   : > { %v5300_v52 = vadd.f32 %v10243_v6, %v4892_v40  ;;  %v11013_v40 = vld [vmem:[#allocation74_spill] sm:$0xff] }
 0x4cc   : > { %v4776_v19 = vpop.f32.mrf.mxu1 }
 0x4cd   : > { %5076 = vmatmul.f32.gmra.mxu2 %v11002_v43  ;;  %5332 = vst [vmem:[%s10261_s3 + $0x40] sm:$0xff] %v5300_v52  ;;  %v4777_v51 = vadd.f32 %v4776_v19, %v4711_v37 }
 0x4ce   : > { %v4832_v41 = vpop.f32.mrf.mxu2 }
 0x4cf   : > { %v4833_v47 = vadd.f32 %v4832_v41, %v4768_v54 }
 0x4d0   : > { %v4894_v5 = vpop.f32.mrf.mxu3 }
 0x4d1   : > { %5141 = vmatmul.f32.gmra.mxu3 %v11003_v4  ;;  %v4895_v8 = vadd.f32 %v4894_v5, %v4830_v11  ;;  %v11014_v4 = vld [vmem:[#allocation60_spill] sm:$0xff] }
 0x4d2   : > { %v4714_v48 = vpop.f32.mrf.mxu0 }
 0x4d3   : > { %v5302_v15 = vadd.f32 %v10243_v6, %v4895_v8  ;;  %v11015_v8 = vld [vmem:[#allocation81_spill] sm:$0xff] }
 0x4d4   : > { %v4779_v9 = vpop.f32.mrf.mxu1 }
 0x4d5   : > { %5079 = vmatmul.f32.gmra.mxu2 %v11004_v0  ;;  %5334 = vst [vmem:[%s10261_s3 + $0x50] sm:$0xff] %v5302_v15  ;;  %v4780_v11 = vadd.f32 %v4779_v9, %v4714_v48 }
 0x4d6   : > { %v4835_v2 = vpop.f32.mrf.mxu2 }
 0x4d7   : > { %v4836_v42 = vadd.f32 %v4835_v2, %v4771_v57  ;;  %v11017_v2 = vld [vmem:[#allocation26_spill] sm:$0xff] }
 0x4d8   : > { %v4897_v38 = vpop.f32.mrf.mxu3 }
 0x4d9   : > { %5144 = vmatmul.f32.gmra.mxu3 %v11005_v25  ;;  %v4898_v55 = vadd.f32 %v4897_v38, %v4833_v47  ;;  %v11016_v25 = vld [vmem:[#allocation63_spill] sm:$0xff] }
 0x4da   : > { %v4717_v10 = vpop.f32.mrf.mxu0 }
 0x4db   : > { %v5304_v24 = vadd.f32 %v10243_v6, %v4898_v55 }
 0x4dc   : > { %v4782_v1 = vpop.f32.mrf.mxu1 }
 0x4dd   : > { %5082 = vmatmul.f32.gmra.mxu2 %v11006_v32  ;;  %5336 = vst [vmem:[%s10261_s3 + $0x60] sm:$0xff] %v5304_v24  ;;  %v4783_v32 = vadd.f32 %v4782_v1, %v4717_v10 }
 0x4de   : > { %v4838_v56 = vpop.f32.mrf.mxu2 }
 0x4df   : > { %v4839_v59 = vadd.f32 %v4838_v56, %v4774_v58 }
 0x4e0   : > { %v4900_v27 = vpop.f32.mrf.mxu3 }
 0x4e1   : > { %5147 = vmatmul.f32.gmra.mxu3 %v11007_v44  ;;  %v4901_v63 = vadd.f32 %v4900_v27, %v4836_v42 }
 0x4e2   : > { %v4720_v0 = vpop.f32.mrf.mxu0 }
 0x4e3   : > { %v5306_v13 = vadd.f32 %v10243_v6, %v4901_v63 }
 0x4e4   : > { %v4785_v5 = vpop.f32.mrf.mxu1 }
 0x4e5   : > { %5085 = vmatmul.f32.gmra.mxu2 %v11008_v20  ;;  %5338 = vst [vmem:[%s10261_s3 + $0x70] sm:$0xff] %v5306_v13  ;;  %v4786_v42 = vadd.f32 %v4785_v5, %v4720_v0 }
 0x4e8   : > { %v4903_v39 = vpop.f32.mrf.mxu3 }
 0x4e9   : > { %5150 = vmatmul.f32.gmra.mxu3 %v11009_v21  ;;  %v4904_v53 = vadd.f32 %v4903_v39, %v4839_v59 }
 0x4ea   : > { %v4841_v33 = vpop.f32.mrf.mxu2  ;;  %v4723_v54 = vpop.f32.mrf.mxu0 }
 0x4eb   : > { %v5308_v18 = vadd.f32 %v10243_v6, %v4904_v53  ;;  %v4842_v43 = vadd.f32 %v4841_v33, %v4777_v51 }
 0x4ec   : > { %v4788_v38 = vpop.f32.mrf.mxu1 }
 0x4ed   : > { %5088 = vmatmul.f32.gmra.mxu2 %v11010_v28  ;;  %5340 = vst [vmem:[%s10261_s3 + $0x80] sm:$0xff] %v5308_v18  ;;  %v4789_v58 = vadd.f32 %v4788_v38, %v4723_v54 }
 0x4f1   : > { %5153 = vmatmul.f32.gmra.mxu3 %v11011_v14 }
 0x4f2   : > { %v4726_v57 = vpop.f32.mrf.mxu0 }
 0x4f4   : > { %v4791_v19 = vpop.f32.mrf.mxu1 }
 0x4f5   : > { %5091 = vmatmul.f32.gmra.mxu2 %v11012_v36 }
 0x4f7   : > { %v4906_v62 = vpop.f32.mrf.mxu3 }
 0x4f8   : > { %v4907_v22 = vadd.f32 %v4906_v62, %v4842_v43 }
 0x4f9   : > { %5156 = vmatmul.f32.gmra.mxu3 %v11013_v40 }
 0x4fa   : > { %v5310_v52 = vadd.f32 %v10243_v6, %v4907_v22  ;;  %v4844_v23 = vpop.f32.mrf.mxu2  ;;  %v4729_v27 = vpop.f32.mrf.mxu0 }
 0x4fb   : > { %v4845_v41 = vadd.f32 %v4844_v23, %v4780_v11 }
 0x4fc   : > { %5342 = vst [vmem:[%s10261_s3 + $0x90] sm:$0xff] %v5310_v52  ;;  %v4794_v13 = vpop.f32.mrf.mxu1  ;;  %v10352_v52 = vperm.slane %v10238_v26, 1 }
 0x4fd   : > { %5094 = vmatmul.f32.gmra.mxu2 %v11014_v4  ;;  %v4795_v10 = vadd.f32 %v4794_v13, %v4729_v27 }
 0x501   : > { %5159 = vmatmul.f32.gmra.mxu3 %v11015_v8  ;;  %v4909_v50 = vpop.f32.mrf.mxu3 }
 0x502   : > { %v4910_v16 = vadd.f32 %v4909_v50, %v4845_v41 }
 0x504   : > { %v5312_v15 = vadd.f32 %v10243_v6, %v4910_v16 }
 0x505   : > { %5097 = vmatmul.f32.gmra.mxu2 %v11016_v25  ;;  %v4847_v47 = vpop.f32.mrf.mxu2 }
 0x506   : > { %5344 = vst [vmem:[%s10261_s3 + $0xa0] sm:$0xff] %v5312_v15  ;;  %v4848_v55 = vadd.f32 %v4847_v47, %v4783_v32 }
 0x509   : > { %5162 = vmatmul.f32.gmra.mxu3 %v9907_v35 }
 0x50d   : > { %5100 = vmatmul.f32.gmra.mxu2 %v11017_v2  ;;  %v4912_v24 = vpop.f32.mrf.mxu3 }
 0x50e   : > { %v4913_v37 = vadd.f32 %v4912_v24, %v4848_v55 }
 0x510   : > { %v5314_v44 = vadd.f32 %v10243_v6, %v4913_v37 }
 0x511   : > { %5165 = vmatmul.f32.gmra.mxu3 %v10009_v34 }
 0x512   : > { %5346 = vst [vmem:[%s10261_s3 + $0xb0] sm:$0xff] %v5314_v44 }
 0x513   : > { %v4850_v35 = vpop.f32.mrf.mxu2 }
 0x514   : > { %v4851_v20 = vadd.f32 %v4850_v35, %v4786_v42 }
 0x515   : > { %5103 = vmatmul.f32.gmra.mxu2 %v10023_v45  ;;  %v4944_v45 = vpop.f32.mrf.mxu0 }
 0x519   : > { %5168 = vmatmul.f32.gmra.mxu3 %v10048_v29  ;;  %v5009_v29 = vpop.f32.mrf.mxu1 }
 0x51d   : > { %5106 = vmatmul.f32.gmra.mxu2 %v10068_v3  ;;  %v4915_v63 = vpop.f32.mrf.mxu3  ;;  %v4947_v39 = vpop.f32.mrf.mxu0 }
 0x51e   : > { %v4916_v21 = vadd.f32 %v4915_v63, %v4851_v20 }
 0x520   : > { %v5316_v56 = vadd.f32 %v10243_v6, %v4916_v21 }
 0x521   : > { %5171 = vmatmul.f32.gmra.mxu3 %v10094_v60  ;;  %v4792_v60 = vadd.f32 %v4791_v19, %v4726_v57 }
 0x522   : > { %5348 = vst [vmem:[%s10261_s3 + $0xc0] sm:$0xff] %v5316_v56 }
 0x525   : > { %5109 = vmatmul.f32.gmra.mxu2 %v10113_v17  ;;  %v4853_v34 = vpop.f32.mrf.mxu2  ;;  %v5012_v17 = vpop.f32.mrf.mxu1 }
 0x526   : > { %v4854_v48 = vadd.f32 %v4853_v34, %v4789_v58  ;;  %v5013_v5 = vadd.f32 %v5012_v17, %v4947_v39 }
 0x529   : > { %5174 = vmatmul.f32.gmra.mxu3 %v10153_v7 }
 0x52c   : > { %v4918_v9 = vpop.f32.mrf.mxu3 }
 0x52d   : > { %5112 = vmatmul.f32.gmra.mxu2 %v10186_v12  ;;  %v4919_v3 = vadd.f32 %v4918_v9, %v4854_v48  ;;  %v4950_v12 = vpop.f32.mrf.mxu0  ;;  %v5015_v33 = vpop.f32.mrf.mxu1 }
 0x52e   : > { %v5016_v15 = vadd.f32 %v5015_v33, %v4950_v12 }
 0x52f   : > { %v5318_v59 = vadd.f32 %v10243_v6, %v4919_v3 }
 0x530   : > { %v4856_v28 = vpop.f32.mrf.mxu2 }
 0x531   : > { %5177 = vmatmul.f32.gmra.mxu3 %v10219_v46  ;;  %5350 = vst [vmem:[%s10261_s3 + $0xd0] sm:$0xff] %v5318_v59  ;;  %v4857_v53 = vadd.f32 %v4856_v28, %v4792_v60 }
 0x534   : > { %v4921_v18 = vpop.f32.mrf.mxu3 }
 0x535   : > { %5115 = vmatmul.f32.gmra.mxu2 %v10227_v49  ;;  %v4922_v7 = vadd.f32 %v4921_v18, %v4857_v53  ;;  %v4953_v1 = vpop.f32.mrf.mxu0  ;;  %v5018_v43 = vpop.f32.mrf.mxu1 }
 0x536   : > { %v5019_v2 = vadd.f32 %v5018_v43, %v4953_v1 }
 0x537   : > { %v5320_v14 = vadd.f32 %v10243_v6, %v4922_v7 }
 0x539   : > { %5180 = vmatmul.f32.gmra.mxu3 %v10247_v61  ;;  %5352 = vst [vmem:[%s10261_s3 + $0xe0] sm:$0xff] %v5320_v14  ;;  %v5010_v61 = vadd.f32 %v5009_v29, %v4944_v45 }
 0x53d   : > { %5118 = vmatmul.f32.gmra.mxu2 %v10274_v30  ;;  %v4956_v23 = vpop.f32.mrf.mxu0  ;;  %v5021_v11 = vpop.f32.mrf.mxu1 }
 0x53e   : > { %v5022_v20 = vadd.f32 %v5021_v11, %v4956_v23 }
 0x540   : > { %v4859_v51 = vpop.f32.mrf.mxu2 }
 0x541   : > { %5183 = vmatmul.f32.gmra.mxu3 %v10280_v31  ;;  %v4860_v46 = vadd.f32 %v4859_v51, %v4795_v10 }
 0x544   : > { %v4924_v36 = vpop.f32.mrf.mxu3 }
 0x545   : > { %v4925_v49 = vadd.f32 %v4924_v36, %v4860_v46  ;;  %v4959_v26 = vpop.f32.mrf.mxu0  ;;  %v5024_v25 = vpop.f32.mrf.mxu1 }
 0x546   : > { %v5025_v29 = vadd.f32 %v5024_v25, %v4959_v26 }
 0x547   : > { %v5322_v62 = vadd.f32 %v10243_v6, %v4925_v49 }
 0x548   : > { %v5074_v22 = vpop.f32.mrf.mxu2 }
 0x549   : > { %5354 = vst [vmem:[%s10261_s3 + $0xf0] sm:$0xff] %v5322_v62  ;;  %v5075_v40 = vadd.f32 %v5074_v22, %v5010_v61 }
 0x54c   : > { %v5139_v30 = vpop.f32.mrf.mxu3 }
 0x54d   : > { %v5140_v4 = vadd.f32 %v5139_v30, %v5075_v40  ;;  %v4962_v24 = vpop.f32.mrf.mxu0  ;;  %v5027_v44 = vpop.f32.mrf.mxu1 }
 0x54e   : > { %v5028_v39 = vadd.f32 %v5027_v44, %v4962_v24 }
 0x54f   : > { %v5293_v31 = vadd.f32 %v10352_v52, %v5140_v4 }
 0x550   : > { %v5077_v0 = vpop.f32.mrf.mxu2 }
 0x551   : > { %5325 = vst [vmem:[%s10261_s3 + $0x8] sm:$0xff] %v5293_v31  ;;  %v5078_v41 = vadd.f32 %v5077_v0, %v5013_v5 }
 0x554   : > { %v5142_v6 = vpop.f32.mrf.mxu3 }
 0x555   : > { %v5143_v8 = vadd.f32 %v5142_v6, %v5078_v41  ;;  %v4965_v13 = vpop.f32.mrf.mxu0  ;;  %v5030_v56 = vpop.f32.mrf.mxu1 }
 0x556   : > { %v5031_v12 = vadd.f32 %v5030_v56, %v4965_v13 }
 0x557   : > { %v5295_v50 = vadd.f32 %v10352_v52, %v5143_v8 }
 0x558   : > { %v5080_v16 = vpop.f32.mrf.mxu2 }
 0x559   : > { %5327 = vst [vmem:[%s10261_s3 + $0x18] sm:$0xff] %v5295_v50  ;;  %v5081_v54 = vadd.f32 %v5080_v16, %v5016_v15 }
 0x55c   : > { %v5145_v47 = vpop.f32.mrf.mxu3 }
 0x55d   : > { %v5146_v32 = vadd.f32 %v5145_v47, %v5081_v54  ;;  %v4968_v3 = vpop.f32.mrf.mxu0  ;;  %v5033_v28 = vpop.f32.mrf.mxu1 }
 0x55e   : > { %v5034_v43 = vadd.f32 %v5033_v28, %v4968_v3 }
 0x55f   : > { %v5297_v38 = vadd.f32 %v10352_v52, %v5146_v32 }
 0x560   : > { %v5083_v55 = vpop.f32.mrf.mxu2 }
 0x561   : > { %5329 = vst [vmem:[%s10261_s3 + $0x28] sm:$0xff] %v5297_v38  ;;  %v5084_v37 = vadd.f32 %v5083_v55, %v5019_v2 }
 0x564   : > { %v5148_v57 = vpop.f32.mrf.mxu3 }
 0x565   : > { %v5149_v19 = vadd.f32 %v5148_v57, %v5084_v37  ;;  %v4971_v33 = vpop.f32.mrf.mxu0  ;;  %v5036_v51 = vpop.f32.mrf.mxu1 }
 0x566   : > { %v5037_v31 = vadd.f32 %v5036_v51, %v4971_v33 }
 0x567   : > { %v5299_v35 = vadd.f32 %v10352_v52, %v5149_v19 }
 0x568   : > { %v5086_v42 = vpop.f32.mrf.mxu2 }
 0x569   : > { %5331 = vst [vmem:[%s10261_s3 + $0x38] sm:$0xff] %v5299_v35  ;;  %v5087_v27 = vadd.f32 %v5086_v42, %v5022_v20 }
 0x56c   : > { %v5151_v63 = vpop.f32.mrf.mxu3 }
 0x56d   : > { %v5152_v21 = vadd.f32 %v5151_v63, %v5087_v27  ;;  %v4974_v62 = vpop.f32.mrf.mxu0  ;;  %v5039_v61 = vpop.f32.mrf.mxu1 }
 0x56e   : > { %v5040_v16 = vadd.f32 %v5039_v61, %v4974_v62 }
 0x56f   : > { %v5301_v34 = vadd.f32 %v10352_v52, %v5152_v21 }
 0x570   : > { %v5089_v45 = vpop.f32.mrf.mxu2 }
 0x571   : > { %5333 = vst [vmem:[%s10261_s3 + $0x48] sm:$0xff] %v5301_v34  ;;  %v5090_v58 = vadd.f32 %v5089_v45, %v5025_v29 }
 0x574   : > { %v5154_v48 = vpop.f32.mrf.mxu3 }
 0x575   : > { %v5155_v9 = vadd.f32 %v5154_v48, %v5090_v58  ;;  %v4977_v5 = vpop.f32.mrf.mxu0  ;;  %v5042_v6 = vpop.f32.mrf.mxu1 }
 0x576   : > { %v5043_v55 = vadd.f32 %v5042_v6, %v4977_v5 }
 0x577   : > { %v5303_v59 = vadd.f32 %v10352_v52, %v5155_v9 }
 0x578   : > { %v5092_v60 = vpop.f32.mrf.mxu2 }
 0x579   : > { %5335 = vst [vmem:[%s10261_s3 + $0x58] sm:$0xff] %v5303_v59  ;;  %v5093_v17 = vadd.f32 %v5092_v60, %v5028_v39 }
 0x57c   : > { %v5157_v53 = vpop.f32.mrf.mxu3 }
 0x57d   : > { %v5158_v18 = vadd.f32 %v5157_v53, %v5093_v17  ;;  %v4980_v54 = vpop.f32.mrf.mxu0  ;;  %v5045_v32 = vpop.f32.mrf.mxu1 }
 0x57e   : > { %v5046_v19 = vadd.f32 %v5045_v32, %v4980_v54 }
 0x57f   : > { %v5305_v7 = vadd.f32 %v10352_v52, %v5158_v18 }
 0x580   : > { %v5095_v14 = vpop.f32.mrf.mxu2 }
 0x581   : > { %5337 = vst [vmem:[%s10261_s3 + $0x68] sm:$0xff] %v5305_v7  ;;  %v5096_v10 = vadd.f32 %v5095_v14, %v5031_v12 }
 0x584   : > { %v5160_v46 = vpop.f32.mrf.mxu3 }
 0x585   : > { %v5161_v36 = vadd.f32 %v5160_v46, %v5096_v10  ;;  %v4983_v35 = vpop.f32.mrf.mxu0  ;;  %v5048_v42 = vpop.f32.mrf.mxu1 }
 0x586   : > { %v5049_v56 = vadd.f32 %v5048_v42, %v4983_v35 }
 0x587   : > { %v5307_v1 = vadd.f32 %v10352_v52, %v5161_v36 }
 0x588   : > { %v5098_v49 = vpop.f32.mrf.mxu2 }
 0x589   : > { %5339 = vst [vmem:[%s10261_s3 + $0x78] sm:$0xff] %v5307_v1  ;;  %v5099_v22 = vadd.f32 %v5098_v49, %v5034_v43 }
 0x58c   : > { %v5163_v40 = vpop.f32.mrf.mxu3 }
 0x58d   : > { %v5164_v30 = vadd.f32 %v5163_v40, %v5099_v22  ;;  %v4986_v34 = vpop.f32.mrf.mxu0  ;;  %v5051_v29 = vpop.f32.mrf.mxu1 }
 0x58e   : > { %v5052_v59 = vadd.f32 %v5051_v29, %v4986_v34 }
 0x58f   : > { %v5309_v4 = vadd.f32 %v10352_v52, %v5164_v30 }
 0x590   : > { %v5101_v23 = vpop.f32.mrf.mxu2 }
 0x591   : > { %5341 = vst [vmem:[%s10261_s3 + $0x88] sm:$0xff] %v5309_v4  ;;  %v5102_v11 = vadd.f32 %v5101_v23, %v5037_v31 }
 0x594   : > { %v5166_v0 = vpop.f32.mrf.mxu3 }
 0x595   : > { %v5167_v41 = vadd.f32 %v5166_v0, %v5102_v11  ;;  %v4989_v17 = vpop.f32.mrf.mxu0  ;;  %v5054_v53 = vpop.f32.mrf.mxu1 }
 0x596   : > { %v5055_v14 = vadd.f32 %v5054_v53, %v4989_v17 }
 0x597   : > { %v5311_v8 = vadd.f32 %v10352_v52, %v5167_v41 }
 0x598   : > { %v5104_v50 = vpop.f32.mrf.mxu2 }
 0x599   : > { %5343 = vst [vmem:[%s10261_s3 + $0x98] sm:$0xff] %v5311_v8  ;;  %v5105_v15 = vadd.f32 %v5104_v50, %v5040_v16 }
 0x59c   : > { %v5169_v26 = vpop.f32.mrf.mxu3 }
 0x59d   : > { %v5170_v25 = vadd.f32 %v5169_v26, %v5105_v15 }
 0x59f   : > { %v5313_v47 = vadd.f32 %v10352_v52, %v5170_v25 }
 0x5a0   : > { %v5107_v38 = vpop.f32.mrf.mxu2 }
 0x5a1   : > { %5345 = vst [vmem:[%s10261_s3 + $0xa8] sm:$0xff] %v5313_v47  ;;  %v5108_v2 = vadd.f32 %v5107_v38, %v5043_v55 }
 0x5a4   : > { %v5172_v24 = vpop.f32.mrf.mxu3 }
 0x5a5   : > { %v5173_v37 = vadd.f32 %v5172_v24, %v5108_v2 }
 0x5a7   : > { %v5315_v44 = vadd.f32 %v10352_v52, %v5173_v37 }
 0x5a8   : > { %v5110_v57 = vpop.f32.mrf.mxu2 }
 0x5a9   : > { %5347 = vst [vmem:[%s10261_s3 + $0xb8] sm:$0xff] %v5315_v44  ;;  %v5111_v20 = vadd.f32 %v5110_v57, %v5046_v19 }
 0x5ac   : > { %v5175_v27 = vpop.f32.mrf.mxu3 }
 0x5ad   : > { %v5176_v63 = vadd.f32 %v5175_v27, %v5111_v20 }
 0x5af   : > { %v5317_v13 = vadd.f32 %v10352_v52, %v5176_v63 }
 0x5b0   : > { %v5113_v21 = vpop.f32.mrf.mxu2 }
 0x5b1   : > { %5349 = vst [vmem:[%s10261_s3 + $0xc8] sm:$0xff] %v5317_v13  ;;  %v5114_v45 = vadd.f32 %v5113_v21, %v5049_v56 }
 0x5b4   : > { %v5178_v58 = vpop.f32.mrf.mxu3 }
 0x5b5   : > { %v5179_v48 = vadd.f32 %v5178_v58, %v5114_v45 }
 0x5b7   : > { %v5319_v9 = vadd.f32 %v10352_v52, %v5179_v48 }
 0x5b8   : > { %v5116_v3 = vpop.f32.mrf.mxu2 }
 0x5b9   : > { %5351 = vst [vmem:[%s10261_s3 + $0xd8] sm:$0xff] %v5319_v9  ;;  %v5117_v28 = vadd.f32 %v5116_v3, %v5052_v59 }
 0x5bc   : > { %v5181_v60 = vpop.f32.mrf.mxu3 }
 0x5bd   : > { %v5182_v39 = vadd.f32 %v5181_v60, %v5117_v28 }
 0x5bf   : > { %v5321_v18 = vadd.f32 %v10352_v52, %v5182_v39 }
 0x5c0   : > { %v5119_v7 = vpop.f32.mrf.mxu2 }
 0x5c1   : > { %5353 = vst [vmem:[%s10261_s3 + $0xe8] sm:$0xff] %v5321_v18  ;;  %v5120_v12 = vadd.f32 %v5119_v7, %v5055_v14 }
 0x5c4   : > { %v5184_v33 = vpop.f32.mrf.mxu3 }
 0x5c5   : > { %v5185_v51 = vadd.f32 %v5184_v33, %v5120_v12 }
 0x5c7   : > { %v5323_v10 = vadd.f32 %v10352_v52, %v5185_v51 }
 0x5c9   : > { %5355 = vst [vmem:[%s10261_s3 + $0xf8] sm:$0xff] %v5323_v10 }
 0x5ca   : > { %6093 = shalt.err (!%p6090_p13)
}
 0x5cb   : > { %s6172_s4 = smov 256   ;;  %s6173_s1 = smov 16  }
 0x5cc   : > { %5625 = dma.vmem_to_hbm [thread:$0]  (%p6318_p5), %s5371_s30, 4096, %s5373_s22, %s5357_s27, %s6172_s4, %s6172_s4, %s6173_s1  }
 0x5cd PF: > { %s5387_s2 = sand.u32 1, %s6140_s24   ;;  %p5648_p0 = pnand %p5516_p4, %p6326_p7 }
 0x5ce   : > { %s5388_s3 = scalar_lea.sflag [#allocation6], %s5387_s2 }
 0x5cf   : > { %p5649_p2 = pneg %p5648_p0 }
 0x5d1   : > { %6135 = dma.done.wait (%p5649_p2), %s5388_s3, 4096  }
 0x5d2   : > { %6137 = vsyncadd (%p5649_p2), %s5388_s3, 4294963200  ;;  %s26_s29 = sadd.s32 1, %s6160_s29   ;;  %s11018_s24 = smov %s6144_s25 }
 0x5d3   : > { %p23_p6 = scmp.ge.s32.totalorder %s26_s29, 4   ;;  %s11019_s25 = smov %s6148_s26 }
 0x5d4   : > { %s11020_s26 = smov %s6324_s19  ;;  %s11021_s27 = smov %s6156_s28 }
 0x5d5   : > { %s11022_s28 = smov %s11024_s13  ;;  %25 = sbr.rel (!%p23_p6) target bundleno = 14 (0xe), region = 124 }
 0x5da   :  { %5394 = vsyncpa [#allocation5], 1 }
 0x5db   :  { %5396 = vsyncpa [#allocation5 + $0x1], 1 }
 0x5dc   :  { %5397 = vsyncpa [#allocation8], 1 }
 0x5dd   :  { %5398 = vsyncpa [#allocation11], 1 }
 0x5de   :  { %5399 = vsyncpa [#allocation14], 1 }
 0x5df   :  { %5400 = vsyncpa [#allocation6], 1 }
 0x5e0   :  { %5402 = vsyncpa [#allocation6 + $0x1], 1 }

</bundles_post_ra>
